<compile_context>
chip_gen: v5e
topology: v5e:2x2
jax: 0.10.0
libtpu: 0.0.40
codegen_flags: <defaults>
</compile_context>

<pallas_src>
import numpy as np

import jax
import jax.numpy as jnp
from jax import lax
from jax.experimental import pallas as pl
from jax.experimental.pallas import tpu as pltpu

# ---------------- configuration (small synthetic shapes) ----------------
N = 2            # batch
C = 32           # in_channels == out_channels
T = 16           # temporal frames
V = 16           # num_point (even)
Nh = 4           # attention heads
DK = 16          # int(dk_factor * out_channels), dk_factor = 0.5
DV = C           # only_temporal_attention -> dv = out_channels
DKH = DK // Nh
DVH = DV // Nh
KQ = 2 * DK + DV            # original qkv_conv output channels (64)
KQ2 = 2 * DK + Nh * DV      # qkv columns after folding attn_out into V (160)
NT = Nh * T                 # head-stacked key axis (64)
B = N * V
EPS = 1e-5


def _pick_grid():
    # v5e/v6e: single TensorCore per chip -> one grid step (removes duplicated per-step
    # overhead).  v7x: 2 TCs/chip -> keep 2 parallel steps.
    # TODO(synk): on v7x, verify both cores run a step; else switch the axis to
    # pltpu.CORE_PARALLEL / pl.core_map per the review.
    try:
        kind = jax.devices()[0].device_kind.lower()
    except Exception:
        kind = ""
    return 2 if ("v7" in kind or "tpu7" in kind) else 1


GB = _pick_grid()
BB = B // GB     # (n, v) temporal sequences handled per grid step


# ---------------- Pallas kernel ----------------
def _attn_kernel(x_ref, dsc_ref, dsh_ref, w_ref, b_ref, kmask_ref, smat_ref,
                 bnsc_ref, bnsh_ref, o_ref):
    # x_ref block: (BB, T, C) -- BB (n, v) temporal sequences (also the skip path)
    x_raw = x_ref[...]
    # data_bn (BatchNorm1d over C*V channels, eval) folded to per-(b, c) affine
    x_n = x_raw * dsc_ref[...] + dsh_ref[...]

    # fused qkv + folded attn_out projection: one (BB*T, C) @ (C, 2*DK + Nh*DV) matmul
    x2 = x_n.reshape(BB * T, C)
    qkv = jnp.dot(x2, w_ref[...], preferred_element_type=jnp.float32) + b_ref[...]
    qkv3 = qkv.reshape(BB, T, KQ2)
    q = qkv3[:, :, :DK]                      # (BB, T, DK)   query scale folded into W/b
    k = qkv3[:, :, DK:2 * DK]                # (BB, T, DK)
    vp = qkv3[:, :, 2 * DK:]                 # (BB, T, Nh*DV) per-head context proj already in DV space

    # head-block-masked key matrix: k_rep[b, h*T+s, d] = k[b, s, d] * (d belongs to head h)
    k_rep = (k[:, None, :, :] * kmask_ref[...][None, :, None, :]).reshape(BB, NT, DK)
    # logits for all heads from ONE batched matmul, contraction depth DK=16:
    #   logits[b, t, h*T+s] = Q_h[b, t] . K_h[b, s]
    logits = jnp.einsum('btd,bsd->bts', q, k_rep,
                        preferred_element_type=jnp.float32)           # (BB, T, NT)

    # per-head softmax over the key axis.  A single row-wise max is a valid shift for every
    # head block (softmax is shift invariant within a block); the per-block denominators are
    # computed AND broadcast back in one matmul against the constant block matrix smat.
    lg2 = logits.reshape(BB * T, NT)
    m = jnp.max(lg2, axis=-1, keepdims=True)
    p = jnp.exp(lg2 - m)
    denom = jnp.dot(p, smat_ref[...], preferred_element_type=jnp.float32)
    wgt = (p / denom).reshape(BB, T, NT)     # exact divide (approx reciprocal broke tolerance)

    # context + folded output projection: contraction T=16 per head, summed directly in DV space
    ctx = None
    for h in range(Nh):
        c = jnp.einsum('bts,bsd->btd',
                       wgt[:, :, h * T:(h + 1) * T],
                       vp[:, :, h * DV:(h + 1) * DV],
                       preferred_element_type=jnp.float32)             # (BB, T, DV)
        ctx = c if ctx is None else ctx + c

    # skip connection + BatchNorm2d affine (attn_out bias already folded into bnsh) + ReLU
    res = (ctx + x_raw) * bnsc_ref[...] + bnsh_ref[...]
    o_ref[...] = jnp.maximum(res, 0.0)


# ---------------- one-time parameter preparation (hoisted out of the per-call path) ----------------
def prepare_params(params):
    (wqkv_t, bqkv, wout_t, bout,
     dbn_g, dbn_b, dbn_rm, dbn_rv,
     bn2_g, bn2_b, bn2_rm, bn2_rv) = params

    scale = DKH ** -0.5
    wq = jnp.transpose(wqkv_t[:DK]) * scale          # (C, DK), query scale folded
    bq = bqkv[:DK] * scale
    wk = jnp.transpose(wqkv_t[DK:2 * DK])            # (C, DK)
    bk = bqkv[DK:2 * DK]
    wv = jnp.transpose(wqkv_t[2 * DK:])              # (C, DV)
    bv = bqkv[2 * DK:]
    wout_full = jnp.transpose(wout_t)                # (DV_in, DV_out)

    # fold attn_out into the per-head V projection: Wv'_h = Wv_h @ Wout_h  (C, DV), stacked
    wvp = jnp.concatenate(
        [wv[:, h * DVH:(h + 1) * DVH] @ wout_full[h * DVH:(h + 1) * DVH, :]
         for h in range(Nh)], axis=1)                # (C, Nh*DV)
    w_all = jnp.concatenate([wq, wk, wvp], axis=1)   # (C, KQ2)
    b_all = jnp.concatenate([bq, bk, jnp.zeros((Nh * DV,), jnp.float32)]).reshape(1, KQ2)

    # data_bn (channels indexed by c*V + v) folded to per-b (1, C) scale/shift
    inv = dbn_g / jnp.sqrt(dbn_rv + EPS)             # (C*V,)
    dsc_cv = inv.reshape(C, V)
    dsh_cv = (dbn_b - dbn_rm * inv).reshape(C, V)
    dsc_b = jnp.broadcast_to(dsc_cv.T[None], (N, V, C)).reshape(B, 1, C)
    dsh_b = jnp.broadcast_to(dsh_cv.T[None], (N, V, C)).reshape(B, 1, C)

    # attn_out bias (+ folded V bias, which passes through the softmax since rows sum to 1)
    # merged into the final BatchNorm2d shift.
    bfin = bout + bv @ wout_full                     # (DV,)
    bn2_inv = bn2_g / jnp.sqrt(bn2_rv + EPS)
    bn2_sc = bn2_inv.reshape(1, C)
    bn2_sh = (bn2_b - bn2_rm * bn2_inv + bfin * bn2_inv).reshape(1, C)

    # constant head / block-structure matrices
    hd = jnp.arange(DK) // DKH
    kmask = (jnp.arange(Nh)[:, None] == hd[None, :]).astype(jnp.float32)   # (Nh, DK)
    blk = jnp.arange(NT) // T
    smat = (blk[:, None] == blk[None, :]).astype(jnp.float32)              # (NT, NT)

    return (dsc_b, dsh_b, w_all, b_all, kmask, smat, bn2_sc, bn2_sh)


# ---------------- wrapper ----------------
def tcn_unit_attention_forward(x, prepped):
    """x: (N, C, T, V) float32, matching the PyTorch NCHW (H=T, W=V) input."""
    dsc_b, dsh_b, w_all, b_all, kmask, smat, bn2_sc, bn2_sh = prepped

    # x permute(0,3,1,2).reshape(N*V, C, 1, T)  ->  per-b (B, T, C) layout for the kernel
    x_b = jnp.transpose(x, (0, 3, 2, 1)).reshape(B, T, C)

    out_b = pl.pallas_call(
        _attn_kernel,
        out_shape=jax.ShapeDtypeStruct((B, T, C), jnp.float32),
        grid=(GB,),
        in_specs=[
            pl.BlockSpec((BB, T, C), lambda i: (i, 0, 0)),   # x slab (BB sequences)
            pl.BlockSpec((BB, 1, C), lambda i: (i, 0, 0)),   # data_bn scale per-b
            pl.BlockSpec((BB, 1, C), lambda i: (i, 0, 0)),   # data_bn shift per-b
            pl.BlockSpec((C, KQ2), lambda i: (0, 0)),        # fused qkv+wout weight
            pl.BlockSpec((1, KQ2), lambda i: (0, 0)),        # fused qkv bias
            pl.BlockSpec((Nh, DK), lambda i: (0, 0)),        # per-head K column mask
            pl.BlockSpec((NT, NT), lambda i: (0, 0)),        # softmax block-sum matrix
            pl.BlockSpec((1, C), lambda i: (0, 0)),          # bn2d scale
            pl.BlockSpec((1, C), lambda i: (0, 0)),          # bn2d shift (+ folded biases)
        ],
        out_specs=pl.BlockSpec((BB, T, C), lambda i: (i, 0, 0)),
        compiler_params=pltpu.CompilerParams(dimension_semantics=("parallel",)),
    )(x_b, dsc_b, dsh_b, w_all, b_all, kmask, smat, bn2_sc, bn2_sh)

    # attn_out.reshape(N, V, -1, T).permute(0, 2, 3, 1) equivalent: back to (N, C, T, V)
    return jnp.transpose(out_b.reshape(N, V, T, C), (0, 3, 2, 1))


# ---------------- deterministic parameter init ----------------
def init_params(key):
    ks = jax.random.split(key, 8)
    wqkv_t = 0.1 * jax.random.normal(ks[0], (KQ, C), jnp.float32)   # qkv_conv.weight[:, :, 0, 0]
    bqkv = 0.05 * jax.random.normal(ks[1], (KQ,), jnp.float32)
    wout_t = 0.1 * jax.random.normal(ks[2], (DV, DV), jnp.float32)  # attn_out.weight[:, :, 0, 0]
    bout = 0.05 * jax.random.normal(ks[3], (DV,), jnp.float32)
    dbn_g = 1.0 + 0.1 * jax.random.normal(ks[4], (C * V,), jnp.float32)
    dbn_b = 0.1 * jax.random.normal(ks[5], (C * V,), jnp.float32)
    dbn_rm = 0.05 * jnp.sin(jnp.arange(C * V, dtype=jnp.float32))
    dbn_rv = 1.0 + 0.1 * jnp.cos(jnp.arange(C * V, dtype=jnp.float32)) ** 2
    bn2_g = 1.0 + 0.1 * jax.random.normal(ks[6], (C,), jnp.float32)
    bn2_b = 0.1 * jax.random.normal(ks[7], (C,), jnp.float32)
    bn2_rm = 0.05 * jnp.cos(jnp.arange(C, dtype=jnp.float32))
    bn2_rv = 1.0 + 0.05 * jnp.sin(jnp.arange(C, dtype=jnp.float32)) ** 2
    return (wqkv_t, bqkv, wout_t, bout, dbn_g, dbn_b, dbn_rm, dbn_rv,
            bn2_g, bn2_b, bn2_rm, bn2_rv)


# ---------------- pure-JAX reference mirroring the torch forward ----------------
def reference_forward(x, params):
    (wqkv_t, bqkv, wout_t, bout,
     dbn_g, dbn_b, dbn_rm, dbn_rv,
     bn2_g, bn2_b, bn2_rm, bn2_rv) = params
    PREC = lax.Precision.HIGHEST
    x_sum = x
    xr = jnp.transpose(x, (0, 1, 3, 2)).reshape(N, C * V, T)
    xr = (xr - dbn_rm[None, :, None]) * (dbn_g / jnp.sqrt(dbn_rv + EPS))[None, :, None] \
        + dbn_b[None, :, None]
    xn = jnp.transpose(xr.reshape(N, C, V, T), (0, 1, 3, 2))
    xb = jnp.transpose(xn, (0, 3, 1, 2)).reshape(B, C, T)               # (B, C, T) with V1=1
    qkv = jnp.einsum('oc,bct->bot', wqkv_t, xb, precision=PREC) + bqkv[None, :, None]
    q = qkv[:, :DK] * (DKH ** -0.5)
    k = qkv[:, DK:2 * DK]
    v = qkv[:, 2 * DK:]
    flat_q = q.reshape(B, Nh, DKH, T)
    flat_k = k.reshape(B, Nh, DKH, T)
    flat_v = v.reshape(B, Nh, DVH, T)
    logits = jnp.einsum('bhdt,bhds->bhts', flat_q, flat_k, precision=PREC)
    w = jax.nn.softmax(logits, axis=-1)
    attn = jnp.einsum('bhts,bhds->bhtd', w, flat_v, precision=PREC)     # (B, Nh, T, DVH)
    attn = jnp.transpose(attn, (0, 1, 3, 2)).reshape(B, DV, T)
    out = jnp.einsum('oc,bct->bot', wout_t, attn, precision=PREC) + bout[None, :, None]
    out = jnp.transpose(out.reshape(N, V, DV, T), (0, 2, 3, 1))         # (N, DV, T, V)
    res = out + x_sum
    res = (res - bn2_rm[None, :, None, None]) \
        * (bn2_g / jnp.sqrt(bn2_rv + EPS))[None, :, None, None] \
        + bn2_b[None, :, None, None]
    return jnp.maximum(res, 0.0)


if __name__ == "__main__":
    key = jax.random.PRNGKey(0)
    kx, kp = jax.random.split(key)
    x = jax.random.normal(kx, (N, C, T, V), jnp.float32)
    params = init_params(kp)

    # one-time parameter prep (hoisted out of the per-forward path per review)
    prepped = prepare_params(params)

    out = tcn_unit_attention_forward(x, prepped)
    out = jax.block_until_ready(out)

    ref = reference_forward(x, params)
    # exact-f32 math throughout (no approx reciprocal); remaining diffs are only
    # reassociation from the weight folds and the shared softmax shift.
    np.testing.assert_allclose(np.asarray(out), np.asarray(ref), rtol=2e-4, atol=2e-4)
    print("KERNEL_OK")
</pallas_src>

<mosaic_0001>
module attributes {stable_mosaic.version = 11 : i64} {
  func.func @_attn_kernel(%arg0: i32, %arg1: memref<32x16x32xf32, #tpu.memory_space<vmem>>, %arg2: memref<32x1x32xf32, #tpu.memory_space<vmem>>, %arg3: memref<32x1x32xf32, #tpu.memory_space<vmem>>, %arg4: memref<32x160xf32, #tpu.memory_space<vmem>>, %arg5: memref<1x160xf32, #tpu.memory_space<vmem>>, %arg6: memref<4x16xf32, #tpu.memory_space<vmem>>, %arg7: memref<64x64xf32, #tpu.memory_space<vmem>>, %arg8: memref<1x32xf32, #tpu.memory_space<vmem>>, %arg9: memref<1x32xf32, #tpu.memory_space<vmem>>, %arg10: memref<32x16x32xf32, #tpu.memory_space<vmem>>) attributes {dimension_semantics = [#tpu.dimension_semantics<parallel>], iteration_bounds = array<i64: 1>, scalar_prefetch = 0 : i64, scratch_operands = 0 : i64, tpu.core_type = #tpu.core_type<tc>, window_params = [{transform_indices = @transform_0, window_bounds = array<i64: 32, 16, 32>}, {transform_indices = @transform_1, window_bounds = array<i64: 32, 1, 32>}, {transform_indices = @transform_2, window_bounds = array<i64: 32, 1, 32>}, {pipeline_mode = #tpu.pipeline_mode<synchronous>, transform_indices = @transform_3, window_bounds = array<i64: 32, 160>}, {pipeline_mode = #tpu.pipeline_mode<synchronous>, transform_indices = @transform_4, window_bounds = array<i64: 1, 160>}, {pipeline_mode = #tpu.pipeline_mode<synchronous>, transform_indices = @transform_5, window_bounds = array<i64: 4, 16>}, {pipeline_mode = #tpu.pipeline_mode<synchronous>, transform_indices = @transform_6, window_bounds = array<i64: 64, 64>}, {pipeline_mode = #tpu.pipeline_mode<synchronous>, transform_indices = @transform_7, window_bounds = array<i64: 1, 32>}, {pipeline_mode = #tpu.pipeline_mode<synchronous>, transform_indices = @transform_8, window_bounds = array<i64: 1, 32>}, {transform_indices = @transform_9, window_bounds = array<i64: 32, 16, 32>}]} {
    %c0 = arith.constant 0 : index
    %c0_0 = arith.constant 0 : index
    %c0_1 = arith.constant 0 : index
    %0 = vector.load %arg1[%c0, %c0_0, %c0_1] : memref<32x16x32xf32, #tpu.memory_space<vmem>>, vector<32x16x32xf32>
    %c0_2 = arith.constant 0 : index
    %c0_3 = arith.constant 0 : index
    %c0_4 = arith.constant 0 : index
    %1 = vector.load %arg2[%c0_2, %c0_3, %c0_4] : memref<32x1x32xf32, #tpu.memory_space<vmem>>, vector<32x1x32xf32>
    %2 = vector.broadcast %1 : vector<32x1x32xf32> to vector<32x16x32xf32>
    %3 = arith.mulf %0, %2 : vector<32x16x32xf32>
    %c0_5 = arith.constant 0 : index
    %c0_6 = arith.constant 0 : index
    %c0_7 = arith.constant 0 : index
    %4 = vector.load %arg3[%c0_5, %c0_6, %c0_7] : memref<32x1x32xf32, #tpu.memory_space<vmem>>, vector<32x1x32xf32>
    %5 = vector.broadcast %4 : vector<32x1x32xf32> to vector<32x16x32xf32>
    %6 = arith.addf %3, %5 : vector<32x16x32xf32>
    %7 = vector.shape_cast %6 : vector<32x16x32xf32> to vector<512x32xf32>
    %c0_8 = arith.constant 0 : index
    %c0_9 = arith.constant 0 : index
    %8 = vector.load %arg4[%c0_8, %c0_9] : memref<32x160xf32, #tpu.memory_space<vmem>>, vector<32x160xf32>
    %cst = arith.constant dense<0.000000e+00> : vector<512x160xf32>
    %9 = tpu.matmul %7, %8, %cst {dimension_numbers = #tpu.dot_dimension_numbers<[1], [0], [0], [1], [0, 0, 1, 1], [], []>} : vector<512x32xf32>, vector<32x160xf32>, vector<512x160xf32> -> vector<512x160xf32>
    %c0_10 = arith.constant 0 : index
    %c0_11 = arith.constant 0 : index
    %10 = vector.load %arg5[%c0_10, %c0_11] : memref<1x160xf32, #tpu.memory_space<vmem>>, vector<1x160xf32>
    %11 = vector.broadcast %10 : vector<1x160xf32> to vector<512x160xf32>
    %12 = arith.addf %9, %11 : vector<512x160xf32>
    %13 = vector.shape_cast %12 : vector<512x160xf32> to vector<32x16x160xf32>
    %14 = vector.extract_strided_slice %13 {offsets = [0, 0, 0], sizes = [32, 16, 16], strides = [1, 1, 1]} : vector<32x16x160xf32> to vector<32x16x16xf32>
    %15 = vector.extract_strided_slice %13 {offsets = [0, 0, 16], sizes = [32, 16, 16], strides = [1, 1, 1]} : vector<32x16x160xf32> to vector<32x16x16xf32>
    %16 = vector.extract_strided_slice %13 {offsets = [0, 0, 32], sizes = [32, 16, 128], strides = [1, 1, 1]} : vector<32x16x160xf32> to vector<32x16x128xf32>
    %17 = vector.shape_cast %15 : vector<32x16x16xf32> to vector<32x1x16x16xf32>
    %c0_12 = arith.constant 0 : index
    %c0_13 = arith.constant 0 : index
    %18 = vector.load %arg6[%c0_12, %c0_13] : memref<4x16xf32, #tpu.memory_space<vmem>>, vector<4x16xf32>
    %19 = vector.shape_cast %18 : vector<4x16xf32> to vector<1x4x1x16xf32>
    %20 = vector.broadcast %17 : vector<32x1x16x16xf32> to vector<32x4x16x16xf32>
    %21 = vector.broadcast %19 : vector<1x4x1x16xf32> to vector<32x4x16x16xf32>
    %22 = arith.mulf %20, %21 : vector<32x4x16x16xf32>
    %23 = vector.shape_cast %22 : vector<32x4x16x16xf32> to vector<32x64x16xf32>
    "tpu.trace_start"() <{level = 10 : i32, message = "btd,bsd->bts"}> : () -> ()
    %cst_14 = arith.constant dense<0.000000e+00> : vector<32x16x64xf32>
    %24 = tpu.matmul %14, %23, %cst_14 {dimension_numbers = #tpu.dot_dimension_numbers<[2], [2], [1], [1], [0, 0, 0, 1, 1, 1], [0], [0]>} : vector<32x16x16xf32>, vector<32x64x16xf32>, vector<32x16x64xf32> -> vector<32x16x64xf32>
    "tpu.trace_stop"() : () -> ()
    %25 = vector.shape_cast %24 : vector<32x16x64xf32> to vector<512x64xf32>
    %cst_15 = arith.constant dense<0xFF800000> : vector<512xf32>
    %26 = vector.multi_reduction <maximumf>, %25, %cst_15 [1] : vector<512x64xf32> to vector<512xf32>
    %27 = vector.shape_cast %26 : vector<512xf32> to vector<512x1xf32>
    %28 = vector.broadcast %27 : vector<512x1xf32> to vector<512x64xf32>
    %29 = arith.subf %25, %28 : vector<512x64xf32>
    %30 = math.exp %29 : vector<512x64xf32>
    %c0_16 = arith.constant 0 : index
    %c0_17 = arith.constant 0 : index
    %31 = vector.load %arg7[%c0_16, %c0_17] : memref<64x64xf32, #tpu.memory_space<vmem>>, vector<64x64xf32>
    %cst_18 = arith.constant dense<0.000000e+00> : vector<512x64xf32>
    %32 = tpu.matmul %30, %31, %cst_18 {dimension_numbers = #tpu.dot_dimension_numbers<[1], [0], [0], [1], [0, 0, 1, 1], [], []>} : vector<512x64xf32>, vector<64x64xf32>, vector<512x64xf32> -> vector<512x64xf32>
    %33 = arith.divf %30, %32 : vector<512x64xf32>
    %34 = vector.shape_cast %33 : vector<512x64xf32> to vector<32x16x64xf32>
    %35 = vector.extract_strided_slice %34 {offsets = [0, 0, 0], sizes = [32, 16, 16], strides = [1, 1, 1]} : vector<32x16x64xf32> to vector<32x16x16xf32>
    %36 = vector.extract_strided_slice %16 {offsets = [0, 0, 0], sizes = [32, 16, 32], strides = [1, 1, 1]} : vector<32x16x128xf32> to vector<32x16x32xf32>
    "tpu.trace_start"() <{level = 10 : i32, message = "bts,bsd->btd"}> : () -> ()
    %cst_19 = arith.constant dense<0.000000e+00> : vector<32x16x32xf32>
    %37 = tpu.matmul %35, %36, %cst_19 {dimension_numbers = #tpu.dot_dimension_numbers<[2], [1], [1], [2], [0, 0, 0, 1, 1, 2], [0], [0]>} : vector<32x16x16xf32>, vector<32x16x32xf32>, vector<32x16x32xf32> -> vector<32x16x32xf32>
    "tpu.trace_stop"() : () -> ()
    %38 = vector.extract_strided_slice %34 {offsets = [0, 0, 16], sizes = [32, 16, 16], strides = [1, 1, 1]} : vector<32x16x64xf32> to vector<32x16x16xf32>
    %39 = vector.extract_strided_slice %16 {offsets = [0, 0, 32], sizes = [32, 16, 32], strides = [1, 1, 1]} : vector<32x16x128xf32> to vector<32x16x32xf32>
    "tpu.trace_start"() <{level = 10 : i32, message = "bts,bsd->btd"}> : () -> ()
    %cst_20 = arith.constant dense<0.000000e+00> : vector<32x16x32xf32>
    %40 = tpu.matmul %38, %39, %cst_20 {dimension_numbers = #tpu.dot_dimension_numbers<[2], [1], [1], [2], [0, 0, 0, 1, 1, 2], [0], [0]>} : vector<32x16x16xf32>, vector<32x16x32xf32>, vector<32x16x32xf32> -> vector<32x16x32xf32>
    "tpu.trace_stop"() : () -> ()
    %41 = arith.addf %37, %40 : vector<32x16x32xf32>
    %42 = vector.extract_strided_slice %34 {offsets = [0, 0, 32], sizes = [32, 16, 16], strides = [1, 1, 1]} : vector<32x16x64xf32> to vector<32x16x16xf32>
    %43 = vector.extract_strided_slice %16 {offsets = [0, 0, 64], sizes = [32, 16, 32], strides = [1, 1, 1]} : vector<32x16x128xf32> to vector<32x16x32xf32>
    "tpu.trace_start"() <{level = 10 : i32, message = "bts,bsd->btd"}> : () -> ()
    %cst_21 = arith.constant dense<0.000000e+00> : vector<32x16x32xf32>
    %44 = tpu.matmul %42, %43, %cst_21 {dimension_numbers = #tpu.dot_dimension_numbers<[2], [1], [1], [2], [0, 0, 0, 1, 1, 2], [0], [0]>} : vector<32x16x16xf32>, vector<32x16x32xf32>, vector<32x16x32xf32> -> vector<32x16x32xf32>
    "tpu.trace_stop"() : () -> ()
    %45 = arith.addf %41, %44 : vector<32x16x32xf32>
    %46 = vector.extract_strided_slice %34 {offsets = [0, 0, 48], sizes = [32, 16, 16], strides = [1, 1, 1]} : vector<32x16x64xf32> to vector<32x16x16xf32>
    %47 = vector.extract_strided_slice %16 {offsets = [0, 0, 96], sizes = [32, 16, 32], strides = [1, 1, 1]} : vector<32x16x128xf32> to vector<32x16x32xf32>
    "tpu.trace_start"() <{level = 10 : i32, message = "bts,bsd->btd"}> : () -> ()
    %cst_22 = arith.constant dense<0.000000e+00> : vector<32x16x32xf32>
    %48 = tpu.matmul %46, %47, %cst_22 {dimension_numbers = #tpu.dot_dimension_numbers<[2], [1], [1], [2], [0, 0, 0, 1, 1, 2], [0], [0]>} : vector<32x16x16xf32>, vector<32x16x32xf32>, vector<32x16x32xf32> -> vector<32x16x32xf32>
    "tpu.trace_stop"() : () -> ()
    %49 = arith.addf %45, %48 : vector<32x16x32xf32>
    %50 = arith.addf %49, %0 : vector<32x16x32xf32>
    %c0_23 = arith.constant 0 : index
    %c0_24 = arith.constant 0 : index
    %51 = vector.load %arg8[%c0_23, %c0_24] : memref<1x32xf32, #tpu.memory_space<vmem>>, vector<1x32xf32>
    %52 = vector.shape_cast %51 : vector<1x32xf32> to vector<1x1x32xf32>
    %53 = vector.broadcast %52 : vector<1x1x32xf32> to vector<32x16x32xf32>
    %54 = arith.mulf %50, %53 : vector<32x16x32xf32>
    %c0_25 = arith.constant 0 : index
    %c0_26 = arith.constant 0 : index
    %55 = vector.load %arg9[%c0_25, %c0_26] : memref<1x32xf32, #tpu.memory_space<vmem>>, vector<1x32xf32>
    %56 = vector.shape_cast %55 : vector<1x32xf32> to vector<1x1x32xf32>
    %57 = vector.broadcast %56 : vector<1x1x32xf32> to vector<32x16x32xf32>
    %58 = arith.addf %54, %57 : vector<32x16x32xf32>
    %cst_27 = arith.constant 0.000000e+00 : f32
    %59 = vector.broadcast %cst_27 : f32 to vector<32x16x32xf32>
    %60 = arith.maximumf %58, %59 : vector<32x16x32xf32>
    %c0_28 = arith.constant 0 : index
    %c0_29 = arith.constant 0 : index
    %c0_30 = arith.constant 0 : index
    %61 = vector.load %arg10[%c0_28, %c0_29, %c0_30] : memref<32x16x32xf32, #tpu.memory_space<vmem>>, vector<32x16x32xf32>
    tpu.vector_store %arg10[%c0_28, %c0_29, %c0_30], %60 {strides = array<i32>} : memref<32x16x32xf32, #tpu.memory_space<vmem>>, vector<32x16x32xf32>,
    return
  }
  func.func @transform_0(%arg0: i32) -> (i32, i32, i32) {
    %c0_i32 = arith.constant 0 : i32
    %c0_i32_0 = arith.constant 0 : i32
    %c0_i32_1 = arith.constant 0 : i32
    return %arg0, %c0_i32, %c0_i32_0 : i32, i32, i32
  }
  func.func @transform_1(%arg0: i32) -> (i32, i32, i32) {
    %c0_i32 = arith.constant 0 : i32
    %c0_i32_0 = arith.constant 0 : i32
    %c0_i32_1 = arith.constant 0 : i32
    return %arg0, %c0_i32, %c0_i32_0 : i32, i32, i32
  }
  func.func @transform_2(%arg0: i32) -> (i32, i32, i32) {
    %c0_i32 = arith.constant 0 : i32
    %c0_i32_0 = arith.constant 0 : i32
    %c0_i32_1 = arith.constant 0 : i32
    return %arg0, %c0_i32, %c0_i32_0 : i32, i32, i32
  }
  func.func @transform_3(%arg0: i32) -> (i32, i32) {
    %c0_i32 = arith.constant 0 : i32
    %c0_i32_0 = arith.constant 0 : i32
    %c0_i32_1 = arith.constant 0 : i32
    return %c0_i32, %c0_i32_0 : i32, i32
  }
  func.func @transform_4(%arg0: i32) -> (i32, i32) {
    %c0_i32 = arith.constant 0 : i32
    %c0_i32_0 = arith.constant 0 : i32
    %c0_i32_1 = arith.constant 0 : i32
    return %c0_i32, %c0_i32_0 : i32, i32
  }
  func.func @transform_5(%arg0: i32) -> (i32, i32) {
    %c0_i32 = arith.constant 0 : i32
    %c0_i32_0 = arith.constant 0 : i32
    %c0_i32_1 = arith.constant 0 : i32
    return %c0_i32, %c0_i32_0 : i32, i32
  }
  func.func @transform_6(%arg0: i32) -> (i32, i32) {
    %c0_i32 = arith.constant 0 : i32
    %c0_i32_0 = arith.constant 0 : i32
    %c0_i32_1 = arith.constant 0 : i32
    return %c0_i32, %c0_i32_0 : i32, i32
  }
  func.func @transform_7(%arg0: i32) -> (i32, i32) {
    %c0_i32 = arith.constant 0 : i32
    %c0_i32_0 = arith.constant 0 : i32
    %c0_i32_1 = arith.constant 0 : i32
    return %c0_i32, %c0_i32_0 : i32, i32
  }
  func.func @transform_8(%arg0: i32) -> (i32, i32) {
    %c0_i32 = arith.constant 0 : i32
    %c0_i32_0 = arith.constant 0 : i32
    %c0_i32_1 = arith.constant 0 : i32
    return %c0_i32, %c0_i32_0 : i32, i32
  }
  func.func @transform_9(%arg0: i32) -> (i32, i32, i32) {
    %c0_i32 = arith.constant 0 : i32
    %c0_i32_0 = arith.constant 0 : i32
    %c0_i32_1 = arith.constant 0 : i32
    return %arg0, %c0_i32, %c0_i32_0 : i32, i32, i32
  }
}

</mosaic_0001>

<bundles_post_ra>
// kernel: tpu_custom_call.1
= control target key start
LH: loop header
LB: loop body
LE: loop exit
PB: predicated region body
PF: predicated region fallthrough
CT: control target
= control target key end

     0   :  { %14 = vsyncpa [#allocation3], 0  ;;  %s18444_s0 = inlined_call_operand.hbm [shape: f32[32,16,32], index: 0, kind: input, shape index: {}]   ;;  %s18445_s1 = inlined_call_operand.hbm [shape: f32[32,1,32], index: 1, kind: input, shape index: {}]   ;;  %s18446_s2 = inlined_call_operand.hbm [shape: f32[32,1,32], index: 2, kind: input, shape index: {}]   ;;  %s18447_s3 = inlined_call_operand.hbm [shape: f32[32,160], index: 3, kind: input, shape index: {}]   ;;  %s18448_s4 = inlined_call_operand.hbm [shape: f32[1,160], index: 4, kind: input, shape index: {}]   ;;  %s18449_s5 = inlined_call_operand.vmem [shape: f32[4,16], index: 5, kind: input, shape index: {}]   ;;  %s18450_s6 = inlined_call_operand.hbm [shape: f32[64,64], index: 6, kind: input, shape index: {}]   ;;  %s18451_s7 = inlined_call_operand.vmem [shape: f32[1,32], index: 7, kind: input, shape index: {}]   ;;  %s18452_s8 = inlined_call_operand.vmem [shape: f32[1,32], index: 8, kind: input, shape index: {}]   ;;  %s18453_s9 = inlined_call_operand.hbm [shape: f32[32,16,32], index: 9, kind: output, shape index: {}]  }
   0x1   :  { %15 = vsyncpa [#allocation6], 0 }
   0x2   :  { %16 = vsyncpa [#allocation9], 0 }
   0x3   :  { %17 = vsyncpa [#allocation12], 0  ;;  %s36_s11 = sshll.u32 %s18445_s1, 4  ;;  %s37_s11 = int_to_ptr.hbm [resolvable:$true] %s36_s11 }
   0x4   :  { %18 = vsyncpa [#allocation4], 0  ;;  %s12228_s12 = smov [#allocation5]   ;;  %s62_s16 = sshll.u32 %s18447_s3, 4  ;;  %s63_s16 = int_to_ptr.hbm [resolvable:$true] %s62_s16 }
   0x5   :  { %s38_s13 = sshll.u32 %s12228_s12, 4  ;;  %s12229_s17 = smov 16   ;;  %s39_s13 = int_to_ptr.vmem [resolvable:$true] %s38_s13 }
   0x6   :  { %s12230_s18 = smov 1   ;;  %s12231_s19 = smov [#allocation8]  }
   0x7   :  { %44 = dma.hbm_to_vmem [thread:$0]  %s37_s11, 512, %s39_s13, [#allocation6], %s12229_s17, %s12229_s17, %s12230_s18  }
   0x8   :  { %s64_s20 = sshll.u32 %s12231_s19, 4  ;;  %s23_s22 = sshll.u32 %s18444_s0, 4  ;;  %s65_s20 = int_to_ptr.vmem [resolvable:$true] %s64_s20  ;;  %s24_s22 = int_to_ptr.hbm [resolvable:$true] %s23_s22 }
   0x9   :  { %s12232_s23 = smov 256   ;;  %s12233_s24 = smov [#allocation2]  }
   0xa   :  { %70 = dma.hbm_to_vmem [thread:$0]  %s63_s16, 1024, %s65_s20, [#allocation9], %s12232_s23, %s12232_s23, %s12229_s17  }
   0xb   :  { %s25_s25 = sshll.u32 %s12233_s24, 4  ;;  %s12234_s3 = smov 128   ;;  %s26_s25 = int_to_ptr.vmem [resolvable:$true] %s25_s25 }
   0xc   :  { %s12235_s26 = smov 8   ;;  %s49_s29 = sshll.u32 %s18446_s2, 4  ;;  %s50_s29 = int_to_ptr.hbm [resolvable:$true] %s49_s29 }
   0xd   :  { %31 = dma.hbm_to_vmem [thread:$0]  %s24_s22, 8192, %s26_s25, [#allocation3], %s12234_s3, %s12234_s3, %s12235_s26  }
   0xe   :  { %s12236_s30 = smov [#allocation7]   ;;  %s76_s12 = sshll.u32 %s18448_s4, 4  ;;  %s77_s12 = int_to_ptr.hbm [resolvable:$true] %s76_s12 }
   0xf   :  { %s51_s0 = sshll.u32 %s12236_s30, 4  ;;  %s12237_s13 = smov [#allocation10]   ;;  %s52_s0 = int_to_ptr.vmem [resolvable:$true] %s51_s0 }
  0x10   :  { %57 = dma.hbm_to_vmem [thread:$0]  %s50_s29, 512, %s52_s0, [#allocation6], %s12229_s17, %s12229_s17, %s12230_s18  }
  0x11   :  { %s78_s14 = sshll.u32 %s12237_s13, 4  ;;  %s88_s19 = sshll.u32 %s18450_s6, 4  ;;  %s79_s14 = int_to_ptr.vmem [resolvable:$true] %s78_s14  ;;  %s89_s19 = int_to_ptr.hbm [resolvable:$true] %s88_s19 }
  0x12   :  { %81 = dma.hbm_to_vmem [thread:$0]  %s77_s12, 32, %s79_s14, [#allocation9]  }
  0x13   :  { %s12238_s2 = smov [#allocation11]  }
  0x14   :  { %s90_s20 = sshll.u32 %s12238_s2, 4  ;;  %s91_s20 = int_to_ptr.vmem [resolvable:$true] %s90_s20 }
  0x15   :  { %96 = dma.hbm_to_vmem [thread:$0]  %s89_s19, 1024, %s91_s20, [#allocation12], %s12234_s3, %s12234_s3, %s12235_s26  }
  0x16   :  { %12218 = dma.done.wait [#allocation3], 8192  }
  0x17   :  { %12219 = vsyncadd [#allocation3], 4294959104 }
  0x18   :  { %12220 = dma.done.wait [#allocation6], 1024  }
  0x19   :  { %12221 = vsyncadd [#allocation6], 4294966272 }
  0x1a   :  { %12222 = dma.done.wait [#allocation9], 1056  }
  0x1b   :  { %12223 = vsyncadd [#allocation9], 4294966240 }
  0x1c   :  { %12224 = dma.done.wait [#allocation12], 1024  }
  0x1d   :  { %12225 = vsyncadd [#allocation12], 4294966272  ;;  %v579_v0 = vld [vmem:[#allocation8 + $0x30] sm:$0xff]  ;;  %v577_v1 = vld [vmem:[#allocation8 + $0x20] sm:$0xff]  ;;  %vm587_vm0 = vcmask 261120   ;;  %vm1499_vm1 = vcmask 130048  }
  0x1e   :  { %792 = vmatpush.msra.mxu0 %v579_v0  ;;  %v575_v2 = vld [vmem:[#allocation8 + $0x10] sm:$0xff]  ;;  %v125_v3 = vld [vmem:[#allocation2] sm:$0xff]  ;;  %v126_v11 = vld [vmem:[#allocation2 + $0x8] sm:$0xff]  ;;  %vm3684_vm2 = vcmask 523264   ;;  %s12241_s18 = smov 96   ;;  %s12242_s21 = smov 32  }
  0x1f   :  { %v11661_v4 = vld [vmem:[#allocation5] ss:$0 sm:$0xff]  ;;  %v11663_v19 = vld [vmem:[#allocation5 + $0x1] ss:$0 sm:$0xff]  ;;  %v127_v20 = vld [vmem:[#allocation2 + $0x10] sm:$0xff]  ;;  %s12243_s1 = smov 80  }
  0x20   :  { %v11662_v5 = vld [vmem:[#allocation7] ss:$0 sm:$0xff]  ;;  %793 = vmatpush.msra.mxu0 %v577_v1  ;;  %v317_v8 = vmul.f32 %v11661_v4, %v125_v3  ;;  %v318_v16 = vmul.f32 %v11661_v4, %v126_v11  ;;  %v319_v22 = vmul.f32 %v11663_v19, %v127_v20  ;;  %v11664_v23 = vld [vmem:[#allocation7 + $0x1] ss:$0 sm:$0xff]  ;;  %v128_v24 = vld [vmem:[#allocation2 + $0x18] sm:$0xff]  ;;  %s10380_s11 = sshll.u32 %s18453_s9, 4  ;;  %s10381_s11 = int_to_ptr.hbm [resolvable:$true] %s10380_s11 }
  0x21   :  { %v1198_v6 = vld [vmem:[%s18449_s5] sm:$0xf]  ;;  %v320_v26 = vmul.f32 %v11663_v19, %v128_v24  ;;  %v130_v33 = vld [vmem:[#allocation2 + $0x28] sm:$0xff]  ;;  %v131_v37 = vld [vmem:[#allocation2 + $0x30] sm:$0xff]  ;;  %s12239_s5 = smov 112  }
  0x22   :  { %v573_v7 = vld [vmem:[#allocation8] sm:$0xff]  ;;  %v1203_v9 = vperm.slane %v1198_v6, 0  ;;  %v1201_v10 = vrot.slane %v1198_v6, 2  ;;  %794 = vmatpush.msra.mxu0 %v575_v2  ;;  %v1202_v12 = vrot.slane %v1198_v6, 3  ;;  %v1200_v13 = vrot.slane %v1198_v6, 1  ;;  %v132_v41 = vld [vmem:[#allocation2 + $0x38] sm:$0xff] }
  0x23   :  { %v12327_v14 = vadd.f32 %v11662_v5, %v317_v8  ;;  %v12333_v21 = vadd.f32 %v11662_v5, %v318_v16  ;;  %v12339_v25 = vadd.f32 %v11664_v23, %v319_v22  ;;  %v11665_v27 = vld [vmem:[#allocation5 + $0x2] ss:$0 sm:$0xff]  ;;  %v12343_v29 = vadd.f32 %v11664_v23, %v320_v26  ;;  %v11667_v36 = vld [vmem:[#allocation5 + $0x3] ss:$0 sm:$0xff]  ;;  %v11669_v44 = vld [vmem:[#allocation5 + $0x4] ss:$0 sm:$0xff] }
  0x24   :  { %1207 = vrot.lane.b32.xlu0 %v1203_v9, %s12229_s17  ;;  %v1205_v15 = vperm.slane %v1201_v10, 0  ;;  %795 = vmatpush.msra.mxu0 %v573_v7  ;;  %v1206_v17 = vperm.slane %v1202_v12, 0  ;;  %v1204_v18 = vperm.slane %v1200_v13, 0  ;;  %v129_v28 = vld [vmem:[#allocation2 + $0x20] sm:$0xff]  ;;  %v322_v34 = vmul.f32 %v11665_v27, %v130_v33  ;;  %v134_v49 = vld [vmem:[#allocation2 + $0x48] sm:$0xff]  ;;  %v135_v53 = vld [vmem:[#allocation2 + $0x50] sm:$0xff] }
  0x25   :  { %10396 = vmatmul.msk.f32.vlgmr.msra.gmra.mxu0 %vm587_vm0, %v12327_v14  ;;  %v321_v30 = vmul.f32 %v11665_v27, %v129_v28  ;;  %v11666_v31 = vld [vmem:[#allocation7 + $0x2] ss:$0 sm:$0xff]  ;;  %v323_v38 = vmul.f32 %v11667_v36, %v131_v37  ;;  %v11668_v39 = vld [vmem:[#allocation7 + $0x3] ss:$0 sm:$0xff]  ;;  %v324_v42 = vmul.f32 %v11667_v36, %v132_v41  ;;  %v11670_v47 = vld [vmem:[#allocation7 + $0x4] ss:$0 sm:$0xff]  ;;  %v326_v50 = vmul.f32 %v11669_v44, %v134_v49 }
  0x26   :  { %1211 = vrot.lane.b32.xlu1 %v1205_v15, %s12229_s17  ;;  %v12351_v35 = vadd.f32 %v11666_v31, %v322_v34  ;;  %v133_v45 = vld [vmem:[#allocation2 + $0x40] sm:$0xff]  ;;  %v136_v57 = vld [vmem:[#allocation2 + $0x58] sm:$0xff]  ;;  %v138_v1 = vld [vmem:[#allocation2 + $0x68] sm:$0xff] }
  0x27   :  { %v12347_v32 = vadd.f32 %v11666_v31, %v321_v30  ;;  %v12355_v40 = vadd.f32 %v11668_v39, %v323_v38  ;;  %v12359_v43 = vadd.f32 %v11668_v39, %v324_v42  ;;  %v325_v46 = vmul.f32 %v11669_v44, %v133_v45  ;;  %v11671_v52 = vld [vmem:[#allocation5 + $0x5] ss:$0 sm:$0xff]  ;;  %v11673_v60 = vld [vmem:[#allocation5 + $0x6] ss:$0 sm:$0xff]  ;;  %v11675_v4 = vld [vmem:[#allocation5 + $0x7] ss:$0 sm:$0xff] }
  0x28   :  { %v12367_v51 = vadd.f32 %v11670_v47, %v326_v50  ;;  %v327_v54 = vmul.f32 %v11671_v52, %v135_v53  ;;  %v11672_v55 = vld [vmem:[#allocation7 + $0x5] ss:$0 sm:$0xff]  ;;  %v328_v58 = vmul.f32 %v11671_v52, %v136_v57  ;;  %v11674_v63 = vld [vmem:[#allocation7 + $0x6] ss:$0 sm:$0xff]  ;;  %v330_v2 = vmul.f32 %v11673_v60, %v138_v1  ;;  %v139_v5 = vld [vmem:[#allocation2 + $0x70] sm:$0xff] }
  0x29   :  { %v12363_v48 = vadd.f32 %v11670_v47, %v325_v46  ;;  %v137_v61 = vld [vmem:[#allocation2 + $0x60] sm:$0xff]  ;;  %v331_v6 = vmul.f32 %v11675_v4, %v139_v5  ;;  %v140_v9 = vld [vmem:[#allocation2 + $0x78] sm:$0xff]  ;;  %v11677_v15 = vld [vmem:[#allocation5 + $0x8] ss:$0 sm:$0xff] }
  0x2a   :  { %v12371_v56 = vadd.f32 %v11672_v55, %v327_v54  ;;  %v12375_v59 = vadd.f32 %v11672_v55, %v328_v58  ;;  %v329_v62 = vmul.f32 %v11673_v60, %v137_v61  ;;  %v12383_v3 = vadd.f32 %v11674_v63, %v330_v2  ;;  %v11676_v7 = vld [vmem:[#allocation7 + $0x7] ss:$0 sm:$0xff]  ;;  %v11678_v19 = vld [vmem:[#allocation7 + $0x8] ss:$0 sm:$0xff]  ;;  %v11679_v37 = vld [vmem:[#allocation5 + $0x9] ss:$0 sm:$0xff] }
  0x2b   :  { %v12387_v8 = vadd.f32 %v11676_v7, %v331_v6  ;;  %v332_v10 = vmul.f32 %v11675_v4, %v140_v9  ;;  %v141_v16 = vld [vmem:[#allocation2 + $0x80] sm:$0xff]  ;;  %v142_v27 = vld [vmem:[#allocation2 + $0x88] sm:$0xff]  ;;  %v143_v39 = vld [vmem:[#allocation2 + $0x90] sm:$0xff] }
  0x2c   :  { %1209 = vrot.lane.b32.xlu0 %v1204_v18, %s12229_s17  ;;  %v12379_v0 = vadd.f32 %v11674_v63, %v329_v62  ;;  %v333_v18 = vmul.f32 %v11677_v15, %v141_v16  ;;  %v334_v34 = vmul.f32 %v11677_v15, %v142_v27  ;;  %v335_v45 = vmul.f32 %v11679_v37, %v143_v39  ;;  %v11680_v46 = vld [vmem:[#allocation7 + $0x9] ss:$0 sm:$0xff]  ;;  %v144_v52 = vld [vmem:[#allocation2 + $0x98] sm:$0xff]  ;;  %v11681_v61 = vld [vmem:[#allocation5 + $0xa] ss:$0 sm:$0xff] }
  0x2d   :  { %10397 = vmatmul.msk.f32.gmra.mxu0 %vm587_vm0, %v12333_v21  ;;  %v12395_v13 = vadd.f32 %v11676_v7, %v332_v10  ;;  %v336_v57 = vmul.f32 %v11679_v37, %v144_v52  ;;  %v145_v63 = vld [vmem:[#allocation2 + $0xa0] sm:$0xff]  ;;  %v11682_v6 = vld [vmem:[#allocation7 + $0xa] ss:$0 sm:$0xff]  ;;  %v11684_v39 = vld [vmem:[#allocation7 + $0xb] ss:$0 sm:$0xff] }
  0x2e   :  { %1213 = vrot.lane.b32.xlu1 %v1206_v17, %s12229_s17  ;;  %v581_v17 = vld [vmem:[#allocation10] sm:$0x3]  ;;  %v12403_v23 = vadd.f32 %v11678_v19, %v333_v18  ;;  %v12421_v36 = vadd.f32 %v11678_v19, %v334_v34  ;;  %v12437_v49 = vadd.f32 %v11680_v46, %v335_v45  ;;  %v337_v5 = vmul.f32 %v11681_v61, %v145_v63  ;;  %v146_v15 = vld [vmem:[#allocation2 + $0xa8] sm:$0xff]  ;;  %s12240_s17 = smov 64  }
  0x2f   :  { %v12399_v20 = vperm.slane %v581_v17, 0  ;;  %v12453_v60 = vadd.f32 %v11680_v46, %v336_v57  ;;  %v338_v18 = vmul.f32 %v11681_v61, %v146_v15  ;;  %v11685_v61 = vld [vmem:[#allocation5 + $0xc] ss:$0 sm:$0xff] }
  0x30   :  { %18798 = vst [vmem:[#allocation21_spill] sm:$0xff] %v12437_v49  ;;  %v12469_v9 = vadd.f32 %v11682_v6, %v337_v5  ;;  %v150_v15 = vld [vmem:[#allocation2 + $0xc8] sm:$0xff] }
  0x31   :  { %18800 = vst [vmem:[#allocation23_spill] sm:$0xff] %v12453_v60  ;;  %v12485_v27 = vadd.f32 %v11682_v6, %v338_v18  ;;  %v11686_v6 = vld [vmem:[#allocation7 + $0xc] ss:$0 sm:$0xff]  ;;  %v342_v18 = vmul.f32 %v11685_v61, %v150_v15  ;;  %v153_v15 = vld [vmem:[#allocation2 + $0xe0] sm:$0xff] }
  0x32   :  { %18802 = vst [vmem:[#allocation25_spill] sm:$0xff] %v12469_v9 }
  0x33   :  { %18804 = vst [vmem:[#allocation27_spill] sm:$0xff] %v12485_v27 }
  0x35   :  { %10398 = vmatmul.msk.f32.gmra.mxu0 %vm587_vm0, %v12339_v25 }
  0x3d   :  { %10399 = vmatmul.msk.f32.gmra.mxu0 %vm587_vm0, %v12343_v29 }
  0x45   :  { %10400 = vmatmul.msk.f32.gmra.mxu0 %vm587_vm0, %v12347_v32 }
  0x4d   :  { %10401 = vmatmul.msk.f32.gmra.mxu0 %vm587_vm0, %v12351_v35 }
  0x55   :  { %10402 = vmatmul.msk.f32.gmra.mxu0 %vm587_vm0, %v12355_v40 }
  0x5d   :  { %10403 = vmatmul.msk.f32.gmra.mxu0 %vm587_vm0, %v12359_v43 }
  0x65   :  { %10404 = vmatmul.msk.f32.gmra.mxu0 %vm587_vm0, %v12363_v48 }
  0x6d   :  { %10405 = vmatmul.msk.f32.gmra.mxu0 %vm587_vm0, %v12367_v51 }
  0x75   :  { %10406 = vmatmul.msk.f32.gmra.mxu0 %vm587_vm0, %v12371_v56 }
  0x7d   :  { %10407 = vmatmul.msk.f32.gmra.mxu0 %vm587_vm0, %v12375_v59 }
  0x85   :  { %10408 = vmatmul.msk.f32.gmra.mxu0 %vm587_vm0, %v12379_v0 }
  0x8d   :  { %10409 = vmatmul.msk.f32.gmra.mxu0 %vm587_vm0, %v12383_v3 }
  0x95   :  { %10410 = vmatmul.msk.f32.gmra.mxu0 %vm587_vm0, %v12387_v8 }
  0x96   :  { %v12391_v11 = vpop.permute.xlu0 %1207 }
  0x98   :  { %v12393_v12 = vpop.permute.xlu1 %1211 }
  0x9d   :  { %10411 = vmatmul.msk.f32.gmra.mxu0 %vm587_vm0, %v12395_v13 }
  0x9e   :  { %v12401_v22 = vpop.permute.xlu0 %1209 }
  0xa0   :  { %v12405_v26 = vpop.permute.xlu1 %1213 }
  0xa2   :  { %v797_v24 = vpop.f32.mrf.mxu0 }
  0xa3   :  { %v12408_v28 = vadd.f32 %v797_v24, %v12399_v20 }
  0xa5   :  { %18796 = vst [vmem:[#allocation19_spill] sm:$0xff] %v12408_v28  ;;  %10412 = vmatmul.msk.f32.gmra.mxu0 %vm587_vm0, %v12403_v23  ;;  %v1225_v30 = vmul.f32 %v12405_v26, %v12408_v28  ;;  %v1221_v31 = vmul.f32 %v12401_v22, %v12408_v28  ;;  %v1219_v33 = vmul.f32 %v12391_v11, %v12408_v28 }
  0xa6   :  { %v1223_v47 = vmul.f32 %v12393_v12, %v12408_v28 }
  0xa7   :  { %1495 = vrot.lane.b32.xlu1 %v1225_v30, %s12239_s5  ;;  %1487 = vrot.lane.b32.xlu0 %v1221_v31, %s12239_s5  ;;  %v11683_v30 = vld [vmem:[#allocation5 + $0xb] ss:$0 sm:$0xff] }
  0xa8   :  { %1483 = vrot.lane.b32.xlu2 %v1219_v33, %s12239_s5  ;;  %v147_v33 = vld [vmem:[#allocation2 + $0xb0] sm:$0xff] }
  0xaa   :  { %v800_v38 = vpop.f32.mrf.mxu0 }
  0xab   :  { %v12424_v41 = vadd.f32 %v800_v38, %v12399_v20  ;;  %v339_v38 = vmul.f32 %v11683_v30, %v147_v33  ;;  %v12546_v33 = vadd.f32 %v11686_v6, %v342_v18 }
  0xad   :  { %18797 = vst [vmem:[#allocation20_spill] sm:$0xff] %v12424_v41  ;;  %10413 = vmatmul.msk.f32.gmra.mxu0 %vm587_vm0, %v12421_v36  ;;  %v1222_v42 = vmul.f32 %v12401_v22, %v12424_v41  ;;  %v1224_v44 = vmul.f32 %v12393_v12, %v12424_v41  ;;  %v1220_v58 = vmul.f32 %v12391_v11, %v12424_v41 }
  0xae   :  { %v1226_v7 = vmul.f32 %v12405_v26, %v12424_v41  ;;  %v12501_v45 = vadd.f32 %v11684_v39, %v339_v38  ;;  %18811 = vst [vmem:[#allocation34_spill] sm:$0xff] %v12546_v33 }
  0xaf   :  { %1489 = vrot.lane.b32.xlu1 %v1222_v42, %s12239_s5  ;;  %1493 = vrot.lane.b32.xlu0 %v1224_v44, %s12239_s5 }
  0xb0   :  { %1491 = vrot.lane.b32.xlu2 %v1223_v47, %s12239_s5  ;;  %18806 = vst [vmem:[#allocation29_spill] sm:$0xff] %v12501_v45  ;;  %v148_v47 = vld [vmem:[#allocation2 + $0xb8] sm:$0xff] }
  0xb2   :  { %v803_v50 = vpop.f32.mrf.mxu0 }
  0xb3   :  { %v12440_v53 = vadd.f32 %v803_v50, %v12399_v20 }
  0xb5   :  { %18799 = vst [vmem:[#allocation22_spill] sm:$0xff] %v12440_v53  ;;  %10414 = vmatmul.msk.f32.gmra.mxu0 %vm587_vm0, %v12437_v49  ;;  %v1231_v54 = vmul.f32 %v12393_v12, %v12440_v53  ;;  %v1227_v55 = vmul.f32 %v12391_v11, %v12440_v53  ;;  %v1233_v2 = vmul.f32 %v12405_v26, %v12440_v53 }
  0xb6   :  { %v1229_v19 = vmul.f32 %v12401_v22, %v12440_v53 }
  0xb7   :  { %1561 = vrot.lane.b32.xlu1 %v1231_v54, %s12239_s5  ;;  %1553 = vrot.lane.b32.xlu0 %v1227_v55, %s12239_s5  ;;  %v340_v54 = vmul.f32 %v11683_v30, %v148_v47 }
  0xb8   :  { %1485 = vrot.lane.b32.xlu2 %v1220_v58, %s12239_s5 }
  0xb9   :  { %v12517_v58 = vadd.f32 %v11684_v39, %v340_v54 }
  0xba   :  { %v806_v62 = vpop.f32.mrf.mxu0 }
  0xbb   :  { %v12456_v1 = vadd.f32 %v806_v62, %v12399_v20  ;;  %18808 = vst [vmem:[#allocation31_spill] sm:$0xff] %v12517_v58  ;;  %v149_v62 = vld [vmem:[#allocation2 + $0xc0] sm:$0xff] }
  0xbc   :  { %v341_v5 = vmul.f32 %v11685_v61, %v149_v62 }
  0xbd   :  { %18801 = vst [vmem:[#allocation24_spill] sm:$0xff] %v12456_v1  ;;  %10415 = vmatmul.msk.f32.gmra.mxu0 %vm587_vm0, %v12453_v60  ;;  %v1228_v4 = vmul.f32 %v12391_v11, %v12456_v1  ;;  %v1234_v16 = vmul.f32 %v12405_v26, %v12456_v1  ;;  %v1230_v17 = vmul.f32 %v12401_v22, %v12456_v1  ;;  %v172_v60 = vld [vmem:[#allocation2 + $0x178] sm:$0xff] }
  0xbe   :  { %v1232_v42 = vmul.f32 %v12393_v12, %v12456_v1 }
  0xbf   :  { %1555 = vrot.lane.b32.xlu1 %v1228_v4, %s12239_s5  ;;  %1565 = vrot.lane.b32.xlu0 %v1233_v2, %s12239_s5 }
  0xc0   :  { %1497 = vrot.lane.b32.xlu2 %v1226_v7, %s12239_s5 }
  0xc2   :  { %v809_v10 = vpop.f32.mrf.mxu0 }
  0xc3   :  { %v12483_v24 = vadd.f32 %v809_v10, %v12399_v20  ;;  %v12530_v10 = vadd.f32 %v11686_v6, %v341_v5  ;;  %v11689_v6 = vld [vmem:[#allocation5 + $0xe] ss:$0 sm:$0xff] }
  0xc4   :  { %v345_v18 = vmul.f32 %v11689_v6, %v153_v15 }
  0xc5   :  { %10416 = vmatmul.msk.f32.gmra.mxu0 %vm587_vm0, %v12469_v9  ;;  %18803 = vst [vmem:[#allocation26_spill] sm:$0xff] %v12483_v24  ;;  %v1237_v34 = vmul.f32 %v12401_v22, %v12483_v24  ;;  %v1239_v37 = vmul.f32 %v12393_v12, %v12483_v24  ;;  %v1235_v55 = vmul.f32 %v12391_v11, %v12483_v24 }
  0xc6   :  { %v1241_v7 = vmul.f32 %v12405_v26, %v12483_v24  ;;  %18809 = vst [vmem:[#allocation32_spill] sm:$0xff] %v12530_v10 }
  0xc7   :  { %1567 = vrot.lane.b32.xlu1 %v1234_v16, %s12239_s5  ;;  %1559 = vrot.lane.b32.xlu0 %v1230_v17, %s12239_s5 }
  0xc8   :  { %1557 = vrot.lane.b32.xlu2 %v1229_v19, %s12239_s5 }
  0xca   :  { %v812_v31 = vpop.f32.mrf.mxu0 }
  0xcb   :  { %v12499_v44 = vadd.f32 %v812_v31, %v12399_v20 }
  0xcd   :  { %10417 = vmatmul.msk.f32.gmra.mxu0 %vm587_vm0, %v12485_v27  ;;  %18805 = vst [vmem:[#allocation28_spill] sm:$0xff] %v12499_v44  ;;  %v1240_v50 = vmul.f32 %v12393_v12, %v12499_v44  ;;  %v1236_v52 = vmul.f32 %v12391_v11, %v12499_v44  ;;  %v1242_v4 = vmul.f32 %v12405_v26, %v12499_v44  ;;  %v163_v27 = vld [vmem:[#allocation2 + $0x130] sm:$0xff] }
  0xce   :  { %v1238_v30 = vmul.f32 %v12401_v22, %v12499_v44 }
  0xcf   :  { %1626 = vrot.lane.b32.xlu1 %v1237_v34, %s12239_s5  ;;  %1630 = vrot.lane.b32.xlu0 %v1239_v37, %s12239_s5  ;;  %v11687_v34 = vld [vmem:[#allocation5 + $0xd] ss:$0 sm:$0xff]  ;;  %v151_v37 = vld [vmem:[#allocation2 + $0xd0] sm:$0xff] }
  0xd0   :  { %1563 = vrot.lane.b32.xlu2 %v1232_v42, %s12239_s5  ;;  %v343_v42 = vmul.f32 %v11687_v34, %v151_v37 }
  0xd2   :  { %v815_v46 = vpop.f32.mrf.mxu0 }
  0xd3   :  { %v12515_v57 = vadd.f32 %v815_v46, %v12399_v20  ;;  %v11688_v46 = vld [vmem:[#allocation7 + $0xd] ss:$0 sm:$0xff] }
  0xd4   :  { %v12562_v54 = vadd.f32 %v11688_v46, %v343_v42 }
  0xd5   :  { %10418 = vmatmul.msk.f32.gmra.mxu0 %vm587_vm0, %v12501_v45  ;;  %18807 = vst [vmem:[#allocation30_spill] sm:$0xff] %v12515_v57  ;;  %v1243_v2 = vmul.f32 %v12391_v11, %v12515_v57  ;;  %v1249_v16 = vmul.f32 %v12405_v26, %v12515_v57  ;;  %v1245_v17 = vmul.f32 %v12401_v22, %v12515_v57 }
  0xd6   :  { %v1247_v47 = vmul.f32 %v12393_v12, %v12515_v57  ;;  %18813 = vst [vmem:[#allocation36_spill] sm:$0xff] %v12562_v54 }
  0xd7   :  { %1632 = vrot.lane.b32.xlu1 %v1240_v50, %s12239_s5  ;;  %1624 = vrot.lane.b32.xlu0 %v1236_v52, %s12239_s5 }
  0xd8   :  { %1622 = vrot.lane.b32.xlu2 %v1235_v55, %s12239_s5  ;;  %v152_v55 = vld [vmem:[#allocation2 + $0xd8] sm:$0xff] }
  0xda   :  { %v818_v63 = vpop.f32.mrf.mxu0 }
  0xdb   :  { %v12544_v31 = vadd.f32 %v818_v63, %v12399_v20  ;;  %v344_v63 = vmul.f32 %v11687_v34, %v152_v55 }
  0xdd   :  { %10419 = vmatmul.msk.f32.gmra.mxu0 %vm587_vm0, %v12517_v58  ;;  %18810 = vst [vmem:[#allocation33_spill] sm:$0xff] %v12544_v31  ;;  %v1246_v38 = vmul.f32 %v12401_v22, %v12544_v31  ;;  %v1248_v39 = vmul.f32 %v12393_v12, %v12544_v31  ;;  %v12578_v5 = vadd.f32 %v11688_v46, %v344_v63 }
  0xdf   :  { %1691 = vrot.lane.b32.xlu1 %v1243_v2, %s12239_s5  ;;  %1636 = vrot.lane.b32.xlu0 %v1242_v4, %s12239_s5  ;;  %v1244_v2 = vmul.f32 %v12391_v11, %v12544_v31  ;;  %18815 = vst [vmem:[#allocation38_spill] sm:$0xff] %v12578_v5 }
  0xe0   :  { %1634 = vrot.lane.b32.xlu2 %v1241_v7, %s12239_s5 }
  0xe2   :  { %v821_v19 = vpop.f32.mrf.mxu0 }
  0xe3   :  { %v12560_v52 = vadd.f32 %v821_v19, %v12399_v20  ;;  %v11690_v19 = vld [vmem:[#allocation7 + $0xe] ss:$0 sm:$0xff] }
  0xe4   :  { %v12591_v34 = vadd.f32 %v11690_v19, %v345_v18 }
  0xe5   :  { %10420 = vmatmul.msk.f32.gmra.mxu0 %vm587_vm0, %v12530_v10  ;;  %18812 = vst [vmem:[#allocation35_spill] sm:$0xff] %v12560_v52  ;;  %v1255_v61 = vmul.f32 %v12393_v12, %v12560_v52  ;;  %v1251_v62 = vmul.f32 %v12391_v11, %v12560_v52  ;;  %v160_v10 = vld [vmem:[#allocation2 + $0x118] sm:$0xff] }
  0xe6   :  { %18816 = vst [vmem:[#allocation39_spill] sm:$0xff] %v12591_v34 }
  0xe7   :  { %1703 = vrot.lane.b32.xlu1 %v1249_v16, %s12239_s5  ;;  %1695 = vrot.lane.b32.xlu0 %v1245_v17, %s12239_s5  ;;  %v1257_v17 = vmul.f32 %v12405_v26, %v12560_v52 }
  0xe8   :  { %1628 = vrot.lane.b32.xlu2 %v1238_v30, %s12239_s5  ;;  %v1250_v30 = vmul.f32 %v12405_v26, %v12544_v31 }
  0xea   :  { %v824_v50 = vpop.f32.mrf.mxu0 }
  0xeb   :  { %v12576_v4 = vadd.f32 %v824_v50, %v12399_v20  ;;  %v1253_v50 = vmul.f32 %v12401_v22, %v12560_v52 }
  0xed   :  { %10421 = vmatmul.msk.f32.gmra.mxu0 %vm587_vm0, %v12546_v33  ;;  %18814 = vst [vmem:[#allocation37_spill] sm:$0xff] %v12576_v4  ;;  %v1252_v16 = vmul.f32 %v12391_v11, %v12576_v4  ;;  %v1258_v42 = vmul.f32 %v12405_v26, %v12576_v4  ;;  %v1254_v46 = vmul.f32 %v12401_v22, %v12576_v4 }
  0xef   :  { %1697 = vrot.lane.b32.xlu1 %v1246_v38, %s12239_s5  ;;  %1701 = vrot.lane.b32.xlu0 %v1248_v39, %s12239_s5  ;;  %v154_v38 = vld [vmem:[#allocation2 + $0xe8] sm:$0xff] }
  0xf0   :  { %1699 = vrot.lane.b32.xlu2 %v1247_v47, %s12239_s5  ;;  %v346_v47 = vmul.f32 %v11689_v6, %v154_v38 }
  0xf2   :  { %v827_v7 = vpop.f32.mrf.mxu0 }
  0xf3   :  { %v12607_v55 = vadd.f32 %v827_v7, %v12399_v20  ;;  %v1256_v7 = vmul.f32 %v12393_v12, %v12576_v4 }
  0xf5   :  { %10422 = vmatmul.msk.f32.gmra.mxu0 %vm587_vm0, %v12562_v54  ;;  %18817 = vst [vmem:[#allocation40_spill] sm:$0xff] %v12607_v55  ;;  %v1261_v6 = vmul.f32 %v12401_v22, %v12607_v55  ;;  %v1263_v15 = vmul.f32 %v12393_v12, %v12607_v55  ;;  %v159_v54 = vld [vmem:[#allocation2 + $0x110] sm:$0xff] }
  0xf7   :  { %1768 = vrot.lane.b32.xlu1 %v1255_v61, %s12239_s5  ;;  %1760 = vrot.lane.b32.xlu0 %v1251_v62, %s12239_s5  ;;  %v12609_v61 = vadd.f32 %v11690_v19, %v346_v47  ;;  %v11691_v62 = vld [vmem:[#allocation5 + $0xf] ss:$0 sm:$0xff] }
  0xf8   :  { %1693 = vrot.lane.b32.xlu2 %v1244_v2, %s12239_s5  ;;  %v155_v2 = vld [vmem:[#allocation2 + $0xf0] sm:$0xff] }
  0xf9   :  { %18818 = vst [vmem:[#allocation41_spill] sm:$0xff] %v12609_v61 }
  0xfa   :  { %v830_v39 = vpop.f32.mrf.mxu0 }
  0xfb   :  { %v12623_v19 = vadd.f32 %v830_v39, %v12399_v20 }
  0xfd   :  { %10423 = vmatmul.msk.f32.gmra.mxu0 %vm587_vm0, %v12578_v5  ;;  %18819 = vst [vmem:[#allocation42_spill] sm:$0xff] %v12623_v19  ;;  %v1260_v47 = vmul.f32 %v12391_v11, %v12623_v19 }
  0xff   :  { %1762 = vrot.lane.b32.xlu1 %v1252_v16, %s12239_s5  ;;  %1772 = vrot.lane.b32.xlu0 %v1257_v17, %s12239_s5  ;;  %v347_v16 = vmul.f32 %v11691_v62, %v155_v2  ;;  %v11692_v17 = vld [vmem:[#allocation7 + $0xf] ss:$0 sm:$0xff]  ;;  %v1259_v2 = vmul.f32 %v12391_v11, %v12607_v55 }
 0x100   :  { %1705 = vrot.lane.b32.xlu2 %v1250_v30, %s12239_s5 }
 0x101   :  { %v12625_v30 = vadd.f32 %v11692_v17, %v347_v16 }
 0x102   :  { %v12593_v37 = vpop.permute.xlu2 %1483  ;;  %v833_v18 = vpop.f32.mrf.mxu0 }
 0x103   :  { %18820 = vst [vmem:[#allocation43_spill] sm:$0xff] %v12625_v30 }
 0x105   :  { %10424 = vmatmul.msk.f32.gmra.mxu0 %vm587_vm0, %v12591_v34  ;;  %v158_v34 = vld [vmem:[#allocation2 + $0x108] sm:$0xff] }
 0x107   :  { %1774 = vrot.lane.b32.xlu1 %v1258_v42, %s12239_s5  ;;  %1766 = vrot.lane.b32.xlu0 %v1254_v46, %s12239_s5  ;;  %v156_v42 = vld [vmem:[#allocation2 + $0xf8] sm:$0xff]  ;;  %v1264_v46 = vmul.f32 %v12393_v12, %v12623_v19 }
 0x108   :  { %1764 = vrot.lane.b32.xlu2 %v1253_v50, %s12239_s5  ;;  %v348_v50 = vmul.f32 %v11691_v62, %v156_v42  ;;  %v157_v42 = vld [vmem:[#allocation2 + $0x100] sm:$0xff] }
 0x10a   :  { %v1492_v63 = vpop.permute.xlu2 %1491  ;;  %v836_v39 = vpop.f32.mrf.mxu0 }
 0x10d   :  { %10425 = vmatmul.msk.f32.gmra.mxu0 %vm587_vm0, %v12609_v61 }
 0x10f   :  { %1833 = vrot.lane.b32.xlu1 %v1261_v6, %s12239_s5  ;;  %1837 = vrot.lane.b32.xlu0 %v1263_v15, %s12239_s5  ;;  %v12641_v6 = vadd.f32 %v833_v18, %v12399_v20  ;;  %v1266_v18 = vmul.f32 %v12405_v26, %v12623_v19 }
 0x110   :  { %1770 = vrot.lane.b32.xlu2 %v1256_v7, %s12239_s5  ;;  %v12643_v7 = vadd.f32 %v11692_v17, %v348_v50  ;;  %v1265_v17 = vmul.f32 %v12405_v26, %v12607_v55 }
 0x111   :  { %18821 = vst [vmem:[#allocation44_spill] sm:$0xff] %v12641_v6 }
 0x112   :  { %v12627_v38 = vpop.permute.xlu2 %1485  ;;  %18822 = vst [vmem:[#allocation45_spill] sm:$0xff] %v12643_v7 }
 0x115   :  { %10426 = vmatmul.msk.f32.gmra.mxu0 %vm587_vm0, %v12625_v30  ;;  %v11693_v30 = vld [vmem:[#allocation5 + $0x10] ss:$0 sm:$0xff] }
 0x117   :  { %1839 = vrot.lane.b32.xlu1 %v1264_v46, %s12239_s5  ;;  %1831 = vrot.lane.b32.xlu0 %v1260_v47, %s12239_s5  ;;  %v1267_v46 = vmul.f32 %v12391_v11, %v12641_v6  ;;  %v349_v47 = vmul.f32 %v11693_v30, %v157_v42  ;;  %v839_v42 = vpop.f32.mrf.mxu0 }
 0x118   :  { %1829 = vrot.lane.b32.xlu2 %v1259_v2, %s12239_s5  ;;  %v11694_v2 = vld [vmem:[#allocation7 + $0x10] ss:$0 sm:$0xff] }
 0x119   :  { %v1496_v15 = vpop.permute.xlu1 %1495  ;;  %v1488_v16 = vpop.permute.xlu0 %1487 }
 0x11a   :  { %v1498_v62 = vpop.permute.xlu2 %1497 }
 0x11b   :  { %10524 = vmatpush.xpose.msk.msra.mxu2 %vm1499_vm1, %v1498_v62 }
 0x11d   :  { %10427 = vmatmul.msk.f32.gmra.mxu0 %vm587_vm0, %v12643_v7  ;;  %v12658_v7 = vadd.f32 %v11694_v2, %v349_v47  ;;  %v1262_v47 = vmul.f32 %v12401_v22, %v12623_v19 }
 0x11f   :  { %10525 = vmatpush.xpose.msk.msra.mxu2 %vm1499_vm1, %v1496_v15  ;;  %1898 = vrot.lane.b32.xlu1 %v1267_v46, %s12239_s5  ;;  %18823 = vst [vmem:[#allocation46_spill] sm:$0xff] %v12658_v7  ;;  %v1273_v15 = vmul.f32 %v12405_v26, %v12641_v6  ;;  %v350_v46 = vmul.f32 %v11693_v30, %v158_v34 }
 0x120   :  { %1843 = vrot.lane.b32.xlu0 %v1266_v18, %s12239_s5  ;;  %1841 = vrot.lane.b32.xlu2 %v1265_v17, %s12239_s5  ;;  %v1269_v18 = vmul.f32 %v12401_v22, %v12641_v6  ;;  %v12676_v17 = vadd.f32 %v836_v39, %v12399_v20 }
 0x121   :  { %v1490_v50 = vpop.permute.xlu1 %1489  ;;  %v1494_v62 = vpop.permute.xlu0 %1493  ;;  %v12682_v30 = vadd.f32 %v11694_v2, %v350_v46  ;;  %v1271_v2 = vmul.f32 %v12393_v12, %v12641_v6 }
 0x122   :  { %v12660_v61 = vpop.permute.xlu2 %1557  ;;  %18824 = vst [vmem:[#allocation47_spill] sm:$0xff] %v12676_v17 }
 0x123   :  { %10526 = vmatpush.xpose.msk.msra.mxu2 %vm1499_vm1, %v1494_v62  ;;  %18825 = vst [vmem:[#allocation48_spill] sm:$0xff] %v12682_v30 }
 0x125   :  { %10428 = vmatmul.msk.f32.gmra.mxu0 %vm587_vm0, %v12658_v7  ;;  %v11695_v7 = vld [vmem:[#allocation5 + $0x11] ss:$0 sm:$0xff] }
 0x126   :  { %v351_v39 = vmul.f32 %v11695_v7, %v159_v54 }
 0x127   :  { %10527 = vmatpush.xpose.msk.msra.mxu2 %vm1499_vm1, %v1492_v63  ;;  %1910 = vrot.lane.b32.xlu1 %v1273_v15, %s12239_s5  ;;  %v842_v63 = vpop.f32.mrf.mxu0  ;;  %v1270_v15 = vmul.f32 %v12401_v22, %v12676_v17 }
 0x128   :  { %1902 = vrot.lane.b32.xlu0 %v1269_v18, %s12239_s5  ;;  %1835 = vrot.lane.b32.xlu2 %v1262_v47, %s12239_s5  ;;  %v11696_v18 = vld [vmem:[#allocation7 + $0x11] ss:$0 sm:$0xff]  ;;  %v1272_v47 = vmul.f32 %v12393_v12, %v12676_v17 }
 0x129   :  { %v12678_v62 = vpop.permute.xlu1 %1561  ;;  %v12680_v34 = vpop.permute.xlu0 %1553 }
 0x12a   :  { %v1564_v5 = vpop.permute.xlu2 %1563 }
 0x12b   :  { %10528 = vmatpush.xpose.msk.msra.mxu2 %vm1499_vm1, %v1490_v50  ;;  %v12698_v50 = vadd.f32 %v839_v42, %v12399_v20 }
 0x12d   :  { %10429 = vmatmul.msk.f32.gmra.mxu0 %vm587_vm0, %v12682_v30  ;;  %18826 = vst [vmem:[#allocation49_spill] sm:$0xff] %v12698_v50  ;;  %v12702_v30 = vadd.f32 %v11696_v18, %v351_v39  ;;  %v1268_v39 = vmul.f32 %v12391_v11, %v12676_v17 }
 0x12f   :  { %10529 = vmatpush.xpose.msk.msra.mxu2 %vm1499_vm1, %v1488_v16  ;;  %1904 = vrot.lane.b32.xlu1 %v1270_v15, %s12239_s5  ;;  %18827 = vst [vmem:[#allocation50_spill] sm:$0xff] %v12702_v30  ;;  %v1279_v16 = vmul.f32 %v12393_v12, %v12698_v50  ;;  %v352_v15 = vmul.f32 %v11695_v7, %v160_v10  ;;  %v845_v42 = vpop.f32.mrf.mxu0 }
 0x130   :  { %1908 = vrot.lane.b32.xlu0 %v1272_v47, %s12239_s5  ;;  %1906 = vrot.lane.b32.xlu2 %v1271_v2, %s12239_s5  ;;  %v1275_v47 = vmul.f32 %v12391_v11, %v12698_v50 }
 0x131   :  { %v12700_v46 = vpop.permute.xlu1 %1555  ;;  %v1566_v54 = vpop.permute.xlu0 %1565  ;;  %v12724_v2 = vadd.f32 %v11696_v18, %v352_v15  ;;  %v1281_v18 = vmul.f32 %v12405_v26, %v12698_v50  ;;  %v1274_v15 = vmul.f32 %v12405_v26, %v12676_v17 }
 0x132   :  { %v12704_v33 = vpop.permute.xlu2 %1622 }
 0x133   :  { %10530 = vmatpush.xpose.msk.msra.mxu2 %vm1499_vm1, %v12627_v38  ;;  %v12722_v38 = vadd.f32 %v842_v63, %v12399_v20  ;;  %18829 = vst [vmem:[#allocation52_spill] sm:$0xff] %v12724_v2 }
 0x135   :  { %10430 = vmatmul.msk.f32.gmra.mxu0 %vm587_vm0, %v12702_v30  ;;  %18828 = vst [vmem:[#allocation51_spill] sm:$0xff] %v12722_v38  ;;  %v11697_v30 = vld [vmem:[#allocation5 + $0x12] ss:$0 sm:$0xff] }
 0x137   :  { %10531 = vmatpush.xpose.msk.msra.mxu2 %vm1499_vm1, %v12593_v37  ;;  %1975 = vrot.lane.b32.xlu1 %v1279_v16, %s12239_s5  ;;  %v161_v37 = vld [vmem:[#allocation2 + $0x120] sm:$0xff]  ;;  %v1276_v16 = vmul.f32 %v12391_v11, %v12722_v38 }
 0x138   :  { %1967 = vrot.lane.b32.xlu0 %v1275_v47, %s12239_s5  ;;  %1900 = vrot.lane.b32.xlu2 %v1268_v39, %s12239_s5  ;;  %v353_v63 = vmul.f32 %v11697_v30, %v161_v37  ;;  %v11698_v47 = vld [vmem:[#allocation7 + $0x12] ss:$0 sm:$0xff]  ;;  %v848_v39 = vpop.f32.mrf.mxu0 }
 0x139   :  { %v1568_v10 = vpop.permute.xlu1 %1567  ;;  %v1560_v7 = vpop.permute.xlu0 %1559 }
 0x13a   :  { %10532 = vmatmul.msk.f32.vlgmr.msra.gmra.mxu2 %vm1499_vm1, %v12408_v28  ;;  %v1635_v58 = vpop.permute.xlu2 %1634  ;;  %10534 = vmatpush.xpose.msk.msra.mxu3 %vm1499_vm1, %v1568_v10  ;;  %v12745_v37 = vadd.f32 %v11698_v47, %v353_v63  ;;  %v1278_v63 = vmul.f32 %v12401_v22, %v12722_v38 }
 0x13c   :  { %18830 = vst [vmem:[#allocation53_spill] sm:$0xff] %v12745_v37 }
 0x13d   :  { %10431 = vmatmul.msk.f32.gmra.mxu0 %vm587_vm0, %v12724_v2  ;;  %v162_v2 = vld [vmem:[#allocation2 + $0x128] sm:$0xff] }
 0x13e   :  { %10535 = vmatpush.xpose.msk.msra.mxu3 %vm1499_vm1, %v1566_v54 }
 0x13f   :  { %1969 = vrot.lane.b32.xlu1 %v1276_v16, %s12239_s5  ;;  %v1282_v16 = vmul.f32 %v12405_v26, %v12722_v38 }
 0x140   :  { %1979 = vrot.lane.b32.xlu0 %v1281_v18, %s12239_s5  ;;  %1912 = vrot.lane.b32.xlu2 %v1274_v15, %s12239_s5  ;;  %v354_v18 = vmul.f32 %v11697_v30, %v162_v2  ;;  %v1277_v15 = vmul.f32 %v12401_v22, %v12698_v50 }
 0x141   :  { %v12741_v10 = vpop.permute.xlu1 %1626  ;;  %v12743_v28 = vpop.permute.xlu0 %1630 }
 0x142   :  { %10533 = vmatmul.msk.f32.gmra.mxu2 %vm1499_vm1, %v12424_v41  ;;  %v12749_v54 = vpop.permute.xlu2 %1628  ;;  %10536 = vmatpush.xpose.msk.msra.mxu3 %vm1499_vm1, %v1564_v5  ;;  %v12766_v5 = vadd.f32 %v845_v42, %v12399_v20  ;;  %v12770_v2 = vadd.f32 %v11698_v47, %v354_v18  ;;  %v1280_v18 = vmul.f32 %v12393_v12, %v12722_v38 }
 0x144   :  { %18831 = vst [vmem:[#allocation54_spill] sm:$0xff] %v12766_v5  ;;  %v1287_v47 = vmul.f32 %v12393_v12, %v12766_v5 }
 0x145   :  { %10432 = vmatmul.msk.f32.gmra.mxu0 %vm587_vm0, %v12745_v37  ;;  %18832 = vst [vmem:[#allocation55_spill] sm:$0xff] %v12770_v2  ;;  %v851_v37 = vpop.f32.mrf.mxu0 }
 0x146   :  { %10537 = vmatpush.xpose.msk.msra.mxu3 %vm1499_vm1, %v12678_v62  ;;  %v11699_v62 = vld [vmem:[#allocation5 + $0x13] ss:$0 sm:$0xff] }
 0x147   :  { %1981 = vrot.lane.b32.xlu1 %v1282_v16, %s12239_s5  ;;  %v1285_v16 = vmul.f32 %v12401_v22, %v12766_v5  ;;  %v355_v42 = vmul.f32 %v11699_v62, %v163_v27 }
 0x148   :  { %1973 = vrot.lane.b32.xlu0 %v1278_v63, %s12239_s5  ;;  %1971 = vrot.lane.b32.xlu2 %v1277_v15, %s12239_s5  ;;  %v11700_v63 = vld [vmem:[#allocation7 + $0x13] ss:$0 sm:$0xff] }
 0x149   :  { %v1633_v41 = vpop.permute.xlu1 %1632  ;;  %v12768_v30 = vpop.permute.xlu0 %1624 }
 0x14a   :  { %v12772_v45 = vpop.permute.xlu2 %1699  ;;  %10538 = vmatpush.xpose.msk.msra.mxu3 %vm1499_vm1, %v1560_v7  ;;  %v12789_v7 = vadd.f32 %v848_v39, %v12399_v20 }
 0x14c   :  { %18833 = vst [vmem:[#allocation56_spill] sm:$0xff] %v12789_v7  ;;  %v1288_v39 = vmul.f32 %v12393_v12, %v12789_v7 }
 0x14d   :  { %10433 = vmatmul.msk.f32.gmra.mxu0 %vm587_vm0, %v12770_v2  ;;  %v12793_v2 = vadd.f32 %v11700_v63, %v355_v42  ;;  %v854_v9 = vpop.f32.mrf.mxu0  ;;  %v1284_v42 = vmul.f32 %v12391_v11, %v12789_v7 }
 0x14e   :  { %10539 = vmatpush.xpose.msk.msra.mxu3 %vm1499_vm1, %v12660_v61 }
 0x14f   :  { %2040 = vrot.lane.b32.xlu1 %v1285_v16, %s12239_s5  ;;  %18834 = vst [vmem:[#allocation57_spill] sm:$0xff] %v12793_v2  ;;  %v164_v16 = vld [vmem:[#allocation2 + $0x138] sm:$0xff] }
 0x150   :  { %2044 = vrot.lane.b32.xlu0 %v1287_v47, %s12239_s5  ;;  %1977 = vrot.lane.b32.xlu2 %v1280_v18, %s12239_s5  ;;  %v356_v47 = vmul.f32 %v11699_v62, %v164_v16  ;;  %v12815_v18 = vadd.f32 %v851_v37, %v12399_v20 }
 0x151   :  { %v12791_v27 = vpop.permute.xlu1 %1691  ;;  %v1637_v15 = vpop.permute.xlu0 %1636 }
 0x152   :  { %v12795_v61 = vpop.permute.xlu2 %1693  ;;  %10540 = vmatpush.xpose.msk.msra.mxu3 %vm1499_vm1, %v12700_v46  ;;  %10544 = vmatpush.xpose.msk.msrb.mxu2 %vm1499_vm1, %v1637_v15  ;;  %v1283_v46 = vmul.f32 %v12391_v11, %v12766_v5  ;;  %18835 = vst [vmem:[#allocation58_spill] sm:$0xff] %v12815_v18  ;;  %v1291_v37 = vmul.f32 %v12391_v11, %v12815_v18 }
 0x155   :  { %10434 = vmatmul.msk.f32.gmra.mxu0 %vm587_vm0, %v12793_v2  ;;  %v165_v2 = vld [vmem:[#allocation2 + $0x140] sm:$0xff] }
 0x156   :  { %10541 = vmatpush.xpose.msk.msra.mxu3 %vm1499_vm1, %v12680_v34  ;;  %10545 = vmatpush.xpose.msk.msrb.mxu2 %vm1499_vm1, %v1635_v58  ;;  %v12819_v58 = vadd.f32 %v11700_v63, %v356_v47  ;;  %v11701_v34 = vld [vmem:[#allocation5 + $0x14] ss:$0 sm:$0xff]  ;;  %v1290_v63 = vmul.f32 %v12405_v26, %v12789_v7 }
 0x157   :  { %2046 = vrot.lane.b32.xlu1 %v1288_v39, %s12239_s5  ;;  %v357_v39 = vmul.f32 %v11701_v34, %v165_v2 }
 0x158   :  { %2038 = vrot.lane.b32.xlu0 %v1284_v42, %s12239_s5  ;;  %2036 = vrot.lane.b32.xlu2 %v1283_v46, %s12239_s5  ;;  %18836 = vst [vmem:[#allocation59_spill] sm:$0xff] %v12819_v58  ;;  %v11702_v42 = vld [vmem:[#allocation7 + $0x14] ss:$0 sm:$0xff]  ;;  %v857_v46 = vpop.f32.mrf.mxu0 }
 0x159   :  { %v1704_v62 = vpop.permute.xlu1 %1703  ;;  %v1696_v15 = vpop.permute.xlu0 %1695  ;;  %10542 = vmatmul.msk.f32.vlgmr.msra.gmra.mxu3 %vm1499_vm1, %v12440_v53  ;;  %v166_v53 = vld [vmem:[#allocation2 + $0x148] sm:$0xff] }
 0x15a   :  { %v1706_v16 = vpop.permute.xlu2 %1705  ;;  %10546 = vmatpush.xpose.msk.msrb.mxu2 %vm1499_vm1, %v1633_v41  ;;  %v1289_v41 = vmul.f32 %v12405_v26, %v12766_v5 }
 0x15b   :  { %10554 = vmatpush.xpose.msk.msrb.mxu3 %vm1499_vm1, %v1706_v16 }
 0x15d   :  { %10435 = vmatmul.msk.f32.gmra.mxu0 %vm587_vm0, %v12819_v58 }
 0x15e   :  { %10547 = vmatpush.xpose.msk.msrb.mxu2 %vm1499_vm1, %v12743_v28  ;;  %v12839_v28 = vadd.f32 %v11702_v42, %v357_v39  ;;  %v1293_v39 = vmul.f32 %v12401_v22, %v12815_v18 }
 0x15f   :  { %10555 = vmatpush.xpose.msk.msrb.mxu3 %vm1499_vm1, %v1704_v62  ;;  %2105 = vrot.lane.b32.xlu1 %v1291_v37, %s12239_s5  ;;  %v1297_v62 = vmul.f32 %v12405_v26, %v12815_v18  ;;  %v358_v37 = vmul.f32 %v11701_v34, %v166_v53  ;;  %v12862_v53 = vadd.f32 %v854_v9, %v12399_v20 }
 0x160   :  { %2050 = vrot.lane.b32.xlu0 %v1290_v63, %s12239_s5  ;;  %2048 = vrot.lane.b32.xlu2 %v1289_v41, %s12239_s5  ;;  %18837 = vst [vmem:[#allocation60_spill] sm:$0xff] %v12839_v28  ;;  %v1286_v63 = vmul.f32 %v12401_v22, %v12789_v7 }
 0x161   :  { %v1698_v2 = vpop.permute.xlu1 %1697  ;;  %v1702_v47 = vpop.permute.xlu0 %1701  ;;  %10543 = vmatmul.msk.f32.gmra.mxu3 %vm1499_vm1, %v12456_v1  ;;  %18838 = vst [vmem:[#allocation61_spill] sm:$0xff] %v12862_v53  ;;  %v12868_v41 = vadd.f32 %v11702_v42, %v358_v37  ;;  %v1294_v9 = vmul.f32 %v12401_v22, %v12862_v53  ;;  %v1296_v42 = vmul.f32 %v12393_v12, %v12862_v53 }
 0x162   :  { %v12841_v16 = vpop.permute.xlu2 %1764  ;;  %10548 = vmatpush.xpose.msk.msrb.mxu2 %vm1499_vm1, %v12749_v54  ;;  %v860_v54 = vpop.f32.mrf.mxu0 }
 0x163   :  { %10556 = vmatpush.xpose.msk.msrb.mxu3 %vm1499_vm1, %v1702_v47  ;;  %18839 = vst [vmem:[#allocation62_spill] sm:$0xff] %v12868_v41  ;;  %v11703_v47 = vld [vmem:[#allocation5 + $0x15] ss:$0 sm:$0xff] }
 0x165   :  { %10436 = vmatmul.msk.f32.gmra.mxu0 %vm587_vm0, %v12839_v28  ;;  %v171_v28 = vld [vmem:[#allocation2 + $0x170] sm:$0xff] }
 0x166   :  { %10549 = vmatpush.xpose.msk.msrb.mxu2 %vm1499_vm1, %v12741_v10 }
 0x167   :  { %10557 = vmatpush.xpose.msk.msrb.mxu3 %vm1499_vm1, %v12772_v45  ;;  %2117 = vrot.lane.b32.xlu1 %v1297_v62, %s12239_s5  ;;  %v167_v45 = vld [vmem:[#allocation2 + $0x150] sm:$0xff] }
 0x168   :  { %2109 = vrot.lane.b32.xlu0 %v1293_v39, %s12239_s5  ;;  %2042 = vrot.lane.b32.xlu2 %v1286_v63, %s12239_s5  ;;  %v359_v62 = vmul.f32 %v11703_v47, %v167_v45  ;;  %v11704_v39 = vld [vmem:[#allocation7 + $0x15] ss:$0 sm:$0xff] }
 0x169   :  { %v12864_v10 = vpop.permute.xlu1 %1768  ;;  %v12866_v34 = vpop.permute.xlu0 %1760 }
 0x16a   :  { %v1771_v1 = vpop.permute.xlu2 %1770  ;;  %10550 = vmatpush.xpose.msk.msrb.mxu2 %vm1499_vm1, %v12768_v30  ;;  %v1295_v30 = vmul.f32 %v12393_v12, %v12815_v18  ;;  %v12894_v63 = vadd.f32 %v11704_v39, %v359_v62  ;;  %v1292_v62 = vmul.f32 %v12391_v11, %v12862_v53 }
 0x16b   :  { %10558 = vmatpush.xpose.msk.msrb.mxu3 %vm1499_vm1, %v1698_v2  ;;  %v12888_v2 = vadd.f32 %v857_v46, %v12399_v20 }
 0x16c   :  { %18841 = vst [vmem:[#allocation64_spill] sm:$0xff] %v12894_v63 }
 0x16d   :  { %10437 = vmatmul.msk.f32.gmra.mxu0 %vm587_vm0, %v12868_v41  ;;  %18840 = vst [vmem:[#allocation63_spill] sm:$0xff] %v12888_v2  ;;  %v863_v41 = vpop.f32.mrf.mxu0  ;;  %v1303_v46 = vmul.f32 %v12393_v12, %v12888_v2 }
 0x16e   :  { %10551 = vmatpush.xpose.msk.msrb.mxu2 %vm1499_vm1, %v12704_v33 }
 0x16f   :  { %10559 = vmatpush.xpose.msk.msrb.mxu3 %vm1499_vm1, %v1696_v15  ;;  %2111 = vrot.lane.b32.xlu1 %v1294_v9, %s12239_s5  ;;  %v168_v15 = vld [vmem:[#allocation2 + $0x158] sm:$0xff] }
 0x170   :  { %2115 = vrot.lane.b32.xlu0 %v1296_v42, %s12239_s5  ;;  %2113 = vrot.lane.b32.xlu2 %v1295_v30, %s12239_s5  ;;  %v360_v9 = vmul.f32 %v11703_v47, %v168_v15  ;;  %v1299_v42 = vmul.f32 %v12391_v11, %v12888_v2 }
 0x171   :  { %v12890_v37 = vpop.permute.xlu1 %1762  ;;  %v1773_v33 = vpop.permute.xlu0 %1772  ;;  %10552 = vmatmul.msk.f32.vlgmr.msrb.gmra.mxu2 %vm1499_vm1, %v12483_v24  ;;  %v11705_v24 = vld [vmem:[#allocation5 + $0x16] ss:$0 sm:$0xff] }
 0x172   :  { %v12896_v45 = vpop.permute.xlu2 %1829  ;;  %v12918_v15 = vadd.f32 %v11704_v39, %v360_v9  ;;  %v1305_v39 = vmul.f32 %v12405_v26, %v12888_v2  ;;  %v1298_v9 = vmul.f32 %v12405_v26, %v12862_v53 }
 0x173   :  { %10560 = vmatpush.xpose.msk.msrb.mxu3 %vm1499_vm1, %v12795_v61  ;;  %v12914_v61 = vadd.f32 %v860_v54, %v12399_v20 }
 0x174   :  { %18843 = vst [vmem:[#allocation66_spill] sm:$0xff] %v12918_v15 }
 0x175   :  { %10438 = vmatmul.msk.f32.gmra.mxu0 %vm587_vm0, %v12894_v63  ;;  %18842 = vst [vmem:[#allocation65_spill] sm:$0xff] %v12914_v61  ;;  %v1300_v54 = vmul.f32 %v12391_v11, %v12914_v61 }
 0x177   :  { %10561 = vmatpush.xpose.msk.msrb.mxu3 %vm1499_vm1, %v12791_v27  ;;  %2182 = vrot.lane.b32.xlu1 %v1303_v46, %s12239_s5  ;;  %v169_v46 = vld [vmem:[#allocation2 + $0x160] sm:$0xff] }
 0x178   :  { %2174 = vrot.lane.b32.xlu0 %v1299_v42, %s12239_s5  ;;  %2107 = vrot.lane.b32.xlu2 %v1292_v62, %s12239_s5  ;;  %v866_v42 = vpop.f32.mrf.mxu0  ;;  %v361_v62 = vmul.f32 %v11705_v24, %v169_v46 }
 0x179   :  { %v1775_v30 = vpop.permute.xlu1 %1774  ;;  %v1767_v47 = vpop.permute.xlu0 %1766  ;;  %10553 = vmatmul.msk.f32.gmra.mxu2 %vm1499_vm1, %v12499_v44  ;;  %v11706_v44 = vld [vmem:[#allocation7 + $0x16] ss:$0 sm:$0xff] }
 0x17a   :  { %10562 = vmatmul.msk.f32.vlgmr.msrb.gmra.mxu3 %vm1499_vm1, %v12515_v57  ;;  %v12922_v27 = vpop.permute.xlu2 %1841  ;;  %10564 = vmatpush.xpose.msk.msra.mxu2 %vm1499_vm1, %v1775_v30  ;;  %v12941_v46 = vadd.f32 %v11706_v44, %v361_v62  ;;  %v1302_v62 = vmul.f32 %v12401_v22, %v12914_v61 }
 0x17c   :  { %18844 = vst [vmem:[#allocation67_spill] sm:$0xff] %v12941_v46 }
 0x17d   :  { %10439 = vmatmul.msk.f32.gmra.mxu0 %vm587_vm0, %v12918_v15  ;;  %v170_v15 = vld [vmem:[#allocation2 + $0x168] sm:$0xff] }
 0x17e   :  { %10565 = vmatpush.xpose.msk.msra.mxu2 %vm1499_vm1, %v1773_v33 }
 0x17f   :  { %2176 = vrot.lane.b32.xlu1 %v1300_v54, %s12239_s5  ;;  %v1306_v54 = vmul.f32 %v12405_v26, %v12914_v61 }
 0x180   :  { %2186 = vrot.lane.b32.xlu0 %v1305_v39, %s12239_s5  ;;  %2119 = vrot.lane.b32.xlu2 %v1298_v9, %s12239_s5  ;;  %v362_v39 = vmul.f32 %v11705_v24, %v170_v15  ;;  %v1301_v9 = vmul.f32 %v12401_v22, %v12888_v2 }
 0x181   :  { %v12937_v30 = vpop.permute.xlu1 %1833  ;;  %v12939_v57 = vpop.permute.xlu0 %1837 }
 0x182   :  { %10563 = vmatmul.msk.f32.gmra.mxu3 %vm1499_vm1, %v12544_v31  ;;  %v12945_v33 = vpop.permute.xlu2 %1835  ;;  %10566 = vmatpush.xpose.msk.msra.mxu2 %vm1499_vm1, %v1771_v1  ;;  %v869_v31 = vpop.f32.mrf.mxu0  ;;  %v12962_v1 = vadd.f32 %v863_v41, %v12399_v20  ;;  %v11708_v41 = vld [vmem:[#allocation7 + $0x17] ss:$0 sm:$0xff] }
 0x184   :  { %18845 = vst [vmem:[#allocation68_spill] sm:$0xff] %v12962_v1 }
 0x185   :  { %10440 = vmatmul.msk.f32.gmra.mxu0 %vm587_vm0, %v12941_v46  ;;  %v11707_v46 = vld [vmem:[#allocation5 + $0x17] ss:$0 sm:$0xff] }
 0x186   :  { %10567 = vmatpush.xpose.msk.msra.mxu2 %vm1499_vm1, %v12864_v10  ;;  %v12966_v10 = vadd.f32 %v11706_v44, %v362_v39  ;;  %v1311_v44 = vmul.f32 %v12393_v12, %v12962_v1  ;;  %v1304_v39 = vmul.f32 %v12393_v12, %v12914_v61 }
 0x187   :  { %2188 = vrot.lane.b32.xlu1 %v1306_v54, %s12239_s5  ;;  %v1309_v54 = vmul.f32 %v12401_v22, %v12962_v1 }
 0x188   :  { %2180 = vrot.lane.b32.xlu0 %v1302_v62, %s12239_s5  ;;  %2178 = vrot.lane.b32.xlu2 %v1301_v9, %s12239_s5  ;;  %18846 = vst [vmem:[#allocation69_spill] sm:$0xff] %v12966_v10  ;;  %v363_v62 = vmul.f32 %v11707_v46, %v171_v28 }
 0x189   :  { %v1840_v24 = vpop.permute.xlu1 %1839  ;;  %v12964_v15 = vpop.permute.xlu0 %1831 }
 0x18a   :  { %v12968_v63 = vpop.permute.xlu2 %1906  ;;  %10568 = vmatpush.xpose.msk.msra.mxu2 %vm1499_vm1, %v1767_v47  ;;  %v12985_v47 = vadd.f32 %v866_v42, %v12399_v20  ;;  %v872_v28 = vpop.f32.mrf.mxu0 }
 0x18c   :  { %18847 = vst [vmem:[#allocation70_spill] sm:$0xff] %v12985_v47  ;;  %v1312_v42 = vmul.f32 %v12393_v12, %v12985_v47 }
 0x18d   :  { %10441 = vmatmul.msk.f32.gmra.mxu0 %vm587_vm0, %v12966_v10  ;;  %v12989_v10 = vadd.f32 %v11708_v41, %v363_v62  ;;  %v1308_v62 = vmul.f32 %v12391_v11, %v12985_v47 }
 0x18e   :  { %10569 = vmatpush.xpose.msk.msra.mxu2 %vm1499_vm1, %v12841_v16 }
 0x18f   :  { %2247 = vrot.lane.b32.xlu1 %v1309_v54, %s12239_s5  ;;  %18848 = vst [vmem:[#allocation71_spill] sm:$0xff] %v12989_v10  ;;  %v364_v54 = vmul.f32 %v11707_v46, %v172_v60  ;;  %v13016_v46 = vadd.f32 %v869_v31, %v12399_v20  ;;  %v1314_v31 = vmul.f32 %v12405_v26, %v12985_v47 }
 0x190   :  { %2251 = vrot.lane.b32.xlu0 %v1311_v44, %s12239_s5  ;;  %2184 = vrot.lane.b32.xlu2 %v1304_v39, %s12239_s5  ;;  %v1307_v44 = vmul.f32 %v12391_v11, %v12962_v1 }
 0x191   :  { %v12987_v9 = vpop.permute.xlu1 %1898  ;;  %v13013_v60 = vadd.f32 %v11708_v41, %v364_v54  ;;  %18850 = vst [vmem:[#allocation73_spill] sm:$0xff] %v13016_v46  ;;  %v1315_v41 = vmul.f32 %v12391_v11, %v13016_v46 }
 0x192   :  { %v1844_v16 = vpop.permute.xlu0 %1843  ;;  %v12991_v58 = vpop.permute.xlu2 %1900  ;;  %10570 = vmatpush.xpose.msk.msra.mxu2 %vm1499_vm1, %v12890_v37 }
 0x193   :  { %10574 = vmatpush.xpose.msk.msra.mxu3 %vm1499_vm1, %v1844_v16  ;;  %18849 = vst [vmem:[#allocation72_spill] sm:$0xff] %v13013_v60 }
 0x195   :  { %10442 = vmatmul.msk.f32.gmra.mxu0 %vm587_vm0, %v12989_v10  ;;  %v173_v10 = vld [vmem:[#allocation2 + $0x180] sm:$0xff] }
 0x196   :  { %10571 = vmatpush.xpose.msk.msra.mxu2 %vm1499_vm1, %v12866_v34  ;;  %v11709_v34 = vld [vmem:[#allocation5 + $0x18] ss:$0 sm:$0xff] }
 0x197   :  { %10575 = vmatpush.xpose.msk.msra.mxu3 %vm1499_vm1, %v12922_v27  ;;  %2253 = vrot.lane.b32.xlu1 %v1312_v42, %s12239_s5  ;;  %v875_v27 = vpop.f32.mrf.mxu0  ;;  %v365_v42 = vmul.f32 %v11709_v34, %v173_v10 }
 0x198   :  { %2245 = vrot.lane.b32.xlu0 %v1308_v62, %s12239_s5  ;;  %2243 = vrot.lane.b32.xlu2 %v1307_v44, %s12239_s5  ;;  %v11710_v62 = vld [vmem:[#allocation7 + $0x18] ss:$0 sm:$0xff] }
 0x199   :  { %v1911_v37 = vpop.permute.xlu1 %1910  ;;  %10572 = vmatmul.msk.f32.vlgmr.msra.gmra.mxu2 %vm1499_vm1, %v12560_v52  ;;  %v13036_v54 = vadd.f32 %v11710_v62, %v365_v42  ;;  %v1317_v42 = vmul.f32 %v12401_v22, %v13016_v46 }
 0x19a   :  { %v1903_v39 = vpop.permute.xlu0 %1902  ;;  %v1913_v16 = vpop.permute.xlu2 %1912 }
 0x19b   :  { %10576 = vmatpush.xpose.msk.msra.mxu3 %vm1499_vm1, %v1840_v24  ;;  %10584 = vmatpush.xpose.msk.msrb.mxu2 %vm1499_vm1, %v1913_v16  ;;  %v1313_v24 = vmul.f32 %v12405_v26, %v12962_v1  ;;  %18851 = vst [vmem:[#allocation74_spill] sm:$0xff] %v13036_v54 }
 0x19d   :  { %10443 = vmatmul.msk.f32.gmra.mxu0 %vm587_vm0, %v13013_v60 }
 0x19f   :  { %10577 = vmatpush.xpose.msk.msra.mxu3 %vm1499_vm1, %v12939_v57  ;;  %10585 = vmatpush.xpose.msk.msrb.mxu2 %vm1499_vm1, %v1911_v37  ;;  %v174_v57 = vld [vmem:[#allocation2 + $0x188] sm:$0xff]  ;;  %v878_v37 = vpop.f32.mrf.mxu0 }
 0x1a0   :  { %2312 = vrot.lane.b32.xlu1 %v1315_v41, %s12239_s5  ;;  %2257 = vrot.lane.b32.xlu0 %v1314_v31, %s12239_s5  ;;  %v366_v41 = vmul.f32 %v11709_v34, %v174_v57  ;;  %v1321_v31 = vmul.f32 %v12405_v26, %v13016_v46  ;;  %v13063_v57 = vadd.f32 %v872_v28, %v12399_v20 }
 0x1a1   :  { %2255 = vrot.lane.b32.xlu2 %v1313_v24, %s12239_s5  ;;  %v1905_v10 = vpop.permute.xlu1 %1904  ;;  %10573 = vmatmul.msk.f32.gmra.mxu2 %vm1499_vm1, %v12576_v4  ;;  %v175_v4 = vld [vmem:[#allocation2 + $0x190] sm:$0xff] }
 0x1a2   :  { %v1909_v44 = vpop.permute.xlu0 %1908  ;;  %v13038_v16 = vpop.permute.xlu2 %1971  ;;  %v13060_v24 = vadd.f32 %v11710_v62, %v366_v41  ;;  %18853 = vst [vmem:[#allocation76_spill] sm:$0xff] %v13063_v57  ;;  %v1318_v62 = vmul.f32 %v12401_v22, %v13063_v57  ;;  %v1320_v28 = vmul.f32 %v12393_v12, %v13063_v57 }
 0x1a3   :  { %10578 = vmatpush.xpose.msk.msra.mxu3 %vm1499_vm1, %v12945_v33  ;;  %10586 = vmatpush.xpose.msk.msrb.mxu2 %vm1499_vm1, %v1909_v44  ;;  %v1310_v33 = vmul.f32 %v12401_v22, %v12985_v47  ;;  %v11711_v44 = vld [vmem:[#allocation5 + $0x19] ss:$0 sm:$0xff] }
 0x1a4   :  { %18852 = vst [vmem:[#allocation75_spill] sm:$0xff] %v13060_v24 }
 0x1a5   :  { %10444 = vmatmul.msk.f32.gmra.mxu0 %vm587_vm0, %v13036_v54 }
 0x1a7   :  { %10579 = vmatpush.xpose.msk.msra.mxu3 %vm1499_vm1, %v12937_v30  ;;  %10587 = vmatpush.xpose.msk.msrb.mxu2 %vm1499_vm1, %v12968_v63  ;;  %v13076_v41 = vpop.f32.mrf.mxu0 }
 0x1a8   :  { %2324 = vrot.lane.b32.xlu1 %v1321_v31, %s12239_s5  ;;  %2316 = vrot.lane.b32.xlu0 %v1317_v42, %s12239_s5  ;;  %v367_v31 = vmul.f32 %v11711_v44, %v175_v4  ;;  %v11712_v42 = vld [vmem:[#allocation7 + $0x19] ss:$0 sm:$0xff] }
 0x1a9   :  { %2249 = vrot.lane.b32.xlu2 %v1310_v33, %s12239_s5  ;;  %v13058_v34 = vpop.permute.xlu1 %1975  ;;  %v13091_v33 = vadd.f32 %v875_v27, %v12399_v20 }
 0x1aa   :  { %v13065_v30 = vpop.permute.xlu0 %1967  ;;  %v1978_v63 = vpop.permute.xlu2 %1977 }
 0x1ab   :  { %10580 = vmatpush.xpose.msk.msra.mxu3 %vm1499_vm1, %v12964_v15  ;;  %10588 = vmatpush.xpose.msk.msrb.mxu2 %vm1499_vm1, %v1905_v10  ;;  %v1319_v15 = vmul.f32 %v12393_v12, %v13016_v46  ;;  %v13088_v10 = vadd.f32 %v11712_v42, %v367_v31  ;;  %18855 = vst [vmem:[#allocation78_spill] sm:$0xff] %v13091_v33 }
 0x1ac   :  { %v1327_v31 = vmul.f32 %v12393_v12, %v13091_v33  ;;  %v1323_v27 = vmul.f32 %v12391_v11, %v13091_v33 }
 0x1ad   :  { %10445 = vmatmul.msk.f32.gmra.mxu0 %vm587_vm0, %v13060_v24  ;;  %18854 = vst [vmem:[#allocation77_spill] sm:$0xff] %v13088_v10  ;;  %v179_v24 = vld [vmem:[#allocation2 + $0x1b0] sm:$0xff] }
 0x1af   :  { %10581 = vmatpush.xpose.msk.msra.mxu3 %vm1499_vm1, %v12896_v45  ;;  %10589 = vmatpush.xpose.msk.msrb.mxu2 %vm1499_vm1, %v1903_v39  ;;  %v176_v39 = vld [vmem:[#allocation2 + $0x198] sm:$0xff] }
 0x1b0   :  { %2318 = vrot.lane.b32.xlu1 %v1318_v62, %s12239_s5  ;;  %2322 = vrot.lane.b32.xlu0 %v1320_v28, %s12239_s5  ;;  %v368_v62 = vmul.f32 %v11711_v44, %v176_v39  ;;  %v1316_v28 = vmul.f32 %v12391_v11, %v13063_v57  ;;  %v11713_v39 = vld [vmem:[#allocation5 + $0x1a] ss:$0 sm:$0xff] }
 0x1b1   :  { %2320 = vrot.lane.b32.xlu2 %v1319_v15, %s12239_s5  ;;  %v13086_v4 = vpop.permute.xlu1 %1969 }
 0x1b2   :  { %v1980_v52 = vpop.permute.xlu0 %1979  ;;  %10582 = vmatmul.msk.f32.vlgmr.msra.gmra.mxu3 %vm1499_vm1, %v12607_v55  ;;  %v13095_v45 = vpop.permute.xlu2 %2036  ;;  %v13112_v15 = vadd.f32 %v11712_v42, %v368_v62  ;;  %v13115_v55 = vadd.f32 %v878_v37, %v12399_v20  ;;  %v11714_v62 = vld [vmem:[#allocation7 + $0x1a] ss:$0 sm:$0xff] }
 0x1b3   :  { %10590 = vmatpush.xpose.msk.msrb.mxu2 %vm1499_vm1, %v12991_v58  ;;  %v884_v58 = vpop.f32.mrf.mxu0 }
 0x1b4   :  { %18856 = vst [vmem:[#allocation79_spill] sm:$0xff] %v13112_v15  ;;  %v1324_v37 = vmul.f32 %v12391_v11, %v13115_v55 }
 0x1b5   :  { %10446 = vmatmul.msk.f32.gmra.mxu0 %vm587_vm0, %v13088_v10  ;;  %18857 = vst [vmem:[#allocation80_spill] sm:$0xff] %v13115_v55 }
 0x1b7   :  { %10591 = vmatpush.xpose.msk.msrb.mxu2 %vm1499_vm1, %v12987_v9 }
 0x1b8   :  { %2389 = vrot.lane.b32.xlu1 %v1327_v31, %s12239_s5  ;;  %2381 = vrot.lane.b32.xlu0 %v1323_v27, %s12239_s5  ;;  %v177_v31 = vld [vmem:[#allocation2 + $0x1a0] sm:$0xff]  ;;  %v1329_v27 = vmul.f32 %v12405_v26, %v13091_v33 }
 0x1b9   :  { %2314 = vrot.lane.b32.xlu2 %v1316_v28, %s12239_s5  ;;  %v1982_v44 = vpop.permute.xlu1 %1981  ;;  %v369_v42 = vmul.f32 %v11713_v39, %v177_v31  ;;  %v1322_v28 = vmul.f32 %v12405_v26, %v13063_v57 }
 0x1ba   :  { %v1974_v10 = vpop.permute.xlu0 %1973  ;;  %10583 = vmatmul.msk.f32.gmra.mxu3 %vm1499_vm1, %v12623_v19  ;;  %10592 = vmatmul.msk.f32.vlgmr.msrb.gmra.mxu2 %vm1499_vm1, %v12641_v6  ;;  %v13121_v9 = vpop.permute.xlu2 %2048 }
 0x1bb   :  { %10594 = vmatpush.xpose.msk.msrb.mxu3 %vm1499_vm1, %v1982_v44  ;;  %v13138_v31 = vadd.f32 %v11714_v62, %v369_v42  ;;  %v1326_v42 = vmul.f32 %v12401_v22, %v13115_v55 }
 0x1bd   :  { %10447 = vmatmul.msk.f32.gmra.mxu0 %vm587_vm0, %v13112_v15  ;;  %18858 = vst [vmem:[#allocation81_spill] sm:$0xff] %v13138_v31  ;;  %v887_v15 = vpop.f32.mrf.mxu0 }
 0x1bf   :  { %10595 = vmatpush.xpose.msk.msrb.mxu3 %vm1499_vm1, %v1980_v52  ;;  %v178_v52 = vld [vmem:[#allocation2 + $0x1a8] sm:$0xff] }
 0x1c0   :  { %2383 = vrot.lane.b32.xlu1 %v1324_v37, %s12239_s5  ;;  %2393 = vrot.lane.b32.xlu0 %v1329_v27, %s12239_s5  ;;  %v370_v37 = vmul.f32 %v11713_v39, %v178_v52  ;;  %v1330_v27 = vmul.f32 %v12405_v26, %v13115_v55  ;;  %v11715_v52 = vld [vmem:[#allocation5 + $0x1b] ss:$0 sm:$0xff] }
 0x1c1   :  { %2326 = vrot.lane.b32.xlu2 %v1322_v28, %s12239_s5  ;;  %v13136_v44 = vpop.permute.xlu1 %2040  ;;  %v1325_v28 = vmul.f32 %v12401_v22, %v13091_v33 }
 0x1c2   :  { %v13140_v6 = vpop.permute.xlu0 %2044  ;;  %10593 = vmatmul.msk.f32.gmra.mxu2 %vm1499_vm1, %v12676_v17  ;;  %v13144_v19 = vpop.permute.xlu2 %2042  ;;  %v13160_v39 = vadd.f32 %v11714_v62, %v370_v37  ;;  %v13164_v17 = vadd.f32 %v13076_v41, %v12399_v20  ;;  %v11716_v62 = vld [vmem:[#allocation7 + $0x1b] ss:$0 sm:$0xff] }
 0x1c3   :  { %10596 = vmatpush.xpose.msk.msrb.mxu3 %vm1499_vm1, %v1978_v63 }
 0x1c4   :  { %18859 = vst [vmem:[#allocation82_spill] sm:$0xff] %v13160_v39  ;;  %v1333_v37 = vmul.f32 %v12401_v22, %v13164_v17  ;;  %v1335_v41 = vmul.f32 %v12393_v12, %v13164_v17 }
 0x1c5   :  { %10448 = vmatmul.msk.f32.gmra.mxu0 %vm587_vm0, %v13138_v31  ;;  %18860 = vst [vmem:[#allocation83_spill] sm:$0xff] %v13164_v17 }
 0x1c7   :  { %10597 = vmatpush.xpose.msk.msrb.mxu3 %vm1499_vm1, %v13058_v34 }
 0x1c8   :  { %2395 = vrot.lane.b32.xlu1 %v1330_v27, %s12239_s5  ;;  %2387 = vrot.lane.b32.xlu0 %v1326_v42, %s12239_s5  ;;  %v13171_v27 = vpop.f32.mrf.mxu0  ;;  %v371_v42 = vmul.f32 %v11715_v52, %v179_v24 }
 0x1c9   :  { %2385 = vrot.lane.b32.xlu2 %v1325_v28, %s12239_s5  ;;  %v2047_v63 = vpop.permute.xlu1 %2046  ;;  %v1328_v28 = vmul.f32 %v12393_v12, %v13115_v55 }
 0x1ca   :  { %v13166_v31 = vpop.permute.xlu0 %2038  ;;  %v13168_v34 = vpop.permute.xlu2 %2113 }
 0x1cb   :  { %10598 = vmatpush.xpose.msk.msrb.mxu3 %vm1499_vm1, %v1974_v10  ;;  %v13188_v10 = vadd.f32 %v11716_v62, %v371_v42 }
 0x1cd   :  { %10449 = vmatmul.msk.f32.gmra.mxu0 %vm587_vm0, %v13160_v39  ;;  %18861 = vst [vmem:[#allocation84_spill] sm:$0xff] %v13188_v10  ;;  %v13191_v39 = vadd.f32 %v884_v58, %v12399_v20 }
 0x1cf   :  { %10599 = vmatpush.xpose.msk.msrb.mxu3 %vm1499_vm1, %v13038_v16  ;;  %18862 = vst [vmem:[#allocation85_spill] sm:$0xff] %v13191_v39  ;;  %v180_v16 = vld [vmem:[#allocation2 + $0x1b8] sm:$0xff]  ;;  %v1336_v42 = vmul.f32 %v12393_v12, %v13191_v39  ;;  %v1332_v58 = vmul.f32 %v12391_v11, %v13191_v39 }
 0x1d0   :  { %2454 = vrot.lane.b32.xlu1 %v1333_v37, %s12239_s5  ;;  %2458 = vrot.lane.b32.xlu0 %v1335_v41, %s12239_s5  ;;  %v372_v37 = vmul.f32 %v11715_v52, %v180_v16  ;;  %v13204_v41 = vpop.f32.mrf.mxu0  ;;  %v13218_v16 = vadd.f32 %v887_v15, %v12399_v20  ;;  %v1338_v15 = vmul.f32 %v12405_v26, %v13191_v39 }
 0x1d1   :  { %2391 = vrot.lane.b32.xlu2 %v1328_v28, %s12239_s5  ;;  %v13186_v24 = vpop.permute.xlu1 %2105  ;;  %v11717_v28 = vld [vmem:[#allocation5 + $0x1c] ss:$0 sm:$0xff] }
 0x1d2   :  { %v2051_v54 = vpop.permute.xlu0 %2050  ;;  %v13193_v60 = vpop.permute.xlu2 %2107  ;;  %v13215_v52 = vadd.f32 %v11716_v62, %v372_v37  ;;  %18864 = vst [vmem:[#allocation87_spill] sm:$0xff] %v13218_v16  ;;  %v11718_v62 = vld [vmem:[#allocation7 + $0x1c] ss:$0 sm:$0xff]  ;;  %v1339_v37 = vmul.f32 %v12391_v11, %v13218_v16 }
 0x1d3   :  { %10600 = vmatpush.xpose.msk.msrb.mxu3 %vm1499_vm1, %v13086_v4  ;;  %10604 = vmatpush.xpose.msk.msra.mxu2 %vm1499_vm1, %v2051_v54  ;;  %v1331_v54 = vmul.f32 %v12391_v11, %v13164_v17 }
 0x1d4   :  { %18863 = vst [vmem:[#allocation86_spill] sm:$0xff] %v13215_v52 }
 0x1d5   :  { %10450 = vmatmul.msk.f32.gmra.mxu0 %vm587_vm0, %v13188_v10  ;;  %v181_v10 = vld [vmem:[#allocation2 + $0x1c0] sm:$0xff] }
 0x1d7   :  { %10601 = vmatpush.xpose.msk.msrb.mxu3 %vm1499_vm1, %v13065_v30  ;;  %10605 = vmatpush.xpose.msk.msra.mxu2 %vm1499_vm1, %v13121_v9 }
 0x1d8   :  { %2460 = vrot.lane.b32.xlu1 %v1336_v42, %s12239_s5  ;;  %2452 = vrot.lane.b32.xlu0 %v1332_v58, %s12239_s5  ;;  %v373_v42 = vmul.f32 %v11717_v28, %v181_v10  ;;  %v896_v10 = vpop.f32.mrf.mxu0 }
 0x1d9   :  { %2450 = vrot.lane.b32.xlu2 %v1331_v54, %s12239_s5  ;;  %v2118_v4 = vpop.permute.xlu1 %2117 }
 0x1da   :  { %v2110_v30 = vpop.permute.xlu0 %2109  ;;  %10602 = vmatmul.msk.f32.vlgmr.msrb.gmra.mxu3 %vm1499_vm1, %v12698_v50  ;;  %v2120_v9 = vpop.permute.xlu2 %2119  ;;  %v13238_v54 = vadd.f32 %v11718_v62, %v373_v42  ;;  %v1345_v42 = vmul.f32 %v12405_v26, %v13218_v16 }
 0x1db   :  { %10606 = vmatpush.xpose.msk.msra.mxu2 %vm1499_vm1, %v2047_v63  ;;  %10614 = vmatpush.xpose.msk.msra.mxu3 %vm1499_vm1, %v2120_v9  ;;  %v1337_v63 = vmul.f32 %v12405_v26, %v13164_v17 }
 0x1dc   :  { %18865 = vst [vmem:[#allocation88_spill] sm:$0xff] %v13238_v54 }
 0x1dd   :  { %10451 = vmatmul.msk.f32.gmra.mxu0 %vm587_vm0, %v13215_v52  ;;  %v188_v52 = vld [vmem:[#allocation2 + $0x1f8] sm:$0xff] }
 0x1df   :  { %10607 = vmatpush.xpose.msk.msra.mxu2 %vm1499_vm1, %v13140_v6  ;;  %10615 = vmatpush.xpose.msk.msra.mxu3 %vm1499_vm1, %v2118_v4  ;;  %v182_v4 = vld [vmem:[#allocation2 + $0x1c8] sm:$0xff] }
 0x1e0   :  { %2519 = vrot.lane.b32.xlu1 %v1339_v37, %s12239_s5  ;;  %2464 = vrot.lane.b32.xlu0 %v1338_v15, %s12239_s5  ;;  %v374_v37 = vmul.f32 %v11717_v28, %v182_v4  ;;  %v1341_v15 = vmul.f32 %v12401_v22, %v13218_v16  ;;  %v13272_v50 = vpop.f32.mrf.mxu0 }
 0x1e1   :  { %2462 = vrot.lane.b32.xlu2 %v1337_v63, %s12239_s5  ;;  %v2112_v58 = vpop.permute.xlu1 %2111 }
 0x1e2   :  { %v2116_v9 = vpop.permute.xlu0 %2115  ;;  %10603 = vmatmul.msk.f32.gmra.mxu3 %vm1499_vm1, %v12722_v38  ;;  %v13242_v6 = vpop.permute.xlu2 %2178  ;;  %v13264_v63 = vadd.f32 %v11718_v62, %v374_v37  ;;  %v183_v38 = vld [vmem:[#allocation2 + $0x1d0] sm:$0xff]  ;;  %v11720_v37 = vld [vmem:[#allocation7 + $0x1d] ss:$0 sm:$0xff] }
 0x1e3   :  { %10608 = vmatpush.xpose.msk.msra.mxu2 %vm1499_vm1, %v13144_v19  ;;  %10616 = vmatpush.xpose.msk.msra.mxu3 %vm1499_vm1, %v2116_v9  ;;  %v1334_v19 = vmul.f32 %v12401_v22, %v13191_v39  ;;  %v11719_v9 = vld [vmem:[#allocation5 + $0x1d] ss:$0 sm:$0xff] }
 0x1e4   :  { %18866 = vst [vmem:[#allocation89_spill] sm:$0xff] %v13264_v63  ;;  %v375_v62 = vmul.f32 %v11719_v9, %v183_v38 }
 0x1e5   :  { %10452 = vmatmul.msk.f32.gmra.mxu0 %vm587_vm0, %v13238_v54 }
 0x1e7   :  { %10609 = vmatpush.xpose.msk.msra.mxu2 %vm1499_vm1, %v13136_v44  ;;  %10617 = vmatpush.xpose.msk.msra.mxu3 %vm1499_vm1, %v13168_v34  ;;  %v13268_v44 = vadd.f32 %v13171_v27, %v12399_v20 }
 0x1e8   :  { %2531 = vrot.lane.b32.xlu1 %v1345_v42, %s12239_s5  ;;  %2523 = vrot.lane.b32.xlu0 %v1341_v15, %s12239_s5  ;;  %v13297_v15 = vadd.f32 %v13204_v41, %v12399_v20 }
 0x1e9   :  { %2456 = vrot.lane.b32.xlu2 %v1334_v19, %s12239_s5  ;;  %v13262_v28 = vpop.permute.xlu1 %2182  ;;  %18867 = vst [vmem:[#allocation90_spill] sm:$0xff] %v13268_v44  ;;  %v1342_v27 = vmul.f32 %v12401_v22, %v13268_v44  ;;  %v1344_v42 = vmul.f32 %v12393_v12, %v13268_v44  ;;  %v184_v19 = vld [vmem:[#allocation2 + $0x1d8] sm:$0xff] }
 0x1ea   :  { %v13270_v4 = vpop.permute.xlu0 %2174  ;;  %v2185_v34 = vpop.permute.xlu2 %2184  ;;  %18869 = vst [vmem:[#allocation92_spill] sm:$0xff] %v13297_v15  ;;  %v1351_v41 = vmul.f32 %v12393_v12, %v13297_v15 }
 0x1eb   :  { %10610 = vmatpush.xpose.msk.msra.mxu2 %vm1499_vm1, %v13166_v31  ;;  %10618 = vmatpush.xpose.msk.msra.mxu3 %vm1499_vm1, %v2112_v58  ;;  %v1343_v31 = vmul.f32 %v12393_v12, %v13218_v16  ;;  %v13293_v58 = vadd.f32 %v11720_v37, %v375_v62  ;;  %v376_v62 = vmul.f32 %v11719_v9, %v184_v19  ;;  %v11721_v19 = vld [vmem:[#allocation5 + $0x1e] ss:$0 sm:$0xff] }
 0x1ed   :  { %10453 = vmatmul.msk.f32.gmra.mxu0 %vm587_vm0, %v13264_v63  ;;  %18868 = vst [vmem:[#allocation91_spill] sm:$0xff] %v13293_v58  ;;  %v13320_v9 = vadd.f32 %v11720_v37, %v376_v62  ;;  %v11722_v62 = vld [vmem:[#allocation7 + $0x1e] ss:$0 sm:$0xff]  ;;  %v187_v63 = vld [vmem:[#allocation2 + $0x1f0] sm:$0xff] }
 0x1ef   :  { %10611 = vmatpush.xpose.msk.msra.mxu2 %vm1499_vm1, %v13095_v45  ;;  %10619 = vmatpush.xpose.msk.msra.mxu3 %vm1499_vm1, %v2110_v30  ;;  %18870 = vst [vmem:[#allocation93_spill] sm:$0xff] %v13320_v9 }
 0x1f0   :  { %2525 = vrot.lane.b32.xlu1 %v1342_v27, %s12239_s5  ;;  %2529 = vrot.lane.b32.xlu0 %v1344_v42, %s12239_s5  ;;  %v13305_v27 = vpop.f32.mrf.mxu0  ;;  %v1347_v42 = vmul.f32 %v12391_v11, %v13297_v15 }
 0x1f1   :  { %2527 = vrot.lane.b32.xlu2 %v1343_v31, %s12239_s5  ;;  %v13291_v38 = vpop.permute.xlu1 %2176  ;;  %v1340_v31 = vmul.f32 %v12391_v11, %v13268_v44 }
 0x1f2   :  { %v2187_v45 = vpop.permute.xlu0 %2186  ;;  %10612 = vmatmul.msk.f32.vlgmr.msra.gmra.mxu2 %vm1499_vm1, %v12766_v5  ;;  %v13301_v30 = vpop.permute.xlu2 %2243  ;;  %v13323_v5 = vadd.f32 %v896_v10, %v12399_v20 }
 0x1f3   :  { %10620 = vmatpush.xpose.msk.msra.mxu3 %vm1499_vm1, %v13193_v60 }
 0x1f4   :  { %18871 = vst [vmem:[#allocation94_spill] sm:$0xff] %v13323_v5  ;;  %v1348_v10 = vmul.f32 %v12391_v11, %v13323_v5 }
 0x1f5   :  { %10454 = vmatmul.msk.f32.gmra.mxu0 %vm587_vm0, %v13293_v58 }
 0x1f7   :  { %10621 = vmatpush.xpose.msk.msra.mxu3 %vm1499_vm1, %v13186_v24  ;;  %v185_v24 = vld [vmem:[#allocation2 + $0x1e0] sm:$0xff] }
 0x1f8   :  { %2596 = vrot.lane.b32.xlu1 %v1351_v41, %s12239_s5  ;;  %2588 = vrot.lane.b32.xlu0 %v1347_v42, %s12239_s5  ;;  %v377_v37 = vmul.f32 %v11721_v19, %v185_v24  ;;  %v1353_v42 = vmul.f32 %v12405_v26, %v13297_v15 }
 0x1f9   :  { %2521 = vrot.lane.b32.xlu2 %v1340_v31, %s12239_s5  ;;  %v2189_v60 = vpop.permute.xlu1 %2188  ;;  %v905_v31 = vpop.f32.mrf.mxu0 }
 0x1fa   :  { %v2181_v58 = vpop.permute.xlu0 %2180  ;;  %10613 = vmatmul.msk.f32.gmra.mxu2 %vm1499_vm1, %v12789_v7  ;;  %10622 = vmatmul.msk.f32.vlgmr.msra.gmra.mxu3 %vm1499_vm1, %v12815_v18  ;;  %v1346_v18 = vmul.f32 %v12405_v26, %v13268_v44  ;;  %v13344_v24 = vadd.f32 %v11722_v62, %v377_v37  ;;  %v1350_v37 = vmul.f32 %v12401_v22, %v13323_v5 }
 0x1fb   :  { %v2256_v41 = vpop.permute.xlu2 %2255  ;;  %10624 = vmatpush.xpose.msk.msrb.mxu2 %vm1499_vm1, %v2189_v60 }
 0x1fc   :  { %18872 = vst [vmem:[#allocation95_spill] sm:$0xff] %v13344_v24 }
 0x1fd   :  { %10455 = vmatmul.msk.f32.gmra.mxu0 %vm587_vm0, %v13320_v9  ;;  %v186_v9 = vld [vmem:[#allocation2 + $0x1e8] sm:$0xff] }
 0x1ff   :  { %10625 = vmatpush.xpose.msk.msrb.mxu2 %vm1499_vm1, %v2187_v45 }
 0x200   :  { %2590 = vrot.lane.b32.xlu1 %v1348_v10, %s12239_s5  ;;  %2600 = vrot.lane.b32.xlu0 %v1353_v42, %s12239_s5  ;;  %v378_v10 = vmul.f32 %v11721_v19, %v186_v9  ;;  %v1349_v42 = vmul.f32 %v12401_v22, %v13297_v15 }
 0x201   :  { %2533 = vrot.lane.b32.xlu2 %v1346_v18, %s12239_s5  ;;  %v13342_v60 = vpop.permute.xlu1 %2247  ;;  %v1354_v18 = vmul.f32 %v12405_v26, %v13323_v5 }
 0x202   :  { %v13346_v7 = vpop.permute.xlu0 %2251  ;;  %10623 = vmatmul.msk.f32.gmra.mxu3 %vm1499_vm1, %v12862_v53  ;;  %v13368_v19 = vadd.f32 %v11722_v62, %v378_v10  ;;  %v11723_v53 = vld [vmem:[#allocation5 + $0x1f] ss:$0 sm:$0xff] }
 0x203   :  { %v13350_v45 = vpop.permute.xlu2 %2249  ;;  %10626 = vmatpush.xpose.msk.msrb.mxu2 %vm1499_vm1, %v2185_v34  ;;  %v13365_v34 = vpop.f32.mrf.mxu0 }
 0x204   :  { %18873 = vst [vmem:[#allocation96_spill] sm:$0xff] %v13368_v19 }
 0x205   :  { %10456 = vmatmul.msk.f32.gmra.mxu0 %vm587_vm0, %v13344_v24  ;;  %v13372_v24 = vadd.f32 %v13272_v50, %v12399_v20  ;;  %v1352_v50 = vmul.f32 %v12393_v12, %v13323_v5 }
 0x207   :  { %10627 = vmatpush.xpose.msk.msrb.mxu2 %vm1499_vm1, %v13262_v28  ;;  %18874 = vst [vmem:[#allocation97_spill] sm:$0xff] %v13372_v24  ;;  %v1357_v62 = vmul.f32 %v12401_v22, %v13372_v24  ;;  %v1359_v10 = vmul.f32 %v12393_v12, %v13372_v24 }
 0x208   :  { %2602 = vrot.lane.b32.xlu1 %v1354_v18, %s12239_s5  ;;  %2594 = vrot.lane.b32.xlu0 %v1350_v37, %s12239_s5  ;;  %v379_v18 = vmul.f32 %v11723_v53, %v187_v63  ;;  %v11724_v37 = vld [vmem:[#allocation7 + $0x1f] ss:$0 sm:$0xff] }
 0x209   :  { %2592 = vrot.lane.b32.xlu2 %v1349_v42, %s12239_s5  ;;  %v2254_v9 = vpop.permute.xlu1 %2253 }
 0x20a   :  { %v13374_v28 = vpop.permute.xlu0 %2245  ;;  %v13390_v63 = vadd.f32 %v11724_v37, %v379_v18  ;;  %v380_v18 = vmul.f32 %v11723_v53, %v188_v52  ;;  %v13420_v52 = vadd.f32 %v905_v31, %v12399_v20 }
 0x20b   :  { %v2321_v54 = vpop.permute.xlu2 %2320  ;;  %10628 = vmatpush.xpose.msk.msrb.mxu2 %vm1499_vm1, %v2181_v58  ;;  %v13394_v58 = vadd.f32 %v13305_v27, %v12399_v20 }
 0x20c   :  { %v13417_v53 = vadd.f32 %v11724_v37, %v380_v18  ;;  %18876 = vst [vmem:[#allocation99_spill] sm:$0xff] %v13420_v52  ;;  %v1363_v37 = vmul.f32 %v12391_v11, %v13420_v52 }
 0x20d   :  { %10457 = vmatmul.msk.f32.gmra.mxu0 %vm587_vm0, %v13368_v19  ;;  %18875 = vst [vmem:[#allocation98_spill] sm:$0xff] %v13394_v58  ;;  %v1360_v27 = vmul.f32 %v12393_v12, %v13394_v58  ;;  %v1362_v31 = vmul.f32 %v12405_v26, %v13394_v58 }
 0x20f   :  { %10629 = vmatpush.xpose.msk.msrb.mxu2 %vm1499_vm1, %v13242_v6  ;;  %v911_v6 = vpop.f32.mrf.mxu0 }
 0x210   :  { %2661 = vrot.lane.b32.xlu1 %v1357_v62, %s12239_s5  ;;  %2665 = vrot.lane.b32.xlu0 %v1359_v10, %s12239_s5  ;;  %v1356_v62 = vmul.f32 %v12391_v11, %v13394_v58 }
 0x211   :  { %2598 = vrot.lane.b32.xlu2 %v1352_v50, %s12239_s5  ;;  %v1361_v50 = vmul.f32 %v12405_v26, %v13372_v24 }
 0x212   :  { %v13396_v42 = vpop.permute.xlu1 %2312  ;;  %v2258_v19 = vpop.permute.xlu0 %2257 }
 0x213   :  { %v13398_v49 = vpop.permute.xlu2 %2314  ;;  %10630 = vmatpush.xpose.msk.msrb.mxu2 %vm1499_vm1, %v13291_v38  ;;  %10634 = vmatpush.xpose.msk.msrb.mxu3 %vm1499_vm1, %v2258_v19  ;;  %v1355_v38 = vmul.f32 %v12391_v11, %v13372_v24 }
 0x215   :  { %10458 = vmatmul.msk.f32.gmra.mxu0 %vm587_vm0, %v13390_v63 }
 0x217   :  { %10631 = vmatpush.xpose.msk.msrb.mxu2 %vm1499_vm1, %v13270_v4  ;;  %10635 = vmatpush.xpose.msk.msrb.mxu3 %vm1499_vm1, %v2256_v41  ;;  %v914_v41 = vpop.f32.mrf.mxu0 }
 0x218   :  { %2667 = vrot.lane.b32.xlu1 %v1360_v27, %s12239_s5  ;;  %2659 = vrot.lane.b32.xlu0 %v1356_v62, %s12239_s5  ;;  %v1369_v27 = vmul.f32 %v12405_v26, %v13420_v52  ;;  %v1365_v62 = vmul.f32 %v12401_v22, %v13420_v52 }
 0x219   :  { %2657 = vrot.lane.b32.xlu2 %v1355_v38, %s12239_s5  ;;  %v1358_v38 = vmul.f32 %v12401_v22, %v13394_v58 }
 0x21a   :  { %v2325_v19 = vpop.permute.xlu1 %2324  ;;  %v2317_v10 = vpop.permute.xlu0 %2316  ;;  %10632 = vmatmul.msk.f32.vlgmr.msrb.gmra.mxu2 %vm1499_vm1, %v12888_v2 }
 0x21b   :  { %v2327_v4 = vpop.permute.xlu2 %2326  ;;  %10636 = vmatpush.xpose.msk.msrb.mxu3 %vm1499_vm1, %v2254_v9 }
 0x21c   :  { %10644 = vmatpush.xpose.msk.msra.mxu2 %vm1499_vm1, %v2327_v4 }
 0x21d   :  { %10459 = vmatmul.msk.f32.gmra.mxu0 %vm587_vm0, %v13417_v53 }
 0x21f   :  { %10637 = vmatpush.xpose.msk.msrb.mxu3 %vm1499_vm1, %v13346_v7 }
 0x220   :  { %10645 = vmatpush.xpose.msk.msra.mxu2 %vm1499_vm1, %v2325_v19  ;;  %2726 = vrot.lane.b32.xlu1 %v1363_v37, %s12239_s5 }
 0x221   :  { %2671 = vrot.lane.b32.xlu0 %v1362_v31, %s12239_s5  ;;  %2669 = vrot.lane.b32.xlu2 %v1361_v50, %s12239_s5 }
 0x222   :  { %v2319_v9 = vpop.permute.xlu1 %2318  ;;  %v2323_v18 = vpop.permute.xlu0 %2322  ;;  %10633 = vmatmul.msk.f32.gmra.mxu2 %vm1499_vm1, %v12914_v61  ;;  %v18918_v61 = vld [vmem:[#allocation36_spill] sm:$0xff] }
 0x223   :  { %v13442_v7 = vpop.permute.xlu2 %2385  ;;  %10638 = vmatpush.xpose.msk.msrb.mxu3 %vm1499_vm1, %v13350_v45  ;;  %v13461_v45 = vadd.f32 %v13365_v34, %v12399_v20  ;;  %v1367_v34 = vmul.f32 %v12393_v12, %v13420_v52 }
 0x224   :  { %10646 = vmatpush.xpose.msk.msra.mxu2 %vm1499_vm1, %v2323_v18 }
 0x225   :  { %18877 = vst [vmem:[#allocation100_spill] sm:$0xff] %v13461_v45  ;;  %v1368_v37 = vmul.f32 %v12393_v12, %v13461_v45 }
 0x227   :  { %10639 = vmatpush.xpose.msk.msrb.mxu3 %vm1499_vm1, %v13342_v60 }
 0x228   :  { %10647 = vmatpush.xpose.msk.msra.mxu2 %vm1499_vm1, %v2321_v54  ;;  %2738 = vrot.lane.b32.xlu1 %v1369_v27, %s12239_s5  ;;  %v1366_v54 = vmul.f32 %v12401_v22, %v13461_v45 }
 0x229   :  { %2730 = vrot.lane.b32.xlu0 %v1365_v62, %s12239_s5  ;;  %2663 = vrot.lane.b32.xlu2 %v1358_v38, %s12239_s5 }
 0x22a   :  { %v2390_v19 = vpop.permute.xlu1 %2389  ;;  %v13463_v60 = vpop.permute.xlu0 %2381 }
 0x22b   :  { %v2392_v4 = vpop.permute.xlu2 %2391  ;;  %10640 = vmatpush.xpose.msk.msrb.mxu3 %vm1499_vm1, %v13374_v28  ;;  %v13481_v28 = vadd.f32 %v911_v6, %v12399_v20  ;;  %v1364_v6 = vmul.f32 %v12391_v11, %v13461_v45 }
 0x22c   :  { %10648 = vmatpush.xpose.msk.msra.mxu2 %vm1499_vm1, %v2319_v9 }
 0x22d   :  { %18878 = vst [vmem:[#allocation101_spill] sm:$0xff] %v13481_v28  ;;  %v1371_v9 = vmul.f32 %v12391_v11, %v13481_v28 }
 0x22f   :  { %10641 = vmatpush.xpose.msk.msrb.mxu3 %vm1499_vm1, %v13301_v30 }
 0x230   :  { %10649 = vmatpush.xpose.msk.msra.mxu2 %vm1499_vm1, %v2317_v10  ;;  %2732 = vrot.lane.b32.xlu1 %v1366_v54, %s12239_s5  ;;  %v1375_v10 = vmul.f32 %v12393_v12, %v13481_v28  ;;  %v1370_v54 = vmul.f32 %v12405_v26, %v13461_v45 }
 0x231   :  { %2736 = vrot.lane.b32.xlu0 %v1368_v37, %s12239_s5  ;;  %2734 = vrot.lane.b32.xlu2 %v1367_v34, %s12239_s5 }
 0x232   :  { %v2384_v31 = vpop.permute.xlu1 %2383  ;;  %v2394_v50 = vpop.permute.xlu0 %2393  ;;  %10642 = vmatmul.msk.f32.vlgmr.msrb.gmra.mxu3 %vm1499_vm1, %v12962_v1 }
 0x233   :  { %v13485_v30 = vpop.permute.xlu2 %2450 }
 0x234   :  { %10650 = vmatpush.xpose.msk.msra.mxu2 %vm1499_vm1, %v13398_v49  ;;  %v13501_v49 = vadd.f32 %v914_v41, %v12399_v20  ;;  %v1377_v41 = vmul.f32 %v12405_v26, %v13481_v28 }
 0x236   :  { %18879 = vst [vmem:[#allocation102_spill] sm:$0xff] %v13501_v49  ;;  %v1372_v38 = vmul.f32 %v12391_v11, %v13501_v49 }
 0x238   :  { %10651 = vmatpush.xpose.msk.msra.mxu2 %vm1499_vm1, %v13396_v42  ;;  %2803 = vrot.lane.b32.xlu1 %v1375_v10, %s12239_s5  ;;  %v4076_v42 = vld [vmem:[#allocation11 + $0x38] sm:$0xff]  ;;  %v917_v10 = vpop.f32.mrf.mxu0 }
 0x239   :  { %2795 = vrot.lane.b32.xlu0 %v1371_v9, %s12239_s5  ;;  %2728 = vrot.lane.b32.xlu2 %v1364_v6, %s12239_s5  ;;  %v1378_v9 = vmul.f32 %v12405_v26, %v13501_v49  ;;  %v1374_v6 = vmul.f32 %v12401_v22, %v13501_v49 }
 0x23a   :  { %v2396_v18 = vpop.permute.xlu1 %2395  ;;  %v2388_v27 = vpop.permute.xlu0 %2387  ;;  %10643 = vmatmul.msk.f32.gmra.mxu3 %vm1499_vm1, %v12985_v47  ;;  %4277 = vmatpush.msrb.mxu0 %v4076_v42  ;;  %v13534_v42 = vadd.f32 %v917_v10, %v12399_v20 }
 0x23b   :  { %10652 = vmatmul.msk.f32.vlgmr.msra.gmra.mxu2 %vm1499_vm1, %v13016_v46  ;;  %v2463_v62 = vpop.permute.xlu2 %2462  ;;  %10654 = vmatpush.xpose.msk.msra.mxu3 %vm1499_vm1, %v2396_v18  ;;  %v1373_v18 = vmul.f32 %v12401_v22, %v13481_v28 }
 0x23c   :  { %18880 = vst [vmem:[#allocation103_spill] sm:$0xff] %v13534_v42 }
 0x23f   :  { %10655 = vmatpush.xpose.msk.msra.mxu3 %vm1499_vm1, %v2394_v50 }
 0x240   :  { %2797 = vrot.lane.b32.xlu1 %v1372_v38, %s12239_s5 }
 0x241   :  { %2807 = vrot.lane.b32.xlu0 %v1377_v41, %s12239_s5  ;;  %2740 = vrot.lane.b32.xlu2 %v1370_v54, %s12239_s5  ;;  %v1381_v54 = vmul.f32 %v12401_v22, %v13534_v42 }
 0x242   :  { %v13518_v37 = vpop.permute.xlu1 %2454  ;;  %v2459_v34 = vpop.permute.xlu0 %2458 }
 0x243   :  { %10653 = vmatmul.msk.f32.gmra.mxu2 %vm1499_vm1, %v13063_v57  ;;  %v2457_v50 = vpop.permute.xlu2 %2456  ;;  %10656 = vmatpush.xpose.msk.msra.mxu3 %vm1499_vm1, %v2392_v4 }
 0x247   :  { %10657 = vmatpush.xpose.msk.msra.mxu3 %vm1499_vm1, %v2390_v19  ;;  %v920_v19 = vpop.f32.mrf.mxu0 }
 0x248   :  { %2809 = vrot.lane.b32.xlu1 %v1378_v9, %s12239_s5  ;;  %v1383_v9 = vmul.f32 %v12393_v12, %v13534_v42 }
 0x249   :  { %2801 = vrot.lane.b32.xlu0 %v1374_v6, %s12239_s5  ;;  %2799 = vrot.lane.b32.xlu2 %v1373_v18, %s12239_s5  ;;  %v1376_v6 = vmul.f32 %v12393_v12, %v13501_v49 }
 0x24a   :  { %v2461_v4 = vpop.permute.xlu1 %2460  ;;  %v2453_v38 = vpop.permute.xlu0 %2452 }
 0x24b   :  { %v2528_v41 = vpop.permute.xlu2 %2527  ;;  %10658 = vmatpush.xpose.msk.msra.mxu3 %vm1499_vm1, %v2388_v27  ;;  %v13549_v27 = vadd.f32 %v920_v19, %v12399_v20 }
 0x24d   :  { %18881 = vst [vmem:[#allocation104_spill] sm:$0xff] %v13549_v27  ;;  %v1380_v19 = vmul.f32 %v12391_v11, %v13549_v27 }
 0x24f   :  { %10659 = vmatpush.xpose.msk.msra.mxu3 %vm1499_vm1, %v13442_v7  ;;  %v1384_v7 = vmul.f32 %v12393_v12, %v13549_v27  ;;  %v923_v46 = vpop.f32.mrf.mxu0 }
 0x250   :  { %2868 = vrot.lane.b32.xlu1 %v1381_v54, %s12239_s5  ;;  %v1379_v54 = vmul.f32 %v12391_v11, %v13534_v42 }
 0x251   :  { %2872 = vrot.lane.b32.xlu0 %v1383_v9, %s12239_s5  ;;  %2805 = vrot.lane.b32.xlu2 %v1376_v6, %s12239_s5 }
 0x252   :  { %v13551_v10 = vpop.permute.xlu1 %2519  ;;  %v2465_v18 = vpop.permute.xlu0 %2464 }
 0x253   :  { %v2522_v57 = vpop.permute.xlu2 %2521  ;;  %10660 = vmatpush.xpose.msk.msra.mxu3 %vm1499_vm1, %v2384_v31  ;;  %10664 = vmatpush.xpose.msk.msrb.mxu2 %vm1499_vm1, %v2465_v18  ;;  %v13568_v31 = vadd.f32 %v923_v46, %v12399_v20  ;;  %v1386_v18 = vmul.f32 %v12405_v26, %v13549_v27  ;;  %v1385_v46 = vmul.f32 %v12405_v26, %v13534_v42 }
 0x255   :  { %18882 = vst [vmem:[#allocation105_spill] sm:$0xff] %v13568_v31 }
 0x257   :  { %10661 = vmatpush.xpose.msk.msra.mxu3 %vm1499_vm1, %v13463_v60  ;;  %10665 = vmatpush.xpose.msk.msrb.mxu2 %vm1499_vm1, %v2463_v62  ;;  %v1387_v62 = vmul.f32 %v12391_v11, %v13568_v31 }
 0x258   :  { %2874 = vrot.lane.b32.xlu1 %v1384_v7, %s12239_s5 }
 0x259   :  { %2866 = vrot.lane.b32.xlu0 %v1380_v19, %s12239_s5  ;;  %2864 = vrot.lane.b32.xlu2 %v1379_v54, %s12239_s5  ;;  %v1393_v54 = vmul.f32 %v12405_v26, %v13568_v31 }
 0x25a   :  { %v2532_v9 = vpop.permute.xlu1 %2531  ;;  %v2524_v6 = vpop.permute.xlu0 %2523  ;;  %10662 = vmatmul.msk.f32.vlgmr.msra.gmra.mxu3 %vm1499_vm1, %v13091_v33 }
 0x25b   :  { %v2534_v60 = vpop.permute.xlu2 %2533  ;;  %10666 = vmatpush.xpose.msk.msrb.mxu2 %vm1499_vm1, %v2461_v4 }
 0x25c   :  { %10674 = vmatpush.xpose.msk.msrb.mxu3 %vm1499_vm1, %v2534_v60  ;;  %v1382_v60 = vmul.f32 %v12401_v22, %v13549_v27 }
 0x25f   :  { %10667 = vmatpush.xpose.msk.msrb.mxu2 %vm1499_vm1, %v2459_v34  ;;  %v926_v34 = vpop.f32.mrf.mxu0 }
 0x260   :  { %10675 = vmatpush.xpose.msk.msrb.mxu3 %vm1499_vm1, %v2532_v9  ;;  %2933 = vrot.lane.b32.xlu1 %v1387_v62, %s12239_s5  ;;  %v1389_v9 = vmul.f32 %v12401_v22, %v13568_v31 }
 0x261   :  { %2878 = vrot.lane.b32.xlu0 %v1386_v18, %s12239_s5  ;;  %2876 = vrot.lane.b32.xlu2 %v1385_v46, %s12239_s5 }
 0x262   :  { %v2526_v4 = vpop.permute.xlu1 %2525  ;;  %v2530_v7 = vpop.permute.xlu0 %2529  ;;  %10663 = vmatmul.msk.f32.gmra.mxu3 %vm1499_vm1, %v13115_v55 }
 0x263   :  { %v13587_v19 = vpop.permute.xlu2 %2592  ;;  %10668 = vmatpush.xpose.msk.msrb.mxu2 %vm1499_vm1, %v2457_v50  ;;  %v13604_v50 = vadd.f32 %v926_v34, %v12399_v20  ;;  %v1391_v34 = vmul.f32 %v12393_v12, %v13568_v31 }
 0x264   :  { %10676 = vmatpush.xpose.msk.msrb.mxu3 %vm1499_vm1, %v2530_v7 }
 0x265   :  { %18883 = vst [vmem:[#allocation106_spill] sm:$0xff] %v13604_v50  ;;  %v1392_v7 = vmul.f32 %v12393_v12, %v13604_v50 }
 0x267   :  { %10669 = vmatpush.xpose.msk.msrb.mxu2 %vm1499_vm1, %v13518_v37  ;;  %v929_v46 = vpop.f32.mrf.mxu0 }
 0x268   :  { %10677 = vmatpush.xpose.msk.msrb.mxu3 %vm1499_vm1, %v2528_v41  ;;  %2945 = vrot.lane.b32.xlu1 %v1393_v54, %s12239_s5  ;;  %v1390_v41 = vmul.f32 %v12401_v22, %v13604_v50 }
 0x269   :  { %2937 = vrot.lane.b32.xlu0 %v1389_v9, %s12239_s5  ;;  %2870 = vrot.lane.b32.xlu2 %v1382_v60, %s12239_s5 }
 0x26a   :  { %v2597_v62 = vpop.permute.xlu1 %2596  ;;  %v13606_v18 = vpop.permute.xlu0 %2588 }
 0x26b   :  { %v2599_v37 = vpop.permute.xlu2 %2598  ;;  %10670 = vmatpush.xpose.msk.msrb.mxu2 %vm1499_vm1, %v2453_v38  ;;  %v13623_v38 = vadd.f32 %v929_v46, %v12399_v20  ;;  %v1388_v46 = vmul.f32 %v12391_v11, %v13604_v50 }
 0x26c   :  { %10678 = vmatpush.xpose.msk.msrb.mxu3 %vm1499_vm1, %v2526_v4 }
 0x26d   :  { %18884 = vst [vmem:[#allocation107_spill] sm:$0xff] %v13623_v38  ;;  %v1395_v60 = vmul.f32 %v12391_v11, %v13623_v38 }
 0x26f   :  { %10671 = vmatpush.xpose.msk.msrb.mxu2 %vm1499_vm1, %v13485_v30  ;;  %v932_v9 = vpop.f32.mrf.mxu0 }
 0x270   :  { %10679 = vmatpush.xpose.msk.msrb.mxu3 %vm1499_vm1, %v2524_v6  ;;  %2939 = vrot.lane.b32.xlu1 %v1390_v41, %s12239_s5  ;;  %v1399_v6 = vmul.f32 %v12393_v12, %v13623_v38 }
 0x271   :  { %2943 = vrot.lane.b32.xlu0 %v1392_v7, %s12239_s5  ;;  %2941 = vrot.lane.b32.xlu2 %v1391_v34, %s12239_s5 }
 0x272   :  { %v2591_v4 = vpop.permute.xlu1 %2590  ;;  %v2601_v54 = vpop.permute.xlu0 %2600  ;;  %10672 = vmatmul.msk.f32.vlgmr.msrb.gmra.mxu2 %vm1499_vm1, %v13164_v17 }
 0x273   :  { %v13627_v30 = vpop.permute.xlu2 %2657 }
 0x274   :  { %10680 = vmatpush.xpose.msk.msrb.mxu3 %vm1499_vm1, %v2522_v57  ;;  %v13642_v57 = vadd.f32 %v932_v9, %v12399_v20  ;;  %v1401_v9 = vmul.f32 %v12405_v26, %v13623_v38 }
 0x276   :  { %18885 = vst [vmem:[#allocation108_spill] sm:$0xff] %v13642_v57 }
 0x278   :  { %10681 = vmatpush.xpose.msk.msrb.mxu3 %vm1499_vm1, %v13551_v10  ;;  %3010 = vrot.lane.b32.xlu1 %v1399_v6, %s12239_s5  ;;  %v4075_v10 = vld [vmem:[#allocation11 + $0x30] sm:$0xff]  ;;  %v1396_v6 = vmul.f32 %v12391_v11, %v13642_v57 }
 0x279   :  { %3002 = vrot.lane.b32.xlu0 %v1395_v60, %s12239_s5  ;;  %2935 = vrot.lane.b32.xlu2 %v1388_v46, %s12239_s5  ;;  %v1394_v60 = vmul.f32 %v12405_v26, %v13604_v50  ;;  %v935_v46 = vpop.f32.mrf.mxu0 }
 0x27a   :  { %v2603_v41 = vpop.permute.xlu1 %2602  ;;  %v2595_v7 = vpop.permute.xlu0 %2594  ;;  %10673 = vmatmul.msk.f32.gmra.mxu2 %vm1499_vm1, %v13191_v39  ;;  %4278 = vmatpush.msrb.mxu0 %v4075_v10  ;;  %v1402_v10 = vmul.f32 %v12405_v26, %v13642_v57 }
 0x27b   :  { %10682 = vmatmul.msk.f32.vlgmr.msrb.gmra.mxu3 %vm1499_vm1, %v13218_v16  ;;  %v2670_v34 = vpop.permute.xlu2 %2669  ;;  %10684 = vmatpush.xpose.msk.msra.mxu2 %vm1499_vm1, %v2603_v41 }
 0x27f   :  { %10685 = vmatpush.xpose.msk.msra.mxu2 %vm1499_vm1, %v2601_v54 }
 0x280   :  { %3004 = vrot.lane.b32.xlu1 %v1396_v6, %s12239_s5  ;;  %v1398_v6 = vmul.f32 %v12401_v22, %v13642_v57 }
 0x281   :  { %3014 = vrot.lane.b32.xlu0 %v1401_v9, %s12239_s5  ;;  %2947 = vrot.lane.b32.xlu2 %v1394_v60, %s12239_s5  ;;  %v1397_v9 = vmul.f32 %v12401_v22, %v13623_v38  ;;  %v13675_v60 = vadd.f32 %v935_v46, %v12399_v20 }
 0x282   :  { %v13659_v41 = vpop.permute.xlu1 %2661  ;;  %v2666_v16 = vpop.permute.xlu0 %2665 }
 0x283   :  { %10683 = vmatmul.msk.f32.gmra.mxu3 %vm1499_vm1, %v13268_v44  ;;  %v2664_v54 = vpop.permute.xlu2 %2663  ;;  %10686 = vmatpush.xpose.msk.msra.mxu2 %vm1499_vm1, %v2599_v37  ;;  %18886 = vst [vmem:[#allocation109_spill] sm:$0xff] %v13675_v60  ;;  %v1405_v17 = vmul.f32 %v12401_v22, %v13675_v60 }
 0x287   :  { %10687 = vmatpush.xpose.msk.msra.mxu2 %vm1499_vm1, %v2597_v62  ;;  %v938_v62 = vpop.f32.mrf.mxu0 }
 0x288   :  { %3016 = vrot.lane.b32.xlu1 %v1402_v10, %s12239_s5  ;;  %v1407_v10 = vmul.f32 %v12393_v12, %v13675_v60 }
 0x289   :  { %3008 = vrot.lane.b32.xlu0 %v1398_v6, %s12239_s5  ;;  %3006 = vrot.lane.b32.xlu2 %v1397_v9, %s12239_s5  ;;  %v1400_v6 = vmul.f32 %v12393_v12, %v13642_v57 }
 0x28a   :  { %v2668_v37 = vpop.permute.xlu1 %2667  ;;  %v2660_v44 = vpop.permute.xlu0 %2659 }
 0x28b   :  { %v2735_v39 = vpop.permute.xlu2 %2734  ;;  %10688 = vmatpush.xpose.msk.msra.mxu2 %vm1499_vm1, %v2595_v7  ;;  %v13690_v7 = vadd.f32 %v938_v62, %v12399_v20 }
 0x28d   :  { %18887 = vst [vmem:[#allocation110_spill] sm:$0xff] %v13690_v7  ;;  %v1404_v62 = vmul.f32 %v12391_v11, %v13690_v7 }
 0x28f   :  { %10689 = vmatpush.xpose.msk.msra.mxu2 %vm1499_vm1, %v13587_v19  ;;  %v941_v19 = vpop.f32.mrf.mxu0 }
 0x290   :  { %3075 = vrot.lane.b32.xlu1 %v1405_v17, %s12239_s5  ;;  %v1408_v17 = vmul.f32 %v12393_v12, %v13690_v7 }
 0x291   :  { %3079 = vrot.lane.b32.xlu0 %v1407_v10, %s12239_s5  ;;  %3012 = vrot.lane.b32.xlu2 %v1400_v6, %s12239_s5  ;;  %v1403_v10 = vmul.f32 %v12391_v11, %v13675_v60 }
 0x292   :  { %v13692_v46 = vpop.permute.xlu1 %2726 }
 0x293   :  { %v2672_v9 = vpop.permute.xlu0 %2671  ;;  %v13694_v55 = vpop.permute.xlu2 %2728  ;;  %10690 = vmatpush.xpose.msk.msra.mxu2 %vm1499_vm1, %v2591_v4 }
 0x294   :  { %10694 = vmatpush.xpose.msk.msra.mxu3 %vm1499_vm1, %v2672_v9 }
 0x297   :  { %10691 = vmatpush.xpose.msk.msra.mxu2 %vm1499_vm1, %v13606_v18  ;;  %v13713_v18 = vadd.f32 %v941_v19, %v12399_v20  ;;  %v1409_v19 = vmul.f32 %v12405_v26, %v13675_v60 }
 0x298   :  { %10695 = vmatpush.xpose.msk.msra.mxu3 %vm1499_vm1, %v2670_v34  ;;  %3081 = vrot.lane.b32.xlu1 %v1408_v17, %s12239_s5  ;;  %v1410_v17 = vmul.f32 %v12405_v26, %v13690_v7 }
 0x299   :  { %3073 = vrot.lane.b32.xlu0 %v1404_v62, %s12239_s5  ;;  %3071 = vrot.lane.b32.xlu2 %v1403_v10, %s12239_s5  ;;  %18888 = vst [vmem:[#allocation111_spill] sm:$0xff] %v13713_v18  ;;  %v1411_v34 = vmul.f32 %v12391_v11, %v13713_v18  ;;  %v944_v62 = vpop.f32.mrf.mxu0 }
 0x29a   :  { %v2739_v4 = vpop.permute.xlu1 %2738  ;;  %10692 = vmatmul.msk.f32.vlgmr.msra.gmra.mxu2 %vm1499_vm1, %v13297_v15 }
 0x29b   :  { %v2731_v6 = vpop.permute.xlu0 %2730  ;;  %v2741_v9 = vpop.permute.xlu2 %2740 }
 0x29c   :  { %10696 = vmatpush.xpose.msk.msra.mxu3 %vm1499_vm1, %v2668_v37  ;;  %10704 = vmatpush.xpose.msk.msrb.mxu2 %vm1499_vm1, %v2741_v9 }
 0x2a0   :  { %10697 = vmatpush.xpose.msk.msra.mxu3 %vm1499_vm1, %v2666_v16  ;;  %10705 = vmatpush.xpose.msk.msrb.mxu2 %vm1499_vm1, %v2739_v4  ;;  %v1417_v16 = vmul.f32 %v12405_v26, %v13713_v18  ;;  %v1413_v4 = vmul.f32 %v12401_v22, %v13713_v18 }
 0x2a1   :  { %3140 = vrot.lane.b32.xlu1 %v1411_v34, %s12239_s5  ;;  %3085 = vrot.lane.b32.xlu0 %v1410_v17, %s12239_s5  ;;  %v1406_v34 = vmul.f32 %v12401_v22, %v13690_v7 }
 0x2a2   :  { %3083 = vrot.lane.b32.xlu2 %v1409_v19, %s12239_s5  ;;  %v2733_v37 = vpop.permute.xlu1 %2732  ;;  %10693 = vmatmul.msk.f32.gmra.mxu2 %vm1499_vm1, %v13323_v5  ;;  %v13747_v19 = vadd.f32 %v944_v62, %v12399_v20  ;;  %v1415_v62 = vmul.f32 %v12393_v12, %v13713_v18 }
 0x2a3   :  { %v2737_v10 = vpop.permute.xlu0 %2736  ;;  %v13730_v9 = vpop.permute.xlu2 %2799 }
 0x2a4   :  { %10698 = vmatpush.xpose.msk.msra.mxu3 %vm1499_vm1, %v2664_v54  ;;  %10706 = vmatpush.xpose.msk.msrb.mxu2 %vm1499_vm1, %v2737_v10  ;;  %v947_v54 = vpop.f32.mrf.mxu0  ;;  %18889 = vst [vmem:[#allocation112_spill] sm:$0xff] %v13747_v19 }
 0x2a8   :  { %10699 = vmatpush.xpose.msk.msra.mxu3 %vm1499_vm1, %v13659_v41  ;;  %10707 = vmatpush.xpose.msk.msrb.mxu2 %vm1499_vm1, %v2735_v39  ;;  %v1414_v39 = vmul.f32 %v12401_v22, %v13747_v19  ;;  %v1416_v41 = vmul.f32 %v12393_v12, %v13747_v19 }
 0x2a9   :  { %3152 = vrot.lane.b32.xlu1 %v1417_v16, %s12239_s5  ;;  %3144 = vrot.lane.b32.xlu0 %v1413_v4, %s12239_s5 }
 0x2aa   :  { %3077 = vrot.lane.b32.xlu2 %v1406_v34, %s12239_s5  ;;  %v2804_v17 = vpop.permute.xlu1 %2803 }
 0x2ab   :  { %v13749_v10 = vpop.permute.xlu0 %2795  ;;  %v2806_v5 = vpop.permute.xlu2 %2805 }
 0x2ac   :  { %10700 = vmatpush.xpose.msk.msra.mxu3 %vm1499_vm1, %v2660_v44  ;;  %10708 = vmatpush.xpose.msk.msrb.mxu2 %vm1499_vm1, %v2733_v37  ;;  %v13768_v37 = vadd.f32 %v947_v54, %v12399_v20  ;;  %v1412_v54 = vmul.f32 %v12391_v11, %v13747_v19 }
 0x2ae   :  { %18890 = vst [vmem:[#allocation113_spill] sm:$0xff] %v13768_v37  ;;  %v1423_v4 = vmul.f32 %v12393_v12, %v13768_v37  ;;  %v1419_v34 = vmul.f32 %v12391_v11, %v13768_v37 }
 0x2b0   :  { %10701 = vmatpush.xpose.msk.msra.mxu3 %vm1499_vm1, %v13627_v30  ;;  %10709 = vmatpush.xpose.msk.msrb.mxu2 %vm1499_vm1, %v2731_v6  ;;  %v950_v6 = vpop.f32.mrf.mxu0 }
 0x2b1   :  { %3146 = vrot.lane.b32.xlu1 %v1414_v39, %s12239_s5  ;;  %3150 = vrot.lane.b32.xlu0 %v1416_v41, %s12239_s5 }
 0x2b2   :  { %3148 = vrot.lane.b32.xlu2 %v1415_v62, %s12239_s5  ;;  %v13765_v44 = vpop.permute.xlu1 %2797  ;;  %v4074_v62 = vld [vmem:[#allocation11 + $0x28] sm:$0xff] }
 0x2b3   :  { %v2808_v16 = vpop.permute.xlu0 %2807  ;;  %10702 = vmatmul.msk.f32.vlgmr.msra.gmra.mxu3 %vm1499_vm1, %v13372_v24  ;;  %v13772_v30 = vpop.permute.xlu2 %2864  ;;  %4279 = vmatpush.msrb.mxu0 %v4074_v62  ;;  %v576_v62 = vld [vmem:[#allocation8 + $0x18] sm:$0xff] }
 0x2b4   :  { %10710 = vmatpush.xpose.msk.msrb.mxu2 %vm1499_vm1, %v13694_v55  ;;  %v13788_v55 = vadd.f32 %v950_v6, %v12399_v20 }
 0x2b6   :  { %18891 = vst [vmem:[#allocation114_spill] sm:$0xff] %v13788_v55  ;;  %v1420_v6 = vmul.f32 %v12391_v11, %v13788_v55  ;;  %v1422_v24 = vmul.f32 %v12401_v22, %v13788_v55 }
 0x2b8   :  { %10711 = vmatpush.xpose.msk.msrb.mxu2 %vm1499_vm1, %v13692_v46 }
 0x2b9   :  { %3217 = vrot.lane.b32.xlu1 %v1423_v4, %s12239_s5  ;;  %3209 = vrot.lane.b32.xlu0 %v1419_v34, %s12239_s5  ;;  %v580_v4 = vld [vmem:[#allocation8 + $0x38] sm:$0xff]  ;;  %v578_v34 = vld [vmem:[#allocation8 + $0x28] sm:$0xff] }
 0x2ba   :  { %3142 = vrot.lane.b32.xlu2 %v1412_v54, %s12239_s5  ;;  %v2810_v39 = vpop.permute.xlu1 %2809  ;;  %1001 = vmatpush.msra.mxu1 %v580_v4  ;;  %v953_v54 = vpop.f32.mrf.mxu0 }
 0x2bb   :  { %v2802_v41 = vpop.permute.xlu0 %2801  ;;  %10703 = vmatmul.msk.f32.gmra.mxu3 %vm1499_vm1, %v13394_v58  ;;  %10712 = vmatmul.msk.f32.vlgmr.msrb.gmra.mxu2 %vm1499_vm1, %v13420_v52  ;;  %v2877_v46 = vpop.permute.xlu2 %2876  ;;  %v1418_v52 = vmul.f32 %v12405_v26, %v13747_v19 }
 0x2bc   :  { %10714 = vmatpush.xpose.msk.msrb.mxu3 %vm1499_vm1, %v2810_v39  ;;  %1002 = vmatpush.msra.mxu1 %v578_v34 }
 0x2be   :  { %1003 = vmatpush.msra.mxu1 %v576_v62 }
 0x2c0   :  { %10715 = vmatpush.xpose.msk.msrb.mxu3 %vm1499_vm1, %v2808_v16  ;;  %v574_v16 = vld [vmem:[#allocation8 + $0x8] sm:$0xff] }
 0x2c1   :  { %3211 = vrot.lane.b32.xlu1 %v1420_v6, %s12239_s5  ;;  %3215 = vrot.lane.b32.xlu0 %v1422_v24, %s12239_s5  ;;  %v1426_v24 = vmul.f32 %v12405_v26, %v13788_v55  ;;  %v1421_v6 = vmul.f32 %v12401_v22, %v13768_v37 }
 0x2c2   :  { %3154 = vrot.lane.b32.xlu2 %v1418_v52, %s12239_s5  ;;  %v13805_v39 = vpop.permute.xlu1 %2868  ;;  %1004 = vmatpush.msra.mxu1 %v574_v16  ;;  %v1425_v52 = vmul.f32 %v12405_v26, %v13768_v37  ;;  %v956_v34 = vpop.f32.mrf.mxu0 }
 0x2c3   :  { %v2873_v4 = vpop.permute.xlu0 %2872  ;;  %10713 = vmatmul.msk.f32.gmra.mxu2 %vm1499_vm1, %v13461_v45  ;;  %v13809_v58 = vpop.permute.xlu2 %2870  ;;  %10460 = vmatmul.msk.f32.vlgmr.msra.gmra.mxu1 %vm587_vm0, %v12327_v14  ;;  %v13825_v14 = vadd.f32 %v953_v54, %v12399_v20  ;;  %v13828_v62 = vadd.f32 %v956_v34, %v12399_v20  ;;  %v1424_v54 = vmul.f32 %v12393_v12, %v13788_v55 }
 0x2c4   :  { %10716 = vmatpush.xpose.msk.msrb.mxu3 %vm1499_vm1, %v2806_v5 }
 0x2c5   :  { %18892 = vst [vmem:[#allocation115_spill] sm:$0xff] %v13825_v14 }
 0x2c6   :  { %18893 = vst [vmem:[#allocation116_spill] sm:$0xff] %v13828_v62 }
 0x2c8   :  { %10717 = vmatpush.xpose.msk.msrb.mxu3 %vm1499_vm1, %v2804_v17  ;;  %v1429_v17 = vmul.f32 %v12401_v22, %v13825_v14 }
 0x2c9   :  { %3223 = vrot.lane.b32.xlu1 %v1426_v24, %s12239_s5  ;;  %3221 = vrot.lane.b32.xlu0 %v1425_v52, %s12239_s5  ;;  %v1428_v24 = vmul.f32 %v12391_v11, %v13828_v62 }
 0x2ca   :  { %3213 = vrot.lane.b32.xlu2 %v1421_v6, %s12239_s5  ;;  %v2875_v5 = vpop.permute.xlu1 %2874  ;;  %v1431_v6 = vmul.f32 %v12393_v12, %v13825_v14 }
 0x2cb   :  { %v13830_v16 = vpop.permute.xlu0 %2866  ;;  %v2942_v45 = vpop.permute.xlu2 %2941  ;;  %10461 = vmatmul.msk.f32.gmra.mxu1 %vm587_vm0, %v12333_v21 }
 0x2cc   :  { %10718 = vmatpush.xpose.msk.msrb.mxu3 %vm1499_vm1, %v2802_v41  ;;  %v959_v41 = vpop.f32.mrf.mxu0 }
 0x2d0   :  { %10719 = vmatpush.xpose.msk.msrb.mxu3 %vm1499_vm1, %v13730_v9  ;;  %v1432_v9 = vmul.f32 %v12393_v12, %v13828_v62 }
 0x2d1   :  { %3282 = vrot.lane.b32.xlu1 %v1429_v17, %s12239_s5  ;;  %3280 = vrot.lane.b32.xlu0 %v1428_v24, %s12239_s5  ;;  %v1427_v17 = vmul.f32 %v12391_v11, %v13825_v14 }
 0x2d2   :  { %3219 = vrot.lane.b32.xlu2 %v1424_v54, %s12239_s5  ;;  %v13846_v21 = vpop.permute.xlu1 %2933 }
 0x2d3   :  { %v2879_v52 = vpop.permute.xlu0 %2878  ;;  %v13848_v34 = vpop.permute.xlu2 %2935  ;;  %10462 = vmatmul.msk.f32.gmra.mxu1 %vm587_vm0, %v12339_v25 }
 0x2d4   :  { %10720 = vmatpush.xpose.msk.msrb.mxu3 %vm1499_vm1, %v13765_v44  ;;  %10724 = vmatpush.xpose.msk.msra.mxu2 %vm1499_vm1, %v2879_v52  ;;  %v13868_v44 = vadd.f32 %v959_v41, %v12399_v20  ;;  %v962_v54 = vpop.f32.mrf.mxu0  ;;  %v1434_v41 = vmul.f32 %v12405_v26, %v13828_v62  ;;  %v1430_v52 = vmul.f32 %v12401_v22, %v13828_v62 }
 0x2d6   :  { %18894 = vst [vmem:[#allocation117_spill] sm:$0xff] %v13868_v44 }
 0x2d8   :  { %10721 = vmatpush.xpose.msk.msrb.mxu3 %vm1499_vm1, %v13749_v10  ;;  %10725 = vmatpush.xpose.msk.msra.mxu2 %vm1499_vm1, %v2877_v46  ;;  %v1435_v46 = vmul.f32 %v12391_v11, %v13868_v44 }
 0x2d9   :  { %3288 = vrot.lane.b32.xlu1 %v1432_v9, %s12239_s5  ;;  %3286 = vrot.lane.b32.xlu0 %v1431_v6, %s12239_s5 }
 0x2da   :  { %3278 = vrot.lane.b32.xlu2 %v1427_v17, %s12239_s5  ;;  %v2946_v25 = vpop.permute.xlu1 %2945 }
 0x2db   :  { %v2938_v24 = vpop.permute.xlu0 %2937  ;;  %10722 = vmatmul.msk.f32.vlgmr.msrb.gmra.mxu3 %vm1499_vm1, %v13481_v28  ;;  %v2948_v10 = vpop.permute.xlu2 %2947  ;;  %10463 = vmatmul.msk.f32.gmra.mxu1 %vm587_vm0, %v12343_v29 }
 0x2dc   :  { %10726 = vmatpush.xpose.msk.msra.mxu2 %vm1499_vm1, %v2875_v5  ;;  %10734 = vmatpush.xpose.msk.msra.mxu3 %vm1499_vm1, %v2948_v10  ;;  %v13888_v5 = vadd.f32 %v962_v54, %v12399_v20  ;;  %v965_v6 = vpop.f32.mrf.mxu0 }
 0x2de   :  { %18895 = vst [vmem:[#allocation118_spill] sm:$0xff] %v13888_v5  ;;  %v1438_v17 = vmul.f32 %v12401_v22, %v13888_v5 }
 0x2e0   :  { %10727 = vmatpush.xpose.msk.msra.mxu2 %vm1499_vm1, %v2873_v4  ;;  %10735 = vmatpush.xpose.msk.msra.mxu3 %vm1499_vm1, %v2946_v25  ;;  %v1437_v25 = vmul.f32 %v12401_v22, %v13868_v44 }
 0x2e1   :  { %3347 = vrot.lane.b32.xlu1 %v1435_v46, %s12239_s5  ;;  %3292 = vrot.lane.b32.xlu0 %v1434_v41, %s12239_s5  ;;  %v13933_v41 = vadd.f32 %v965_v6, %v12399_v20  ;;  %v1439_v6 = vmul.f32 %v12393_v12, %v13868_v44 }
 0x2e2   :  { %3284 = vrot.lane.b32.xlu2 %v1430_v52, %s12239_s5  ;;  %v2940_v29 = vpop.permute.xlu1 %2939 }
 0x2e3   :  { %v2944_v9 = vpop.permute.xlu0 %2943  ;;  %10723 = vmatmul.msk.f32.gmra.mxu3 %vm1499_vm1, %v13501_v49  ;;  %v13892_v4 = vpop.permute.xlu2 %3006  ;;  %10464 = vmatmul.msk.f32.gmra.mxu1 %vm587_vm0, %v12347_v32  ;;  %18896 = vst [vmem:[#allocation119_spill] sm:$0xff] %v13933_v41  ;;  %v18915_v49 = vld [vmem:[#allocation31_spill] sm:$0xff] }
 0x2e4   :  { %10728 = vmatpush.xpose.msk.msra.mxu2 %vm1499_vm1, %v13809_v58  ;;  %10736 = vmatpush.xpose.msk.msra.mxu3 %vm1499_vm1, %v2944_v9  ;;  %v1433_v58 = vmul.f32 %v12405_v26, %v13825_v14  ;;  %v968_v46 = vpop.f32.mrf.mxu0  ;;  %v1443_v9 = vmul.f32 %v12391_v11, %v13933_v41 }
 0x2e5   :  { %v13936_v52 = vadd.f32 %v968_v46, %v12399_v20 }
 0x2e7   :  { %18897 = vst [vmem:[#allocation120_spill] sm:$0xff] %v13936_v52 }
 0x2e8   :  { %10729 = vmatpush.xpose.msk.msra.mxu2 %vm1499_vm1, %v13805_v39  ;;  %10737 = vmatpush.xpose.msk.msra.mxu3 %vm1499_vm1, %v2942_v45  ;;  %v1441_v45 = vmul.f32 %v12405_v26, %v13868_v44  ;;  %v1440_v39 = vmul.f32 %v12393_v12, %v13888_v5 }
 0x2e9   :  { %3353 = vrot.lane.b32.xlu1 %v1438_v17, %s12239_s5  ;;  %3351 = vrot.lane.b32.xlu0 %v1437_v25, %s12239_s5 }
 0x2ea   :  { %3290 = vrot.lane.b32.xlu2 %v1433_v58, %s12239_s5  ;;  %v3011_v32 = vpop.permute.xlu1 %3010  ;;  %v1447_v58 = vmul.f32 %v12393_v12, %v13933_v41 }
 0x2eb   :  { %v13911_v10 = vpop.permute.xlu0 %3002  ;;  %v3013_v54 = vpop.permute.xlu2 %3012  ;;  %10465 = vmatmul.msk.f32.gmra.mxu1 %vm587_vm0, %v12351_v35 }
 0x2ec   :  { %10730 = vmatpush.xpose.msk.msra.mxu2 %vm1499_vm1, %v13830_v16  ;;  %10738 = vmatpush.xpose.msk.msra.mxu3 %vm1499_vm1, %v2940_v29  ;;  %v1436_v16 = vmul.f32 %v12391_v11, %v13888_v5  ;;  %v1444_v29 = vmul.f32 %v12391_v11, %v13936_v52  ;;  %v971_v25 = vpop.f32.mrf.mxu0 }
 0x2f0   :  { %10731 = vmatpush.xpose.msk.msra.mxu2 %vm1499_vm1, %v13772_v30  ;;  %10739 = vmatpush.xpose.msk.msra.mxu3 %vm1499_vm1, %v2938_v24 }
 0x2f1   :  { %3359 = vrot.lane.b32.xlu1 %v1441_v45, %s12239_s5  ;;  %3357 = vrot.lane.b32.xlu0 %v1440_v39, %s12239_s5  ;;  %v1446_v45 = vmul.f32 %v12401_v22, %v13936_v52  ;;  %v1442_v39 = vmul.f32 %v12405_v26, %v13888_v5 }
 0x2f2   :  { %3349 = vrot.lane.b32.xlu2 %v1436_v16, %s12239_s5  ;;  %v13930_v35 = vpop.permute.xlu1 %3004 }
 0x2f3   :  { %v3015_v30 = vpop.permute.xlu0 %3014  ;;  %10732 = vmatmul.msk.f32.vlgmr.msra.gmra.mxu2 %vm1499_vm1, %v13534_v42  ;;  %v13940_v24 = vpop.permute.xlu2 %3071  ;;  %10466 = vmatmul.msk.f32.gmra.mxu1 %vm587_vm0, %v12355_v40 }
 0x2f4   :  { %10740 = vmatpush.xpose.msk.msra.mxu3 %vm1499_vm1, %v13848_v34 }
 0x2f8   :  { %10741 = vmatpush.xpose.msk.msra.mxu3 %vm1499_vm1, %v13846_v21  ;;  %v4073_v21 = vld [vmem:[#allocation11 + $0x20] sm:$0xff] }
 0x2f9   :  { %3418 = vrot.lane.b32.xlu1 %v1444_v29, %s12239_s5  ;;  %3416 = vrot.lane.b32.xlu0 %v1443_v9, %s12239_s5  ;;  %v1450_v29 = vmul.f32 %v12405_v26, %v13936_v52  ;;  %v1449_v9 = vmul.f32 %v12405_v26, %v13933_v41 }
 0x2fa   :  { %3355 = vrot.lane.b32.xlu2 %v1439_v6, %s12239_s5  ;;  %v3017_v34 = vpop.permute.xlu1 %3016  ;;  %4280 = vmatpush.msrb.mxu0 %v4073_v21  ;;  %v13989_v6 = vpop.f32.mrf.mxu3  ;;  %v1445_v21 = vmul.f32 %v12401_v22, %v13933_v41 }
 0x2fb   :  { %v3009_v40 = vpop.permute.xlu0 %3008  ;;  %10733 = vmatmul.msk.f32.gmra.mxu2 %vm1499_vm1, %v13549_v27  ;;  %10742 = vmatmul.msk.f32.vlgmr.msra.gmra.mxu3 %vm1499_vm1, %v13568_v31 }
 0x2fc   :  { %v3084_v17 = vpop.permute.xlu2 %3083  ;;  %10744 = vmatpush.xpose.msk.msrb.mxu2 %vm1499_vm1, %v3017_v34  ;;  %10467 = vmatmul.msk.f32.gmra.mxu1 %vm587_vm0, %v12359_v43  ;;  %v974_v34 = vpop.f32.mrf.mxu0 }
 0x300   :  { %10745 = vmatpush.xpose.msk.msrb.mxu2 %vm1499_vm1, %v3015_v30  ;;  %v13983_v30 = vpop.f32.mrf.mxu2 }
 0x301   :  { %3424 = vrot.lane.b32.xlu1 %v1447_v58, %s12239_s5  ;;  %3422 = vrot.lane.b32.xlu0 %v1446_v45, %s12239_s5  ;;  %v14001_v58 = vadd.f32 %v974_v34, %v12399_v20 }
 0x302   :  { %3361 = vrot.lane.b32.xlu2 %v1442_v39, %s12239_s5  ;;  %v13974_v46 = vpop.permute.xlu1 %3075 }
 0x303   :  { %v3080_v43 = vpop.permute.xlu0 %3079  ;;  %10743 = vmatmul.msk.f32.gmra.mxu3 %vm1499_vm1, %v13604_v50  ;;  %18899 = vst [vmem:[#allocation122_spill] sm:$0xff] %v14001_v58 }
 0x304   :  { %v13978_v16 = vpop.permute.xlu2 %3077  ;;  %10746 = vmatpush.xpose.msk.msrb.mxu2 %vm1499_vm1, %v3013_v54  ;;  %10468 = vmatmul.msk.f32.gmra.mxu1 %vm587_vm0, %v12363_v48  ;;  %v13998_v54 = vadd.f32 %v971_v25, %v12399_v20  ;;  %v1448_v25 = vmul.f32 %v12393_v12, %v13936_v52 }
 0x306   :  { %18898 = vst [vmem:[#allocation121_spill] sm:$0xff] %v13998_v54 }
 0x308   :  { %10747 = vmatpush.xpose.msk.msrb.mxu2 %vm1499_vm1, %v3011_v32  ;;  %v1453_v32 = vmul.f32 %v12401_v22, %v13998_v54 }
 0x309   :  { %3430 = vrot.lane.b32.xlu1 %v1450_v29, %s12239_s5  ;;  %3428 = vrot.lane.b32.xlu0 %v1449_v9, %s12239_s5  ;;  %v1452_v29 = vmul.f32 %v12391_v11, %v14001_v58  ;;  %v14016_v9 = vpop.f32.mrf.mxu2 }
 0x30a   :  { %3420 = vrot.lane.b32.xlu2 %v1445_v21, %s12239_s5  ;;  %v3082_v48 = vpop.permute.xlu1 %3081 }
 0x30b   :  { %v14003_v45 = vpop.permute.xlu0 %3073 }
 0x30c   :  { %v3149_v39 = vpop.permute.xlu2 %3148  ;;  %10748 = vmatpush.xpose.msk.msrb.mxu2 %vm1499_vm1, %v3009_v40  ;;  %10469 = vmatmul.msk.f32.gmra.mxu1 %vm587_vm0, %v12367_v51  ;;  %v14020_v40 = vpop.f32.mrf.mxu3 }
 0x30d   :  { %v977_v51 = vpop.f32.mrf.mxu0 }
 0x310   :  { %10749 = vmatpush.xpose.msk.msrb.mxu2 %vm1499_vm1, %v13892_v4  ;;  %v1456_v4 = vmul.f32 %v12393_v12, %v14001_v58 }
 0x311   :  { %3489 = vrot.lane.b32.xlu1 %v1453_v32, %s12239_s5  ;;  %3487 = vrot.lane.b32.xlu0 %v1452_v29, %s12239_s5  ;;  %v1455_v32 = vmul.f32 %v12393_v12, %v13998_v54  ;;  %v1451_v29 = vmul.f32 %v12391_v11, %v13998_v54 }
 0x312   :  { %3426 = vrot.lane.b32.xlu2 %v1448_v25, %s12239_s5  ;;  %v14049_v25 = vadd.f32 %v977_v51, %v12399_v20  ;;  %v1458_v51 = vmul.f32 %v12405_v26, %v14001_v58 }
 0x313   :  { %v14023_v34 = vpop.permute.xlu1 %3140  ;;  %v3086_v21 = vpop.permute.xlu0 %3085 }
 0x314   :  { %v14025_v50 = vpop.permute.xlu2 %3142  ;;  %10750 = vmatpush.xpose.msk.msrb.mxu2 %vm1499_vm1, %v13930_v35  ;;  %10754 = vmatpush.xpose.msk.msrb.mxu3 %vm1499_vm1, %v3086_v21  ;;  %v14043_v35 = vpop.f32.mrf.mxu2  ;;  %18900 = vst [vmem:[#allocation123_spill] sm:$0xff] %v14049_v25 }
 0x315   :  { %10470 = vmatmul.msk.f32.gmra.mxu1 %vm587_vm0, %v12371_v56  ;;  %v14045_v56 = vpop.f32.mrf.mxu3 }
 0x318   :  { %10751 = vmatpush.xpose.msk.msrb.mxu2 %vm1499_vm1, %v13911_v10  ;;  %10755 = vmatpush.xpose.msk.msrb.mxu3 %vm1499_vm1, %v3084_v17  ;;  %v980_v17 = vpop.f32.mrf.mxu0 }
 0x319   :  { %3495 = vrot.lane.b32.xlu1 %v1456_v4, %s12239_s5  ;;  %3493 = vrot.lane.b32.xlu0 %v1455_v32, %s12239_s5  ;;  %v1459_v4 = vmul.f32 %v12391_v11, %v14049_v25  ;;  %v1454_v32 = vmul.f32 %v12401_v22, %v14001_v58 }
 0x31a   :  { %3485 = vrot.lane.b32.xlu2 %v1451_v29, %s12239_s5 }
 0x31b   :  { %v3153_v21 = vpop.permute.xlu1 %3152  ;;  %v3145_v10 = vpop.permute.xlu0 %3144  ;;  %10752 = vmatmul.msk.f32.vlgmr.msrb.gmra.mxu2 %vm1499_vm1, %v13623_v38 }
 0x31c   :  { %v3155_v31 = vpop.permute.xlu2 %3154  ;;  %10756 = vmatpush.xpose.msk.msrb.mxu3 %vm1499_vm1, %v3082_v48  ;;  %v14077_v29 = vpop.f32.mrf.mxu2 }
 0x31d   :  { %10764 = vmatpush.xpose.msk.msra.mxu2 %vm1499_vm1, %v3155_v31  ;;  %10471 = vmatmul.msk.f32.gmra.mxu1 %vm587_vm0, %v12375_v59  ;;  %v14069_v59 = vadd.f32 %v980_v17, %v12399_v20 }
 0x31f   :  { %18901 = vst [vmem:[#allocation124_spill] sm:$0xff] %v14069_v59  ;;  %v1462_v17 = vmul.f32 %v12401_v22, %v14069_v59 }
 0x320   :  { %10757 = vmatpush.xpose.msk.msrb.mxu3 %vm1499_vm1, %v3080_v43 }
 0x321   :  { %10765 = vmatpush.xpose.msk.msra.mxu2 %vm1499_vm1, %v3153_v21  ;;  %3554 = vrot.lane.b32.xlu1 %v1459_v4, %s12239_s5  ;;  %v14080_v21 = vpop.f32.mrf.mxu3  ;;  %v983_v4 = vpop.f32.mrf.mxu0 }
 0x322   :  { %3499 = vrot.lane.b32.xlu0 %v1458_v51, %s12239_s5  ;;  %3491 = vrot.lane.b32.xlu2 %v1454_v32, %s12239_s5  ;;  %v1461_v51 = vmul.f32 %v12401_v22, %v14049_v25 }
 0x323   :  { %v3147_v31 = vpop.permute.xlu1 %3146  ;;  %v3151_v48 = vpop.permute.xlu0 %3150  ;;  %10753 = vmatmul.msk.f32.gmra.mxu2 %vm1499_vm1, %v13642_v57 }
 0x324   :  { %v14073_v43 = vpop.permute.xlu2 %3213  ;;  %10758 = vmatpush.xpose.msk.msrb.mxu3 %vm1499_vm1, %v13978_v16  ;;  %v1457_v16 = vmul.f32 %v12405_v26, %v13998_v54 }
 0x325   :  { %10766 = vmatpush.xpose.msk.msra.mxu2 %vm1499_vm1, %v3151_v48  ;;  %10472 = vmatmul.msk.f32.gmra.mxu1 %vm587_vm0, %v12379_v0 }
 0x328   :  { %10759 = vmatpush.xpose.msk.msrb.mxu3 %vm1499_vm1, %v13974_v46  ;;  %v14101_v46 = vpop.f32.mrf.mxu2 }
 0x329   :  { %10767 = vmatpush.xpose.msk.msra.mxu2 %vm1499_vm1, %v3149_v39  ;;  %3560 = vrot.lane.b32.xlu1 %v1462_v17, %s12239_s5  ;;  %v14103_v57 = vpop.f32.mrf.mxu3  ;;  %v1465_v39 = vmul.f32 %v12405_v26, %v14049_v25  ;;  %v986_v17 = vpop.f32.mrf.mxu0 }
 0x32a   :  { %3558 = vrot.lane.b32.xlu0 %v1461_v51, %s12239_s5  ;;  %3497 = vrot.lane.b32.xlu2 %v1457_v16, %s12239_s5  ;;  %v1464_v51 = vmul.f32 %v12393_v12, %v14069_v59  ;;  %v14127_v16 = vadd.f32 %v983_v4, %v12399_v20  ;;  %v4072_v4 = vld [vmem:[#allocation11 + $0x18] sm:$0xff] }
 0x32b   :  { %v3218_v0 = vpop.permute.xlu1 %3217  ;;  %v14096_v32 = vpop.permute.xlu0 %3209  ;;  %4281 = vmatpush.msrb.mxu0 %v4072_v4 }
 0x32c   :  { %v3220_v48 = vpop.permute.xlu2 %3219  ;;  %10760 = vmatpush.xpose.msk.msrb.mxu3 %vm1499_vm1, %v14003_v45  ;;  %v1460_v45 = vmul.f32 %v12391_v11, %v14069_v59  ;;  %18903 = vst [vmem:[#allocation126_spill] sm:$0xff] %v14127_v16 }
 0x32d   :  { %10768 = vmatpush.xpose.msk.msra.mxu2 %vm1499_vm1, %v3147_v31  ;;  %10473 = vmatmul.msk.f32.gmra.mxu1 %vm587_vm0, %v12383_v3  ;;  %v14120_v3 = vadd.f32 %v986_v17, %v12399_v20  ;;  %v1463_v20 = vmul.f32 %v12393_v12, %v14049_v25 }
 0x32f   :  { %18902 = vst [vmem:[#allocation125_spill] sm:$0xff] %v14120_v3 }
 0x330   :  { %10761 = vmatpush.xpose.msk.msrb.mxu3 %vm1499_vm1, %v13940_v24 }
 0x331   :  { %10769 = vmatpush.xpose.msk.msra.mxu2 %vm1499_vm1, %v3145_v10  ;;  %3566 = vrot.lane.b32.xlu1 %v1465_v39, %s12239_s5  ;;  %v1468_v10 = vmul.f32 %v12391_v11, %v14120_v3  ;;  %v14137_v39 = vpop.f32.mrf.mxu2  ;;  %v14139_v17 = vpop.f32.mrf.mxu3 }
 0x332   :  { %3564 = vrot.lane.b32.xlu0 %v1464_v51, %s12239_s5  ;;  %3556 = vrot.lane.b32.xlu2 %v1460_v45, %s12239_s5  ;;  %v1467_v51 = vmul.f32 %v12391_v11, %v14127_v16  ;;  %v3718_v15 = vsel %vm3684_vm2, %v14139_v17, -inf }
 0x333   :  { %v14122_v31 = vpop.permute.xlu1 %3211  ;;  %v3216_v24 = vpop.permute.xlu0 %3215  ;;  %10762 = vmatmul.msk.f32.vlgmr.msrb.gmra.mxu3 %vm1499_vm1, %v13675_v60 }
 0x334   :  { %v14129_v38 = vpop.permute.xlu2 %3278 }
 0x335   :  { %10770 = vmatpush.xpose.msk.msra.mxu2 %vm1499_vm1, %v14025_v50  ;;  %10474 = vmatmul.msk.f32.gmra.mxu1 %vm587_vm0, %v12387_v8 }
 0x339   :  { %10771 = vmatpush.xpose.msk.msra.mxu2 %vm1499_vm1, %v14023_v34  ;;  %3625 = vrot.lane.b32.xlu1 %v1468_v10, %s12239_s5  ;;  %v1471_v34 = vmul.f32 %v12393_v12, %v14127_v16  ;;  %v14161_v45 = vpop.f32.mrf.mxu2  ;;  %v14163_v10 = vpop.f32.mrf.mxu3 }
 0x33a   :  { %3623 = vrot.lane.b32.xlu0 %v1467_v51, %s12239_s5  ;;  %3562 = vrot.lane.b32.xlu2 %v1463_v20, %s12239_s5  ;;  %v1470_v51 = vmul.f32 %v12401_v22, %v14120_v3  ;;  %v1466_v20 = vmul.f32 %v12405_v26, %v14069_v59 }
 0x33b   :  { %v3224_v8 = vpop.permute.xlu1 %3223  ;;  %v3222_v50 = vpop.permute.xlu0 %3221  ;;  %10763 = vmatmul.msk.f32.gmra.mxu3 %vm1499_vm1, %v13690_v7 }
 0x33c   :  { %10772 = vmatmul.msk.f32.vlgmr.msra.gmra.mxu2 %vm1499_vm1, %v13713_v18  ;;  %v14154_v11 = vpop.permute.xlu2 %3284  ;;  %10774 = vmatpush.xpose.msk.msra.mxu3 %vm1499_vm1, %v3224_v8 }
 0x33d   :  { %10475 = vmatmul.msk.f32.gmra.mxu1 %vm587_vm0, %v12395_v13 }
 0x340   :  { %10775 = vmatpush.xpose.msk.msra.mxu3 %vm1499_vm1, %v3222_v50  ;;  %v14176_v50 = vpop.f32.mrf.mxu1 }
 0x341   :  { %3631 = vrot.lane.b32.xlu1 %v1471_v34, %s12239_s5  ;;  %v1474_v34 = vmul.f32 %v12405_v26, %v14120_v3 }
 0x342   :  { %3629 = vrot.lane.b32.xlu0 %v1470_v51, %s12239_s5  ;;  %3568 = vrot.lane.b32.xlu2 %v1466_v20, %s12239_s5  ;;  %v1473_v51 = vmul.f32 %v12405_v26, %v14127_v16  ;;  %v1469_v20 = vmul.f32 %v12401_v22, %v14127_v16  ;;  %v1472_v22 = vmul.f32 %v12393_v12, %v14120_v3 }
 0x343   :  { %v3283_v13 = vpop.permute.xlu1 %3282  ;;  %v3281_v8 = vpop.permute.xlu0 %3280 }
 0x344   :  { %10773 = vmatmul.msk.f32.gmra.mxu2 %vm1499_vm1, %v13747_v19  ;;  %v3291_v4 = vpop.permute.xlu2 %3290  ;;  %10776 = vmatpush.xpose.msk.msra.mxu3 %vm1499_vm1, %v3220_v48  ;;  %v14188_v19 = vpop.f32.mrf.mxu2 }
 0x345   :  { %10476 = vmatmul.msk.f32.gmra.mxu1 %vm587_vm0, %v12403_v23  ;;  %v14190_v48 = vpop.f32.mrf.mxu3 }
 0x346   :  { %v3730_v47 = vsel %vm3684_vm2, %v14190_v48, -inf }
 0x348   :  { %10777 = vmatpush.xpose.msk.msra.mxu3 %vm1499_vm1, %v3218_v0  ;;  %v14197_v26 = vpop.f32.mrf.mxu1 }
 0x349   :  { %3637 = vrot.lane.b32.xlu1 %v1474_v34, %s12239_s5 }
 0x34a   :  { %3635 = vrot.lane.b32.xlu0 %v1473_v51, %s12239_s5  ;;  %3627 = vrot.lane.b32.xlu2 %v1469_v20, %s12239_s5 }
 0x34b   :  { %v3289_v23 = vpop.permute.xlu1 %3288  ;;  %v3287_v18 = vpop.permute.xlu0 %3286 }
 0x34c   :  { %v14194_v7 = vpop.permute.xlu2 %3349  ;;  %10778 = vmatpush.xpose.msk.msra.mxu3 %vm1499_vm1, %v3216_v24  ;;  %v14205_v0 = vpop.f32.mrf.mxu2 }
 0x34d   :  { %10477 = vmatmul.msk.f32.gmra.mxu1 %vm587_vm0, %v12421_v36  ;;  %v14207_v34 = vpop.f32.mrf.mxu3 }
 0x350   :  { %10779 = vmatpush.xpose.msk.msra.mxu3 %vm1499_vm1, %v14073_v43  ;;  %v14215_v36 = vpop.f32.mrf.mxu1  ;;  %v18905_v43 = vld [vmem:[#allocation21_spill] sm:$0xff] }
 0x351   :  { %18904 = vst [vmem:[#allocation127_spill] sm:$0xff] %v14215_v36  ;;  %v18907_v36 = vld [vmem:[#allocation23_spill] sm:$0xff] }
 0x352   :  { %3633 = vrot.lane.b32.xlu2 %v1472_v22, %s12239_s5 }
 0x353   :  { %v14210_v51 = vpop.permute.xlu1 %3347  ;;  %v3293_v24 = vpop.permute.xlu0 %3292 }
 0x354   :  { %v3356_v20 = vpop.permute.xlu2 %3355  ;;  %10780 = vmatpush.xpose.msk.msra.mxu3 %vm1499_vm1, %v14122_v31  ;;  %10784 = vmatpush.xpose.msk.msrb.mxu2 %vm1499_vm1, %v3293_v24  ;;  %v14228_v24 = vpop.f32.mrf.mxu2 }
 0x355   :  { %10478 = vmatmul.msk.f32.gmra.mxu1 %vm587_vm0, %v18905_v43  ;;  %v14230_v43 = vpop.f32.mrf.mxu3 }
 0x358   :  { %10781 = vmatpush.xpose.msk.msra.mxu3 %vm1499_vm1, %v14096_v32  ;;  %10785 = vmatpush.xpose.msk.msrb.mxu2 %vm1499_vm1, %v3291_v4  ;;  %v14225_v31 = vpop.f32.mrf.mxu1 }
 0x359   :  { %18906 = vst [vmem:[#allocation21_spill] sm:$0xff] %v14225_v31 }
 0x35b   :  { %v3354_v12 = vpop.permute.xlu1 %3353  ;;  %v3352_v22 = vpop.permute.xlu0 %3351  ;;  %10782 = vmatmul.msk.f32.vlgmr.msra.gmra.mxu3 %vm1499_vm1, %v13768_v37 }
 0x35c   :  { %v3362_v60 = vpop.permute.xlu2 %3361  ;;  %10786 = vmatpush.xpose.msk.msrb.mxu2 %vm1499_vm1, %v3289_v23  ;;  %v14244_v23 = vpop.f32.mrf.mxu2 }
 0x35d   :  { %10794 = vmatpush.xpose.msk.msrb.mxu3 %vm1499_vm1, %v3362_v60  ;;  %10479 = vmatmul.msk.f32.gmra.mxu1 %vm587_vm0, %v18907_v36  ;;  %v14246_v31 = vpop.f32.mrf.mxu3  ;;  %v18909_v36 = vld [vmem:[#allocation25_spill] sm:$0xff] }
 0x360   :  { %10787 = vmatpush.xpose.msk.msrb.mxu2 %vm1499_vm1, %v3287_v18  ;;  %v14242_v60 = vpop.f32.mrf.mxu1 }
 0x361   :  { %18908 = vst [vmem:[#allocation23_spill] sm:$0xff] %v14242_v60  ;;  %v18911_v60 = vld [vmem:[#allocation27_spill] sm:$0xff] }
 0x363   :  { %v3360_v32 = vpop.permute.xlu1 %3359  ;;  %v3358_v4 = vpop.permute.xlu0 %3357  ;;  %10783 = vmatmul.msk.f32.gmra.mxu3 %vm1499_vm1, %v13788_v55 }
 0x364   :  { %v14237_v37 = vpop.permute.xlu2 %3420  ;;  %10788 = vmatpush.xpose.msk.msrb.mxu2 %vm1499_vm1, %v14154_v11  ;;  %10795 = vmatpush.xpose.msk.msrb.mxu3 %vm1499_vm1, %v3360_v32  ;;  %v14262_v27 = vpop.f32.mrf.mxu2 }
 0x365   :  { %10480 = vmatmul.msk.f32.gmra.mxu1 %vm587_vm0, %v18909_v36  ;;  %v14264_v36 = vpop.f32.mrf.mxu3 }
 0x368   :  { %10789 = vmatpush.xpose.msk.msrb.mxu2 %vm1499_vm1, %v3283_v13  ;;  %10796 = vmatpush.xpose.msk.msrb.mxu3 %vm1499_vm1, %v3358_v4  ;;  %v14258_v32 = vpop.f32.mrf.mxu1  ;;  %v3691_v13 = vsel %vm3684_vm2, %v13989_v6, -inf  ;;  %v3688_v4 = vsel %vm3684_vm2, %v14016_v9, -inf }
 0x369   :  { %18910 = vst [vmem:[#allocation25_spill] sm:$0xff] %v14258_v32 }
 0x36b   :  { %v14252_v18 = vpop.permute.xlu1 %3418  ;;  %v14254_v55 = vpop.permute.xlu0 %3416 }
 0x36c   :  { %v3427_v11 = vpop.permute.xlu2 %3426  ;;  %10790 = vmatpush.xpose.msk.msrb.mxu2 %vm1499_vm1, %v3281_v8  ;;  %10797 = vmatpush.xpose.msk.msrb.mxu3 %vm1499_vm1, %v3356_v20  ;;  %v14282_v32 = vpop.f32.mrf.mxu2 }
 0x36d   :  { %10481 = vmatmul.msk.f32.gmra.mxu1 %vm587_vm0, %v18911_v60  ;;  %v14284_v42 = vpop.f32.mrf.mxu3 }
 0x370   :  { %10791 = vmatpush.xpose.msk.msrb.mxu2 %vm1499_vm1, %v14129_v38  ;;  %10798 = vmatpush.xpose.msk.msrb.mxu3 %vm1499_vm1, %v3354_v12  ;;  %v14278_v38 = vpop.f32.mrf.mxu1  ;;  %v18913_v12 = vld [vmem:[#allocation29_spill] sm:$0xff] }
 0x371   :  { %18912 = vst [vmem:[#allocation27_spill] sm:$0xff] %v14278_v38  ;;  %v3700_v38 = vsel %vm3684_vm2, %v14077_v29, -inf }
 0x373   :  { %v3425_v8 = vpop.permute.xlu1 %3424  ;;  %v3423_v20 = vpop.permute.xlu0 %3422  ;;  %3692 = vmax.xlane.f32.xlu1 %v3691_v13  ;;  %10792 = vmatmul.msk.f32.vlgmr.msrb.gmra.mxu2 %vm1499_vm1, %v13825_v14  ;;  %v3685_v13 = vsel %vm3684_vm2, %v13983_v30, -inf }
 0x374   :  { %3689 = vmax.xlane.f32.xlu0 %v3688_v4  ;;  %v14275_v60 = vpop.permute.xlu2 %3485  ;;  %10799 = vmatpush.xpose.msk.msrb.mxu3 %vm1499_vm1, %v3352_v22  ;;  %v3703_v4 = vsel %vm3684_vm2, %v14045_v56, -inf }
 0x375   :  { %10482 = vmatmul.msk.f32.gmra.mxu1 %vm587_vm0, %v18913_v12 }
 0x378   :  { %10800 = vmatpush.xpose.msk.msrb.mxu3 %vm1499_vm1, %v14194_v7 }
 0x379   :  { %v14301_v7 = vpop.f32.mrf.mxu1 }
 0x37a   :  { %18914 = vst [vmem:[#allocation29_spill] sm:$0xff] %v14301_v7 }
 0x37b   :  { %3686 = vmax.xlane.f32.xlu2 %v3685_v13  ;;  %v3431_v22 = vpop.permute.xlu1 %3430  ;;  %v3429_v14 = vpop.permute.xlu0 %3428  ;;  %3704 = vmax.xlane.f32.xlu1 %v3703_v4  ;;  %v4071_v13 = vld [vmem:[#allocation11 + $0x10] sm:$0xff] }
 0x37c   :  { %3701 = vmax.xlane.f32.xlu0 %v3700_v38  ;;  %10793 = vmatmul.msk.f32.gmra.mxu2 %vm1499_vm1, %v13828_v62  ;;  %v14296_v12 = vpop.permute.xlu2 %3491  ;;  %v14308_v38 = vpop.f32.mrf.mxu2 }
 0x37d   :  { %10801 = vmatpush.xpose.msk.msrb.mxu3 %vm1499_vm1, %v14210_v51  ;;  %10804 = vmatpush.xpose.msk.msra.mxu2 %vm1499_vm1, %v3431_v22  ;;  %v14310_v4 = vpop.f32.mrf.mxu3  ;;  %v3694_v51 = vsel %vm3684_vm2, %v14020_v40, -inf  ;;  %v3712_v22 = vsel %vm3684_vm2, %v14137_v39, -inf }
 0x37e   :  { %4282 = vmatpush.msrb.mxu0 %v4071_v13  ;;  %10483 = vmatmul.msk.f32.gmra.mxu1 %vm587_vm0, %v18915_v49  ;;  %v3709_v49 = vsel %vm3684_vm2, %v14101_v46, -inf }
 0x380   :  { %10802 = vmatmul.msk.f32.vlgmr.msrb.gmra.mxu3 %vm1499_vm1, %v13868_v44  ;;  %v18916_v44 = vld [vmem:[#allocation32_spill] sm:$0xff] }
 0x381   :  { %10805 = vmatpush.xpose.msk.msra.mxu2 %vm1499_vm1, %v3429_v14  ;;  %v14325_v62 = vpop.f32.mrf.mxu1 }
 0x383   :  { %3695 = vmax.xlane.f32.xlu2 %v3694_v51  ;;  %v14316_v13 = vpop.permute.xlu1 %3489  ;;  %v14318_v7 = vpop.permute.xlu0 %3487  ;;  %3713 = vmax.xlane.f32.xlu1 %v3712_v22  ;;  %v3697_v22 = vsel %vm3684_vm2, %v14043_v35, -inf }
 0x384   :  { %3710 = vmax.xlane.f32.xlu0 %v3709_v49  ;;  %v3498_v14 = vpop.permute.xlu2 %3497  ;;  %v14330_v51 = vpop.f32.mrf.mxu2 }
 0x385   :  { %10806 = vmatpush.xpose.msk.msra.mxu2 %vm1499_vm1, %v3427_v11  ;;  %v14332_v28 = vpop.f32.mrf.mxu3  ;;  %v3721_v11 = vsel %vm3684_vm2, %v14161_v45, -inf }
 0x386   :  { %10484 = vmatmul.msk.f32.gmra.mxu1 %vm587_vm0, %v18916_v44 }
 0x388   :  { %10803 = vmatmul.msk.f32.gmra.mxu3 %vm1499_vm1, %v13888_v5 }
 0x389   :  { %10807 = vmatpush.xpose.msk.msra.mxu2 %vm1499_vm1, %v3425_v8  ;;  %v18917_v8 = vld [vmem:[#allocation34_spill] sm:$0xff]  ;;  %v14347_v33 = vpop.f32.mrf.mxu1 }
 0x38b   :  { %3698 = vmax.xlane.f32.xlu2 %v3697_v22  ;;  %v3496_v49 = vpop.permute.xlu1 %3495  ;;  %v3494_v44 = vpop.permute.xlu0 %3493  ;;  %3722 = vmax.xlane.f32.xlu1 %v3721_v11  ;;  %v3706_v22 = vsel %vm3684_vm2, %v14080_v21, -inf }
 0x38c   :  { %3719 = vmax.xlane.f32.xlu0 %v3718_v15  ;;  %v14340_v5 = vpop.permute.xlu2 %3556  ;;  %v14357_v1 = vpop.f32.mrf.mxu2 }
 0x38d   :  { %10808 = vmatpush.xpose.msk.msra.mxu2 %vm1499_vm1, %v3423_v20  ;;  %v3727_v20 = vsel %vm3684_vm2, %v14163_v10, -inf }
 0x38e   :  { %10485 = vmatmul.msk.f32.gmra.mxu1 %vm587_vm0, %v18917_v8 }
 0x391   :  { %10809 = vmatpush.xpose.msk.msra.mxu2 %vm1499_vm1, %v14237_v37  ;;  %v14359_v37 = vpop.f32.mrf.mxu3 }
 0x393   :  { %3707 = vmax.xlane.f32.xlu2 %v3706_v22  ;;  %v14353_v15 = vpop.permute.xlu1 %3554  ;;  %3731 = vmax.xlane.f32.xlu1 %v3730_v47  ;;  %v3715_v47 = vsel %vm3684_vm2, %v14103_v57, -inf  ;;  %v3739_v22 = vsel %vm3684_vm2, %v14207_v34, -inf }
 0x394   :  { %v3500_v11 = vpop.permute.xlu0 %3499  ;;  %3728 = vmax.xlane.f32.xlu0 %v3727_v20  ;;  %v3563_v8 = vpop.permute.xlu2 %3562 }
 0x395   :  { %10810 = vmatpush.xpose.msk.msra.mxu2 %vm1499_vm1, %v14252_v18  ;;  %10814 = vmatpush.xpose.msk.msra.mxu3 %vm1499_vm1, %v3500_v11  ;;  %v3736_v18 = vsel %vm3684_vm2, %v14228_v24, -inf  ;;  %v14375_v11 = vpop.f32.mrf.mxu1 }
 0x396   :  { %10486 = vmatmul.msk.f32.gmra.mxu1 %vm587_vm0, %v18918_v61  ;;  %18919 = vst [vmem:[#allocation31_spill] sm:$0xff] %v14375_v11 }
 0x399   :  { %10811 = vmatpush.xpose.msk.msra.mxu2 %vm1499_vm1, %v14254_v55  ;;  %10815 = vmatpush.xpose.msk.msra.mxu3 %vm1499_vm1, %v3498_v14  ;;  %v14379_v14 = vpop.f32.mrf.mxu2  ;;  %v14381_v2 = vpop.f32.mrf.mxu3 }
 0x39b   :  { %3716 = vmax.xlane.f32.xlu2 %v3715_v47  ;;  %v3561_v20 = vpop.permute.xlu1 %3560  ;;  %3740 = vmax.xlane.f32.xlu1 %v3739_v22  ;;  %v18920_v47 = vld [vmem:[#allocation38_spill] sm:$0xff]  ;;  %v3724_v22 = vsel %vm3684_vm2, %v14188_v19, -inf }
 0x39c   :  { %v3559_v61 = vpop.permute.xlu0 %3558  ;;  %3737 = vmax.xlane.f32.xlu0 %v3736_v18  ;;  %10812 = vmatmul.msk.f32.vlgmr.msra.gmra.mxu2 %vm1499_vm1, %v13933_v41  ;;  %v3569_v55 = vpop.permute.xlu2 %3568  ;;  %v3748_v18 = vsel %vm3684_vm2, %v14262_v27, -inf  ;;  %v3745_v41 = vsel %vm3684_vm2, %v14244_v23, -inf }
 0x39d   :  { %10816 = vmatpush.xpose.msk.msra.mxu3 %vm1499_vm1, %v3496_v49  ;;  %10824 = vmatpush.xpose.msk.msrb.mxu2 %vm1499_vm1, %v3569_v55  ;;  %v18922_v55 = vld [vmem:[#allocation39_spill] sm:$0xff] }
 0x39e   :  { %10487 = vmatmul.msk.f32.gmra.mxu1 %vm587_vm0, %v18920_v47 }
 0x3a1   :  { %10817 = vmatpush.xpose.msk.msra.mxu3 %vm1499_vm1, %v3494_v44  ;;  %v14399_v44 = vpop.f32.mrf.mxu1  ;;  %v14403_v47 = vpop.f32.mrf.mxu2 }
 0x3a2   :  { %18921 = vst [vmem:[#allocation32_spill] sm:$0xff] %v14399_v44 }
 0x3a3   :  { %3725 = vmax.xlane.f32.xlu2 %v3724_v22  ;;  %v3567_v11 = vpop.permute.xlu1 %3566  ;;  %3749 = vmax.xlane.f32.xlu1 %v3748_v18  ;;  %v14405_v22 = vpop.f32.mrf.mxu3  ;;  %v3754_v18 = vsel %vm3684_vm2, %v14264_v36, -inf }
 0x3a4   :  { %v3565_v49 = vpop.permute.xlu0 %3564  ;;  %3746 = vmax.xlane.f32.xlu0 %v3745_v41  ;;  %10813 = vmatmul.msk.f32.gmra.mxu2 %vm1499_vm1, %v13936_v52  ;;  %v3733_v41 = vsel %vm3684_vm2, %v14205_v0, -inf  ;;  %v18929_v52 = vld [vmem:[#allocation45_spill] sm:$0xff] }
 0x3a5   :  { %10818 = vmatpush.xpose.msk.msra.mxu3 %vm1499_vm1, %v14296_v12  ;;  %10825 = vmatpush.xpose.msk.msrb.mxu2 %vm1499_vm1, %v3567_v11  ;;  %v3757_v12 = vsel %vm3684_vm2, %v14282_v32, -inf }
 0x3a6   :  { %10488 = vmatmul.msk.f32.gmra.mxu1 %vm587_vm0, %v18922_v55 }
 0x3a9   :  { %10819 = vmatpush.xpose.msk.msra.mxu3 %vm1499_vm1, %v14316_v13  ;;  %10826 = vmatpush.xpose.msk.msrb.mxu2 %vm1499_vm1, %v3565_v49  ;;  %v18923_v13 = vld [vmem:[#allocation41_spill] sm:$0xff]  ;;  %v14425_v49 = vpop.f32.mrf.mxu2  ;;  %v14429_v44 = vpop.f32.mrf.mxu1 }
 0x3aa   :  { %18925 = vst [vmem:[#allocation36_spill] sm:$0xff] %v14429_v44 }
 0x3ab   :  { %3734 = vmax.xlane.f32.xlu2 %v3733_v41  ;;  %v14414_v11 = vpop.permute.xlu1 %3625  ;;  %3758 = vmax.xlane.f32.xlu1 %v3757_v12  ;;  %v14427_v41 = vpop.f32.mrf.mxu3  ;;  %v3742_v12 = vsel %vm3684_vm2, %v14230_v43, -inf }
 0x3ac   :  { %v14418_v55 = vpop.permute.xlu0 %3623  ;;  %3755 = vmax.xlane.f32.xlu0 %v3754_v18  ;;  %18924 = vst [vmem:[#allocation34_spill] sm:$0xff] %v14427_v41  ;;  %v3763_v18 = vsel %vm3684_vm2, %v14284_v42, -inf }
 0x3ad   :  { %10820 = vmatpush.xpose.msk.msra.mxu3 %vm1499_vm1, %v14318_v7  ;;  %10827 = vmatpush.xpose.msk.msrb.mxu2 %vm1499_vm1, %v3563_v8  ;;  %v3766_v7 = vsel %vm3684_vm2, %v14310_v4, -inf }
 0x3ae   :  { %10489 = vmatmul.msk.f32.gmra.mxu1 %vm587_vm0, %v18923_v13 }
 0x3b1   :  { %10821 = vmatpush.xpose.msk.msra.mxu3 %vm1499_vm1, %v14275_v60  ;;  %10828 = vmatpush.xpose.msk.msrb.mxu2 %vm1499_vm1, %v3561_v20  ;;  %v18926_v20 = vld [vmem:[#allocation43_spill] sm:$0xff]  ;;  %v14445_v13 = vpop.f32.mrf.mxu2 }
 0x3b3   :  { %3743 = vmax.xlane.f32.xlu2 %v3742_v12  ;;  %v3632_v8 = vpop.permute.xlu1 %3631  ;;  %3767 = vmax.xlane.f32.xlu1 %v3766_v7  ;;  %v14447_v44 = vpop.f32.mrf.mxu3  ;;  %v3751_v7 = vsel %vm3684_vm2, %v14246_v31, -inf }
 0x3b4   :  { %3764 = vmax.xlane.f32.xlu0 %v3763_v18  ;;  %10822 = vmatmul.msk.f32.vlgmr.msra.gmra.mxu3 %vm1499_vm1, %v13998_v54  ;;  %v3630_v60 = vpop.permute.xlu0 %3629  ;;  %18927 = vst [vmem:[#allocation38_spill] sm:$0xff] %v14447_v44  ;;  %v3628_v12 = vpop.permute.xlu2 %3627  ;;  %v3775_v18 = vsel %vm3684_vm2, %v14332_v28, -inf }
 0x3b5   :  { %10829 = vmatpush.xpose.msk.msrb.mxu2 %vm1499_vm1, %v3559_v61  ;;  %v14455_v54 = vpop.f32.mrf.mxu1 }
 0x3b6   :  { %10490 = vmatmul.msk.f32.gmra.mxu1 %vm587_vm0, %v18926_v20  ;;  %18928 = vst [vmem:[#allocation39_spill] sm:$0xff] %v14455_v54  ;;  %v3772_v20 = vsel %vm3684_vm2, %v14357_v1, -inf }
 0x3b9   :  { %10830 = vmatpush.xpose.msk.msrb.mxu2 %vm1499_vm1, %v14340_v5  ;;  %v4070_v5 = vld [vmem:[#allocation11 + $0x8] sm:$0xff]  ;;  %v14468_v54 = vpop.f32.mrf.mxu2 }
 0x3ba   :  { %4283 = vmatpush.msrb.mxu0 %v4070_v5  ;;  %18930 = vst [vmem:[#allocation41_spill] sm:$0xff] %v14468_v54 }
 0x3bb   :  { %3752 = vmax.xlane.f32.xlu2 %v3751_v7  ;;  %v3638_v61 = vpop.permute.xlu1 %3637  ;;  %3776 = vmax.xlane.f32.xlu1 %v3775_v18  ;;  %v14470_v18 = vpop.f32.mrf.mxu3 }
 0x3bc   :  { %3773 = vmax.xlane.f32.xlu0 %v3772_v20  ;;  %10823 = vmatmul.msk.f32.gmra.mxu3 %vm1499_vm1, %v14001_v58  ;;  %v3636_v7 = vpop.permute.xlu0 %3635  ;;  %18931 = vst [vmem:[#allocation43_spill] sm:$0xff] %v14470_v18  ;;  %v3760_v20 = vsel %vm3684_vm2, %v14308_v38, -inf }
 0x3bd   :  { %10831 = vmatpush.xpose.msk.msrb.mxu2 %vm1499_vm1, %v14353_v15  ;;  %10834 = vmatpush.xpose.msk.msrb.mxu3 %vm1499_vm1, %v3638_v61  ;;  %v3784_v15 = vsel %vm3684_vm2, %v14403_v47, -inf  ;;  %v3634_v61 = vpop.permute.xlu2 %3633  ;;  %v14479_v5 = vpop.f32.mrf.mxu1 }
 0x3be   :  { %10491 = vmatmul.msk.f32.gmra.mxu1 %vm587_vm0, %v18929_v52  ;;  %v3781_v52 = vsel %vm3684_vm2, %v14379_v14, -inf  ;;  %18932 = vst [vmem:[#allocation45_spill] sm:$0xff] %v14479_v5  ;;  %v3778_v5 = vsel %vm3684_vm2, %v14359_v37, -inf }
 0x3c0   :  { %10832 = vmatmul.msk.f32.vlgmr.msrb.gmra.mxu2 %vm1499_vm1, %v14049_v25  ;;  %v18933_v25 = vld [vmem:[#allocation46_spill] sm:$0xff] }
 0x3c1   :  { %10835 = vmatpush.xpose.msk.msrb.mxu3 %vm1499_vm1, %v3636_v7  ;;  %v3769_v7 = vsel %vm3684_vm2, %v14330_v51, -inf }
 0x3c3   :  { %3761 = vmax.xlane.f32.xlu2 %v3760_v20  ;;  %3785 = vmax.xlane.f32.xlu1 %v3784_v15  ;;  %v3793_v20 = vsel %vm3684_vm2, %v14425_v49, -inf  ;;  %v14491_v15 = vpop.f32.mrf.mxu2 }
 0x3c4   :  { %3782 = vmax.xlane.f32.xlu0 %v3781_v52  ;;  %18934 = vst [vmem:[#allocation46_spill] sm:$0xff] %v14491_v15  ;;  %v14493_v52 = vpop.f32.mrf.mxu3 }
 0x3c5   :  { %10836 = vmatpush.xpose.msk.msrb.mxu3 %vm1499_vm1, %v3634_v61  ;;  %18935 = vst [vmem:[#allocation128_spill] sm:$0xff] %v14493_v52  ;;  %v3790_v61 = vsel %vm3684_vm2, %v14405_v22, -inf }
 0x3c6   :  { %10492 = vmatmul.msk.f32.gmra.mxu1 %vm587_vm0, %v18933_v25  ;;  %v14498_v25 = vpop.f32.mrf.mxu1 }
 0x3c7   :  { %18936 = vst [vmem:[#allocation129_spill] sm:$0xff] %v14498_v25 }
 0x3c8   :  { %10833 = vmatmul.msk.f32.gmra.mxu2 %vm1499_vm1, %v14069_v59 }
 0x3c9   :  { %10837 = vmatpush.xpose.msk.msrb.mxu3 %vm1499_vm1, %v3632_v8  ;;  %v18937_v8 = vld [vmem:[#allocation48_spill] sm:$0xff] }
 0x3cb   :  { %3770 = vmax.xlane.f32.xlu2 %v3769_v7  ;;  %3794 = vmax.xlane.f32.xlu1 %v3793_v20  ;;  %v3802_v7 = vsel %vm3684_vm2, %v14447_v44, -inf  ;;  %v14507_v59 = vpop.f32.mrf.mxu2  ;;  %v11983_v20 = vld [vmem:[#allocation10] sm:$0x3] }
 0x3cc   :  { %3791 = vmax.xlane.f32.xlu0 %v3790_v61  ;;  %18938 = vst [vmem:[#allocation48_spill] sm:$0xff] %v14507_v59  ;;  %v14509_v58 = vpop.f32.mrf.mxu3  ;;  %v14513_v61 = vperm.slane %v11983_v20, 1  ;;  %v3808_v20 = vsel %vm3684_vm2, %v14491_v15, -inf }
 0x3cd   :  { %10838 = vmatpush.xpose.msk.msrb.mxu3 %vm1499_vm1, %v3630_v60  ;;  %18939 = vst [vmem:[#allocation130_spill] sm:$0xff] %v14509_v58  ;;  %v3799_v60 = vsel %vm3684_vm2, %v14427_v41, -inf }
 0x3ce   :  { %10493 = vmatmul.msk.f32.gmra.mxu1 %vm587_vm0, %v18937_v8  ;;  %18940 = vst [vmem:[#allocation131_spill] sm:$0xff] %v14513_v61  ;;  %v14519_v8 = vpop.f32.mrf.mxu1  ;;  %v1010_v25 = vadd.f32 %v14197_v26, %v14513_v61 }
 0x3d1   :  { %10839 = vmatpush.xpose.msk.msrb.mxu3 %vm1499_vm1, %v3628_v12  ;;  %v18941_v12 = vld [vmem:[#allocation50_spill] sm:$0xff] }
 0x3d2   :  { %18942 = vst [vmem:[#allocation50_spill] sm:$0xff] %v14519_v8 }
 0x3d3   :  { %3779 = vmax.xlane.f32.xlu2 %v3778_v5  ;;  %3803 = vmax.xlane.f32.xlu1 %v3802_v7  ;;  %v4069_v5 = vld [vmem:[#allocation11] sm:$0xff]  ;;  %v3787_v7 = vsel %vm3684_vm2, %v14381_v2, -inf  ;;  %v14535_v26 = vpop.f32.mrf.mxu2 }
 0x3d4   :  { %3800 = vmax.xlane.f32.xlu0 %v3799_v60  ;;  %v3811_v60 = vsel %vm3684_vm2, %v14470_v18, -inf  ;;  %4284 = vmatpush.msrb.mxu0 %v4069_v5  ;;  %18943 = vst [vmem:[#allocation132_spill] sm:$0xff] %v14535_v26  ;;  %v3820_v5 = vsel %vm3684_vm2, %v14535_v26, -inf }
 0x3d5   :  { %10840 = vmatpush.xpose.msk.msrb.mxu3 %vm1499_vm1, %v14414_v11  ;;  %v1007_v11 = vadd.f32 %v14176_v50, %v14513_v61  ;;  %v3796_v50 = vsel %vm3684_vm2, %v14445_v13, -inf }
 0x3d6   :  { %10494 = vmatmul.msk.f32.gmra.mxu1 %vm587_vm0, %v18941_v12  ;;  %9012 = vmatpush.msra.mxu0 %v1010_v25  ;;  %v18945_v12 = vld [vmem:[#allocation52_spill] sm:$0xff] }
 0x3d8   :  { %9013 = vmatpush.msra.mxu0 %v1007_v11 }
 0x3d9   :  { %10841 = vmatpush.xpose.msk.msrb.mxu3 %vm1499_vm1, %v14418_v55  ;;  %v14537_v55 = vpop.f32.mrf.mxu3 }
 0x3da   :  { %18944 = vst [vmem:[#allocation133_spill] sm:$0xff] %v14537_v55 }
 0x3db   :  { %3788 = vmax.xlane.f32.xlu2 %v3787_v7  ;;  %3812 = vmax.xlane.f32.xlu1 %v3811_v60  ;;  %v14545_v7 = vpop.f32.mrf.mxu1  ;;  %v3817_v60 = vsel %vm3684_vm2, %v14507_v59, -inf  ;;  %v14551_v25 = vpop.f32.mrf.mxu2 }
 0x3dc   :  { %3809 = vmax.xlane.f32.xlu0 %v3808_v20  ;;  %10842 = vmatmul.msk.f32.vlgmr.msrb.gmra.mxu3 %vm1499_vm1, %v14127_v16  ;;  %18946 = vst [vmem:[#allocation52_spill] sm:$0xff] %v14545_v7  ;;  %v18949_v20 = vld [vmem:[#allocation53_spill] sm:$0xff]  ;;  %v18951_v7 = vld [vmem:[#allocation55_spill] sm:$0xff] }
 0x3dd   :  { %18947 = vst [vmem:[#allocation134_spill] sm:$0xff] %v14551_v25 }
 0x3de   :  { %10495 = vmatmul.msk.f32.gmra.mxu1 %vm587_vm0, %v18945_v12  ;;  %v3805_v12 = vsel %vm3684_vm2, %v14468_v54, -inf }
 0x3e1   :  { %v14553_v11 = vpop.f32.mrf.mxu3 }
 0x3e2   :  { %18948 = vst [vmem:[#allocation135_spill] sm:$0xff] %v14553_v11 }
 0x3e3   :  { %3797 = vmax.xlane.f32.xlu2 %v3796_v50  ;;  %3821 = vmax.xlane.f32.xlu1 %v3820_v5  ;;  %v3829_v50 = vsel %vm3684_vm2, %v14551_v25, -inf  ;;  %v3826_v5 = vsel %vm3684_vm2, %v14537_v55, -inf }
 0x3e4   :  { %3818 = vmax.xlane.f32.xlu0 %v3817_v60  ;;  %10843 = vmatmul.msk.f32.gmra.mxu3 %vm1499_vm1, %v14120_v3  ;;  %v14563_v60 = vpop.f32.mrf.mxu1  ;;  %v14567_v3 = vpop.f32.mrf.mxu2 }
 0x3e5   :  { %18950 = vst [vmem:[#allocation53_spill] sm:$0xff] %v14563_v60 }
 0x3e6   :  { %10496 = vmatmul.msk.f32.gmra.mxu1 %vm587_vm0, %v18949_v20  ;;  %18952 = vst [vmem:[#allocation55_spill] sm:$0xff] %v14567_v3 }
 0x3e7   :  { %v3690_v26 = vpop.xlane.xlu0 %3689 }
 0x3e9   :  { %v14569_v20 = vpop.f32.mrf.mxu3 }
 0x3ea   :  { %18953 = vst [vmem:[#allocation136_spill] sm:$0xff] %v14569_v20 }
 0x3eb   :  { %3806 = vmax.xlane.f32.xlu2 %v3805_v12  ;;  %3830 = vmax.xlane.f32.xlu1 %v3829_v50  ;;  %v3814_v12 = vsel %vm3684_vm2, %v14493_v52, -inf  ;;  %v3838_v50 = vsel %vm3684_vm2, %v14569_v20, -inf  ;;  %v3693_v20 = vpop.xlane.xlu1 %3692 }
 0x3ec   :  { %3827 = vmax.xlane.f32.xlu0 %v3826_v5  ;;  %v3878_v5 = vsub.f32 %v14016_v9, %v3690_v26  ;;  %v14579_v60 = vpop.f32.mrf.mxu1  ;;  %v1031_v26 = vadd.f32 %v14325_v62, %v14513_v61 }
 0x3ed   :  { %18954 = vst [vmem:[#allocation137_spill] sm:$0xff] %v14579_v60 }
 0x3ee   :  { %v3687_v8 = vpop.xlane.xlu2 %3686  ;;  %10497 = vmatmul.msk.f32.gmra.mxu1 %vm587_vm0, %v18951_v7  ;;  %v3835_v7 = vsel %vm3684_vm2, %v14553_v11, -inf }
 0x3ef   :  { %v3877_v16 = vsub.f32 %v13983_v30, %v3687_v8  ;;  %v18955_v30 = vld [vmem:[#allocation57_spill] sm:$0xff]  ;;  %v3943_v8 = vmul.f32 1.442695, %v3878_v5 }
 0x3f1   :  { %v3941_v25 = vmul.f32 1.442695, %v3877_v16  ;;  %v1034_v16 = vadd.f32 %v14347_v33, %v14513_v61 }
 0x3f3   :  { %11727 = vpow2.f32 %v3941_v25  ;;  %3815 = vmax.xlane.f32.xlu2 %v3814_v12  ;;  %3839 = vmax.xlane.f32.xlu1 %v3838_v50  ;;  %v3823_v25 = vsel %vm3684_vm2, %v14509_v58, -inf  ;;  %v3879_v12 = vsub.f32 %v13989_v6, %v3693_v20  ;;  %v18957_v50 = vld [vmem:[#allocation59_spill] sm:$0xff]  ;;  %v3832_v6 = vsel %vm3684_vm2, %v14567_v3, -inf }
 0x3f4   :  { %3836 = vmax.xlane.f32.xlu0 %v3835_v7  ;;  %11729 = vpow2.f32 %v3943_v8 }
 0x3f5   :  { %v3945_v5 = vmul.f32 1.442695, %v3879_v12 }
 0x3f6   :  { %10498 = vmatmul.msk.f32.gmra.mxu1 %vm587_vm0, %v18955_v30  ;;  %v14585_v55 = vpop.f32.mrf.mxu2  ;;  %v3696_v33 = vpop.xlane.xlu2 %3695 }
 0x3f7   :  { %18956 = vst [vmem:[#allocation57_spill] sm:$0xff] %v14585_v55  ;;  %v14602_v30 = vpop.f32.mrf.mxu1  ;;  %11731 = vpow2.f32 %v3945_v5  ;;  %v3880_v20 = vsub.f32 %v14020_v40, %v3696_v33  ;;  %v3841_v40 = vsel %vm3684_vm2, %v14585_v55, -inf  ;;  %v18981_v55 = vld [vmem:[#allocation20_spill] sm:$0xff] }
 0x3f8   :  { %18959 = vst [vmem:[#allocation138_spill] sm:$0xff] %v14602_v30 }
 0x3f9   :  { %v14587_v9 = vpop.eup %11727  ;;  %v3947_v12 = vmul.f32 1.442695, %v3880_v20 }
 0x3fa   :  { %10844 = vmatmul.msk.f32.vlgmr.msrb.gmra.mxu0 %vm3684_vm2, %v14587_v9  ;;  %v14604_v60 = vpop.eup %11729 }
 0x3fb   :  { %3824 = vmax.xlane.f32.xlu2 %v3823_v25  ;;  %9136 = vmatpush.msrb.mxu0 %v1034_v16  ;;  %v18961_v25 = vld [vmem:[#allocation60_spill] sm:$0xff]  ;;  %11733 = vpow2.f32 %v3947_v12 }
 0x3fd   :  { %9137 = vmatpush.msrb.mxu0 %v1031_v26  ;;  %v3705_v26 = vpop.xlane.xlu1 %3704 }
 0x3fe   :  { %10499 = vmatmul.msk.f32.gmra.mxu1 %vm587_vm0, %v18957_v50  ;;  %v3699_v50 = vpop.xlane.xlu2 %3698 }
 0x3ff   :  { %v14598_v7 = vpop.f32.mrf.mxu2  ;;  %v14621_v5 = vpop.f32.mrf.mxu1  ;;  %v3881_v33 = vsub.f32 %v14043_v35, %v3699_v50  ;;  %v18966_v50 = vld [vmem:[#allocation64_spill] sm:$0xff] }
 0x400   :  { %18958 = vst [vmem:[#allocation59_spill] sm:$0xff] %v14598_v7  ;;  %v3844_v62 = vsel %vm3684_vm2, %v14598_v7, -inf }
 0x401   :  { %3845 = vmax.xlane.f32.xlu0 %v3844_v62  ;;  %v14617_v62 = vpop.eup %11731  ;;  %18962 = vst [vmem:[#allocation60_spill] sm:$0xff] %v14621_v5 }
 0x402   :  { %10845 = vmatmul.msk.f32.gmra.mxu0 %vm3684_vm2, %v14604_v60  ;;  %v14630_v61 = vpop.eup %11733 }
 0x403   :  { %3833 = vmax.xlane.f32.xlu2 %v3832_v6  ;;  %v14611_v16 = vpop.f32.mrf.mxu3  ;;  %v18963_v6 = vld [vmem:[#allocation62_spill] sm:$0xff] }
 0x404   :  { %18960 = vst [vmem:[#allocation139_spill] sm:$0xff] %v14611_v16  ;;  %v3847_v8 = vsel %vm3684_vm2, %v14611_v16, -inf }
 0x405   :  { %3848 = vmax.xlane.f32.xlu1 %v3847_v8  ;;  %v3949_v8 = vmul.f32 1.442695, %v3881_v33  ;;  %v3714_v30 = vpop.xlane.xlu1 %3713 }
 0x406   :  { %10500 = vmatmul.msk.f32.gmra.mxu1 %vm587_vm0, %v18961_v25  ;;  %v3702_v25 = vpop.xlane.xlu0 %3701 }
 0x407   :  { %v3882_v12 = vsub.f32 %v14077_v29, %v3702_v25  ;;  %11735 = vpow2.f32 %v3949_v8  ;;  %v14637_v35 = vpop.f32.mrf.mxu1  ;;  %v18968_v29 = vld [vmem:[#allocation66_spill] sm:$0xff]  ;;  %v3708_v25 = vpop.xlane.xlu2 %3707 }
 0x408   :  { %18965 = vst [vmem:[#allocation140_spill] sm:$0xff] %v14637_v35 }
 0x40a   :  { %10846 = vmatmul.msk.f32.gmra.mxu0 %vm3684_vm2, %v14617_v62 }
 0x40b   :  { %3842 = vmax.xlane.f32.xlu2 %v3841_v40  ;;  %v14628_v20 = vpop.f32.mrf.mxu3  ;;  %v3951_v40 = vmul.f32 1.442695, %v3882_v12 }
 0x40c   :  { %18964 = vst [vmem:[#allocation62_spill] sm:$0xff] %v14628_v20  ;;  %v3850_v5 = vsel %vm3684_vm2, %v14628_v20, -inf  ;;  %v3883_v20 = vsub.f32 %v14045_v56, %v3705_v26  ;;  %v3884_v56 = vsub.f32 %v14080_v21, %v3708_v25  ;;  %v18973_v25 = vld [vmem:[#allocation69_spill] sm:$0xff] }
 0x40d   :  { %v14641_v33 = vpop.eup %11735  ;;  %11737 = vpow2.f32 %v3951_v40  ;;  %v18970_v40 = vld [vmem:[#allocation67_spill] sm:$0xff] }
 0x40e   :  { %10501 = vmatmul.msk.f32.gmra.mxu1 %vm587_vm0, %v18963_v6  ;;  %v14643_v6 = vpop.xlane.xlu1 %3722  ;;  %v3711_v35 = vpop.xlane.xlu0 %3710 }
 0x40f   :  { %v14648_v16 = vpop.f32.mrf.mxu1  ;;  %v3885_v21 = vsub.f32 %v14101_v46, %v3711_v35 }
 0x410   :  { %18967 = vst [vmem:[#allocation64_spill] sm:$0xff] %v14648_v16 }
 0x412   :  { %10847 = vmatmul.msk.f32.gmra.mxu0 %vm3684_vm2, %v14630_v61 }
 0x413   :  { %3851 = vmax.xlane.f32.xlu2 %v3850_v5  ;;  %v3953_v5 = vmul.f32 1.442695, %v3883_v20  ;;  %v3955_v20 = vmul.f32 1.442695, %v3884_v56  ;;  %v3957_v56 = vmul.f32 1.442695, %v3885_v21 }
 0x415   :  { %11739 = vpow2.f32 %v3953_v5 }
 0x416   :  { %10502 = vmatmul.msk.f32.gmra.mxu1 %vm587_vm0, %v18966_v50  ;;  %v14656_v50 = vpop.eup %11737  ;;  %v14661_v26 = vpop.xlane.xlu1 %3731  ;;  %11741 = vpow2.f32 %v3955_v20 }
 0x417   :  { %v14667_v16 = vpop.f32.mrf.mxu1  ;;  %11743 = vpow2.f32 %v3957_v56  ;;  %v3717_v20 = vpop.xlane.xlu2 %3716 }
 0x418   :  { %18972 = vst [vmem:[#allocation141_spill] sm:$0xff] %v14667_v16 }
 0x41a   :  { %10848 = vmatmul.msk.f32.gmra.mxu0 %vm3684_vm2, %v14641_v33 }
 0x41e   :  { %10503 = vmatmul.msk.f32.gmra.mxu1 %vm587_vm0, %v18968_v29  ;;  %v14676_v5 = vpop.xlane.xlu1 %3740 }
 0x41f   :  { %v14652_v8 = vpop.f32.mrf.mxu2  ;;  %v14682_v16 = vpop.f32.mrf.mxu1 }
 0x420   :  { %18969 = vst [vmem:[#allocation66_spill] sm:$0xff] %v14652_v8  ;;  %v3853_v12 = vsel %vm3684_vm2, %v14652_v8, -inf  ;;  %v14671_v8 = vpop.eup %11739 }
 0x421   :  { %3854 = vmax.xlane.f32.xlu0 %v3853_v12  ;;  %18974 = vst [vmem:[#allocation69_spill] sm:$0xff] %v14682_v16  ;;  %v18980_v16 = vld [vmem:[#allocation19_spill] sm:$0xff] }
 0x422   :  { %10849 = vmatmul.msk.f32.gmra.mxu0 %vm3684_vm2, %v14656_v50  ;;  %v14706_v11 = vpack.i.bf16 %v18981_v55, %v18980_v16 }
 0x426   :  { %10504 = vmatmul.msk.f32.gmra.mxu1 %vm587_vm0, %v18970_v40  ;;  %v14680_v40 = vpop.eup %11741  ;;  %v14691_v7 = vpop.xlane.xlu1 %3749 }
 0x427   :  { %v14665_v29 = vpop.f32.mrf.mxu2 }
 0x428   :  { %18971 = vst [vmem:[#allocation67_spill] sm:$0xff] %v14665_v29  ;;  %v3856_v12 = vsel %vm3684_vm2, %v14665_v29, -inf  ;;  %v18975_v29 = vld [vmem:[#allocation71_spill] sm:$0xff] }
 0x429   :  { %3857 = vmax.xlane.f32.xlu1 %v3856_v12  ;;  %v3886_v12 = vsub.f32 %v14137_v39, %v3714_v30  ;;  %v3887_v39 = vsub.f32 %v14103_v57, %v3717_v20  ;;  %v14700_v30 = vpop.f32.mrf.mxu1  ;;  %v18984_v20 = vld [vmem:[#allocation74_spill] sm:$0xff] }
 0x42a   :  { %10850 = vmatmul.msk.f32.gmra.mxu0 %vm3684_vm2, %v14671_v8  ;;  %18978 = vst [vmem:[#allocation143_spill] sm:$0xff] %v14700_v30 }
 0x42b   :  { %v3959_v46 = vmul.f32 1.442695, %v3886_v12  ;;  %v3961_v56 = vmul.f32 1.442695, %v3887_v39  ;;  %v3720_v12 = vpop.xlane.xlu0 %3719  ;;  %v3726_v39 = vpop.xlane.xlu2 %3725 }
 0x42c   :  { %v3888_v57 = vsub.f32 %v14139_v17, %v3720_v12  ;;  %v18986_v17 = vld [vmem:[#allocation75_spill] sm:$0xff] }
 0x42d   :  { %11745 = vpow2.f32 %v3959_v46 }
 0x42e   :  { %10505 = vmatmul.msk.f32.gmra.mxu1 %vm587_vm0, %v18973_v25  ;;  %v14695_v25 = vpop.eup %11743  ;;  %11747 = vpow2.f32 %v3961_v56  ;;  %v3963_v55 = vmul.f32 1.442695, %v3888_v57  ;;  %v3890_v57 = vsub.f32 %v14188_v19, %v3726_v39  ;;  %v18991_v19 = vld [vmem:[#allocation79_spill] sm:$0xff] }
 0x42f   :  { %18977 = vst [vmem:[#allocation142_spill] sm:$0xff] %v14695_v25 }
 0x430   :  { %11749 = vpow2.f32 %v3963_v55 }
 0x431   :  { %v14717_v46 = vpop.f32.mrf.mxu1 }
 0x432   :  { %10851 = vmatmul.msk.f32.gmra.mxu0 %vm3684_vm2, %v14680_v40  ;;  %18983 = vst [vmem:[#allocation19_spill] sm:$0xff] %v14717_v46 }
 0x433   :  { %v3735_v55 = vpop.xlane.xlu2 %3734 }
 0x436   :  { %10506 = vmatmul.msk.f32.gmra.mxu1 %vm587_vm0, %v18975_v29  ;;  %v18979_v29 = vld [vmem:[#allocation72_spill] sm:$0xff] }
 0x437   :  { %v14689_v35 = vpop.f32.mrf.mxu3  ;;  %18982 = vst [vmem:[#allocation72_spill] sm:$0xff] %v14706_v11 }
 0x438   :  { %18976 = vst [vmem:[#allocation71_spill] sm:$0xff] %v14689_v35  ;;  %v3859_v21 = vsel %vm3684_vm2, %v14689_v35, -inf  ;;  %v14708_v35 = vpop.eup %11745 }
 0x439   :  { %3860 = vmax.xlane.f32.xlu2 %v3859_v21  ;;  %v14710_v21 = vpop.xlane.xlu1 %3758  ;;  %v14721_v16 = vpop.eup %11747 }
 0x43a   :  { %10852 = vmatmul.msk.f32.gmra.mxu0 %vm3684_vm2, %v14695_v25  ;;  %18985 = vst [vmem:[#allocation20_spill] sm:$0xff] %v14721_v16  ;;  %v14731_v12 = vpop.f32.mrf.mxu1 }
 0x43b   :  { %18987 = vst [vmem:[#allocation74_spill] sm:$0xff] %v14731_v12 }
 0x43e   :  { %10507 = vmatmul.msk.f32.gmra.mxu1 %vm587_vm0, %v18979_v29  ;;  %v3889_v29 = vsub.f32 %v14161_v45, %v14643_v6  ;;  %v18988_v45 = vld [vmem:[#allocation77_spill] sm:$0xff]  ;;  %v3967_v6 = vmul.f32 1.442695, %v3890_v57 }
 0x440   :  { %v3965_v56 = vmul.f32 1.442695, %v3889_v29 }
 0x441   :  { %v14727_v30 = vpop.xlane.xlu1 %3767 }
 0x442   :  { %11182 = vrot.lane.b32.xlu1 %v14706_v11, %s12240_s17  ;;  %10853 = vmatmul.msk.f32.gmra.mxu0 %vm3684_vm2, %v14708_v35  ;;  %11751 = vpow2.f32 %v3965_v56  ;;  %v3729_v11 = vpop.xlane.xlu0 %3728  ;;  %v14744_v29 = vpop.f32.mrf.mxu1 }
 0x443   :  { %18990 = vst [vmem:[#allocation77_spill] sm:$0xff] %v14744_v29  ;;  %v3891_v12 = vsub.f32 %v14163_v10, %v3729_v11  ;;  %11753 = vpow2.f32 %v3967_v6  ;;  %v14749_v56 = vpop.xlane.xlu2 %3743  ;;  %v18993_v10 = vld [vmem:[#allocation81_spill] sm:$0xff] }
 0x445   :  { %v3969_v39 = vmul.f32 1.442695, %v3891_v12  ;;  %v14767_v12 = vpop.f32.mrf.mxu2 }
 0x446   :  { %10508 = vmatmul.msk.f32.gmra.mxu1 %vm587_vm0, %v18984_v20  ;;  %v14733_v20 = vpop.eup %11749  ;;  %18994 = vst [vmem:[#allocation81_spill] sm:$0xff] %v14767_v12 }
 0x447   :  { %11755 = vpow2.f32 %v3969_v39 }
 0x449   :  { %v14738_v46 = vpop.xlane.xlu1 %3776 }
 0x44a   :  { %10854 = vmatmul.msk.f32.gmra.mxu0 %vm3684_vm2, %v14721_v16  ;;  %v14761_v29 = vpop.f32.mrf.mxu1  ;;  %v19008_v16 = vld [vmem:[#allocation88_spill] sm:$0xff] }
 0x44b   :  { %18992 = vst [vmem:[#allocation79_spill] sm:$0xff] %v14761_v29  ;;  %v14765_v6 = vpop.xlane.xlu2 %3752  ;;  %v3738_v29 = vpop.xlane.xlu0 %3737 }
 0x44e   :  { %10509 = vmatmul.msk.f32.gmra.mxu1 %vm587_vm0, %v18986_v17  ;;  %v14742_v17 = vpop.eup %11751 }
 0x44f   :  { %18989 = vst [vmem:[#allocation75_spill] sm:$0xff] %v14742_v17  ;;  %v14755_v57 = vpop.eup %11753 }
 0x451   :  { %v14753_v3 = vpop.xlane.xlu1 %3785 }
 0x452   :  { %10855 = vmatmul.msk.f32.gmra.mxu0 %vm3684_vm2, %v14733_v20  ;;  %v14778_v39 = vpop.f32.mrf.mxu1 }
 0x453   :  { %18996 = vst [vmem:[#allocation145_spill] sm:$0xff] %v14778_v39  ;;  %v14784_v52 = vpop.xlane.xlu2 %3761 }
 0x456   :  { %10510 = vmatmul.msk.f32.gmra.mxu1 %vm587_vm0, %v18988_v45  ;;  %v3892_v45 = vsub.f32 %v14190_v48, %v14661_v26  ;;  %v3893_v48 = vsub.f32 %v14205_v0, %v3735_v55  ;;  %v3865_v26 = vsel %vm3684_vm2, %v14767_v12, -inf  ;;  %v3894_v0 = vsub.f32 %v14228_v24, %v3738_v29 }
 0x457   :  { %v3895_v12 = vsub.f32 %v14207_v34, %v14676_v5 }
 0x458   :  { %v3971_v11 = vmul.f32 1.442695, %v3892_v45  ;;  %v18997_v45 = vld [vmem:[#allocation82_spill] sm:$0xff] }
 0x459   :  { %v14771_v58 = vpop.xlane.xlu1 %3794 }
 0x45a   :  { %10856 = vmatmul.msk.f32.gmra.mxu0 %vm3684_vm2, %v14742_v17  ;;  %11757 = vpow2.f32 %v3971_v11  ;;  %v18999_v11 = vld [vmem:[#allocation84_spill] sm:$0xff] }
 0x45b   :  { %v14801_v24 = vpop.xlane.xlu2 %3770 }
 0x45e   :  { %10511 = vmatmul.msk.f32.gmra.mxu1 %vm587_vm0, %v18991_v19  ;;  %v14769_v19 = vpop.eup %11755 }
 0x45f   :  { %18995 = vst [vmem:[#allocation144_spill] sm:$0xff] %v14769_v19 }
 0x460   :  { %v14782_v59 = vpop.eup %11757 }
 0x461   :  { %v14789_v55 = vpop.xlane.xlu1 %3803 }
 0x462   :  { %10857 = vmatmul.msk.f32.gmra.mxu0 %vm3684_vm2, %v14755_v57  ;;  %18998 = vst [vmem:[#allocation82_spill] sm:$0xff] %v14789_v55 }
 0x463   :  { %v14819_v54 = vpop.xlane.xlu2 %3779 }
 0x466   :  { %10512 = vmatmul.msk.f32.gmra.mxu1 %vm587_vm0, %v18993_v10  ;;  %v3973_v10 = vmul.f32 1.442695, %v3893_v48 }
 0x468   :  { %11759 = vpow2.f32 %v3973_v10  ;;  %v3977_v10 = vmul.f32 1.442695, %v3895_v12  ;;  %v19006_v12 = vld [vmem:[#allocation24_spill] sm:$0xff] }
 0x469   :  { %v14803_v18 = vpop.xlane.xlu1 %3812 }
 0x46a   :  { %10858 = vmatmul.msk.f32.gmra.mxu0 %vm3684_vm2, %v14769_v19  ;;  %19002 = vst [vmem:[#allocation147_spill] sm:$0xff] %v14803_v18 }
 0x46c   :  { %3866 = vmax.xlane.f32.xlu1 %v3865_v26  ;;  %v3975_v26 = vmul.f32 1.442695, %v3894_v0  ;;  %v19003_v0 = vld [vmem:[#allocation86_spill] sm:$0xff] }
 0x46e   :  { %10513 = vmatmul.msk.f32.gmra.mxu1 %vm587_vm0, %v18997_v45  ;;  %v14793_v45 = vpop.f32.mrf.mxu1  ;;  %v14795_v48 = vpop.eup %11759 }
 0x46f   :  { %19000 = vst [vmem:[#allocation84_spill] sm:$0xff] %v14793_v45 }
 0x470   :  { %19001 = vst [vmem:[#allocation146_spill] sm:$0xff] %v14795_v48 }
 0x472   :  { %10859 = vmatmul.msk.f32.gmra.mxu0 %vm3684_vm2, %v14782_v59 }
 0x476   :  { %10514 = vmatmul.msk.f32.gmra.mxu1 %vm587_vm0, %v18999_v11  ;;  %v14809_v34 = vpop.f32.mrf.mxu1 }
 0x477   :  { %v4286_v39 = vpop.f32.mrf.mxu0  ;;  %19004 = vst [vmem:[#allocation86_spill] sm:$0xff] %v14809_v34 }
 0x478   :  { %11761 = vrcp.f32 %v4286_v39  ;;  %v4489_v5 = vand.u32 2147483648, %v4286_v39  ;;  %v4487_v17 = vand.u32 2147483647, %v4286_v39  ;;  %vm4483_vm4 = vweird.f32 %v4286_v39 }
 0x479   :  { %11763 = vpow2.f32 %v3975_v26  ;;  %v19005_v26 = vld [vmem:[#allocation22_spill] sm:$0xff] }
 0x47a   :  { %10860 = vmatmul.msk.f32.gmra.mxu0 %vm3684_vm2, %v14795_v48  ;;  %v14815_v48 = vpack.i.bf16 %v19006_v12, %v19005_v26  ;;  %v4490_v34 = vor.u32 1.1754944e-38, %v4489_v5  ;;  %v3747_v26 = vpop.xlane.xlu0 %3746  ;;  %vm4488_vm6 = vcmp.eq.f32.partialorder %v4487_v17, 8.507059e+37 }
 0x47b   :  { %v3897_v5 = vsub.f32 %v14244_v23, %v3747_v26 }
 0x47c   :  { %19007 = vst [vmem:[#allocation22_spill] sm:$0xff] %v14815_v48 }
 0x47e   :  { %v11762_v29 = vpop.eup %11761  ;;  %10515 = vmatmul.msk.f32.gmra.mxu1 %vm587_vm0, %v19003_v0  ;;  %v3896_v0 = vsub.f32 %v14230_v43, %v14749_v56 }
 0x47f   :  { %v4479_v11 = vmul.f32 %v11762_v29, %v4286_v39  ;;  %v4289_v45 = vpop.f32.mrf.mxu0  ;;  %v14807_v19 = vpop.eup %11763  ;;  %vm4484_vm3 = vweird.f32 %v11762_v29 }
 0x480   :  { %11765 = vrcp.f32 %v4289_v45  ;;  %vm4485_vm5 = vmor %vm4483_vm4, %vm4484_vm3  ;;  %v3979_v12 = vmul.f32 1.442695, %v3896_v0  ;;  %v14829_v39 = vpop.xlane.xlu1 %3821  ;;  %v4504_v25 = vand.u32 2147483648, %v4289_v45  ;;  %v19013_v0 = vld [vmem:[#allocation28_spill] sm:$0xff]  ;;  %vm4498_vm8 = vweird.f32 %v4289_v45 }
 0x481   :  { %v4480_v15 = vsub.f32 1.0, %v4479_v11  ;;  %11767 = vpow2.f32 %v3977_v10  ;;  %19010 = vst [vmem:[#allocation88_spill] sm:$0xff] %v14829_v39 }
 0x482   :  { %10861 = vmatmul.msk.f32.gmra.mxu0 %vm3684_vm2, %v14807_v19  ;;  %11769 = vpow2.f32 %v3979_v12 }
 0x483   :  { %v4481_v18 = vmul.f32 %v11762_v29, %v4480_v15 }
 0x485   :  { %11187 = vrot.lane.b32.xlu1 %v14815_v48, %s12240_s17  ;;  %v4482_v10 = vadd.f32 %v11762_v29, %v4481_v18 }
 0x486   :  { %v11766_v11 = vpop.eup %11765  ;;  %10516 = vmatmul.msk.f32.gmra.mxu1 %vm587_vm0, %v19008_v16  ;;  %v19012_v16 = vld [vmem:[#allocation26_spill] sm:$0xff] }
 0x487   :  { %v4494_v44 = vmul.f32 %v11766_v11, %v4289_v45  ;;  %v14825_v43 = vpop.f32.mrf.mxu0  ;;  %v4486_v15 = vsel %vm4485_vm5, %v11762_v29, %v4482_v10  ;;  %v14827_v56 = vpop.eup %11767  ;;  %v14839_v41 = vpack.i.bf16 %v19013_v0, %v19012_v16  ;;  %vm4499_vm7 = vweird.f32 %v11766_v11  ;;  %v19020_v0 = vld [vmem:[#allocation91_spill] sm:$0xff] }
 0x488   :  { %19009 = vst [vmem:[#allocation24_spill] sm:$0xff] %v14827_v56  ;;  %v4491_v55 = vsel %vm4488_vm6, %v4490_v34, %v4486_v15  ;;  %v14843_v29 = vpop.f32.mrf.mxu1  ;;  %vm4500_vm9 = vmor %vm4498_vm8, %vm4499_vm7  ;;  %v3981_v34 = vmul.f32 1.442695, %v3897_v5  ;;  %v14849_v10 = vpop.xlane.xlu2 %3788  ;;  %vm4513_vm3 = vweird.f32 %v14825_v43 }
 0x489   :  { %v4495_v48 = vsub.f32 1.0, %v4494_v44  ;;  %v14832_v18 = vmul.f32 %v14587_v9, %v4491_v55  ;;  %19014 = vst [vmem:[#allocation26_spill] sm:$0xff] %v14839_v41  ;;  %v4502_v44 = vand.u32 2147483647, %v4289_v45  ;;  %v4505_v9 = vor.u32 1.1754944e-38, %v4504_v25  ;;  %v19016_v55 = vld [vmem:[#allocation89_spill] sm:$0xff]  ;;  %v14853_v15 = vpop.eup %11769  ;;  %v14858_v16 = vpop.xlane.xlu1 %3830 }
 0x48a   :  { %10862 = vmatmul.msk.f32.gmra.mxu0 %vm3684_vm2, %v14827_v56  ;;  %19015 = vst [vmem:[#allocation28_spill] sm:$0xff] %v14843_v29  ;;  %11771 = vpow2.f32 %v3981_v34  ;;  %v3898_v25 = vsub.f32 %v14262_v27, %v14691_v7  ;;  %v3756_v5 = vpop.xlane.xlu0 %3755  ;;  %v3899_v27 = vsub.f32 %v14246_v31, %v14765_v6 }
 0x48b   :  { %19011 = vst [vmem:[#allocation148_spill] sm:$0xff] %v14832_v18  ;;  %v4496_v17 = vmul.f32 %v11766_v11, %v4495_v48  ;;  %5440 = vrot.lane.b32.xlu2 %v14832_v18, %s12239_s5  ;;  %vm4503_vm10 = vcmp.eq.f32.partialorder %v4502_v44, 8.507059e+37  ;;  %v19033_v18 = vld [vmem:[#allocation96_spill] sm:$0xff] }
 0x48c   :  { %19018 = vst [vmem:[#allocation149_spill] sm:$0xff] %v14858_v16  ;;  %v3985_v34 = vmul.f32 1.442695, %v3899_v27  ;;  %v19028_v27 = vld [vmem:[#allocation95_spill] sm:$0xff] }
 0x48d   :  { %11192 = vrot.lane.b32.xlu1 %v14839_v41, %s12240_s17  ;;  %v4497_v23 = vadd.f32 %v11766_v11, %v4496_v17 }
 0x48e   :  { %10517 = vmatmul.msk.f32.gmra.mxu1 %vm587_vm0, %v19016_v55  ;;  %v19023_v55 = vld [vmem:[#allocation93_spill] sm:$0xff] }
 0x48f   :  { %v14851_v48 = vpop.f32.mrf.mxu0  ;;  %v4501_v26 = vsel %vm4500_vm9, %v11766_v11, %v4497_v23 }
 0x490   :  { %v4506_v12 = vsel %vm4503_vm10, %v4505_v9, %v4501_v26  ;;  %v14866_v11 = vpop.f32.mrf.mxu1  ;;  %v14872_v44 = vpop.eup %11771  ;;  %vm4528_vm12 = vweird.f32 %v14851_v48 }
 0x491   :  { %v14856_v45 = vmul.f32 %v14604_v60, %v4506_v12  ;;  %19019 = vst [vmem:[#allocation150_spill] sm:$0xff] %v14866_v11  ;;  %v3983_v60 = vmul.f32 1.442695, %v3898_v25  ;;  %v14874_v23 = vpop.xlane.xlu2 %3797  ;;  %v14880_v7 = vpop.xlane.xlu1 %3839 }
 0x492   :  { %10863 = vmatmul.msk.f32.gmra.mxu0 %vm3684_vm2, %v14853_v15  ;;  %19021 = vst [vmem:[#allocation91_spill] sm:$0xff] %v14872_v44  ;;  %v14882_v9 = vpop.xlane.xlu0 %3764 }
 0x493   :  { %19017 = vst [vmem:[#allocation89_spill] sm:$0xff] %v14856_v45  ;;  %5442 = vrot.lane.b32.xlu0 %v14856_v45, %s12239_s5  ;;  %11773 = vpow2.f32 %v3983_v60  ;;  %v3900_v60 = vsub.f32 %v14264_v36, %v3756_v5  ;;  %v3901_v36 = vsub.f32 %v14282_v32, %v14710_v21  ;;  %v14928_v32 = vpop.f32.mrf.mxu2 }
 0x494   :  { %19022 = vst [vmem:[#allocation151_spill] sm:$0xff] %v14880_v7  ;;  %11775 = vpow2.f32 %v3985_v34 }
 0x495   :  { %19035 = vst [vmem:[#allocation158_spill] sm:$0xff] %v14928_v32 }
 0x496   :  { %10518 = vmatmul.msk.f32.gmra.mxu1 %vm587_vm0, %v19020_v0  ;;  %v14892_v0 = vpop.f32.mrf.mxu3 }
 0x497   :  { %v14870_v17 = vpop.f32.mrf.mxu0  ;;  %19026 = vst [vmem:[#allocation153_spill] sm:$0xff] %v14892_v0 }
 0x498   :  { %v14888_v12 = vpop.f32.mrf.mxu1 }
 0x499   :  { %19024 = vst [vmem:[#allocation93_spill] sm:$0xff] %v14888_v12  ;;  %v14890_v25 = vpop.eup %11773  ;;  %v14897_v31 = vpop.xlane.xlu2 %3806 }
 0x49a   :  { %10864 = vmatmul.msk.f32.gmra.mxu0 %vm3684_vm2, %v14872_v44  ;;  %19025 = vst [vmem:[#allocation152_spill] sm:$0xff] %v14890_v25  ;;  %v14899_v6 = vpop.xlane.xlu1 %3848  ;;  %v14903_v29 = vpop.xlane.xlu0 %3773 }
 0x49b   :  { %19027 = vst [vmem:[#allocation154_spill] sm:$0xff] %v14899_v6  ;;  %v14907_v11 = vpop.eup %11775 }
 0x49c   :  { %19029 = vst [vmem:[#allocation95_spill] sm:$0xff] %v14907_v11 }
 0x49e   :  { %10519 = vmatmul.msk.f32.gmra.mxu1 %vm587_vm0, %v19023_v55  ;;  %v3987_v55 = vmul.f32 1.442695, %v3900_v60  ;;  %v14909_v45 = vpop.f32.mrf.mxu3 }
 0x49f   :  { %v14886_v26 = vpop.f32.mrf.mxu0 }
 0x4a0   :  { %11777 = vpow2.f32 %v3987_v55  ;;  %v14913_v5 = vpop.f32.mrf.mxu1  ;;  %vm4558_vm6 = vweird.f32 %v14886_v26 }
 0x4a1   :  { %19030 = vst [vmem:[#allocation155_spill] sm:$0xff] %v14913_v5  ;;  %11779 = vrcp.f32 %v14851_v48  ;;  %v14920_v60 = vpop.xlane.xlu2 %3815 }
 0x4a2   :  { %10865 = vmatmul.msk.f32.gmra.mxu0 %vm3684_vm2, %v14890_v25  ;;  %v14918_v34 = vpop.xlane.xlu1 %3857  ;;  %19032 = vst [vmem:[#allocation157_spill] sm:$0xff] %v14920_v60  ;;  %11781 = vrcp.f32 %v14825_v43  ;;  %v14933_v5 = vpop.xlane.xlu0 %3782 }
 0x4a3   :  { %19031 = vst [vmem:[#allocation156_spill] sm:$0xff] %v14918_v34  ;;  %v3902_v34 = vsub.f32 %v14308_v38, %v14784_v52 }
 0x4a5   :  { %v3991_v38 = vmul.f32 1.442695, %v3902_v34 }
 0x4a6   :  { %10520 = vmatmul.msk.f32.gmra.mxu1 %vm587_vm0, %v19028_v27  ;;  %v3989_v27 = vmul.f32 1.442695, %v3901_v36  ;;  %v14926_v55 = vpop.eup %11777  ;;  %v3868_v36 = vsel %vm3684_vm2, %v14928_v32, -inf }
 0x4a7   :  { %v14905_v12 = vpop.f32.mrf.mxu0  ;;  %19034 = vst [vmem:[#allocation96_spill] sm:$0xff] %v14926_v55  ;;  %v14931_v21 = vpop.eup %11779 }
 0x4a8   :  { %11783 = vpow2.f32 %v3989_v27  ;;  %v4524_v6 = vmul.f32 %v14931_v21, %v14851_v48  ;;  %v14946_v7 = vpop.f32.mrf.mxu1  ;;  %vm4529_vm11 = vweird.f32 %v14931_v21 }
 0x4a9   :  { %11785 = vrcp.f32 %v14886_v26  ;;  %19037 = vst [vmem:[#allocation160_spill] sm:$0xff] %v14946_v7  ;;  %v14954_v39 = vpop.xlane.xlu2 %3824  ;;  %vm15003_vm13 = vmor %vm4528_vm12, %vm4529_vm11  ;;  %vm4543_vm11 = vweird.f32 %v14870_v17 }
 0x4aa   :  { %10866 = vmatmul.msk.f32.gmra.mxu0 %vm3684_vm2, %v14907_v11  ;;  %v14948_v11 = vpop.eup %11781  ;;  %19038 = vst [vmem:[#allocation161_spill] sm:$0xff] %v14954_v39  ;;  %11787 = vrcp.f32 %v14870_v17 }
 0x4ab   :  { %v4509_v34 = vmul.f32 %v14948_v11, %v14825_v43  ;;  %11789 = vpow2.f32 %v3991_v38  ;;  %vm4514_vm14 = vweird.f32 %v14948_v11 }
 0x4ac   :  { %vm15025_vm4 = vmor %vm4513_vm3, %vm4514_vm14 }
 0x4ae   :  { %10521 = vmatmul.msk.f32.gmra.mxu1 %vm587_vm0, %v19033_v18  ;;  %v14939_v18 = vpop.f32.mrf.mxu3  ;;  %v14958_v7 = vpop.eup %11783 }
 0x4af   :  { %v14924_v41 = vpop.f32.mrf.mxu0  ;;  %19036 = vst [vmem:[#allocation159_spill] sm:$0xff] %v14939_v18  ;;  %v3874_v52 = vsel %vm3684_vm2, %v14939_v18, -inf  ;;  %v14961_v56 = vpop.eup %11785 }
 0x4b0   :  { %19039 = vst [vmem:[#allocation162_spill] sm:$0xff] %v14958_v7  ;;  %11791 = vrcp.f32 %v14924_v41  ;;  %v14977_v18 = vpop.eup %11787  ;;  %vm4559_vm5 = vweird.f32 %v14961_v56  ;;  %vm4588_vm14 = vweird.f32 %v14924_v41 }
 0x4b1   :  { %vm15051_vm7 = vmor %vm4558_vm6, %vm4559_vm5  ;;  %vm4544_vm9 = vweird.f32 %v14977_v18 }
 0x4b2   :  { %10867 = vmatmul.msk.f32.gmra.mxu0 %vm3684_vm2, %v14926_v55  ;;  %v4519_v55 = vand.u32 2147483648, %v14825_v43  ;;  %vm15079_vm12 = vmor %vm4543_vm11, %vm4544_vm9 }
 0x4b4   :  { %v11183_v16 = vpop.permute.xlu1 %11182  ;;  %3869 = vmax.xlane.f32.xlu2 %v3868_v36  ;;  %v4525_v36 = vsub.f32 1.0, %v4524_v6  ;;  %v4554_v6 = vmul.f32 %v14961_v56, %v14886_v26 }
 0x4b5   :  { %v11185_v27 = vunpack.i.h.bf16 %v11183_v16  ;;  %v11184_v44 = vunpack.i.l.bf16 %v11183_v16 }
 0x4b6   :  { %10522 = vmatmul.msk.f32.gmra.mxu1 %vm587_vm0, %v13390_v63  ;;  %v3903_v63 = vsub.f32 %v14284_v42, %v14882_v9  ;;  %v4526_v16 = vmul.f32 %v14931_v21, %v4525_v36  ;;  %v14979_v9 = vpop.f32.mrf.mxu1  ;;  %v4555_v36 = vsub.f32 1.0, %v4554_v6  ;;  %v4532_v6 = vand.u32 2147483647, %v14851_v48 }
 0x4b7   :  { %5468 = vmatpush.msrb.mxu1 %v11185_v27  ;;  %3875 = vmax.xlane.f32.xlu1 %v3874_v52  ;;  %v14956_v32 = vpop.f32.mrf.mxu0  ;;  %v14969_v27 = vpop.xlane.xlu0 %3791  ;;  %v3862_v52 = vsel %vm3684_vm2, %v14892_v0, -inf  ;;  %19040 = vst [vmem:[#allocation163_spill] sm:$0xff] %v14979_v9  ;;  %v4517_v9 = vand.u32 2147483647, %v14825_v43  ;;  %v4564_v43 = vand.u32 2147483648, %v14886_v26 }
 0x4b8   :  { %v3993_v42 = vmul.f32 1.442695, %v3903_v63  ;;  %v4527_v39 = vadd.f32 %v14931_v21, %v4526_v16  ;;  %v3904_v16 = vsub.f32 %v14310_v4, %v14727_v30  ;;  %vm4533_vm15 = vcmp.eq.f32.partialorder %v4532_v6, 8.507059e+37 }
 0x4b9   :  { %5469 = vmatpush.msrb.mxu1 %v11184_v44  ;;  %v4510_v44 = vsub.f32 1.0, %v4509_v34  ;;  %v14991_v34 = vpop.xlane.xlu2 %3833  ;;  %v3905_v6 = vsub.f32 %v14330_v51, %v14801_v24  ;;  %vm4518_vm8 = vcmp.eq.f32.partialorder %v4517_v9, 8.507059e+37  ;;  %v19051_v9 = vld [vmem:[#allocation30_spill] sm:$0xff] }
 0x4ba   :  { %10868 = vmatmul.msk.f32.gmra.mxu0 %vm3684_vm2, %v14958_v7  ;;  %v14985_v7 = vpop.eup %11789  ;;  %19042 = vst [vmem:[#allocation165_spill] sm:$0xff] %v14991_v34  ;;  %11793 = vpow2.f32 %v3993_v42  ;;  %v4531_v34 = vsel %vm15003_vm13, %v14931_v21, %v4527_v39  ;;  %v3995_v60 = vmul.f32 1.442695, %v3904_v16  ;;  %v19052_v21 = vld [vmem:[#allocation33_spill] sm:$0xff] }
 0x4bb   :  { %19041 = vst [vmem:[#allocation164_spill] sm:$0xff] %v14985_v7  ;;  %v14989_v0 = vpop.eup %11791  ;;  %v4511_v63 = vmul.f32 %v14948_v11, %v4510_v44  ;;  %v4556_v44 = vmul.f32 %v14961_v56, %v4555_v36 }
 0x4bc   :  { %v4584_v42 = vmul.f32 %v14989_v0, %v14924_v41  ;;  %vm4589_vm13 = vweird.f32 %v14989_v0 }
 0x4bd   :  { %3863 = vmax.xlane.f32.xlu0 %v3862_v52  ;;  %v4534_v52 = vand.u32 2147483648, %v14851_v48  ;;  %v4512_v48 = vadd.f32 %v14948_v11, %v4511_v63 }
 0x4be   :  { %10523 = vmatmul.msk.f32.gmra.mxu1 %vm587_vm0, %v13417_v53  ;;  %v4539_v53 = vmul.f32 %v14977_v18, %v14870_v17  ;;  %v4585_v63 = vsub.f32 1.0, %v4584_v42  ;;  %v4562_v42 = vand.u32 2147483647, %v14886_v26 }
 0x4bf   :  { %v14983_v38 = vpop.f32.mrf.mxu0  ;;  %v4535_v4 = vor.u32 1.1754944e-38, %v4534_v52  ;;  %v4557_v52 = vadd.f32 %v14961_v56, %v4556_v44  ;;  %v4516_v16 = vsel %vm15025_vm4, %v14948_v11, %v4512_v48  ;;  %v4549_v48 = vand.u32 2147483648, %v14870_v17 }
 0x4c0   :  { %11795 = vrcp.f32 %v14983_v38  ;;  %v4540_v30 = vsub.f32 1.0, %v4539_v53  ;;  %v15023_v39 = vpop.eup %11793  ;;  %v4586_v11 = vmul.f32 %v14989_v0, %v4585_v63  ;;  %v15068_v63 = vpack.i.bf16 %v19052_v21, %v19051_v9 }
 0x4c1   :  { %v4536_v25 = vsel %vm4533_vm15, %v4535_v4, %v4531_v34  ;;  %v4520_v4 = vor.u32 1.1754944e-38, %v4519_v55  ;;  %11797 = vpow2.f32 %v3995_v60  ;;  %v15047_v51 = vpop.xlane.xlu2 %3842  ;;  %v4561_v26 = vsel %vm15051_vm7, %v14961_v56, %v4557_v52  ;;  %vm15107_vm15 = vmor %vm4588_vm14, %vm4589_vm13 }
 0x4c2   :  { %10869 = vmatmul.msk.f32.gmra.mxu0 %vm3684_vm2, %v14985_v7  ;;  %v15014_v7 = vpop.xlane.xlu0 %3800  ;;  %v4541_v34 = vmul.f32 %v14977_v18, %v4540_v30  ;;  %v15044_v44 = vmul.f32 %v14630_v61, %v4536_v25  ;;  %19048 = vst [vmem:[#allocation167_spill] sm:$0xff] %v15047_v51  ;;  %v4565_v25 = vor.u32 1.1754944e-38, %v4564_v43  ;;  %v3997_v30 = vmul.f32 1.442695, %v3905_v6 }
 0x4c3   :  { %v4521_v61 = vsel %vm4518_vm8, %v4520_v4, %v4516_v16  ;;  %19053 = vst [vmem:[#allocation30_spill] sm:$0xff] %v15068_v63  ;;  %vm4563_vm10 = vcmp.eq.f32.partialorder %v4562_v42, 8.507059e+37  ;;  %v4587_v4 = vadd.f32 %v14989_v0, %v4586_v11  ;;  %v4550_v24 = vor.u32 1.1754944e-38, %v4549_v48 }
 0x4c4   :  { %19047 = vst [vmem:[#allocation166_spill] sm:$0xff] %v15044_v44  ;;  %v4542_v60 = vadd.f32 %v14977_v18, %v4541_v34  ;;  %v15076_v56 = vmul.f32 %v14617_v62, %v4521_v61  ;;  %v4566_v52 = vsel %vm4563_vm10, %v4565_v25, %v4561_v26  ;;  %v4547_v34 = vand.u32 2147483647, %v14870_v17 }
 0x4c5   :  { %v4594_v62 = vand.u32 2147483648, %v14924_v41  ;;  %v4592_v11 = vand.u32 2147483647, %v14924_v41  ;;  %v3906_v61 = vsub.f32 %v14357_v1, %v14903_v29  ;;  %v4591_v41 = vsel %vm15107_vm15, %v14989_v0, %v4587_v4 }
 0x4c6   :  { %v15031_v53 = vpop.eup %11795  ;;  %v4546_v17 = vsel %vm15079_vm12, %v14977_v18, %v4542_v60  ;;  %vm4548_vm3 = vcmp.eq.f32.partialorder %v4547_v34, 8.507059e+37  ;;  %v19059_v60 = vld [vmem:[#allocation35_spill] sm:$0xff]  ;;  %vm4618_vm6 = vweird.f32 %v14983_v38 }
 0x4c7   :  { %v15020_v36 = vpop.f32.mrf.mxu0  ;;  %v4614_v55 = vmul.f32 %v15031_v53, %v14983_v38  ;;  %v15088_v42 = vpop.eup %11797  ;;  %v4595_v1 = vor.u32 1.1754944e-38, %v4594_v62  ;;  %vm4593_vm4 = vcmp.eq.f32.partialorder %v4592_v11, 8.507059e+37  ;;  %v3999_v9 = vmul.f32 1.442695, %v3906_v61 }
 0x4c8   :  { %vm4619_vm5 = vweird.f32 %v15031_v53  ;;  %v4624_v62 = vand.u32 2147483648, %v14983_v38  ;;  %v3907_v11 = vsub.f32 %v14332_v28, %v14738_v46 }
 0x4c9   :  { %v4615_v43 = vsub.f32 1.0, %v4614_v55  ;;  %v15100_v55 = vmul.f32 %v14656_v50, %v4566_v52  ;;  %v4551_v50 = vsel %vm4548_vm3, %v4550_v24, %v4546_v17  ;;  %v15117_v25 = vpop.xlane.xlu2 %3851  ;;  %v4596_v6 = vsel %vm4593_vm4, %v4595_v1, %v4591_v41  ;;  %vm4620_vm7 = vmor %vm4618_vm6, %vm4619_vm5  ;;  %v19064_v41 = vld [vmem:[#allocation40_spill] sm:$0xff]  ;;  %v19065_v1 = vld [vmem:[#allocation42_spill] sm:$0xff] }
 0x4ca   :  { %10870 = vmatmul.msk.f32.gmra.mxu0 %vm3684_vm2, %v15023_v39  ;;  %v15070_v51 = vpop.xlane.xlu0 %3809  ;;  %v15127_v34 = vmul.f32 %v14641_v33, %v4551_v50  ;;  %v15144_v33 = vmul.f32 %v14680_v40, %v4596_v6  ;;  %v4622_v24 = vand.u32 2147483647, %v14983_v38  ;;  %v4625_v50 = vor.u32 1.1754944e-38, %v4624_v62 }
 0x4cb   :  { %19056 = vst [vmem:[#allocation33_spill] sm:$0xff] %v15100_v55  ;;  %v4616_v18 = vmul.f32 %v15031_v53, %v4615_v43  ;;  %v15156_v40 = vpack.i.bf16 %v19065_v1, %v19064_v41  ;;  %v4001_v38 = vmul.f32 1.442695, %v3907_v11  ;;  %v3908_v6 = vsub.f32 %v14359_v37, %v14819_v54 }
 0x4cc   :  { %5481 = vrot.lane.b32.xlu2 %v15044_v44, %s12239_s5  ;;  %19063 = vst [vmem:[#allocation168_spill] sm:$0xff] %v15144_v33  ;;  %vm4623_vm8 = vcmp.eq.f32.partialorder %v4622_v24, 8.507059e+37 }
 0x4cd   :  { %v4617_v0 = vadd.f32 %v15031_v53, %v4616_v18  ;;  %v4003_v54 = vmul.f32 1.442695, %v3908_v6 }
 0x4cf   :  { %v15073_v16 = vpop.f32.mrf.mxu0  ;;  %v4621_v26 = vsel %vm4620_vm7, %v15031_v53, %v4617_v0 }
 0x4d0   :  { %11799 = vrcp.f32 %v15073_v16  ;;  %11197 = vrot.lane.b32.xlu1 %v15068_v63, %s12240_s17  ;;  %v4654_v53 = vand.u32 2147483648, %v15073_v16  ;;  %vm4648_vm10 = vweird.f32 %v15073_v16 }
 0x4d1   :  { %5479 = vrot.lane.b32.xlu0 %v15076_v56, %s12239_s5  ;;  %11801 = vpow2.f32 %v3997_v30  ;;  %v19060_v30 = vld [vmem:[#allocation37_spill] sm:$0xff]  ;;  %v15152_v18 = vpop.xlane.xlu2 %3860 }
 0x4d2   :  { %10871 = vmatmul.msk.f32.gmra.mxu0 %vm3684_vm2, %v15088_v42  ;;  %v15121_v48 = vpack.i.bf16 %v19060_v30, %v19059_v60  ;;  %19062 = vst [vmem:[#allocation37_spill] sm:$0xff] %v15127_v34  ;;  %v15135_v4 = vpop.xlane.xlu0 %3818  ;;  %11803 = vpow2.f32 %v3999_v9  ;;  %v4626_v30 = vsel %vm4623_vm8, %v4625_v50, %v4621_v26 }
 0x4d3   :  { %v15167_v9 = vmul.f32 %v14708_v35, %v4626_v30  ;;  %v19068_v35 = vld [vmem:[#allocation44_spill] sm:$0xff] }
 0x4d4   :  { %5520 = vrot.lane.b32.xlu2 %v15100_v55, %s12239_s5  ;;  %19061 = vst [vmem:[#allocation35_spill] sm:$0xff] %v15121_v48  ;;  %v19089_v55 = vld [vmem:[#allocation70_spill] sm:$0xff] }
 0x4d5   :  { %19066 = vst [vmem:[#allocation40_spill] sm:$0xff] %v15167_v9 }
 0x4d6   :  { %v11800_v29 = vpop.eup %11799 }
 0x4d7   :  { %v4644_v21 = vmul.f32 %v11800_v29, %v15073_v16  ;;  %v15124_v52 = vpop.f32.mrf.mxu0  ;;  %v15133_v43 = vpop.eup %11801  ;;  %vm4649_vm9 = vweird.f32 %v11800_v29 }
 0x4d8   :  { %11202 = vrot.lane.b32.xlu1 %v15121_v48, %s12240_s17  ;;  %v15160_v46 = vpop.eup %11803  ;;  %vm4650_vm11 = vmor %vm4648_vm10, %vm4649_vm9  ;;  %vm4573_vm10 = vweird.f32 %v14905_v12 }
 0x4d9   :  { %v4645_v17 = vsub.f32 1.0, %v4644_v21  ;;  %5518 = vrot.lane.b32.xlu0 %v15127_v34, %s12239_s5  ;;  %v4652_v21 = vand.u32 2147483647, %v15073_v16  ;;  %v19069_v16 = vld [vmem:[#allocation47_spill] sm:$0xff] }
 0x4da   :  { %10872 = vmatmul.msk.f32.gmra.mxu0 %vm3684_vm2, %v15133_v43  ;;  %v15172_v0 = vpop.xlane.xlu0 %3827  ;;  %v15181_v26 = vpack.i.bf16 %v19069_v16, %v19068_v35 }
 0x4db   :  { %v4646_v61 = vmul.f32 %v11800_v29, %v4645_v17  ;;  %v4655_v17 = vor.u32 1.1754944e-38, %v4654_v53  ;;  %vm4653_vm12 = vcmp.eq.f32.partialorder %v4652_v21, 8.507059e+37 }
 0x4dc   :  { %5559 = vrot.lane.b32.xlu2 %v15144_v33, %s12239_s5  ;;  %19070 = vst [vmem:[#allocation44_spill] sm:$0xff] %v15181_v26 }
 0x4dd   :  { %v4647_v28 = vadd.f32 %v11800_v29, %v4646_v61  ;;  %v15176_v61 = vpop.f32.mrf.mxu1 }
 0x4de   :  { %19067 = vst [vmem:[#allocation42_spill] sm:$0xff] %v15176_v61 }
 0x4df   :  { %v4325_v60 = vpop.f32.mrf.mxu0  ;;  %v4651_v62 = vsel %vm4650_vm11, %v11800_v29, %v4647_v28 }
 0x4e0   :  { %11805 = vrcp.f32 %v4325_v60  ;;  %11207 = vrot.lane.b32.xlu1 %v15156_v40, %s12240_s17  ;;  %v4656_v41 = vsel %vm4653_vm12, %v4655_v17, %v4651_v62  ;;  %v4684_v30 = vand.u32 2147483648, %v4325_v60  ;;  %v4682_v21 = vand.u32 2147483647, %v4325_v60  ;;  %v19073_v17 = vld [vmem:[#allocation51_spill] sm:$0xff] }
 0x4e1   :  { %11807 = vpow2.f32 %v4001_v38  ;;  %v3909_v38 = vsub.f32 %v14379_v14, %v14933_v5  ;;  %v15194_v28 = vmul.f32 %v14733_v20, %v4656_v41  ;;  %vm4678_vm14 = vweird.f32 %v4325_v60  ;;  %v19072_v5 = vld [vmem:[#allocation49_spill] sm:$0xff]  ;;  %v15204_v20 = vpop.xlane.xlu1 %3866 }
 0x4e2   :  { %10873 = vmatmul.msk.f32.gmra.mxu0 %vm3684_vm2, %v15160_v46  ;;  %11809 = vpow2.f32 %v4003_v54  ;;  %v15198_v6 = vpop.xlane.xlu0 %3836  ;;  %v4685_v14 = vor.u32 1.1754944e-38, %v4684_v30  ;;  %vm4683_vm3 = vcmp.eq.f32.partialorder %v4682_v21, 8.507059e+37  ;;  %v19077_v21 = vld [vmem:[#allocation56_spill] sm:$0xff] }
 0x4e3   :  { %19071 = vst [vmem:[#allocation47_spill] sm:$0xff] %v15194_v28  ;;  %v4005_v35 = vmul.f32 1.442695, %v3909_v38 }
 0x4e4   :  { %5598 = vrot.lane.b32.xlu2 %v15167_v9, %s12239_s5 }
 0x4e5   :  { %v5441_v24 = vpop.permute.xlu2 %5440 }
 0x4e6   :  { %v11806_v11 = vpop.eup %11805  ;;  %10908 = vmatmul.msk.f32.vlgmr.msrb.gmra.mxu1 %vm1499_vm1, %v5441_v24  ;;  %v15202_v24 = vpack.i.bf16 %v19073_v17, %v19072_v5 }
 0x4e7   :  { %v4674_v37 = vmul.f32 %v11806_v11, %v4325_v60  ;;  %v15183_v50 = vpop.f32.mrf.mxu0  ;;  %v15187_v29 = vpop.eup %11807  ;;  %vm4679_vm13 = vweird.f32 %v11806_v11 }
 0x4e8   :  { %11212 = vrot.lane.b32.xlu1 %v15181_v26, %s12240_s17  ;;  %vm4680_vm15 = vmor %vm4678_vm14, %vm4679_vm13  ;;  %19074 = vst [vmem:[#allocation49_spill] sm:$0xff] %v15202_v24  ;;  %v15208_v41 = vpop.eup %11809 }
 0x4e9   :  { %v4675_v1 = vsub.f32 1.0, %v4674_v37 }
 0x4ea   :  { %10874 = vmatmul.msk.f32.gmra.mxu0 %vm3684_vm2, %v15187_v29 }
 0x4eb   :  { %v4676_v53 = vmul.f32 %v11806_v11, %v4675_v1  ;;  %v3910_v1 = vsub.f32 %v14403_v47, %v14753_v3 }
 0x4ec   :  { %5637 = vrot.lane.b32.xlu2 %v15194_v28, %s12239_s5 }
 0x4ed   :  { %v4677_v62 = vadd.f32 %v11806_v11, %v4676_v53  ;;  %v4007_v30 = vmul.f32 1.442695, %v3910_v1  ;;  %v19076_v53 = vld [vmem:[#allocation54_spill] sm:$0xff] }
 0x4ef   :  { %v4331_v16 = vpop.f32.mrf.mxu0  ;;  %v4681_v54 = vsel %vm4680_vm15, %v11806_v11, %v4677_v62  ;;  %v15219_v11 = vpop.xlane.xlu0 %3845 }
 0x4f0   :  { %11811 = vrcp.f32 %v4331_v16  ;;  %11217 = vrot.lane.b32.xlu1 %v15202_v24, %s12240_s17  ;;  %v4686_v37 = vsel %vm4683_vm3, %v4685_v14, %v4681_v54  ;;  %v3911_v54 = vsub.f32 %v14381_v2, %v14849_v10  ;;  %v4714_v1 = vand.u32 2147483648, %v4331_v16 }
 0x4f1   :  { %v15211_v60 = vmul.f32 %v14755_v57, %v4686_v37  ;;  %11813 = vpow2.f32 %v4005_v35  ;;  %v15224_v57 = vpack.i.bf16 %v19077_v21, %v19076_v53  ;;  %v4712_v21 = vand.u32 2147483647, %v4331_v16 }
 0x4f2   :  { %10875 = vmatmul.msk.f32.gmra.mxu0 %vm3684_vm2, %v15208_v41  ;;  %11815 = vrcp.f32 %v14905_v12  ;;  %vm4708_vm5 = vweird.f32 %v4331_v16  ;;  %v4715_v10 = vor.u32 1.1754944e-38, %v4714_v1 }
 0x4f3   :  { %19075 = vst [vmem:[#allocation51_spill] sm:$0xff] %v15211_v60  ;;  %11817 = vpow2.f32 %v4007_v30  ;;  %vm4713_vm7 = vcmp.eq.f32.partialorder %v4712_v21, 8.507059e+37 }
 0x4f4   :  { %5676 = vrot.lane.b32.xlu2 %v15211_v60, %s12239_s5  ;;  %11819 = vrcp.f32 %v14956_v32  ;;  %v4009_v60 = vmul.f32 1.442695, %v3911_v54 }
 0x4f6   :  { %v11812_v38 = vpop.eup %11811 }
 0x4f7   :  { %v4704_v62 = vmul.f32 %v11812_v38, %v4331_v16  ;;  %v11188_v14 = vpop.permute.xlu1 %11187  ;;  %v15226_v3 = vpop.f32.mrf.mxu0  ;;  %vm4709_vm4 = vweird.f32 %v11812_v38 }
 0x4f8   :  { %v11190_v47 = vunpack.i.h.bf16 %v11188_v14  ;;  %11222 = vrot.lane.b32.xlu1 %v15224_v57, %s12240_s17  ;;  %v15230_v5 = vpop.eup %11813  ;;  %v11189_v35 = vunpack.i.l.bf16 %v11188_v14  ;;  %v15238_v61 = vpop.xlane.xlu0 %3854  ;;  %vm4710_vm6 = vmor %vm4708_vm5, %vm4709_vm4  ;;  %v19079_v14 = vld [vmem:[#allocation61_spill] sm:$0xff]  ;;  %vm4603_vm4 = vweird.f32 %v14956_v32 }
 0x4f9   :  { %v4705_v17 = vsub.f32 1.0, %v4704_v62  ;;  %v15236_v53 = vpop.eup %11815  ;;  %v19078_v62 = vld [vmem:[#allocation58_spill] sm:$0xff] }
 0x4fa   :  { %10876 = vmatmul.msk.f32.gmra.mxu0 %vm3684_vm2, %v15230_v5  ;;  %5507 = vmatpush.msra.mxu2 %v11190_v47  ;;  %v15243_v47 = vpack.i.bf16 %v19079_v14, %v19078_v62  ;;  %v4569_v2 = vmul.f32 %v15236_v53, %v14905_v12  ;;  %v15247_v9 = vpop.eup %11817  ;;  %v15264_v14 = vpop.f32.mrf.mxu1  ;;  %vm4574_vm8 = vweird.f32 %v15236_v53 }
 0x4fb   :  { %v4706_v37 = vmul.f32 %v11812_v38, %v4705_v17  ;;  %19082 = vst [vmem:[#allocation58_spill] sm:$0xff] %v15264_v14  ;;  %vm15291_vm11 = vmor %vm4573_vm10, %vm4574_vm8 }
 0x4fc   :  { %5508 = vmatpush.msra.mxu2 %v11189_v35  ;;  %19080 = vst [vmem:[#allocation54_spill] sm:$0xff] %v15243_v47  ;;  %v4570_v62 = vsub.f32 1.0, %v4569_v2 }
 0x4fd   :  { %v4707_v30 = vadd.f32 %v11812_v38, %v4706_v37  ;;  %v3912_v37 = vsub.f32 %v14405_v22, %v14969_v27 }
 0x4ff   :  { %v11193_v17 = vpop.permute.xlu1 %11192  ;;  %v4337_v28 = vpop.f32.mrf.mxu0  ;;  %v4711_v35 = vsel %vm4710_vm6, %v11812_v38, %v4707_v30  ;;  %v3871_v38 = vsel %vm3684_vm2, %v14909_v45, -inf  ;;  %v4011_v21 = vmul.f32 1.442695, %v3912_v37  ;;  %v3913_v37 = vsub.f32 %v14425_v49, %v14771_v58 }
 0x500   :  { %v11195_v33 = vunpack.i.h.bf16 %v11193_v17  ;;  %11821 = vrcp.f32 %v4337_v28  ;;  %11227 = vrot.lane.b32.xlu1 %v15243_v47, %s12240_s17  ;;  %v4716_v16 = vsel %vm4713_vm7, %v4715_v10, %v4711_v35  ;;  %v11194_v54 = vunpack.i.l.bf16 %v11193_v17  ;;  %v15260_v30 = vpop.eup %11819 }
 0x501   :  { %v15258_v1 = vmul.f32 %v14782_v59, %v4716_v16  ;;  %11823 = vpow2.f32 %v4009_v60  ;;  %v19083_v59 = vld [vmem:[#allocation63_spill] sm:$0xff]  ;;  %v19084_v60 = vld [vmem:[#allocation65_spill] sm:$0xff]  ;;  %v4571_v10 = vmul.f32 %v15236_v53, %v4570_v62  ;;  %v4579_v58 = vand.u32 2147483648, %v14905_v12 }
 0x502   :  { %10877 = vmatmul.msk.f32.gmra.mxu0 %vm3684_vm2, %v15247_v9  ;;  %5546 = vmatpush.msra.mxu3 %v11195_v33  ;;  %v4599_v33 = vmul.f32 %v15260_v30, %v14956_v32  ;;  %11825 = vrcp.f32 %v15020_v36  ;;  %v15272_v2 = vpack.i.bf16 %v19084_v60, %v19083_v59  ;;  %v4742_v59 = vand.u32 2147483647, %v4337_v28 }
 0x503   :  { %19081 = vst [vmem:[#allocation56_spill] sm:$0xff] %v15258_v1  ;;  %3872 = vmax.xlane.f32.xlu0 %v3871_v38  ;;  %5715 = vrot.lane.b32.xlu2 %v15258_v1, %s12239_s5  ;;  %11827 = vpow2.f32 %v4011_v21  ;;  %v4572_v60 = vadd.f32 %v15236_v53, %v4571_v10  ;;  %vm4738_vm12 = vweird.f32 %v4337_v28  ;;  %v19088_v1 = vld [vmem:[#allocation68_spill] sm:$0xff]  ;;  %vm4604_vm3 = vweird.f32 %v15260_v30 }
 0x504   :  { %5547 = vmatpush.msra.mxu3 %v11194_v54  ;;  %19085 = vst [vmem:[#allocation61_spill] sm:$0xff] %v15272_v2  ;;  %v4600_v38 = vsub.f32 1.0, %v4599_v33  ;;  %11829 = vrcp.f32 %v15124_v52  ;;  %v4577_v33 = vand.u32 2147483647, %v14905_v12  ;;  %v15300_v44 = vpack.i.bf16 %v19089_v55, %v19088_v1  ;;  %vm15330_vm5 = vmor %vm4603_vm4, %vm4604_vm3 }
 0x505   :  { %v5443_v22 = vpop.permute.xlu0 %5442  ;;  %vm4743_vm14 = vcmp.eq.f32.partialorder %v4742_v59, 8.507059e+37  ;;  %v4576_v12 = vsel %vm15291_vm11, %v15236_v53, %v4572_v60  ;;  %v19095_v59 = vld [vmem:[#allocation73_spill] sm:$0xff]  ;;  %v19096_v60 = vld [vmem:[#allocation76_spill] sm:$0xff]  ;;  %vm4663_vm3 = vweird.f32 %v15124_v52 }
 0x506   :  { %v11822_v27 = vpop.eup %11821  ;;  %10909 = vmatmul.msk.f32.gmra.mxu1 %vm1499_vm1, %v5443_v22  ;;  %v4744_v22 = vand.u32 2147483648, %v4337_v28  ;;  %19090 = vst [vmem:[#allocation63_spill] sm:$0xff] %v15300_v44  ;;  %vm4578_vm15 = vcmp.eq.f32.partialorder %v4577_v33, 8.507059e+37 }
 0x507   :  { %v4734_v17 = vmul.f32 %v11822_v27, %v4337_v28  ;;  %v15275_v35 = vpop.f32.mrf.mxu0  ;;  %v15279_v16 = vpop.eup %11823  ;;  %vm4739_vm9 = vweird.f32 %v11822_v27 }
 0x508   :  { %11232 = vrot.lane.b32.xlu1 %v15272_v2, %s12240_s17  ;;  %v15287_v14 = vpop.eup %11825  ;;  %vm4740_vm13 = vmor %vm4738_vm12, %vm4739_vm9  ;;  %v4745_v10 = vor.u32 1.1754944e-38, %v4744_v22  ;;  %vm4633_vm9 = vweird.f32 %v15020_v36 }
 0x509   :  { %v4735_v54 = vsub.f32 1.0, %v4734_v17  ;;  %v4013_v17 = vmul.f32 1.442695, %v3913_v37  ;;  %v4629_v2 = vmul.f32 %v15287_v14, %v15020_v36  ;;  %v15309_v28 = vpop.eup %11827  ;;  %v4580_v37 = vor.u32 1.1754944e-38, %v4579_v58 }
 0x50a   :  { %10878 = vmatmul.msk.f32.gmra.mxu0 %vm3684_vm2, %v15279_v16  ;;  %v15323_v22 = vpop.eup %11829  ;;  %v15339_v58 = vpack.i.bf16 %v19096_v60, %v19095_v59  ;;  %vm4634_vm7 = vweird.f32 %v15287_v14 }
 0x50b   :  { %v4736_v62 = vmul.f32 %v11822_v27, %v4735_v54  ;;  %v4601_v54 = vmul.f32 %v15260_v30, %v4600_v38  ;;  %v4581_v53 = vsel %vm4578_vm15, %v4580_v37, %v4576_v12  ;;  %v19098_v12 = vld [vmem:[#allocation34_spill] sm:$0xff]  ;;  %vm15372_vm10 = vmor %vm4633_vm9, %vm4634_vm7  ;;  %vm4664_vm15 = vweird.f32 %v15323_v22 }
 0x50c   :  { %19097 = vst [vmem:[#allocation70_spill] sm:$0xff] %v15339_v58  ;;  %v3915_v37 = vsub.f32 %v19098_v12, %v15014_v7  ;;  %v4639_v7 = vand.u32 2147483648, %v15020_v36  ;;  %v19104_v12 = vld [vmem:[#allocation80_spill] sm:$0xff]  ;;  %vm15414_vm4 = vmor %vm4663_vm3, %vm4664_vm15  ;;  %vm4723_vm15 = vweird.f32 %v15226_v3 }
 0x50d   :  { %v4737_v21 = vadd.f32 %v11822_v27, %v4736_v62  ;;  %v4602_v38 = vadd.f32 %v15260_v30, %v4601_v54  ;;  %v4630_v62 = vsub.f32 1.0, %v4629_v2 }
 0x50f   :  { %v15304_v47 = vpop.f32.mrf.mxu0  ;;  %v4741_v24 = vsel %vm4740_vm13, %v11822_v27, %v4737_v21  ;;  %v3914_v27 = vsub.f32 %v14445_v13, %v14874_v23  ;;  %v4607_v13 = vand.u32 2147483647, %v14956_v32  ;;  %v15335_v23 = vmul.f32 %v14671_v8, %v4581_v53 }
 0x510   :  { %11831 = vrcp.f32 %v15304_v47  ;;  %11237 = vrot.lane.b32.xlu1 %v15300_v44, %s12240_s17  ;;  %v4746_v55 = vsel %vm4743_vm14, %v4745_v10, %v4741_v24  ;;  %v4609_v24 = vand.u32 2147483648, %v14956_v32  ;;  %v4659_v21 = vmul.f32 %v15323_v22, %v15124_v52 }
 0x511   :  { %v15315_v1 = vmul.f32 %v14807_v19, %v4746_v55  ;;  %11833 = vpow2.f32 %v4013_v17  ;;  %19094 = vst [vmem:[#allocation68_spill] sm:$0xff] %v15335_v23  ;;  %v4015_v2 = vmul.f32 1.442695, %v3914_v27  ;;  %v4606_v32 = vsel %vm15330_vm5, %v15260_v30, %v4602_v38  ;;  %v19099_v19 = vld [vmem:[#allocation142_spill] sm:$0xff] }
 0x512   :  { %10879 = vmatmul.msk.f32.gmra.mxu0 %vm3684_vm2, %v15309_v28  ;;  %11835 = vrcp.f32 %v15183_v50  ;;  %v4610_v33 = vor.u32 1.1754944e-38, %v4609_v24  ;;  %v4631_v17 = vmul.f32 %v15287_v14, %v4630_v62  ;;  %vm4608_vm6 = vcmp.eq.f32.partialorder %v4607_v13, 8.507059e+37 }
 0x513   :  { %19091 = vst [vmem:[#allocation65_spill] sm:$0xff] %v15315_v1  ;;  %5754 = vrot.lane.b32.xlu2 %v15315_v1, %s12239_s5  ;;  %11837 = vpow2.f32 %v4015_v2  ;;  %v4660_v27 = vsub.f32 1.0, %v4659_v21  ;;  %v4774_v53 = vand.u32 2147483648, %v15304_v47  ;;  %v4772_v24 = vand.u32 2147483647, %v15304_v47 }
 0x514   :  { %v4611_v55 = vsel %vm4608_vm6, %v4610_v33, %v4606_v32  ;;  %v4632_v62 = vadd.f32 %v15287_v14, %v4631_v17  ;;  %11839 = vrcp.f32 %v15226_v3  ;;  %vm4768_vm11 = vweird.f32 %v15304_v47 }
 0x515   :  { %v15370_v59 = vmul.f32 %v19099_v19, %v4611_v55  ;;  %v4637_v21 = vand.u32 2147483647, %v15020_v36  ;;  %v4017_v32 = vmul.f32 1.442695, %v3915_v37  ;;  %v4661_v33 = vmul.f32 %v15323_v22, %v4660_v27 }
 0x516   :  { %v11832_v49 = vpop.eup %11831  ;;  %v4775_v17 = vor.u32 1.1754944e-38, %v4774_v53  ;;  %vm4773_vm13 = vcmp.eq.f32.partialorder %v4772_v24, 8.507059e+37  ;;  %v4636_v36 = vsel %vm15372_vm10, %v15287_v14, %v4632_v62  ;;  %v4640_v27 = vor.u32 1.1754944e-38, %v4639_v7 }
 0x517   :  { %v4764_v8 = vmul.f32 %v11832_v49, %v15304_v47  ;;  %5557 = vrot.lane.b32.xlu0 %v15335_v23, %s12239_s5  ;;  %v15351_v54 = vpop.f32.mrf.mxu0  ;;  %v15355_v10 = vpop.eup %11833  ;;  %vm4769_vm8 = vweird.f32 %v11832_v49  ;;  %19100 = vst [vmem:[#allocation73_spill] sm:$0xff] %v15370_v59  ;;  %vm4638_vm14 = vcmp.eq.f32.partialorder %v4637_v21, 8.507059e+37  ;;  %v4669_v62 = vand.u32 2147483648, %v15124_v52  ;;  %v19111_v21 = vld [vmem:[#allocation20_spill] sm:$0xff] }
 0x518   :  { %11242 = vrot.lane.b32.xlu1 %v15339_v58, %s12240_s17  ;;  %v15365_v13 = vpop.eup %11835  ;;  %vm4770_vm12 = vmor %vm4768_vm11, %vm4769_vm8  ;;  %v4641_v14 = vsel %vm4638_vm14, %v4640_v27, %v4636_v36  ;;  %vm4693_vm8 = vweird.f32 %v15183_v50 }
 0x519   :  { %v4765_v30 = vsub.f32 1.0, %v4764_v8  ;;  %v19103_v8 = vld [vmem:[#allocation78_spill] sm:$0xff]  ;;  %v4689_v55 = vmul.f32 %v15365_v13, %v15183_v50  ;;  %v15393_v37 = vpop.eup %11837  ;;  %vm4694_vm6 = vweird.f32 %v15365_v13 }
 0x51a   :  { %10880 = vmatmul.msk.f32.gmra.mxu0 %vm3684_vm2, %v15355_v10  ;;  %v15407_v24 = vpop.eup %11839  ;;  %vm15456_vm9 = vmor %vm4693_vm8, %vm4694_vm6 }
 0x51b   :  { %v4766_v38 = vmul.f32 %v11832_v49, %v4765_v30  ;;  %v15382_v30 = vpack.i.bf16 %v19104_v12, %v19103_v8  ;;  %v19107_v8 = vld [vmem:[#allocation38_spill] sm:$0xff]  ;;  %v4690_v7 = vsub.f32 1.0, %v4689_v55  ;;  %v19114_v55 = vld [vmem:[#allocation85_spill] sm:$0xff]  ;;  %vm4724_vm14 = vweird.f32 %v15407_v24 }
 0x51c   :  { %vm15498_vm3 = vmor %vm4723_vm15, %vm4724_vm14  ;;  %vm4783_vm14 = vweird.f32 %v15351_v54 }
 0x51d   :  { %v4767_v2 = vadd.f32 %v11832_v49, %v4766_v38  ;;  %19105 = vst [vmem:[#allocation76_spill] sm:$0xff] %v15382_v30  ;;  %v19106_v38 = vld [vmem:[#allocation82_spill] sm:$0xff]  ;;  %v4691_v36 = vmul.f32 %v15365_v13, %v4690_v7 }
 0x51e   :  { %v3916_v12 = vsub.f32 %v19107_v8, %v19106_v38  ;;  %v19113_v8 = vld [vmem:[#allocation83_spill] sm:$0xff] }
 0x51f   :  { %5596 = vrot.lane.b32.xlu0 %v15370_v59, %s12239_s5  ;;  %v15388_v19 = vpop.f32.mrf.mxu0  ;;  %v4771_v47 = vsel %vm4770_vm12, %v11832_v49, %v4767_v2  ;;  %v4662_v49 = vadd.f32 %v15323_v22, %v4661_v33  ;;  %v15419_v33 = vmul.f32 %v19111_v21, %v4641_v14  ;;  %v19158_v59 = vld [vmem:[#allocation102_spill] sm:$0xff] }
 0x520   :  { %11841 = vrcp.f32 %v15388_v19  ;;  %11247 = vrot.lane.b32.xlu1 %v15382_v30, %s12240_s17  ;;  %v4776_v53 = vsel %vm4773_vm13, %v4775_v17, %v4771_v47  ;;  %v4019_v60 = vmul.f32 1.442695, %v3916_v12  ;;  %v15426_v47 = vpack.i.bf16 %v19114_v55, %v19113_v8  ;;  %v19121_v30 = vld [vmem:[#allocation90_spill] sm:$0xff] }
 0x521   :  { %v15401_v1 = vmul.f32 %v14853_v15, %v4776_v53  ;;  %11843 = vpow2.f32 %v4017_v32  ;;  %v4667_v15 = vand.u32 2147483647, %v15124_v52  ;;  %19112 = vst [vmem:[#allocation142_spill] sm:$0xff] %v15419_v33  ;;  %v4719_v32 = vmul.f32 %v15407_v24, %v15226_v3 }
 0x522   :  { %10881 = vmatmul.msk.f32.gmra.mxu0 %vm3684_vm2, %v15393_v37  ;;  %11845 = vrcp.f32 %v15275_v35  ;;  %v4666_v52 = vsel %vm15414_vm4, %v15323_v22, %v4662_v49  ;;  %v4670_v12 = vor.u32 1.1754944e-38, %v4669_v62  ;;  %v19115_v22 = vld [vmem:[#allocation41_spill] sm:$0xff]  ;;  %v4804_v7 = vand.u32 2147483648, %v15388_v19 }
 0x523   :  { %19108 = vst [vmem:[#allocation34_spill] sm:$0xff] %v15401_v1  ;;  %5793 = vrot.lane.b32.xlu2 %v15401_v1, %s12239_s5  ;;  %vm4668_vm5 = vcmp.eq.f32.partialorder %v4667_v15, 8.507059e+37  ;;  %11847 = vpow2.f32 %v4019_v60  ;;  %v3917_v49 = vsub.f32 %v19115_v22, %v14897_v31  ;;  %v4720_v62 = vsub.f32 1.0, %v4719_v32  ;;  %v19120_v1 = vld [vmem:[#allocation87_spill] sm:$0xff] }
 0x524   :  { %v4671_v2 = vsel %vm4668_vm5, %v4670_v12, %v4666_v52  ;;  %v4802_v15 = vand.u32 2147483647, %v15388_v19  ;;  %v4692_v8 = vadd.f32 %v15365_v13, %v4691_v36  ;;  %v4699_v31 = vand.u32 2147483648, %v15183_v50  ;;  %v19116_v52 = vld [vmem:[#allocation75_spill] sm:$0xff] }
 0x525   :  { %v15454_v12 = vmul.f32 %v19116_v52, %v4671_v2  ;;  %11849 = vrcp.f32 %v15351_v54  ;;  %vm4798_vm10 = vweird.f32 %v15388_v19  ;;  %v4697_v36 = vand.u32 2147483647, %v15183_v50 }
 0x526   :  { %v11842_v17 = vpop.eup %11841  ;;  %v4721_v22 = vmul.f32 %v15407_v24, %v4720_v62  ;;  %v4805_v55 = vor.u32 1.1754944e-38, %v4804_v7  ;;  %v15466_v2 = vpack.i.bf16 %v19121_v30, %v19120_v1  ;;  %vm4803_vm12 = vcmp.eq.f32.partialorder %v4802_v15, 8.507059e+37  ;;  %v19125_v1 = vld [vmem:[#allocation46_spill] sm:$0xff] }
 0x527   :  { %v4794_v27 = vmul.f32 %v11842_v17, %v15388_v19  ;;  %5635 = vrot.lane.b32.xlu0 %v15419_v33, %s12239_s5  ;;  %v15435_v53 = vpop.f32.mrf.mxu0  ;;  %v15439_v38 = vpop.eup %11843  ;;  %vm4799_vm7 = vweird.f32 %v11842_v17  ;;  %19117 = vst [vmem:[#allocation82_spill] sm:$0xff] %v15454_v12  ;;  %v4700_v62 = vor.u32 1.1754944e-38, %v4699_v31  ;;  %vm4698_vm13 = vcmp.eq.f32.partialorder %v4697_v36, 8.507059e+37  ;;  %v19128_v31 = vld [vmem:[#allocation144_spill] sm:$0xff] }
 0x528   :  { %11252 = vrot.lane.b32.xlu1 %v15426_v47, %s12240_s17  ;;  %v15449_v60 = vpop.eup %11845  ;;  %vm4800_vm11 = vmor %vm4798_vm10, %vm4799_vm7  ;;  %19122 = vst [vmem:[#allocation38_spill] sm:$0xff] %v15466_v2  ;;  %v3918_v26 = vsub.f32 %v19125_v1, %v15070_v51  ;;  %v4727_v51 = vand.u32 2147483647, %v15226_v3  ;;  %vm4753_vm7 = vweird.f32 %v15275_v35 }
 0x529   :  { %v4795_v14 = vsub.f32 1.0, %v4794_v27  ;;  %v15468_v52 = vpop.eup %11847  ;;  %v4749_v58 = vmul.f32 %v15449_v60, %v15275_v35  ;;  %vm4754_vm5 = vweird.f32 %v15449_v60 }
 0x52a   :  { %10882 = vmatmul.msk.f32.gmra.mxu0 %vm3684_vm2, %v15439_v38  ;;  %v4023_v36 = vmul.f32 1.442695, %v3918_v26  ;;  %vm4728_vm4 = vcmp.eq.f32.partialorder %v4727_v51, 8.507059e+37  ;;  %vm15544_vm8 = vmor %vm4753_vm7, %vm4754_vm5 }
 0x52b   :  { %v4796_v21 = vmul.f32 %v11842_v17, %v4795_v14  ;;  %v4021_v14 = vmul.f32 1.442695, %v3917_v49  ;;  %v4696_v49 = vsel %vm15456_vm9, %v15365_v13, %v4692_v8  ;;  %v15491_v8 = vpop.eup %11849  ;;  %v4750_v15 = vsub.f32 1.0, %v4749_v58 }
 0x52c   :  { %v4701_v13 = vsel %vm4698_vm13, %v4700_v62, %v4696_v49  ;;  %v4779_v58 = vmul.f32 %v15491_v8, %v15351_v54  ;;  %vm4784_vm13 = vweird.f32 %v15491_v8 }
 0x52d   :  { %v4797_v27 = vadd.f32 %v11842_v17, %v4796_v21  ;;  %v19123_v21 = vld [vmem:[#allocation152_spill] sm:$0xff]  ;;  %v15504_v32 = vmul.f32 %v19128_v31, %v4701_v13  ;;  %v4751_v62 = vmul.f32 %v15449_v60, %v4750_v15  ;;  %v19133_v13 = vld [vmem:[#allocation147_spill] sm:$0xff]  ;;  %v15528_v15 = vpop.xlane.xlu1 %3875  ;;  %vm15591_vm15 = vmor %vm4783_vm14, %vm4784_vm13 }
 0x52e   :  { %v19134_v31 = vld [vmem:[#allocation43_spill] sm:$0xff] }
 0x52f   :  { %5674 = vrot.lane.b32.xlu0 %v15454_v12, %s12239_s5  ;;  %v15474_v19 = vpop.f32.mrf.mxu0  ;;  %v4801_v50 = vsel %vm4800_vm11, %v11842_v17, %v4797_v27  ;;  %v4722_v17 = vadd.f32 %v15407_v24, %v4721_v22  ;;  %19129 = vst [vmem:[#allocation41_spill] sm:$0xff] %v15504_v32  ;;  %v19131_v22 = vld [vmem:[#allocation94_spill] sm:$0xff]  ;;  %v3919_v1 = vsub.f32 %v19134_v31, %v19133_v13  ;;  %v19143_v12 = vld [vmem:[#allocation96_spill] sm:$0xff] }
 0x530   :  { %11851 = vrcp.f32 %v15474_v19  ;;  %11257 = vrot.lane.b32.xlu1 %v15466_v2, %s12240_s17  ;;  %v4806_v7 = vsel %vm4803_vm12, %v4805_v55, %v4801_v50  ;;  %v4729_v55 = vand.u32 2147483648, %v15226_v3  ;;  %vm4828_vm9 = vweird.f32 %v15474_v19 }
 0x531   :  { %v15483_v30 = vmul.f32 %v19123_v21, %v4806_v7  ;;  %11853 = vpow2.f32 %v4021_v14  ;;  %v19130_v14 = vld [vmem:[#allocation92_spill] sm:$0xff]  ;;  %v4726_v3 = vsel %vm15498_vm3, %v15407_v24, %v4722_v17  ;;  %v4025_v63 = vmul.f32 1.442695, %v3919_v1 }
 0x532   :  { %10883 = vmatmul.msk.f32.gmra.mxu0 %vm3684_vm2, %v15468_v52  ;;  %11855 = vrcp.f32 %v15435_v53  ;;  %v15510_v50 = vpack.i.bf16 %v19131_v22, %v19130_v14  ;;  %v4730_v49 = vor.u32 1.1754944e-38, %v4729_v55  ;;  %v4780_v55 = vsub.f32 1.0, %v4779_v58 }
 0x533   :  { %19124 = vst [vmem:[#allocation20_spill] sm:$0xff] %v15483_v30  ;;  %5832 = vrot.lane.b32.xlu2 %v15483_v30, %s12239_s5  ;;  %11857 = vpow2.f32 %v4023_v36  ;;  %v4834_v14 = vand.u32 2147483648, %v15474_v19  ;;  %v4752_v36 = vadd.f32 %v15449_v60, %v4751_v62  ;;  %v4759_v58 = vand.u32 2147483648, %v15275_v35 }
 0x534   :  { %19132 = vst [vmem:[#allocation75_spill] sm:$0xff] %v15510_v50  ;;  %v4731_v17 = vsel %vm4728_vm4, %v4730_v49, %v4726_v3  ;;  %v19135_v3 = vld [vmem:[#allocation146_spill] sm:$0xff]  ;;  %v4781_v62 = vmul.f32 %v15491_v8, %v4780_v55 }
 0x535   :  { %v15542_v49 = vmul.f32 %v19135_v3, %v4731_v17  ;;  %v4835_v22 = vor.u32 1.1754944e-38, %v4834_v14  ;;  %v19139_v17 = vld [vmem:[#allocation97_spill] sm:$0xff]  ;;  %v19140_v3 = vld [vmem:[#allocation98_spill] sm:$0xff]  ;;  %v4756_v55 = vsel %vm15544_vm8, %v15449_v60, %v4752_v36  ;;  %v4760_v14 = vor.u32 1.1754944e-38, %v4759_v58 }
 0x536   :  { %v11852_v27 = vpop.eup %11851  ;;  %v15556_v48 = vpack.i.bf16 %v19140_v3, %v19139_v17  ;;  %v19141_v17 = vld [vmem:[#allocation157_spill] sm:$0xff]  ;;  %v19142_v3 = vld [vmem:[#allocation128_spill] sm:$0xff]  ;;  %v4782_v36 = vadd.f32 %v15491_v8, %v4781_v62 }
 0x537   :  { %v4824_v7 = vmul.f32 %v11852_v27, %v15474_v19  ;;  %5713 = vrot.lane.b32.xlu0 %v15504_v32, %s12239_s5  ;;  %v15519_v26 = vpop.f32.mrf.mxu0  ;;  %v15523_v21 = vpop.eup %11853  ;;  %vm4829_vm6 = vweird.f32 %v11852_v27  ;;  %19136 = vst [vmem:[#allocation152_spill] sm:$0xff] %v15542_v49  ;;  %v19147_v62 = vld [vmem:[#allocation24_spill] sm:$0xff] }
 0x538   :  { %11262 = vrot.lane.b32.xlu1 %v15510_v50, %s12240_s17  ;;  %v15533_v30 = vpop.eup %11855  ;;  %v15535_v50 = vpop.xlane.xlu0 %3863  ;;  %11859 = vrcp.f32 %v15519_v26  ;;  %vm4830_vm10 = vmor %vm4828_vm9, %vm4829_vm6  ;;  %vm4813_vm6 = vweird.f32 %v15435_v53  ;;  %vm4843_vm13 = vweird.f32 %v15519_v26 }
 0x539   :  { %v4825_v24 = vsub.f32 1.0, %v4824_v7  ;;  %v4832_v7 = vand.u32 2147483647, %v15474_v19  ;;  %v4809_v2 = vmul.f32 %v15533_v30, %v15435_v53  ;;  %v15558_v32 = vpop.xlane.xlu2 %3869  ;;  %vm4814_vm4 = vweird.f32 %v15533_v30 }
 0x53a   :  { %10884 = vmatmul.msk.f32.gmra.mxu0 %vm3684_vm2, %v15523_v21  ;;  %vm15633_vm7 = vmor %vm4813_vm6, %vm4814_vm4 }
 0x53b   :  { %v4826_v51 = vmul.f32 %v11852_v27, %v4825_v24  ;;  %v4757_v24 = vand.u32 2147483647, %v15275_v35  ;;  %vm4833_vm11 = vcmp.eq.f32.partialorder %v4832_v7, 8.507059e+37 }
 0x53d   :  { %v4827_v31 = vadd.f32 %v11852_v27, %v4826_v51  ;;  %v15567_v51 = vpop.eup %11857  ;;  %vm4758_vm12 = vcmp.eq.f32.partialorder %v4757_v24, 8.507059e+37 }
 0x53e   :  { %v4761_v7 = vsel %vm4758_vm12, %v4760_v14, %v4756_v55  ;;  %v15581_v58 = vpop.eup %11859  ;;  %v19149_v14 = vld [vmem:[#allocation99_spill] sm:$0xff] }
 0x53f   :  { %5752 = vrot.lane.b32.xlu0 %v15542_v49, %s12239_s5  ;;  %v15562_v19 = vpop.f32.mrf.mxu0  ;;  %v4831_v35 = vsel %vm4830_vm10, %v11852_v27, %v4827_v31  ;;  %v3920_v49 = vsub.f32 %v19142_v3, %v19141_v17  ;;  %v4810_v27 = vsub.f32 1.0, %v4809_v2  ;;  %v15596_v17 = vmul.f32 %v19147_v62, %v4761_v7 }
 0x540   :  { %11861 = vrcp.f32 %v15562_v19  ;;  %11267 = vrot.lane.b32.xlu1 %v15556_v48, %s12240_s17  ;;  %v4836_v1 = vsel %vm4833_vm11, %v4835_v22, %v4831_v35  ;;  %v4789_v22 = vand.u32 2147483648, %v15351_v54  ;;  %v4839_v55 = vmul.f32 %v15581_v58, %v15519_v26 }
 0x541   :  { %v15575_v33 = vmul.f32 %v19143_v12, %v4836_v1  ;;  %11863 = vpow2.f32 %v4025_v63  ;;  %v4787_v12 = vand.u32 2147483647, %v15351_v54  ;;  %v4027_v2 = vmul.f32 1.442695, %v3920_v49  ;;  %19148 = vst [vmem:[#allocation144_spill] sm:$0xff] %v15596_v17  ;;  %v19150_v54 = vld [vmem:[#allocation100_spill] sm:$0xff] }
 0x542   :  { %v11198_v60 = vpop.permute.xlu1 %11197  ;;  %10885 = vmatmul.msk.f32.gmra.mxu0 %vm3684_vm2, %v15567_v51  ;;  %v4811_v35 = vmul.f32 %v15533_v30, %v4810_v27  ;;  %v15603_v49 = vpack.i.bf16 %v19150_v54, %v19149_v14  ;;  %v4786_v1 = vsel %vm15591_vm15, %v15491_v8, %v4782_v36  ;;  %v5482_v36 = vpop.permute.xlu2 %5481  ;;  %v4864_v62 = vand.u32 2147483648, %v15562_v19 }
 0x543   :  { %19144 = vst [vmem:[#allocation46_spill] sm:$0xff] %v15575_v33  ;;  %v11200_v13 = vunpack.i.h.bf16 %v11198_v60  ;;  %v5480_v31 = vpop.permute.xlu0 %5479  ;;  %5871 = vrot.lane.b32.xlu2 %v15575_v33, %s12239_s5  ;;  %v11199_v63 = vunpack.i.l.bf16 %v11198_v60  ;;  %vm4788_vm3 = vcmp.eq.f32.partialorder %v4787_v12, 8.507059e+37  ;;  %vm4858_vm8 = vweird.f32 %v15562_v19 }
 0x544   :  { %10910 = vmatmul.msk.f32.vlgmr.msra.gmra.mxu2 %vm1499_vm1, %v5480_v31  ;;  %19151 = vst [vmem:[#allocation147_spill] sm:$0xff] %v15603_v49  ;;  %v4790_v31 = vor.u32 1.1754944e-38, %v4789_v22  ;;  %v4812_v12 = vadd.f32 %v15533_v30, %v4811_v35  ;;  %vm4844_vm12 = vweird.f32 %v15581_v58 }
 0x545   :  { %5585 = vmatpush.msra.mxu1 %v11200_v13  ;;  %v19152_v13 = vld [vmem:[#allocation48_spill] sm:$0xff]  ;;  %vm15680_vm14 = vmor %vm4843_vm13, %vm4844_vm12 }
 0x546   :  { %v11862_v3 = vpop.eup %11861  ;;  %v3921_v8 = vsub.f32 %v19152_v13, %v15135_v4  ;;  %v4791_v24 = vsel %vm4788_vm3, %v4790_v31, %v4786_v1  ;;  %v4862_v4 = vand.u32 2147483647, %v15562_v19  ;;  %v19155_v31 = vld [vmem:[#allocation91_spill] sm:$0xff] }
 0x547   :  { %v4854_v60 = vmul.f32 %v11862_v3, %v15562_v19  ;;  %5586 = vmatpush.msra.mxu1 %v11199_v63  ;;  %5791 = vrot.lane.b32.xlu0 %v15596_v17, %s12239_s5  ;;  %v15611_v7 = vpop.f32.mrf.mxu0  ;;  %v15616_v27 = vpop.eup %11863  ;;  %v4840_v63 = vsub.f32 1.0, %v4839_v55  ;;  %vm4859_vm5 = vweird.f32 %v11862_v3  ;;  %v4817_v55 = vand.u32 2147483647, %v15435_v53  ;;  %v19157_v17 = vld [vmem:[#allocation101_spill] sm:$0xff] }
 0x548   :  { %11865 = vrcp.f32 %v15611_v7  ;;  %11272 = vrot.lane.b32.xlu1 %v15603_v49, %s12240_s17  ;;  %vm4860_vm9 = vmor %vm4858_vm8, %vm4859_vm5  ;;  %v15647_v23 = vpack.i.bf16 %v19158_v59, %v19157_v17  ;;  %vm4863_vm10 = vcmp.eq.f32.partialorder %v4862_v4, 8.507059e+37  ;;  %v4849_v4 = vand.u32 2147483648, %v15519_v26  ;;  %v19177_v59 = vld [vmem:[#allocation106_spill] sm:$0xff] }
 0x549   :  { %11867 = vpow2.f32 %v4027_v2  ;;  %v4855_v22 = vsub.f32 1.0, %v4854_v60  ;;  %v4819_v2 = vand.u32 2147483648, %v15435_v53  ;;  %v15639_v60 = vmul.f32 %v19155_v31, %v4791_v24  ;;  %v19162_v31 = vld [vmem:[#allocation164_spill] sm:$0xff] }
 0x54a   :  { %v11203_v14 = vpop.permute.xlu1 %11202  ;;  %10886 = vmatmul.msk.f32.gmra.mxu0 %vm3684_vm2, %v15616_v27  ;;  %v4865_v53 = vor.u32 1.1754944e-38, %v4864_v62  ;;  %19159 = vst [vmem:[#allocation146_spill] sm:$0xff] %v15647_v23  ;;  %v19161_v62 = vld [vmem:[#allocation132_spill] sm:$0xff]  ;;  %vm4818_vm11 = vcmp.eq.f32.partialorder %v4817_v55, 8.507059e+37  ;;  %v4847_v55 = vand.u32 2147483647, %v15519_v26  ;;  %vm4873_vm5 = vweird.f32 %v15611_v7 }
 0x54b   :  { %v4856_v33 = vmul.f32 %v11862_v3, %v4855_v22  ;;  %v11205_v54 = vunpack.i.h.bf16 %v11203_v14  ;;  %v5519_v49 = vpop.permute.xlu0 %5518  ;;  %v11204_v1 = vunpack.i.l.bf16 %v11203_v14  ;;  %19156 = vst [vmem:[#allocation43_spill] sm:$0xff] %v15639_v60 }
 0x54c   :  { %10911 = vmatmul.msk.f32.gmra.mxu2 %vm1499_vm1, %v5482_v36  ;;  %10912 = vmatmul.msk.f32.vlgmr.msra.gmra.mxu3 %vm1499_vm1, %v5519_v49  ;;  %v4029_v36 = vmul.f32 1.442695, %v3921_v8  ;;  %v4841_v49 = vmul.f32 %v15581_v58, %v4840_v63  ;;  %v4820_v8 = vor.u32 1.1754944e-38, %v4819_v2  ;;  %v19160_v63 = vld [vmem:[#allocation88_spill] sm:$0xff]  ;;  %v5521_v2 = vpop.permute.xlu2 %5520  ;;  %vm4848_vm15 = vcmp.eq.f32.partialorder %v4847_v55, 8.507059e+37 }
 0x54d   :  { %5624 = vmatpush.msrb.mxu2 %v11205_v54  ;;  %v4857_v13 = vadd.f32 %v11862_v3, %v4856_v33  ;;  %v4816_v54 = vsel %vm15633_vm7, %v15533_v30, %v4812_v12 }
 0x54e   :  { %v15641_v22 = vpop.eup %11865  ;;  %v4821_v30 = vsel %vm4818_vm11, %v4820_v8, %v4816_v54  ;;  %v4842_v12 = vadd.f32 %v15581_v58, %v4841_v49  ;;  %v19168_v8 = vld [vmem:[#allocation103_spill] sm:$0xff] }
 0x54f   :  { %v15649_v34 = vpop.eup %11867  ;;  %v4869_v19 = vmul.f32 %v15641_v22, %v15611_v7  ;;  %5625 = vmatpush.msrb.mxu2 %v11204_v1  ;;  %5830 = vrot.lane.b32.xlu0 %v15639_v60, %s12239_s5  ;;  %v15655_v33 = vpop.f32.mrf.mxu0  ;;  %v4861_v14 = vsel %vm4860_vm9, %v11862_v3, %v4857_v13  ;;  %v3922_v1 = vsub.f32 %v19161_v62, %v19160_v63  ;;  %v4850_v62 = vor.u32 1.1754944e-38, %v4849_v4  ;;  %v19170_v4 = vld [vmem:[#allocation161_spill] sm:$0xff] }
 0x550   :  { %11869 = vrcp.f32 %v15655_v33  ;;  %11277 = vrot.lane.b32.xlu1 %v15647_v23, %s12240_s17  ;;  %v4866_v24 = vsel %vm4863_vm10, %v4865_v53, %v4861_v14  ;;  %v4846_v26 = vsel %vm15680_vm14, %v15581_v58, %v4842_v12  ;;  %vm4874_vm3 = vweird.f32 %v15641_v22  ;;  %v19176_v23 = vld [vmem:[#allocation105_spill] sm:$0xff] }
 0x551   :  { %v15666_v17 = vmul.f32 %v19162_v31, %v4866_v24  ;;  %11871 = vpow2.f32 %v4029_v36  ;;  %v4870_v35 = vsub.f32 1.0, %v4869_v19  ;;  %v4031_v53 = vmul.f32 1.442695, %v3922_v1  ;;  %v19166_v19 = vld [vmem:[#allocation95_spill] sm:$0xff]  ;;  %v19169_v24 = vld [vmem:[#allocation104_spill] sm:$0xff]  ;;  %vm15718_vm6 = vmor %vm4873_vm5, %vm4874_vm3 }
 0x552   :  { %v11208_v3 = vpop.permute.xlu1 %11207  ;;  %10887 = vmatmul.msk.f32.gmra.mxu0 %vm3684_vm2, %v15649_v34  ;;  %v15685_v14 = vmul.f32 %v19166_v19, %v4821_v30  ;;  %v15689_v63 = vpack.i.bf16 %v19169_v24, %v19168_v8  ;;  %v4851_v12 = vsel %vm4848_vm15, %v4850_v62, %v4846_v26  ;;  %v4879_v26 = vand.u32 2147483648, %v15611_v7  ;;  %v19172_v62 = vld [vmem:[#allocation162_spill] sm:$0xff] }
 0x553   :  { %19163 = vst [vmem:[#allocation157_spill] sm:$0xff] %v15666_v17  ;;  %v11210_v13 = vunpack.i.h.bf16 %v11208_v3  ;;  %5910 = vrot.lane.b32.xlu2 %v15666_v17, %s12239_s5  ;;  %v11209_v36 = vunpack.i.l.bf16 %v11208_v3  ;;  %v4871_v1 = vmul.f32 %v15641_v22, %v4870_v35  ;;  %vm4888_vm7 = vweird.f32 %v15655_v33 }
 0x554   :  { %10913 = vmatmul.msk.f32.gmra.mxu3 %vm1499_vm1, %v5521_v2  ;;  %19167 = vst [vmem:[#allocation128_spill] sm:$0xff] %v15685_v14  ;;  %v19171_v2 = vld [vmem:[#allocation130_spill] sm:$0xff]  ;;  %v4877_v8 = vand.u32 2147483647, %v15611_v7 }
 0x555   :  { %5663 = vmatpush.msrb.mxu3 %v11210_v13  ;;  %v3923_v35 = vsub.f32 %v19171_v2, %v19170_v4  ;;  %v4894_v13 = vand.u32 2147483648, %v15655_v33 }
 0x556   :  { %v11870_v54 = vpop.eup %11869  ;;  %vm4878_vm10 = vcmp.eq.f32.partialorder %v4877_v8, 8.507059e+37 }
 0x557   :  { %v4884_v31 = vmul.f32 %v11870_v54, %v15655_v33  ;;  %5664 = vmatpush.msrb.mxu3 %v11209_v36  ;;  %5869 = vrot.lane.b32.xlu0 %v15685_v14, %s12239_s5  ;;  %v15698_v3 = vpop.f32.mrf.mxu0  ;;  %v15703_v30 = vpop.eup %11871  ;;  %v4892_v36 = vand.u32 2147483647, %v15655_v33  ;;  %vm4889_vm4 = vweird.f32 %v11870_v54  ;;  %v4895_v17 = vor.u32 1.1754944e-38, %v4894_v13 }
 0x558   :  { %11873 = vrcp.f32 %v15698_v3  ;;  %11282 = vrot.lane.b32.xlu1 %v15689_v63, %s12240_s17  ;;  %vm4890_vm8 = vmor %vm4888_vm7, %vm4889_vm4  ;;  %v15726_v14 = vpack.i.bf16 %v19177_v59, %v19176_v23  ;;  %vm4903_vm12 = vweird.f32 %v15698_v3  ;;  %v4907_v4 = vand.u32 2147483647, %v15698_v3  ;;  %v19190_v59 = vld [vmem:[#allocation109_spill] sm:$0xff] }
 0x559   :  { %11875 = vpow2.f32 %v4031_v53  ;;  %v4885_v58 = vsub.f32 1.0, %v4884_v31  ;;  %v4872_v53 = vadd.f32 %v15641_v22, %v4871_v1  ;;  %v15716_v31 = vmul.f32 %v19172_v62, %v4851_v12 }
 0x55a   :  { %v11213_v49 = vpop.permute.xlu1 %11212  ;;  %10888 = vmatmul.msk.f32.gmra.mxu0 %vm3684_vm2, %v15703_v30  ;;  %v4033_v1 = vmul.f32 1.442695, %v3923_v35  ;;  %19178 = vst [vmem:[#allocation24_spill] sm:$0xff] %v15726_v14  ;;  %vm4893_vm9 = vcmp.eq.f32.partialorder %v4892_v36, 8.507059e+37  ;;  %v4880_v35 = vor.u32 1.1754944e-38, %v4879_v26  ;;  %vm4908_vm14 = vcmp.eq.f32.partialorder %v4907_v4, 8.507059e+37 }
 0x55b   :  { %v4886_v19 = vmul.f32 %v11870_v54, %v4885_v58  ;;  %v11215_v55 = vunpack.i.h.bf16 %v11213_v49  ;;  %19173 = vst [vmem:[#allocation96_spill] sm:$0xff] %v15716_v31  ;;  %v11214_v2 = vunpack.i.l.bf16 %v11213_v49  ;;  %v4876_v7 = vsel %vm15718_vm6, %v15641_v22, %v4872_v53 }
 0x55c   :  { %v4881_v22 = vsel %vm4878_vm10, %v4880_v35, %v4876_v7  ;;  %v19185_v7 = vld [vmem:[#allocation108_spill] sm:$0xff] }
 0x55d   :  { %5702 = vmatpush.msrb.mxu1 %v11215_v55  ;;  %v4887_v58 = vadd.f32 %v11870_v54, %v4886_v19 }
 0x55e   :  { %v11874_v24 = vpop.eup %11873 }
 0x55f   :  { %v15728_v12 = vpop.eup %11875  ;;  %v4899_v62 = vmul.f32 %v11874_v24, %v15698_v3  ;;  %5908 = vrot.lane.b32.xlu0 %v15716_v31, %s12239_s5  ;;  %v15733_v33 = vpop.f32.mrf.mxu0  ;;  %5703 = vmatpush.msrb.mxu1 %v11214_v2  ;;  %v4891_v49 = vsel %vm4890_vm8, %v11870_v54, %v4887_v58  ;;  %v19180_v2 = vld [vmem:[#allocation133_spill] sm:$0xff]  ;;  %vm4904_vm11 = vweird.f32 %v11874_v24 }
 0x560   :  { %11877 = vrcp.f32 %v15733_v33  ;;  %11287 = vrot.lane.b32.xlu1 %v15726_v14, %s12240_s17  ;;  %v4896_v13 = vsel %vm4893_vm9, %v4895_v17, %v4891_v49  ;;  %v3924_v54 = vsub.f32 %v19180_v2, %v15172_v0  ;;  %v15753_v0 = vmul.f32 %v15023_v39, %v4881_v22  ;;  %vm15756_vm13 = vmor %vm4903_vm12, %vm4904_vm11  ;;  %v19184_v49 = vld [vmem:[#allocation107_spill] sm:$0xff]  ;;  %v19188_v22 = vld [vmem:[#allocation134_spill] sm:$0xff] }
 0x561   :  { %v4900_v19 = vsub.f32 1.0, %v4899_v62  ;;  %v15742_v55 = vmul.f32 %v15088_v42, %v4896_v13  ;;  %11879 = vpow2.f32 %v4033_v1  ;;  %v4909_v42 = vand.u32 2147483648, %v15698_v3 }
 0x562   :  { %v11218_v36 = vpop.permute.xlu1 %11217  ;;  %10889 = vmatmul.msk.f32.gmra.mxu0 %vm3684_vm2, %v15728_v12  ;;  %19181 = vst [vmem:[#allocation91_spill] sm:$0xff] %v15753_v0  ;;  %v4035_v1 = vmul.f32 1.442695, %v3924_v54  ;;  %v15762_v35 = vpack.i.bf16 %v19185_v7, %v19184_v49  ;;  %v4922_v62 = vand.u32 2147483647, %v15733_v33  ;;  %vm4918_vm3 = vweird.f32 %v15733_v33  ;;  %v19191_v49 = vld [vmem:[#allocation110_spill] sm:$0xff] }
 0x563   :  { %19179 = vst [vmem:[#allocation48_spill] sm:$0xff] %v15742_v55  ;;  %v4901_v53 = vmul.f32 %v11874_v24, %v4900_v19  ;;  %v11220_v26 = vunpack.i.h.bf16 %v11218_v36  ;;  %5949 = vrot.lane.b32.xlu2 %v15742_v55, %s12239_s5  ;;  %v11219_v17 = vunpack.i.l.bf16 %v11218_v36  ;;  %v4910_v19 = vor.u32 1.1754944e-38, %v4909_v42  ;;  %v19187_v36 = vld [vmem:[#allocation149_spill] sm:$0xff] }
 0x564   :  { %19186 = vst [vmem:[#allocation88_spill] sm:$0xff] %v15762_v35  ;;  %vm4923_vm5 = vcmp.eq.f32.partialorder %v4922_v62, 8.507059e+37 }
 0x565   :  { %5741 = vmatpush.msra.mxu2 %v11220_v26  ;;  %v4902_v8 = vadd.f32 %v11874_v24, %v4901_v53  ;;  %v3925_v53 = vsub.f32 %v19188_v22, %v19187_v36  ;;  %v4924_v26 = vand.u32 2147483648, %v15733_v33 }
 0x566   :  { %v11878_v58 = vpop.eup %11877 }
 0x567   :  { %v4914_v13 = vmul.f32 %v11878_v58, %v15733_v33  ;;  %5742 = vmatpush.msra.mxu2 %v11219_v17  ;;  %5947 = vrot.lane.b32.xlu0 %v15753_v0, %s12239_s5  ;;  %v4376_v39 = vpop.f32.mrf.mxu0  ;;  %v4906_v3 = vsel %vm15756_vm13, %v11874_v24, %v4902_v8  ;;  %v15771_v2 = vpop.eup %11879  ;;  %vm4919_vm15 = vweird.f32 %v11878_v58  ;;  %v4037_v22 = vmul.f32 1.442695, %v3925_v53 }
 0x568   :  { %11881 = vrcp.f32 %v4376_v39  ;;  %11292 = vrot.lane.b32.xlu1 %v15762_v35, %s12240_s17  ;;  %v4911_v24 = vsel %vm4908_vm14, %v4910_v19, %v4906_v3  ;;  %vm4920_vm4 = vmor %vm4918_vm3, %vm4919_vm15  ;;  %v4925_v7 = vor.u32 1.1754944e-38, %v4924_v26  ;;  %v15785_v3 = vpack.i.bf16 %v19191_v49, %v19190_v59 }
 0x569   :  { %v4915_v54 = vsub.f32 1.0, %v4914_v13  ;;  %11883 = vpow2.f32 %v4035_v1  ;;  %v15781_v4 = vmul.f32 %v15133_v43, %v4911_v24  ;;  %v4939_v24 = vand.u32 2147483648, %v4376_v39 }
 0x56a   :  { %v11223_v17 = vpop.permute.xlu1 %11222  ;;  %10890 = vmatmul.msk.f32.gmra.mxu0 %vm3684_vm2, %v15771_v2  ;;  %vm4933_vm7 = vweird.f32 %v4376_v39 }
 0x56b   :  { %v4916_v42 = vmul.f32 %v11878_v58, %v4915_v54  ;;  %v11225_v8 = vunpack.i.h.bf16 %v11223_v17  ;;  %v11224_v13 = vunpack.i.l.bf16 %v11223_v17  ;;  %19189 = vst [vmem:[#allocation132_spill] sm:$0xff] %v15781_v4 }
 0x56d   :  { %5780 = vmatpush.msra.mxu3 %v11225_v8  ;;  %v4917_v1 = vadd.f32 %v11878_v58, %v4916_v42  ;;  %v19194_v8 = vld [vmem:[#allocation55_spill] sm:$0xff] }
 0x56e   :  { %v11882_v36 = vpop.eup %11881 }
 0x56f   :  { %v4929_v19 = vmul.f32 %v11882_v36, %v4376_v39  ;;  %5781 = vmatpush.msra.mxu3 %v11224_v13  ;;  %5986 = vrot.lane.b32.xlu0 %v15781_v4, %s12239_s5  ;;  %v4379_v33 = vpop.f32.mrf.mxu0  ;;  %v4921_v54 = vsel %vm4920_vm4, %v11878_v58, %v4917_v1  ;;  %v15789_v17 = vpop.eup %11883  ;;  %v19193_v58 = vld [vmem:[#allocation165_spill] sm:$0xff]  ;;  %vm4934_vm6 = vweird.f32 %v11882_v36 }
 0x570   :  { %11885 = vrcp.f32 %v4379_v33  ;;  %11297 = vrot.lane.b32.xlu1 %v15785_v3, %s12240_s17  ;;  %v4926_v43 = vsel %vm4923_vm5, %v4925_v7, %v4921_v54  ;;  %v3926_v62 = vsub.f32 %v19194_v8, %v19193_v58  ;;  %v4937_v7 = vand.u32 2147483647, %v4376_v39  ;;  %vm4935_vm8 = vmor %vm4933_vm7, %vm4934_vm6  ;;  %v19196_v54 = vld [vmem:[#allocation112_spill] sm:$0xff] }
 0x571   :  { %v4930_v53 = vsub.f32 1.0, %v4929_v19  ;;  %v15794_v26 = vmul.f32 %v15160_v46, %v4926_v43  ;;  %11887 = vpow2.f32 %v4037_v22  ;;  %v4940_v22 = vor.u32 1.1754944e-38, %v4939_v24  ;;  %v19195_v19 = vld [vmem:[#allocation111_spill] sm:$0xff] }
 0x572   :  { %v15796_v42 = vpop.permute.xlu1 %11227  ;;  %10891 = vmatmul.msk.f32.gmra.mxu0 %vm3684_vm2, %v15789_v17  ;;  %v15806_v43 = vpack.i.bf16 %v19196_v54, %v19195_v19  ;;  %v4039_v59 = vmul.f32 1.442695, %v3926_v62  ;;  %vm4938_vm9 = vcmp.eq.f32.partialorder %v4937_v7, 8.507059e+37  ;;  %v19199_v24 = vld [vmem:[#allocation135_spill] sm:$0xff]  ;;  %v4954_v54 = vand.u32 2147483648, %v4379_v33 }
 0x573   :  { %19192 = vst [vmem:[#allocation164_spill] sm:$0xff] %v15794_v26  ;;  %v4931_v13 = vmul.f32 %v11882_v36, %v4930_v53  ;;  %5988 = vrot.lane.b32.xlu2 %v15794_v26, %s12239_s5  ;;  %vm4948_vm11 = vweird.f32 %v4379_v33 }
 0x574   :  { %19197 = vst [vmem:[#allocation95_spill] sm:$0xff] %v15806_v43  ;;  %v4955_v7 = vor.u32 1.1754944e-38, %v4954_v54 }
 0x575   :  { %v4932_v1 = vadd.f32 %v11882_v36, %v4931_v13  ;;  %v3927_v13 = vsub.f32 %v19199_v24, %v15198_v6  ;;  %v19201_v6 = vld [vmem:[#allocation114_spill] sm:$0xff] }
 0x576   :  { %v11886_v46 = vpop.eup %11885 }
 0x577   :  { %v4944_v49 = vmul.f32 %v11886_v46, %v4379_v33  ;;  %v4382_v23 = vpop.f32.mrf.mxu0  ;;  %v4936_v55 = vsel %vm4935_vm8, %v11882_v36, %v4932_v1  ;;  %v15808_v53 = vpop.eup %11887  ;;  %vm4949_vm10 = vweird.f32 %v11886_v46  ;;  %v19200_v1 = vld [vmem:[#allocation113_spill] sm:$0xff] }
 0x578   :  { %11889 = vrcp.f32 %v4382_v23  ;;  %11302 = vrot.lane.b32.xlu1 %v15806_v43, %s12240_s17  ;;  %v4941_v39 = vsel %vm4938_vm9, %v4940_v22, %v4936_v55  ;;  %v4952_v55 = vand.u32 2147483647, %v4379_v33  ;;  %vm4950_vm12 = vmor %vm4948_vm11, %vm4949_vm10  ;;  %v15825_v22 = vpack.i.bf16 %v19201_v6, %v19200_v1  ;;  %v19205_v1 = vld [vmem:[#allocation136_spill] sm:$0xff] }
 0x579   :  { %v4945_v58 = vsub.f32 1.0, %v4944_v49  ;;  %v15813_v8 = vmul.f32 %v15187_v29, %v4941_v39  ;;  %11891 = vpow2.f32 %v4039_v59  ;;  %v4041_v39 = vmul.f32 1.442695, %v3927_v13  ;;  %v19204_v13 = vld [vmem:[#allocation151_spill] sm:$0xff] }
 0x57a   :  { %v15817_v62 = vpop.permute.xlu1 %11232  ;;  %10892 = vmatmul.msk.f32.gmra.mxu0 %vm3684_vm2, %v15808_v53  ;;  %19202 = vst [vmem:[#allocation130_spill] sm:$0xff] %v15825_v22  ;;  %vm4953_vm13 = vcmp.eq.f32.partialorder %v4952_v55, 8.507059e+37  ;;  %v4969_v26 = vand.u32 2147483648, %v4382_v23  ;;  %vm4963_vm15 = vweird.f32 %v4382_v23 }
 0x57b   :  { %19198 = vst [vmem:[#allocation161_spill] sm:$0xff] %v15813_v8  ;;  %v4946_v36 = vmul.f32 %v11886_v46, %v4945_v58  ;;  %6025 = vrot.lane.b32.xlu0 %v15813_v8, %s12239_s5  ;;  %v3928_v8 = vsub.f32 %v19205_v1, %v19204_v13  ;;  %v19206_v1 = vld [vmem:[#allocation115_spill] sm:$0xff] }
 0x57d   :  { %v4947_v49 = vadd.f32 %v11886_v46, %v4946_v36  ;;  %v15834_v36 = vpop.xlane.xlu0 %3872 }
 0x57e   :  { %v11890_v29 = vpop.eup %11889 }
 0x57f   :  { %v4959_v24 = vmul.f32 %v11890_v29, %v4382_v23  ;;  %v15827_v19 = vpop.f32.mrf.mxu0  ;;  %v4951_v59 = vsel %vm4950_vm12, %v11886_v46, %v4947_v49  ;;  %v15832_v58 = vpop.eup %11891  ;;  %vm4964_vm14 = vweird.f32 %v11890_v29  ;;  %v4967_v49 = vand.u32 2147483647, %v4382_v23 }
 0x580   :  { %11893 = vrcp.f32 %v15827_v19  ;;  %11307 = vrot.lane.b32.xlu1 %v15825_v22, %s12240_s17  ;;  %v4956_v33 = vsel %vm4953_vm13, %v4955_v7, %v4951_v59  ;;  %vm4965_vm3 = vmor %vm4963_vm15, %vm4964_vm14  ;;  %v4970_v59 = vor.u32 1.1754944e-38, %v4969_v26  ;;  %v15851_v22 = vpop.f32.mrf.mxu1  ;;  %vm4978_vm6 = vweird.f32 %v15827_v19 }
 0x581   :  { %v4960_v54 = vsub.f32 1.0, %v4959_v24  ;;  %v15837_v6 = vmul.f32 %v15208_v41, %v4956_v33  ;;  %11895 = vpow2.f32 %v4041_v39  ;;  %v4043_v24 = vmul.f32 1.442695, %v3928_v8  ;;  %v19207_v33 = vld [vmem:[#allocation116_spill] sm:$0xff]  ;;  %19208 = vst [vmem:[#allocation133_spill] sm:$0xff] %v15851_v22 }
 0x582   :  { %v15841_v46 = vpop.permute.xlu1 %11237  ;;  %10893 = vmatmul.msk.f32.gmra.mxu0 %vm3684_vm2, %v15832_v58  ;;  %v15849_v13 = vpack.i.bf16 %v19207_v33, %v19206_v1  ;;  %vm4968_vm4 = vcmp.eq.f32.partialorder %v4967_v49, 8.507059e+37  ;;  %v11230_v8 = vunpack.i.h.bf16 %v15796_v42  ;;  %v19210_v33 = vld [vmem:[#allocation167_spill] sm:$0xff] }
 0x583   :  { %19203 = vst [vmem:[#allocation162_spill] sm:$0xff] %v15837_v6  ;;  %v4961_v55 = vmul.f32 %v11890_v29, %v4960_v54  ;;  %6027 = vrot.lane.b32.xlu2 %v15837_v6, %s12239_s5  ;;  %v5560_v6 = vpop.permute.xlu2 %5559 }
 0x585   :  { %v4962_v7 = vadd.f32 %v11890_v29, %v4961_v55 }
 0x586   :  { %v11894_v41 = vpop.eup %11893 }
 0x587   :  { %v4974_v39 = vmul.f32 %v11894_v41, %v15827_v19  ;;  %v15854_v54 = vpop.f32.mrf.mxu0  ;;  %v4966_v35 = vsel %vm4965_vm3, %v11890_v29, %v4962_v7  ;;  %v15859_v26 = vpop.eup %11895  ;;  %v19211_v29 = vld [vmem:[#allocation57_spill] sm:$0xff]  ;;  %v4984_v7 = vand.u32 2147483648, %v15827_v19  ;;  %vm4979_vm5 = vweird.f32 %v11894_v41 }
 0x588   :  { %11897 = vrcp.f32 %v15854_v54  ;;  %11312 = vrot.lane.b32.xlu1 %v15849_v13, %s12240_s17  ;;  %v4971_v23 = vsel %vm4968_vm4, %v4970_v59, %v4966_v35  ;;  %v3929_v49 = vsub.f32 %v19211_v29, %v19210_v33  ;;  %v11229_v35 = vunpack.i.l.bf16 %v15796_v42  ;;  %vm4980_vm7 = vmor %vm4978_vm6, %vm4979_vm5  ;;  %v19213_v29 = vld [vmem:[#allocation118_spill] sm:$0xff] }
 0x589   :  { %v4975_v55 = vsub.f32 1.0, %v4974_v39  ;;  %v5558_v1 = vpop.permute.xlu0 %5557  ;;  %v15863_v22 = vmul.f32 %v15230_v5, %v4971_v23  ;;  %11899 = vpow2.f32 %v4043_v24  ;;  %v4982_v5 = vand.u32 2147483647, %v15827_v19  ;;  %v19212_v23 = vld [vmem:[#allocation117_spill] sm:$0xff] }
 0x58a   :  { %v15868_v43 = vpop.permute.xlu1 %11242  ;;  %10894 = vmatmul.msk.f32.gmra.mxu0 %vm3684_vm2, %v15859_v26  ;;  %10914 = vmatmul.msk.f32.vlgmr.msra.gmra.mxu1 %vm1499_vm1, %v5558_v1  ;;  %v4985_v39 = vor.u32 1.1754944e-38, %v4984_v7  ;;  %v15880_v1 = vpack.i.bf16 %v19213_v29, %v19212_v23  ;;  %v4045_v42 = vmul.f32 1.442695, %v3929_v49  ;;  %v15890_v7 = vpop.f32.mrf.mxu1  ;;  %v19216_v29 = vld [vmem:[#allocation59_spill] sm:$0xff]  ;;  %vm4993_vm10 = vweird.f32 %v15854_v54 }
 0x58b   :  { %19209 = vst [vmem:[#allocation149_spill] sm:$0xff] %v15863_v22  ;;  %v4976_v59 = vmul.f32 %v11894_v41, %v4975_v55  ;;  %5819 = vmatpush.msra.mxu1 %v11230_v8  ;;  %6064 = vrot.lane.b32.xlu0 %v15863_v22, %s12239_s5  ;;  %vm4983_vm8 = vcmp.eq.f32.partialorder %v4982_v5, 8.507059e+37  ;;  %v3930_v23 = vsub.f32 %v19216_v29, %v15219_v11  ;;  %v11235_v5 = vunpack.i.h.bf16 %v15817_v62 }
 0x58c   :  { %19214 = vst [vmem:[#allocation134_spill] sm:$0xff] %v15890_v7  ;;  %v11234_v11 = vunpack.i.l.bf16 %v15817_v62 }
 0x58d   :  { %5820 = vmatpush.msra.mxu1 %v11229_v35  ;;  %v4977_v24 = vadd.f32 %v11894_v41, %v4976_v59 }
 0x58e   :  { %v11898_v33 = vpop.eup %11897 }
 0x58f   :  { %v4989_v55 = vmul.f32 %v11898_v33, %v15854_v54  ;;  %v15883_v8 = vpop.f32.mrf.mxu0  ;;  %v4981_v14 = vsel %vm4980_vm7, %v11894_v41, %v4977_v24  ;;  %v15885_v22 = vpop.eup %11899  ;;  %v4999_v24 = vand.u32 2147483648, %v15854_v54  ;;  %vm4994_vm9 = vweird.f32 %v11898_v33 }
 0x590   :  { %11901 = vrcp.f32 %v15883_v8  ;;  %11317 = vrot.lane.b32.xlu1 %v15880_v1, %s12240_s17  ;;  %v4986_v19 = vsel %vm4983_vm8, %v4985_v39, %v4981_v14  ;;  %v5599_v41 = vpop.permute.xlu2 %5598  ;;  %vm4995_vm11 = vmor %vm4993_vm10, %vm4994_vm9  ;;  %vm5008_vm14 = vweird.f32 %v15883_v8 }
 0x591   :  { %v4990_v35 = vsub.f32 1.0, %v4989_v55  ;;  %v5597_v59 = vpop.permute.xlu0 %5596  ;;  %v15893_v49 = vmul.f32 %v15247_v9, %v4986_v19  ;;  %11903 = vpow2.f32 %v4045_v42  ;;  %v4997_v9 = vand.u32 2147483647, %v15854_v54  ;;  %v19217_v42 = vld [vmem:[#allocation119_spill] sm:$0xff]  ;;  %v19218_v19 = vld [vmem:[#allocation120_spill] sm:$0xff] }
 0x592   :  { %v15899_v4 = vpop.permute.xlu1 %11247  ;;  %10895 = vmatmul.msk.f32.gmra.mxu0 %vm3684_vm2, %v15885_v22  ;;  %10915 = vmatmul.msk.f32.gmra.mxu1 %vm1499_vm1, %v5560_v6  ;;  %v4047_v55 = vmul.f32 1.442695, %v3930_v23  ;;  %v5000_v6 = vor.u32 1.1754944e-38, %v4999_v24  ;;  %v11240_v23 = vunpack.i.h.bf16 %v15841_v46 }
 0x593   :  { %19215 = vst [vmem:[#allocation165_spill] sm:$0xff] %v15893_v49  ;;  %v4991_v14 = vmul.f32 %v11898_v33, %v4990_v35  ;;  %10916 = vmatmul.msk.f32.vlgmr.msrb.gmra.mxu2 %vm1499_vm1, %v5597_v59  ;;  %6066 = vrot.lane.b32.xlu2 %v15893_v49, %s12239_s5  ;;  %v15912_v35 = vpack.i.bf16 %v19218_v19, %v19217_v42  ;;  %vm4998_vm12 = vcmp.eq.f32.partialorder %v4997_v9, 8.507059e+37  ;;  %v19222_v19 = vld [vmem:[#allocation139_spill] sm:$0xff]  ;;  %v5014_v9 = vand.u32 2147483648, %v15883_v8 }
 0x594   :  { %5858 = vmatpush.msrb.mxu2 %v11235_v5 }
 0x595   :  { %v4992_v39 = vadd.f32 %v11898_v33, %v4991_v14  ;;  %19219 = vst [vmem:[#allocation55_spill] sm:$0xff] %v15912_v35 }
 0x596   :  { %v11902_v29 = vpop.eup %11901  ;;  %5859 = vmatpush.msrb.mxu2 %v11234_v11  ;;  %v19221_v11 = vld [vmem:[#allocation154_spill] sm:$0xff] }
 0x597   :  { %v5004_v59 = vmul.f32 %v11902_v29, %v15883_v8  ;;  %v15915_v7 = vpop.f32.mrf.mxu0  ;;  %v4996_v49 = vsel %vm4995_vm11, %v11898_v33, %v4992_v39  ;;  %v15920_v54 = vpop.eup %11903  ;;  %v3931_v33 = vsub.f32 %v19222_v19, %v19221_v11  ;;  %vm5009_vm13 = vweird.f32 %v11902_v29 }
 0x598   :  { %11905 = vrcp.f32 %v15915_v7  ;;  %11322 = vrot.lane.b32.xlu1 %v15912_v35, %s12240_s17  ;;  %v5001_v62 = vsel %vm4998_vm12, %v5000_v6, %v4996_v49  ;;  %v11239_v49 = vunpack.i.l.bf16 %v15841_v46  ;;  %vm5010_vm15 = vmor %vm5008_vm14, %vm5009_vm13  ;;  %v5015_v46 = vor.u32 1.1754944e-38, %v5014_v9  ;;  %v15952_v9 = vpop.f32.mrf.mxu1 }
 0x599   :  { %v5005_v5 = vsub.f32 1.0, %v5004_v59  ;;  %v5636_v24 = vpop.permute.xlu0 %5635  ;;  %v15924_v14 = vmul.f32 %v15279_v16, %v5001_v62  ;;  %11907 = vpow2.f32 %v4047_v55  ;;  %v5012_v16 = vand.u32 2147483647, %v15883_v8  ;;  %v5638_v55 = vpop.permute.xlu2 %5637  ;;  %v19223_v62 = vld [vmem:[#allocation121_spill] sm:$0xff]  ;;  %19225 = vst [vmem:[#allocation151_spill] sm:$0xff] %v15952_v9 }
 0x59a   :  { %10896 = vmatmul.msk.f32.gmra.mxu0 %vm3684_vm2, %v15920_v54  ;;  %10918 = vmatmul.msk.f32.vlgmr.msrb.gmra.mxu3 %vm1499_vm1, %v5636_v24  ;;  %v15933_v6 = vpop.permute.xlu1 %11252  ;;  %v4049_v11 = vmul.f32 1.442695, %v3931_v33  ;;  %vm5023_vm5 = vweird.f32 %v15915_v7 }
 0x59b   :  { %19220 = vst [vmem:[#allocation135_spill] sm:$0xff] %v15924_v14  ;;  %v5006_v39 = vmul.f32 %v11902_v29, %v5005_v5  ;;  %10917 = vmatmul.msk.f32.gmra.mxu2 %vm1499_vm1, %v5599_v41  ;;  %5897 = vmatpush.msrb.mxu3 %v11240_v23  ;;  %v19224_v5 = vld [vmem:[#allocation122_spill] sm:$0xff]  ;;  %vm5013_vm3 = vcmp.eq.f32.partialorder %v5012_v16, 8.507059e+37  ;;  %v5029_v16 = vand.u32 2147483648, %v15915_v7 }
 0x59c   :  { %6103 = vrot.lane.b32.xlu0 %v15924_v14, %s12239_s5  ;;  %v15942_v24 = vpack.i.bf16 %v19224_v5, %v19223_v62  ;;  %v19226_v62 = vld [vmem:[#allocation62_spill] sm:$0xff] }
 0x59d   :  { %5898 = vmatpush.msrb.mxu3 %v11239_v49  ;;  %v5007_v19 = vadd.f32 %v11902_v29, %v5006_v39  ;;  %v3932_v5 = vsub.f32 %v19226_v62, %v15117_v25  ;;  %v11244_v25 = vunpack.i.l.bf16 %v15868_v43 }
 0x59e   :  { %v11906_v59 = vpop.eup %11905 }
 0x59f   :  { %v5019_v41 = vmul.f32 %v11906_v59, %v15915_v7  ;;  %v15945_v23 = vpop.f32.mrf.mxu0  ;;  %v5011_v42 = vsel %vm5010_vm15, %v11902_v29, %v5007_v19  ;;  %v15947_v35 = vpop.eup %11907  ;;  %v11245_v29 = vunpack.i.h.bf16 %v15868_v43  ;;  %vm5024_vm4 = vweird.f32 %v11906_v59 }
 0x5a0   :  { %11909 = vrcp.f32 %v15945_v23  ;;  %11327 = vrot.lane.b32.xlu1 %v15942_v24, %s12240_s17  ;;  %v5016_v8 = vsel %vm5013_vm3, %v5015_v46, %v5011_v42  ;;  %vm5025_vm6 = vmor %vm5023_vm5, %vm5024_vm4  ;;  %vm5038_vm9 = vweird.f32 %v15945_v23 }
 0x5a1   :  { %v5020_v49 = vsub.f32 1.0, %v5019_v41  ;;  %v5675_v39 = vpop.permute.xlu0 %5674  ;;  %v15955_v33 = vmul.f32 %v15309_v28, %v5016_v8  ;;  %11911 = vpow2.f32 %v4049_v11  ;;  %v5027_v28 = vand.u32 2147483647, %v15915_v7  ;;  %v5677_v11 = vpop.permute.xlu2 %5676  ;;  %v19227_v8 = vld [vmem:[#allocation123_spill] sm:$0xff] }
 0x5a2   :  { %10897 = vmatmul.msk.f32.gmra.mxu0 %vm3684_vm2, %v15947_v35  ;;  %10919 = vmatmul.msk.f32.gmra.mxu3 %vm1499_vm1, %v5638_v55  ;;  %v15970_v19 = vpop.permute.xlu1 %11257  ;;  %v4051_v55 = vmul.f32 1.442695, %v3932_v5  ;;  %v5030_v41 = vor.u32 1.1754944e-38, %v5029_v16 }
 0x5a3   :  { %v5021_v42 = vmul.f32 %v11906_v59, %v5020_v49  ;;  %10920 = vmatmul.msk.f32.vlgmr.msrb.gmra.mxu1 %vm1499_vm1, %v5675_v39  ;;  %6105 = vrot.lane.b32.xlu2 %v15955_v33, %s12239_s5  ;;  %v19228_v49 = vld [vmem:[#allocation124_spill] sm:$0xff]  ;;  %vm5028_vm7 = vcmp.eq.f32.partialorder %v5027_v28, 8.507059e+37  ;;  %v5044_v28 = vand.u32 2147483648, %v15945_v23 }
 0x5a4   :  { %5936 = vmatpush.msrb.mxu1 %v11245_v29  ;;  %v15974_v39 = vpack.i.bf16 %v19228_v49, %v19227_v8  ;;  %v11250_v29 = vunpack.i.h.bf16 %v15899_v4  ;;  %v19230_v49 = vld [vmem:[#allocation66_spill] sm:$0xff] }
 0x5a5   :  { %v5022_v46 = vadd.f32 %v11906_v59, %v5021_v42 }
 0x5a6   :  { %v11910_v62 = vpop.eup %11909  ;;  %5937 = vmatpush.msrb.mxu1 %v11244_v25 }
 0x5a7   :  { %v5034_v9 = vmul.f32 %v11910_v62, %v15945_v23  ;;  %v15977_v14 = vpop.f32.mrf.mxu0  ;;  %v5026_v43 = vsel %vm5025_vm6, %v11906_v59, %v5022_v46  ;;  %v15982_v5 = vpop.eup %11911  ;;  %v3933_v59 = vsub.f32 %v19230_v49, %v15238_v61  ;;  %vm5039_vm8 = vweird.f32 %v11910_v62 }
 0x5a8   :  { %11913 = vrcp.f32 %v15977_v14  ;;  %11332 = vrot.lane.b32.xlu1 %v15974_v39, %s12240_s17  ;;  %v5031_v7 = vsel %vm5028_vm7, %v5030_v41, %v5026_v43  ;;  %v15994_v46 = vpop.f32.mrf.mxu1  ;;  %v11249_v41 = vunpack.i.l.bf16 %v15899_v4  ;;  %vm5040_vm10 = vmor %vm5038_vm9, %vm5039_vm8  ;;  %v5045_v49 = vor.u32 1.1754944e-38, %v5044_v28  ;;  %v19232_v43 = vld [vmem:[#allocation126_spill] sm:$0xff] }
 0x5a9   :  { %v5035_v16 = vsub.f32 1.0, %v5034_v9  ;;  %v5714_v42 = vpop.permute.xlu0 %5713  ;;  %v15986_v25 = vmul.f32 %v15355_v10, %v5031_v7  ;;  %11915 = vpow2.f32 %v4051_v55  ;;  %19231 = vst [vmem:[#allocation167_spill] sm:$0xff] %v15994_v46  ;;  %v5042_v10 = vand.u32 2147483647, %v15945_v23  ;;  %v19233_v7 = vld [vmem:[#allocation125_spill] sm:$0xff]  ;;  %v5716_v23 = vpop.permute.xlu2 %5715 }
 0x5aa   :  { %10898 = vmatmul.msk.f32.gmra.mxu0 %vm3684_vm2, %v15982_v5  ;;  %10922 = vmatmul.msk.f32.vlgmr.msra.gmra.mxu2 %vm1499_vm1, %v5714_v42  ;;  %v16004_v4 = vpack.i.bf16 %v19233_v7, %v19232_v43  ;;  %v19234_v7 = vld [vmem:[#allocation156_spill] sm:$0xff]  ;;  %v19235_v43 = vld [vmem:[#allocation67_spill] sm:$0xff]  ;;  %vm5053_vm13 = vweird.f32 %v15977_v14 }
 0x5ab   :  { %19229 = vst [vmem:[#allocation136_spill] sm:$0xff] %v15986_v25  ;;  %v5036_v9 = vmul.f32 %v11910_v62, %v5035_v16  ;;  %10921 = vmatmul.msk.f32.gmra.mxu1 %vm1499_vm1, %v5677_v11  ;;  %5975 = vmatpush.msra.mxu2 %v11250_v29  ;;  %v4053_v16 = vmul.f32 1.442695, %v3933_v59  ;;  %v16007_v29 = vpop.permute.xlu1 %11262  ;;  %vm5043_vm11 = vcmp.eq.f32.partialorder %v5042_v10, 8.507059e+37  ;;  %v5059_v10 = vand.u32 2147483648, %v15977_v14 }
 0x5ac   :  { %6142 = vrot.lane.b32.xlu0 %v15986_v25, %s12239_s5  ;;  %v3934_v25 = vsub.f32 %v19235_v43, %v19234_v7 }
 0x5ad   :  { %5976 = vmatpush.msra.mxu2 %v11249_v41  ;;  %v5037_v61 = vadd.f32 %v11910_v62, %v5036_v9 }
 0x5ae   :  { %v11914_v55 = vpop.eup %11913  ;;  %v4055_v7 = vmul.f32 1.442695, %v3934_v25 }
 0x5af   :  { %v5049_v11 = vmul.f32 %v11914_v55, %v15977_v14  ;;  %v16009_v42 = vpop.f32.mrf.mxu0  ;;  %v5041_v46 = vsel %vm5040_vm10, %v11910_v62, %v5037_v61  ;;  %v16011_v8 = vpop.eup %11915  ;;  %v11255_v62 = vunpack.i.h.bf16 %v15933_v6  ;;  %vm5054_vm12 = vweird.f32 %v11914_v55 }
 0x5b0   :  { %11917 = vrcp.f32 %v16009_v42  ;;  %11337 = vrot.lane.b32.xlu1 %v16004_v4, %s12240_s17  ;;  %v5046_v28 = vsel %vm5043_vm11, %v5045_v49, %v5041_v46  ;;  %v11254_v46 = vunpack.i.l.bf16 %v15933_v6  ;;  %vm5055_vm14 = vmor %vm5053_vm13, %vm5054_vm12  ;;  %vm5068_vm4 = vweird.f32 %v16009_v42 }
 0x5b1   :  { %v5050_v41 = vsub.f32 1.0, %v5049_v11  ;;  %v5753_v9 = vpop.permute.xlu0 %5752  ;;  %v16017_v59 = vmul.f32 %v15393_v37, %v5046_v28  ;;  %11919 = vpow2.f32 %v4053_v16  ;;  %v5057_v37 = vand.u32 2147483647, %v15977_v14  ;;  %v19237_v14 = vld [vmem:[#allocation26_spill] sm:$0xff] }
 0x5b2   :  { %10899 = vmatmul.msk.f32.gmra.mxu0 %vm3684_vm2, %v16011_v8  ;;  %10923 = vmatmul.msk.f32.gmra.mxu2 %vm1499_vm1, %v5716_v23  ;;  %v5060_v11 = vor.u32 1.1754944e-38, %v5059_v10 }
 0x5b3   :  { %v5051_v61 = vmul.f32 %v11914_v55, %v5050_v41  ;;  %10924 = vmatmul.msk.f32.vlgmr.msra.gmra.mxu3 %vm1499_vm1, %v5753_v9  ;;  %6144 = vrot.lane.b32.xlu2 %v16017_v59, %s12239_s5  ;;  %vm5058_vm15 = vcmp.eq.f32.partialorder %v5057_v37, 8.507059e+37  ;;  %v16035_v41 = vpop.f32.mrf.mxu1  ;;  %v5755_v9 = vpop.permute.xlu2 %5754  ;;  %v19238_v37 = vld [vmem:[#allocation71_spill] sm:$0xff] }
 0x5b4   :  { %6014 = vmatpush.msra.mxu3 %v11255_v62  ;;  %19236 = vst [vmem:[#allocation57_spill] sm:$0xff] %v16035_v41  ;;  %v11260_v62 = vunpack.i.h.bf16 %v15970_v19  ;;  %v5074_v41 = vand.u32 2147483648, %v16009_v42 }
 0x5b5   :  { %v5052_v49 = vadd.f32 %v11914_v55, %v5051_v61  ;;  %v16043_v61 = vpop.permute.xlu1 %11267 }
 0x5b6   :  { %v11918_v43 = vpop.eup %11917  ;;  %6015 = vmatpush.msra.mxu3 %v11254_v46 }
 0x5b7   :  { %v5064_v16 = vmul.f32 %v11918_v43, %v16009_v42  ;;  %v16033_v23 = vpop.f32.mrf.mxu0  ;;  %v5056_v28 = vsel %vm5055_vm14, %v11914_v55, %v5052_v49  ;;  %v16040_v25 = vpop.eup %11919  ;;  %v3935_v49 = vsub.f32 %v19238_v37, %v15152_v18  ;;  %vm5069_vm3 = vweird.f32 %v11918_v43 }
 0x5b8   :  { %11921 = vrcp.f32 %v16033_v23  ;;  %11352 = vrot.lane.b32.xlu1 %v19237_v14, %s12241_s18  ;;  %v5061_v6 = vsel %vm5058_vm15, %v5060_v11, %v5056_v28  ;;  %v11259_v11 = vunpack.i.l.bf16 %v15970_v19  ;;  %vm5070_vm5 = vmor %vm5068_vm4, %vm5069_vm3  ;;  %v5075_v28 = vor.u32 1.1754944e-38, %v5074_v41 }
 0x5b9   :  { %v5065_v10 = vsub.f32 1.0, %v5064_v16  ;;  %v5792_v46 = vpop.permute.xlu0 %5791  ;;  %v16046_v55 = vmul.f32 %v15439_v38, %v5061_v6  ;;  %11923 = vpow2.f32 %v4055_v7  ;;  %v5072_v38 = vand.u32 2147483647, %v16009_v42 }
 0x5ba   :  { %10900 = vmatmul.msk.f32.gmra.mxu0 %vm3684_vm2, %v16040_v25  ;;  %10926 = vmatmul.msk.f32.vlgmr.msra.gmra.mxu1 %vm1499_vm1, %v5792_v46  ;;  %v4057_v6 = vmul.f32 1.442695, %v3935_v49  ;;  %vm5083_vm8 = vweird.f32 %v16033_v23 }
 0x5bb   :  { %v5066_v16 = vmul.f32 %v11918_v43, %v5065_v10  ;;  %10925 = vmatmul.msk.f32.gmra.mxu3 %vm1499_vm1, %v5755_v9  ;;  %6053 = vmatpush.msra.mxu1 %v11260_v62  ;;  %vm5073_vm6 = vcmp.eq.f32.partialorder %v5072_v38, 8.507059e+37  ;;  %v5794_v62 = vpop.permute.xlu2 %5793  ;;  %v16071_v49 = vpop.f32.mrf.mxu1  ;;  %v11265_v38 = vunpack.i.h.bf16 %v16007_v29 }
 0x5bc   :  { %6181 = vrot.lane.b32.xlu0 %v16046_v55, %s12239_s5  ;;  %19240 = vst [vmem:[#allocation154_spill] sm:$0xff] %v16071_v49 }
 0x5bd   :  { %6054 = vmatpush.msra.mxu1 %v11259_v11  ;;  %v5067_v18 = vadd.f32 %v11918_v43, %v5066_v16  ;;  %v19241_v16 = vld [vmem:[#allocation153_spill] sm:$0xff] }
 0x5be   :  { %v11922_v7 = vpop.eup %11921 }
 0x5bf   :  { %v5079_v19 = vmul.f32 %v11922_v7, %v16033_v23  ;;  %v16061_v10 = vpop.f32.mrf.mxu0  ;;  %v5071_v46 = vsel %vm5070_vm5, %v11918_v43, %v5067_v18  ;;  %v16063_v9 = vpop.eup %11923  ;;  %v3936_v43 = vsub.f32 %v19241_v16, %v15535_v50  ;;  %v5089_v18 = vand.u32 2147483648, %v16033_v23 }
 0x5c0   :  { %11925 = vrcp.f32 %v16061_v10  ;;  %11367 = vrot.lane.b32.xlu1 %v15156_v40, %s12241_s18  ;;  %v5076_v42 = vsel %vm5073_vm6, %v5075_v28, %v5071_v46  ;;  %vm5084_vm7 = vweird.f32 %v11922_v7  ;;  %v11264_v50 = vunpack.i.l.bf16 %v16007_v29 }
 0x5c1   :  { %v5080_v37 = vsub.f32 1.0, %v5079_v19  ;;  %v5831_v11 = vpop.permute.xlu0 %5830  ;;  %v16069_v41 = vmul.f32 %v15468_v52, %v5076_v42  ;;  %11927 = vpow2.f32 %v4057_v6  ;;  %v16080_v19 = vpop.permute.xlu1 %11272  ;;  %v5087_v52 = vand.u32 2147483647, %v16033_v23  ;;  %vm5085_vm9 = vmor %vm5083_vm8, %vm5084_vm7 }
 0x5c2   :  { %10901 = vmatmul.msk.f32.gmra.mxu0 %vm3684_vm2, %v16063_v9  ;;  %10927 = vmatmul.msk.f32.gmra.mxu1 %vm1499_vm1, %v5794_v62  ;;  %v4059_v62 = vmul.f32 1.442695, %v3936_v43  ;;  %v5090_v6 = vor.u32 1.1754944e-38, %v5089_v18  ;;  %v11270_v43 = vunpack.i.h.bf16 %v16043_v61  ;;  %vm5098_vm12 = vweird.f32 %v16061_v10 }
 0x5c3   :  { %19239 = vst [vmem:[#allocation59_spill] sm:$0xff] %v16069_v41  ;;  %v5081_v28 = vmul.f32 %v11922_v7, %v5080_v37  ;;  %10928 = vmatmul.msk.f32.vlgmr.msrb.gmra.mxu2 %vm1499_vm1, %v5831_v11  ;;  %6183 = vrot.lane.b32.xlu2 %v16069_v41, %s12239_s5  ;;  %vm5088_vm10 = vcmp.eq.f32.partialorder %v5087_v52, 8.507059e+37  ;;  %v5833_v49 = vpop.permute.xlu2 %5832  ;;  %v5104_v52 = vand.u32 2147483648, %v16061_v10 }
 0x5c4   :  { %6092 = vmatpush.msrb.mxu2 %v11265_v38 }
 0x5c5   :  { %v5082_v46 = vadd.f32 %v11922_v7, %v5081_v28 }
 0x5c6   :  { %v11926_v42 = vpop.eup %11925  ;;  %6093 = vmatpush.msrb.mxu2 %v11264_v50  ;;  %v19243_v50 = vld [vmem:[#allocation81_spill] sm:$0xff] }
 0x5c7   :  { %v5094_v37 = vmul.f32 %v11926_v42, %v16061_v10  ;;  %v16089_v16 = vpop.f32.mrf.mxu0  ;;  %v5086_v11 = vsel %vm5085_vm9, %v11922_v7, %v5082_v46  ;;  %v16094_v23 = vpop.eup %11927  ;;  %v3937_v7 = vsub.f32 %v19243_v50, %v15204_v20  ;;  %v11269_v46 = vunpack.i.l.bf16 %v16043_v61 }
 0x5c8   :  { %11929 = vrcp.f32 %v16089_v16  ;;  %11382 = vrot.lane.b32.xlu1 %v15224_v57, %s12241_s18  ;;  %v5091_v29 = vsel %vm5088_vm10, %v5090_v6, %v5086_v11  ;;  %vm5099_vm11 = vweird.f32 %v11926_v42  ;;  %v5105_v11 = vor.u32 1.1754944e-38, %v5104_v52  ;;  %v16122_v50 = vpop.f32.mrf.mxu1 }
 0x5c9   :  { %v5095_v38 = vsub.f32 1.0, %v5094_v37  ;;  %v5870_v18 = vpop.permute.xlu0 %5869  ;;  %v16098_v28 = vmul.f32 %v15523_v21, %v5091_v29  ;;  %11931 = vpow2.f32 %v4059_v62  ;;  %v5102_v21 = vand.u32 2147483647, %v16061_v10  ;;  %v16112_v20 = vpop.permute.xlu1 %11277  ;;  %vm5100_vm13 = vmor %vm5098_vm12, %vm5099_vm11  ;;  %19244 = vst [vmem:[#allocation62_spill] sm:$0xff] %v16122_v50 }
 0x5ca   :  { %10902 = vmatmul.msk.f32.gmra.mxu0 %vm3684_vm2, %v16094_v23  ;;  %10930 = vmatmul.msk.f32.vlgmr.msrb.gmra.mxu3 %vm1499_vm1, %v5870_v18  ;;  %v4061_v61 = vmul.f32 1.442695, %v3937_v7  ;;  %vm5113_vm3 = vweird.f32 %v16089_v16 }
 0x5cb   :  { %19242 = vst [vmem:[#allocation139_spill] sm:$0xff] %v16098_v28  ;;  %v5096_v6 = vmul.f32 %v11926_v42, %v5095_v38  ;;  %10929 = vmatmul.msk.f32.gmra.mxu2 %vm1499_vm1, %v5833_v49  ;;  %6131 = vmatpush.msrb.mxu3 %v11270_v43  ;;  %vm5103_vm14 = vcmp.eq.f32.partialorder %v5102_v21, 8.507059e+37  ;;  %v5872_v18 = vpop.permute.xlu2 %5871  ;;  %v11275_v21 = vunpack.i.h.bf16 %v16080_v19 }
 0x5cc   :  { %6220 = vrot.lane.b32.xlu0 %v16098_v28, %s12239_s5 }
 0x5cd   :  { %6132 = vmatpush.msrb.mxu3 %v11269_v46  ;;  %v5097_v62 = vadd.f32 %v11926_v42, %v5096_v6  ;;  %v19246_v6 = vld [vmem:[#allocation158_spill] sm:$0xff] }
 0x5ce   :  { %v11930_v37 = vpop.eup %11929 }
 0x5cf   :  { %v5109_v29 = vmul.f32 %v11930_v37, %v16089_v16  ;;  %v16115_v38 = vpop.f32.mrf.mxu0  ;;  %v5101_v49 = vsel %vm5100_vm13, %v11926_v42, %v5097_v62  ;;  %v16117_v43 = vpop.eup %11931  ;;  %v3938_v42 = vsub.f32 %v19246_v6, %v15558_v32  ;;  %v5119_v62 = vand.u32 2147483648, %v16089_v16 }
 0x5d0   :  { %11933 = vrcp.f32 %v16115_v38  ;;  %11397 = vrot.lane.b32.xlu1 %v15300_v44, %s12241_s18  ;;  %v5106_v10 = vsel %vm5103_vm14, %v5105_v11, %v5101_v49  ;;  %vm5114_vm15 = vweird.f32 %v11930_v37  ;;  %v11274_v32 = vunpack.i.l.bf16 %v16080_v19 }
 0x5d1   :  { %v5110_v46 = vsub.f32 1.0, %v5109_v29  ;;  %v5909_v52 = vpop.permute.xlu0 %5908  ;;  %v16125_v7 = vmul.f32 %v15567_v51, %v5106_v10  ;;  %11935 = vpow2.f32 %v4061_v61  ;;  %v5117_v51 = vand.u32 2147483647, %v16089_v16  ;;  %vm5115_vm4 = vmor %vm5113_vm3, %vm5114_vm15  ;;  %v16140_v61 = vpop.permute.xlu1 %11282 }
 0x5d2   :  { %10903 = vmatmul.msk.f32.gmra.mxu0 %vm3684_vm2, %v16117_v43  ;;  %10931 = vmatmul.msk.f32.gmra.mxu3 %vm1499_vm1, %v5872_v18  ;;  %v4063_v10 = vmul.f32 1.442695, %v3938_v42  ;;  %v5120_v18 = vor.u32 1.1754944e-38, %v5119_v62  ;;  %v11280_v42 = vunpack.i.h.bf16 %v16112_v20  ;;  %vm5128_vm7 = vweird.f32 %v16115_v38 }
 0x5d3   :  { %19245 = vst [vmem:[#allocation66_spill] sm:$0xff] %v16125_v7  ;;  %v5111_v11 = vmul.f32 %v11930_v37, %v5110_v46  ;;  %10932 = vmatmul.msk.f32.vlgmr.msrb.gmra.mxu1 %vm1499_vm1, %v5909_v52  ;;  %6222 = vrot.lane.b32.xlu2 %v16125_v7, %s12239_s5  ;;  %vm5118_vm5 = vcmp.eq.f32.partialorder %v5117_v51, 8.507059e+37  ;;  %v5911_v50 = vpop.permute.xlu2 %5910  ;;  %v5134_v51 = vand.u32 2147483648, %v16115_v38 }
 0x5d4   :  { %6170 = vmatpush.msrb.mxu1 %v11275_v21 }
 0x5d5   :  { %v5112_v29 = vadd.f32 %v11930_v37, %v5111_v11 }
 0x5d6   :  { %v11934_v49 = vpop.eup %11933  ;;  %6171 = vmatpush.msrb.mxu1 %v11274_v32  ;;  %v11279_v32 = vunpack.i.l.bf16 %v16112_v20 }
 0x5d7   :  { %v5124_v46 = vmul.f32 %v11934_v49, %v16115_v38  ;;  %v16143_v52 = vpop.f32.mrf.mxu0  ;;  %v5116_v6 = vsel %vm5115_vm4, %v11930_v37, %v5112_v29  ;;  %v16148_v16 = vpop.eup %11935  ;;  %v3939_v37 = vsub.f32 %v14909_v45, %v15834_v36  ;;  %vm5129_vm6 = vweird.f32 %v11934_v49 }
 0x5d8   :  { %11937 = vrcp.f32 %v16143_v52  ;;  %11412 = vrot.lane.b32.xlu1 %v15426_v47, %s12241_s18  ;;  %v5121_v19 = vsel %vm5118_vm5, %v5120_v18, %v5116_v6  ;;  %v16160_v47 = vpop.f32.mrf.mxu1  ;;  %vm5130_vm8 = vmor %vm5128_vm7, %vm5129_vm6  ;;  %vm5143_vm11 = vweird.f32 %v16143_v52 }
 0x5d9   :  { %v5125_v21 = vsub.f32 1.0, %v5124_v46  ;;  %v5948_v62 = vpop.permute.xlu0 %5947  ;;  %v16152_v11 = vmul.f32 %v15616_v27, %v5121_v19  ;;  %11939 = vpow2.f32 %v4063_v10  ;;  %19248 = vst [vmem:[#allocation67_spill] sm:$0xff] %v16160_v47  ;;  %v5132_v27 = vand.u32 2147483647, %v16115_v38 }
 0x5da   :  { %10904 = vmatmul.msk.f32.gmra.mxu0 %vm3684_vm2, %v16148_v16  ;;  %10934 = vmatmul.msk.f32.vlgmr.msra.gmra.mxu2 %vm1499_vm1, %v5948_v62  ;;  %v5135_v10 = vor.u32 1.1754944e-38, %v5134_v51  ;;  %v4065_v18 = vmul.f32 1.442695, %v3939_v37  ;;  %v19250_v51 = vld [vmem:[#allocation159_spill] sm:$0xff] }
 0x5db   :  { %19247 = vst [vmem:[#allocation156_spill] sm:$0xff] %v16152_v11  ;;  %v5126_v29 = vmul.f32 %v11934_v49, %v5125_v21  ;;  %10933 = vmatmul.msk.f32.gmra.mxu1 %vm1499_vm1, %v5911_v50  ;;  %6209 = vmatpush.msra.mxu2 %v11280_v42  ;;  %vm5133_vm9 = vcmp.eq.f32.partialorder %v5132_v27, 8.507059e+37  ;;  %v5950_v19 = vpop.permute.xlu2 %5949  ;;  %v16176_v42 = vpop.permute.xlu1 %11287 }
 0x5dc   :  { %6259 = vrot.lane.b32.xlu0 %v16152_v11, %s12239_s5 }
 0x5dd   :  { %6210 = vmatpush.msra.mxu2 %v11279_v32  ;;  %v5127_v45 = vadd.f32 %v11934_v49, %v5126_v29  ;;  %v11285_v32 = vunpack.i.h.bf16 %v16140_v61  ;;  %v5149_v29 = vand.u32 2147483648, %v16143_v52 }
 0x5de   :  { %v11938_v36 = vpop.eup %11937 }
 0x5df   :  { %v5139_v20 = vmul.f32 %v11938_v36, %v16143_v52  ;;  %v16169_v46 = vpop.f32.mrf.mxu0  ;;  %v5131_v6 = vsel %vm5130_vm8, %v11934_v49, %v5127_v45  ;;  %v16171_v50 = vpop.eup %11939  ;;  %v3940_v49 = vsub.f32 %v19250_v51, %v15528_v15  ;;  %vm5144_vm10 = vweird.f32 %v11938_v36 }
 0x5e0   :  { %11941 = vrcp.f32 %v16169_v46  ;;  %11427 = vrot.lane.b32.xlu1 %v15556_v48, %s12241_s18  ;;  %v5136_v38 = vsel %vm5133_vm9, %v5135_v10, %v5131_v6  ;;  %v11284_v15 = vunpack.i.l.bf16 %v16140_v61  ;;  %vm5145_vm12 = vmor %vm5143_vm11, %vm5144_vm10  ;;  %v5150_v10 = vor.u32 1.1754944e-38, %v5149_v29 }
 0x5e1   :  { %v5140_v21 = vsub.f32 1.0, %v5139_v20  ;;  %v5987_v62 = vpop.permute.xlu0 %5986  ;;  %v16179_v37 = vmul.f32 %v15649_v34, %v5136_v38  ;;  %11943 = vpow2.f32 %v4065_v18  ;;  %v5147_v34 = vand.u32 2147483647, %v16143_v52 }
 0x5e2   :  { %10905 = vmatmul.msk.f32.gmra.mxu0 %vm3684_vm2, %v16171_v50  ;;  %10935 = vmatmul.msk.f32.gmra.mxu2 %vm1499_vm1, %v5950_v19  ;;  %v4067_v18 = vmul.f32 1.442695, %v3940_v49  ;;  %v5164_v51 = vand.u32 2147483648, %v16169_v46  ;;  %vm5158_vm15 = vweird.f32 %v16169_v46 }
 0x5e3   :  { %19249 = vst [vmem:[#allocation26_spill] sm:$0xff] %v16179_v37  ;;  %v5141_v48 = vmul.f32 %v11938_v36, %v5140_v21  ;;  %10936 = vmatmul.msk.f32.vlgmr.msra.gmra.mxu3 %vm1499_vm1, %v5987_v62  ;;  %6261 = vrot.lane.b32.xlu2 %v16179_v37, %s12239_s5  ;;  %vm5148_vm13 = vcmp.eq.f32.partialorder %v5147_v34, 8.507059e+37  ;;  %v5989_v62 = vpop.permute.xlu2 %5988 }
 0x5e4   :  { %6248 = vmatpush.msra.mxu3 %v11285_v32  ;;  %v11290_v32 = vunpack.i.h.bf16 %v16176_v42 }
 0x5e5   :  { %v5142_v27 = vadd.f32 %v11938_v36, %v5141_v48 }
 0x5e6   :  { %v11942_v45 = vpop.eup %11941  ;;  %6249 = vmatpush.msra.mxu3 %v11284_v15  ;;  %v5165_v15 = vor.u32 1.1754944e-38, %v5164_v51 }
 0x5e7   :  { %v5154_v20 = vmul.f32 %v11942_v45, %v16169_v46  ;;  %v4424_v6 = vpop.f32.mrf.mxu0  ;;  %v5146_v19 = vsel %vm5145_vm12, %v11938_v36, %v5142_v27  ;;  %v16197_v61 = vpop.eup %11943  ;;  %vm5159_vm14 = vweird.f32 %v11942_v45  ;;  %v11289_v27 = vunpack.i.l.bf16 %v16176_v42 }
 0x5e8   :  { %11945 = vrcp.f32 %v4424_v6  ;;  %11442 = vrot.lane.b32.xlu1 %v15689_v63, %s12241_s18  ;;  %v5151_v38 = vsel %vm5148_vm13, %v5150_v10, %v5146_v19  ;;  %v16205_v36 = vpop.permute.xlu1 %11292  ;;  %v5162_v63 = vand.u32 2147483647, %v16169_v46  ;;  %vm5160_vm3 = vmor %vm5158_vm15, %vm5159_vm14  ;;  %vm5173_vm6 = vweird.f32 %v4424_v6 }
 0x5e9   :  { %v5155_v21 = vsub.f32 1.0, %v5154_v20  ;;  %v16200_v52 = vmul.f32 %v15703_v30, %v5151_v38  ;;  %11947 = vpow2.f32 %v4067_v18  ;;  %v16211_v30 = vpop.f32.mrf.mxu1 }
 0x5ea   :  { %10906 = vmatmul.msk.f32.gmra.mxu0 %vm3684_vm2, %v16197_v61  ;;  %19251 = vst [vmem:[#allocation71_spill] sm:$0xff] %v16211_v30  ;;  %vm5163_vm4 = vcmp.eq.f32.partialorder %v5162_v63, 8.507059e+37 }
 0x5eb   :  { %v5156_v49 = vmul.f32 %v11942_v45, %v5155_v21  ;;  %10937 = vmatmul.msk.f32.gmra.mxu3 %vm1499_vm1, %v5989_v62  ;;  %6298 = vrot.lane.b32.xlu0 %v16200_v52, %s12239_s5  ;;  %v5179_v62 = vand.u32 2147483648, %v4424_v6  ;;  %v6028_v51 = vpop.permute.xlu2 %6027 }
 0x5ed   :  { %v6026_v29 = vpop.permute.xlu0 %6025  ;;  %v5157_v48 = vadd.f32 %v11942_v45, %v5156_v49 }
 0x5ee   :  { %v11946_v34 = vpop.eup %11945  ;;  %10938 = vmatmul.msk.f32.vlgmr.msra.gmra.mxu1 %vm1499_vm1, %v6026_v29 }
 0x5ef   :  { %v5169_v10 = vmul.f32 %v11946_v34, %v4424_v6  ;;  %6287 = vmatpush.msra.mxu1 %v11290_v32  ;;  %v4427_v18 = vpop.f32.mrf.mxu0  ;;  %v5161_v20 = vsel %vm5160_vm3, %v11942_v45, %v5157_v48  ;;  %v16219_v46 = vpop.eup %11947  ;;  %vm5174_vm5 = vweird.f32 %v11946_v34  ;;  %v5177_v45 = vand.u32 2147483647, %v4424_v6 }
 0x5f0   :  { %11949 = vrcp.f32 %v4427_v18  ;;  %11457 = vrot.lane.b32.xlu1 %v15785_v3, %s12241_s18  ;;  %v5166_v19 = vsel %vm5163_vm4, %v5165_v15, %v5161_v20  ;;  %v16228_v3 = vpop.permute.xlu1 %11297  ;;  %vm5175_vm7 = vmor %vm5173_vm6, %vm5174_vm5  ;;  %v5194_v20 = vand.u32 2147483648, %v4427_v18  ;;  %vm5188_vm9 = vweird.f32 %v4427_v18 }
 0x5f1   :  { %v5170_v38 = vsub.f32 1.0, %v5169_v10  ;;  %6288 = vmatpush.msra.mxu1 %v11289_v27  ;;  %v16222_v21 = vmul.f32 %v15728_v12, %v5166_v19  ;;  %v16230_v32 = vpop.f32.mrf.mxu1  ;;  %v5180_v12 = vor.u32 1.1754944e-38, %v5179_v62  ;;  %v11295_v62 = vunpack.i.h.bf16 %v16205_v36 }
 0x5f2   :  { %10907 = vmatmul.msk.f32.gmra.mxu0 %vm3684_vm2, %v16219_v46  ;;  %19253 = vst [vmem:[#allocation81_spill] sm:$0xff] %v16230_v32  ;;  %vm5178_vm2 = vcmp.eq.f32.partialorder %v5177_v45, 8.507059e+37 }
 0x5f3   :  { %19252 = vst [vmem:[#allocation153_spill] sm:$0xff] %v16222_v21  ;;  %v5171_v42 = vmul.f32 %v11946_v34, %v5170_v38  ;;  %6300 = vrot.lane.b32.xlu2 %v16222_v21, %s12239_s5  ;;  %v5192_v38 = vand.u32 2147483647, %v4427_v18 }
 0x5f5   :  { %v5172_v49 = vadd.f32 %v11946_v34, %v5171_v42  ;;  %vm5193_vm11 = vcmp.eq.f32.partialorder %v5192_v38, 8.507059e+37 }
 0x5f6   :  { %v11950_v63 = vpop.eup %11949  ;;  %10939 = vmatmul.msk.f32.gmra.mxu1 %vm1499_vm1, %v6028_v51 }
 0x5f7   :  { %v5184_v29 = vmul.f32 %v11950_v63, %v4427_v18  ;;  %v4430_v48 = vpop.f32.mrf.mxu0  ;;  %v5176_v15 = vsel %vm5175_vm7, %v11946_v34, %v5172_v49  ;;  %vm5189_vm8 = vweird.f32 %v11950_v63 }
 0x5f8   :  { %11951 = vrcp.f32 %v4430_v48  ;;  %11472 = vrot.lane.b32.xlu1 %v15849_v13, %s12241_s18  ;;  %v5181_v27 = vsel %vm5178_vm2, %v5180_v12, %v5176_v15  ;;  %vm5190_vm10 = vmor %vm5188_vm9, %vm5189_vm8  ;;  %v5195_v13 = vor.u32 1.1754944e-38, %v5194_v20  ;;  %v16243_v51 = vpop.permute.xlu1 %11302  ;;  %vm5203_vm13 = vweird.f32 %v4430_v48 }
 0x5f9   :  { %v5185_v10 = vsub.f32 1.0, %v5184_v29  ;;  %v16236_v6 = vmul.f32 %v15771_v2, %v5181_v27  ;;  %v11294_v2 = vunpack.i.l.bf16 %v16205_v36  ;;  %v5207_v36 = vand.u32 2147483647, %v4430_v48 }
 0x5fb   :  { %19254 = vst [vmem:[#allocation158_spill] sm:$0xff] %v16236_v6  ;;  %v5186_v19 = vmul.f32 %v11950_v63, %v5185_v10  ;;  %6337 = vrot.lane.b32.xlu0 %v16236_v6, %s12239_s5  ;;  %v5209_v10 = vand.u32 2147483648, %v4430_v48  ;;  %vm5208_vm15 = vcmp.eq.f32.partialorder %v5207_v36, 8.507059e+37  ;;  %v19269_v6 = vld [vmem:[#allocation22_spill] sm:$0xff] }
 0x5fd   :  { %v6065_v34 = vpop.permute.xlu0 %6064  ;;  %v5187_v42 = vadd.f32 %v11950_v63, %v5186_v19  ;;  %v6067_v19 = vpop.permute.xlu2 %6066 }
 0x5fe   :  { %v11952_v45 = vpop.eup %11951  ;;  %10940 = vmatmul.msk.f32.vlgmr.msrb.gmra.mxu2 %vm1499_vm1, %v6065_v34 }
 0x5ff   :  { %v5199_v49 = vmul.f32 %v11952_v45, %v4430_v48  ;;  %6326 = vmatpush.msrb.mxu2 %v11295_v62  ;;  %v4433_v12 = vpop.f32.mrf.mxu0  ;;  %v5191_v29 = vsel %vm5190_vm10, %v11950_v63, %v5187_v42  ;;  %vm5204_vm12 = vweird.f32 %v11952_v45  ;;  %v5210_v62 = vor.u32 1.1754944e-38, %v5209_v10 }
 0x600   :  { %11953 = vrcp.f32 %v4433_v12  ;;  %11487 = vrot.lane.b32.xlu1 %v15942_v24, %s12241_s18  ;;  %v5196_v18 = vsel %vm5193_vm11, %v5195_v13, %v5191_v29  ;;  %vm5205_vm14 = vmor %vm5203_vm13, %vm5204_vm12  ;;  %v5224_v29 = vand.u32 2147483648, %v4433_v12  ;;  %vm5218_vm4 = vweird.f32 %v4433_v12 }
 0x601   :  { %v5200_v15 = vsub.f32 1.0, %v5199_v49  ;;  %6327 = vmatpush.msrb.mxu2 %v11294_v2  ;;  %v16248_v27 = vmul.f32 %v15789_v17, %v5196_v18  ;;  %v19255_v17 = vld [vmem:[#allocation148_spill] sm:$0xff]  ;;  %v16255_v2 = vpop.permute.xlu1 %11307 }
 0x602   :  { %v5225_v36 = vor.u32 1.1754944e-38, %v5224_v29 }
 0x603   :  { %v5201_v20 = vmul.f32 %v11952_v45, %v5200_v15  ;;  %6339 = vrot.lane.b32.xlu2 %v16248_v27, %s12239_s5  ;;  %v5222_v15 = vand.u32 2147483647, %v4433_v12 }
 0x605   :  { %v5202_v63 = vadd.f32 %v11952_v45, %v5201_v20  ;;  %v11300_v20 = vunpack.i.h.bf16 %v16228_v3  ;;  %vm5223_vm6 = vcmp.eq.f32.partialorder %v5222_v15, 8.507059e+37 }
 0x606   :  { %v11954_v38 = vpop.eup %11953  ;;  %10941 = vmatmul.msk.f32.gmra.mxu2 %vm1499_vm1, %v6067_v19 }
 0x607   :  { %v5214_v24 = vmul.f32 %v11954_v38, %v4433_v12  ;;  %v4436_v34 = vpop.f32.mrf.mxu0  ;;  %v5206_v42 = vsel %vm5205_vm14, %v11952_v45, %v5202_v63  ;;  %vm5219_vm3 = vweird.f32 %v11954_v38 }
 0x608   :  { %11955 = vrcp.f32 %v4436_v34  ;;  %7742 = vrot.lane.b32.xlu1 %v19255_v17, %s12241_s18  ;;  %v5211_v13 = vsel %vm5208_vm15, %v5210_v62, %v5206_v42  ;;  %vm5220_vm5 = vmor %vm5218_vm4, %vm5219_vm3  ;;  %vm5233_vm2 = vweird.f32 %v4436_v34 }
 0x609   :  { %v5215_v49 = vsub.f32 1.0, %v5214_v24  ;;  %v16258_v48 = vmul.f32 %v15808_v53, %v5211_v13  ;;  %v11299_v24 = vunpack.i.l.bf16 %v16228_v3  ;;  %v16270_v29 = vpop.permute.xlu1 %11312  ;;  %v5237_v3 = vand.u32 2147483647, %v4436_v34 }
 0x60a   :  { %v11314_v21 = vunpack.i.l.bf16 %v16270_v29 }
 0x60b   :  { %19256 = vst [vmem:[#allocation159_spill] sm:$0xff] %v16258_v48  ;;  %v5216_v18 = vmul.f32 %v11954_v38, %v5215_v49  ;;  %6376 = vrot.lane.b32.xlu0 %v16258_v48, %s12239_s5  ;;  %v5239_v49 = vand.u32 2147483648, %v4436_v34  ;;  %vm5238_vm9 = vcmp.eq.f32.partialorder %v5237_v3, 8.507059e+37 }
 0x60d   :  { %v5217_v45 = vadd.f32 %v11954_v38, %v5216_v18 }
 0x60e   :  { %v11956_v10 = vpop.eup %11955  ;;  %v6104_v19 = vpop.permute.xlu0 %6103 }
 0x60f   :  { %v5229_v63 = vmul.f32 %v11956_v10, %v4436_v34  ;;  %10942 = vmatmul.msk.f32.vlgmr.msrb.gmra.mxu3 %vm1499_vm1, %v6104_v19  ;;  %v4439_v53 = vpop.f32.mrf.mxu0  ;;  %v5221_v62 = vsel %vm5220_vm5, %v11954_v38, %v5217_v45  ;;  %vm5234_vm7 = vweird.f32 %v11956_v10  ;;  %v6106_v45 = vpop.permute.xlu2 %6105 }
 0x610   :  { %6365 = vmatpush.msrb.mxu3 %v11300_v20  ;;  %11957 = vrcp.f32 %v4439_v53  ;;  %7779 = vrot.lane.b32.xlu1 %v15076_v56, %s12241_s18  ;;  %v5226_v12 = vsel %vm5223_vm6, %v5225_v36, %v5221_v62  ;;  %vm5235_vm8 = vmor %vm5233_vm2, %vm5234_vm7  ;;  %v5240_v20 = vor.u32 1.1754944e-38, %v5239_v49  ;;  %v5254_v34 = vand.u32 2147483648, %v4439_v53 }
 0x611   :  { %v5230_v42 = vsub.f32 1.0, %v5229_v63  ;;  %v16268_v13 = vmul.f32 %v15832_v58, %v5226_v12  ;;  %v19257_v63 = vld [vmem:[#allocation37_spill] sm:$0xff]  ;;  %v5252_v49 = vand.u32 2147483647, %v4439_v53  ;;  %vm5248_vm11 = vweird.f32 %v4439_v53 }
 0x612   :  { %6366 = vmatpush.msrb.mxu3 %v11299_v24 }
 0x613   :  { %v5231_v18 = vmul.f32 %v11956_v10, %v5230_v42  ;;  %6378 = vrot.lane.b32.xlu2 %v16268_v13, %s12239_s5  ;;  %vm5253_vm13 = vcmp.eq.f32.partialorder %v5252_v49, 8.507059e+37 }
 0x615   :  { %v5232_v38 = vadd.f32 %v11956_v10, %v5231_v18  ;;  %v16282_v18 = vpop.f32.mrf.mxu1 }
 0x616   :  { %v11958_v15 = vpop.eup %11957  ;;  %19258 = vst [vmem:[#allocation37_spill] sm:$0xff] %v16282_v18  ;;  %v19259_v18 = vld [vmem:[#allocation68_spill] sm:$0xff] }
 0x617   :  { %v5244_v36 = vmul.f32 %v11958_v15, %v4439_v53  ;;  %10943 = vmatmul.msk.f32.gmra.mxu3 %vm1499_vm1, %v6106_v45  ;;  %v4442_v58 = vpop.f32.mrf.mxu0  ;;  %v5236_v19 = vsel %vm5235_vm8, %v11956_v10, %v5232_v38  ;;  %vm5249_vm10 = vweird.f32 %v11958_v15  ;;  %v16284_v10 = vpop.permute.xlu1 %11317  ;;  %v11305_v45 = vunpack.i.h.bf16 %v16243_v51 }
 0x618   :  { %11959 = vrcp.f32 %v4442_v58  ;;  %7816 = vrot.lane.b32.xlu1 %v19257_v63, %s12241_s18  ;;  %v5241_v62 = vsel %vm5238_vm9, %v5240_v20, %v5236_v19  ;;  %vm5250_vm12 = vmor %vm5248_vm11, %vm5249_vm10  ;;  %v5255_v20 = vor.u32 1.1754944e-38, %v5254_v34  ;;  %v5269_v34 = vand.u32 2147483648, %v4442_v58 }
 0x619   :  { %v5245_v24 = vsub.f32 1.0, %v5244_v36  ;;  %v16278_v12 = vmul.f32 %v15859_v26, %v5241_v62  ;;  %vm5263_vm15 = vweird.f32 %v4442_v58 }
 0x61b   :  { %v5246_v42 = vmul.f32 %v11958_v15, %v5245_v24  ;;  %6415 = vrot.lane.b32.xlu0 %v16278_v12, %s12239_s5  ;;  %v11304_v24 = vunpack.i.l.bf16 %v16243_v51 }
 0x61d   :  { %v5247_v3 = vadd.f32 %v11958_v15, %v5246_v42 }
 0x61e   :  { %v11960_v38 = vpop.eup %11959  ;;  %v6143_v26 = vpop.permute.xlu0 %6142 }
 0x61f   :  { %v5259_v36 = vmul.f32 %v11960_v38, %v4442_v58  ;;  %10944 = vmatmul.msk.f32.vlgmr.msrb.gmra.mxu1 %vm1499_vm1, %v6143_v26  ;;  %v4445_v19 = vpop.f32.mrf.mxu0  ;;  %v5251_v62 = vsel %vm5250_vm12, %v11958_v15, %v5247_v3  ;;  %vm5264_vm14 = vweird.f32 %v11960_v38  ;;  %v5267_v15 = vand.u32 2147483647, %v4442_v58  ;;  %v16296_v3 = vpop.f32.mrf.mxu1 }
 0x620   :  { %6404 = vmatpush.msrb.mxu1 %v11305_v45  ;;  %11961 = vrcp.f32 %v4445_v19  ;;  %7853 = vrot.lane.b32.xlu1 %v19259_v18, %s12241_s18  ;;  %v5256_v53 = vsel %vm5253_vm13, %v5255_v20, %v5251_v62  ;;  %19261 = vst [vmem:[#allocation169_spill] sm:$0xff] %v16296_v3  ;;  %v6145_v45 = vpop.permute.xlu2 %6144  ;;  %vm5265_vm3 = vmor %vm5263_vm15, %vm5264_vm14  ;;  %v5270_v20 = vor.u32 1.1754944e-38, %v5269_v34  ;;  %v16298_v26 = vpop.permute.xlu1 %11322  ;;  %v5282_v34 = vand.u32 2147483647, %v4445_v19 }
 0x621   :  { %v5260_v42 = vsub.f32 1.0, %v5259_v36  ;;  %v16292_v30 = vmul.f32 %v15885_v22, %v5256_v53  ;;  %vm5268_vm4 = vcmp.eq.f32.partialorder %v5267_v15, 8.507059e+37  ;;  %vm5278_vm6 = vweird.f32 %v4445_v19 }
 0x622   :  { %6405 = vmatpush.msrb.mxu1 %v11304_v24  ;;  %v19262_v24 = vld [vmem:[#allocation73_spill] sm:$0xff]  ;;  %v11310_v15 = vunpack.i.h.bf16 %v16255_v2  ;;  %vm5283_vm2 = vcmp.eq.f32.partialorder %v5282_v34, 8.507059e+37 }
 0x623   :  { %19260 = vst [vmem:[#allocation68_spill] sm:$0xff] %v16292_v30  ;;  %v5261_v32 = vmul.f32 %v11960_v38, %v5260_v42  ;;  %6417 = vrot.lane.b32.xlu2 %v16292_v30, %s12239_s5  ;;  %v5284_v42 = vand.u32 2147483648, %v4445_v19 }
 0x625   :  { %v5262_v51 = vadd.f32 %v11960_v38, %v5261_v32 }
 0x626   :  { %v11962_v49 = vpop.eup %11961 }
 0x627   :  { %v5274_v22 = vmul.f32 %v11962_v49, %v4445_v19  ;;  %10945 = vmatmul.msk.f32.gmra.mxu1 %vm1499_vm1, %v6145_v45  ;;  %v4448_v36 = vpop.f32.mrf.mxu0  ;;  %v5266_v62 = vsel %vm5265_vm3, %v11960_v38, %v5262_v51  ;;  %vm5279_vm5 = vweird.f32 %v11962_v49  ;;  %v5285_v51 = vor.u32 1.1754944e-38, %v5284_v42 }
 0x628   :  { %11963 = vrcp.f32 %v4448_v36  ;;  %7890 = vrot.lane.b32.xlu1 %v19262_v24, %s12241_s18  ;;  %v5271_v58 = vsel %vm5268_vm4, %v5270_v20, %v5266_v62  ;;  %vm5280_vm7 = vmor %vm5278_vm6, %vm5279_vm5  ;;  %v11309_v62 = vunpack.i.l.bf16 %v16255_v2  ;;  %v5297_v2 = vand.u32 2147483647, %v4448_v36 }
 0x629   :  { %v5275_v32 = vsub.f32 1.0, %v5274_v22  ;;  %v16304_v53 = vmul.f32 %v15920_v54, %v5271_v58  ;;  %v19264_v58 = vld [vmem:[#allocation142_spill] sm:$0xff]  ;;  %vm5293_vm9 = vweird.f32 %v4448_v36 }
 0x62a   :  { %vm5298_vm11 = vcmp.eq.f32.partialorder %v5297_v2, 8.507059e+37 }
 0x62b   :  { %19263 = vst [vmem:[#allocation170_spill] sm:$0xff] %v16304_v53  ;;  %v5276_v3 = vmul.f32 %v11962_v49, %v5275_v32  ;;  %6454 = vrot.lane.b32.xlu0 %v16304_v53, %s12239_s5 }
 0x62d   :  { %v5277_v45 = vadd.f32 %v11962_v49, %v5276_v3  ;;  %v16313_v3 = vpop.permute.xlu1 %11327 }
 0x62e   :  { %v11964_v38 = vpop.eup %11963  ;;  %v6182_v47 = vpop.permute.xlu0 %6181 }
 0x62f   :  { %v5289_v20 = vmul.f32 %v11964_v38, %v4448_v36  ;;  %10946 = vmatmul.msk.f32.vlgmr.msra.gmra.mxu2 %vm1499_vm1, %v6182_v47  ;;  %v4451_v54 = vpop.f32.mrf.mxu0  ;;  %v5281_v22 = vsel %vm5280_vm7, %v11962_v49, %v5277_v45  ;;  %vm5294_vm8 = vweird.f32 %v11964_v38  ;;  %v5299_v47 = vand.u32 2147483648, %v4448_v36  ;;  %v19266_v49 = vld [vmem:[#allocation72_spill] sm:$0xff] }
 0x630   :  { %6443 = vmatpush.msra.mxu2 %v11310_v15  ;;  %11965 = vrcp.f32 %v4451_v54  ;;  %7927 = vrot.lane.b32.xlu1 %v19264_v58, %s12241_s18  ;;  %v5286_v19 = vsel %vm5283_vm2, %v5285_v51, %v5281_v22  ;;  %v6184_v15 = vpop.permute.xlu2 %6183  ;;  %vm5295_vm10 = vmor %vm5293_vm9, %vm5294_vm8  ;;  %vm5308_vm13 = vweird.f32 %v4451_v54 }
 0x631   :  { %v5290_v32 = vsub.f32 1.0, %v5289_v20  ;;  %v16316_v42 = vmul.f32 %v15947_v35, %v5286_v19  ;;  %v5300_v51 = vor.u32 1.1754944e-38, %v5299_v47  ;;  %v5314_v47 = vand.u32 2147483648, %v4451_v54 }
 0x632   :  { %6444 = vmatpush.msra.mxu2 %v11309_v62  ;;  %v19267_v62 = vld [vmem:[#allocation82_spill] sm:$0xff] }
 0x633   :  { %19265 = vst [vmem:[#allocation171_spill] sm:$0xff] %v16316_v42  ;;  %v5291_v53 = vmul.f32 %v11964_v38, %v5290_v32  ;;  %11342 = vrot.lane.b32.xlu0 %v19266_v49, %s12241_s18  ;;  %6456 = vrot.lane.b32.xlu2 %v16316_v42, %s12239_s5 }
 0x635   :  { %v5292_v34 = vadd.f32 %v11964_v38, %v5291_v53  ;;  %v16328_v36 = vpop.permute.xlu1 %11332 }
 0x636   :  { %v11966_v45 = vpop.eup %11965 }
 0x637   :  { %v5304_v20 = vmul.f32 %v11966_v45, %v4451_v54  ;;  %10947 = vmatmul.msk.f32.gmra.mxu2 %vm1499_vm1, %v6184_v15  ;;  %v4454_v35 = vpop.f32.mrf.mxu0  ;;  %v5296_v22 = vsel %vm5295_vm10, %v11964_v38, %v5292_v34  ;;  %vm5309_vm12 = vweird.f32 %v11966_v45  ;;  %v5312_v38 = vand.u32 2147483647, %v4451_v54  ;;  %v19271_v54 = vld [vmem:[#allocation41_spill] sm:$0xff] }
 0x638   :  { %11967 = vrcp.f32 %v4454_v35  ;;  %7964 = vrot.lane.b32.xlu1 %v19267_v62, %s12241_s18  ;;  %v5301_v32 = vsel %vm5298_vm11, %v5300_v51, %v5296_v22  ;;  %v11315_v15 = vunpack.i.h.bf16 %v16270_v29  ;;  %vm5310_vm14 = vmor %vm5308_vm13, %vm5309_vm12  ;;  %v5315_v51 = vor.u32 1.1754944e-38, %v5314_v47 }
 0x639   :  { %v5305_v19 = vsub.f32 1.0, %v5304_v20  ;;  %v16326_v30 = vmul.f32 %v15982_v5, %v5301_v32  ;;  %v16336_v32 = vpop.f32.mrf.mxu1  ;;  %vm5313_vm15 = vcmp.eq.f32.partialorder %v5312_v38, 8.507059e+37  ;;  %vm5323_vm4 = vweird.f32 %v4454_v35 }
 0x63a   :  { %19270 = vst [vmem:[#allocation82_spill] sm:$0xff] %v16336_v32 }
 0x63b   :  { %19268 = vst [vmem:[#allocation72_spill] sm:$0xff] %v16326_v30  ;;  %v5306_v53 = vmul.f32 %v11966_v45, %v5305_v19  ;;  %11347 = vrot.lane.b32.xlu2 %v19269_v6, %s12241_s18  ;;  %6493 = vrot.lane.b32.xlu0 %v16326_v30, %s12239_s5 }
 0x63d   :  { %v5307_v34 = vadd.f32 %v11966_v45, %v5306_v53  ;;  %v16348_v29 = vpop.permute.xlu1 %11337 }
 0x63e   :  { %v11968_v2 = vpop.eup %11967  ;;  %v6221_v5 = vpop.permute.xlu0 %6220 }
 0x63f   :  { %v5319_v20 = vmul.f32 %v11968_v2, %v4454_v35  ;;  %10948 = vmatmul.msk.f32.vlgmr.msra.gmra.mxu3 %vm1499_vm1, %v6221_v5  ;;  %v4457_v22 = vpop.f32.mrf.mxu0  ;;  %v5311_v19 = vsel %vm5310_vm14, %v11966_v45, %v5307_v34  ;;  %vm5324_vm3 = vweird.f32 %v11968_v2  ;;  %v5329_v5 = vand.u32 2147483648, %v4454_v35  ;;  %v19273_v34 = vld [vmem:[#allocation30_spill] sm:$0xff] }
 0x640   :  { %6482 = vmatpush.msra.mxu3 %v11315_v15  ;;  %11969 = vrcp.f32 %v4457_v22  ;;  %8001 = vrot.lane.b32.xlu1 %v19271_v54, %s12241_s18  ;;  %v5316_v30 = vsel %vm5313_vm15, %v5315_v51, %v5311_v19  ;;  %v5327_v45 = vand.u32 2147483647, %v4454_v35  ;;  %v6223_v51 = vpop.permute.xlu2 %6222  ;;  %vm5325_vm5 = vmor %vm5323_vm4, %vm5324_vm3  ;;  %v19274_v19 = vld [vmem:[#allocation152_spill] sm:$0xff]  ;;  %v5342_v11 = vand.u32 2147483647, %v4457_v22 }
 0x641   :  { %v5320_v53 = vsub.f32 1.0, %v5319_v20  ;;  %v16342_v47 = vmul.f32 %v16011_v8, %v5316_v30  ;;  %v16353_v28 = vpop.f32.mrf.mxu1  ;;  %vm5338_vm2 = vweird.f32 %v4457_v22 }
 0x642   :  { %6483 = vmatpush.msra.mxu3 %v11314_v21  ;;  %v5330_v21 = vor.u32 1.1754944e-38, %v5329_v5  ;;  %vm5328_vm6 = vcmp.eq.f32.partialorder %v5327_v45, 8.507059e+37  ;;  %19275 = vst [vmem:[#allocation41_spill] sm:$0xff] %v16353_v28  ;;  %v5344_v5 = vand.u32 2147483648, %v4457_v22  ;;  %v11319_v28 = vunpack.i.l.bf16 %v16284_v10 }
 0x643   :  { %19272 = vst [vmem:[#allocation22_spill] sm:$0xff] %v16342_v47  ;;  %v5321_v48 = vmul.f32 %v11968_v2, %v5320_v53  ;;  %11357 = vrot.lane.b32.xlu0 %v19273_v34, %s12241_s18  ;;  %6495 = vrot.lane.b32.xlu2 %v16342_v47, %s12239_s5  ;;  %vm5343_vm9 = vcmp.eq.f32.partialorder %v5342_v11, 8.507059e+37 }
 0x645   :  { %v5322_v15 = vadd.f32 %v11968_v2, %v5321_v48 }
 0x646   :  { %v11970_v38 = vpop.eup %11969 }
 0x647   :  { %v5334_v8 = vmul.f32 %v11970_v38, %v4457_v22  ;;  %10949 = vmatmul.msk.f32.gmra.mxu3 %vm1499_vm1, %v6223_v51  ;;  %v4460_v30 = vpop.f32.mrf.mxu0  ;;  %v5326_v20 = vsel %vm5325_vm5, %v11968_v2, %v5322_v15  ;;  %vm5339_vm7 = vweird.f32 %v11970_v38  ;;  %v19277_v51 = vld [vmem:[#allocation35_spill] sm:$0xff]  ;;  %v11320_v15 = vunpack.i.h.bf16 %v16284_v10  ;;  %v19278_v22 = vld [vmem:[#allocation144_spill] sm:$0xff] }
 0x648   :  { %11971 = vrcp.f32 %v4460_v30  ;;  %8038 = vrot.lane.b32.xlu1 %v19274_v19, %s12241_s18  ;;  %v5331_v32 = vsel %vm5328_vm6, %v5330_v21, %v5326_v20  ;;  %vm5340_vm8 = vmor %vm5338_vm2, %vm5339_vm7  ;;  %v5359_v44 = vand.u32 2147483648, %v4460_v30  ;;  %v19281_v10 = vld [vmem:[#allocation44_spill] sm:$0xff]  ;;  %vm5353_vm11 = vweird.f32 %v4460_v30 }
 0x649   :  { %v5335_v53 = vsub.f32 1.0, %v5334_v8  ;;  %v16356_v48 = vmul.f32 %v16040_v25, %v5331_v32  ;;  %v16363_v8 = vpop.permute.xlu1 %11352  ;;  %v5345_v25 = vor.u32 1.1754944e-38, %v5344_v5 }
 0x64b   :  { %19276 = vst [vmem:[#allocation30_spill] sm:$0xff] %v16356_v48  ;;  %v5336_v35 = vmul.f32 %v11970_v38, %v5335_v53  ;;  %11362 = vrot.lane.b32.xlu2 %v19277_v51, %s12241_s18  ;;  %6532 = vrot.lane.b32.xlu0 %v16356_v48, %s12239_s5 }
 0x64d   :  { %v5337_v2 = vadd.f32 %v11970_v38, %v5336_v35 }
 0x64e   :  { %v11972_v45 = vpop.eup %11971  ;;  %v6260_v21 = vpop.permute.xlu0 %6259 }
 0x64f   :  { %v5349_v32 = vmul.f32 %v11972_v45, %v4460_v30  ;;  %10950 = vmatmul.msk.f32.vlgmr.msra.gmra.mxu1 %vm1499_vm1, %v6260_v21  ;;  %v4463_v20 = vpop.f32.mrf.mxu0  ;;  %v5341_v53 = vsel %vm5340_vm8, %v11970_v38, %v5337_v2  ;;  %vm5354_vm10 = vweird.f32 %v11972_v45  ;;  %v16372_v21 = vpop.f32.mrf.mxu1  ;;  %v5357_v38 = vand.u32 2147483647, %v4460_v30 }
 0x650   :  { %6521 = vmatpush.msra.mxu1 %v11320_v15  ;;  %11973 = vrcp.f32 %v4463_v20  ;;  %8075 = vrot.lane.b32.xlu1 %v19278_v22, %s12241_s18  ;;  %v5346_v41 = vsel %vm5343_vm9, %v5345_v25, %v5341_v53  ;;  %19280 = vst [vmem:[#allocation172_spill] sm:$0xff] %v16372_v21  ;;  %v6262_v15 = vpop.permute.xlu2 %6261  ;;  %vm5355_vm12 = vmor %vm5353_vm11, %vm5354_vm10  ;;  %v5372_v21 = vand.u32 2147483647, %v4463_v20  ;;  %vm5368_vm15 = vweird.f32 %v4463_v20 }
 0x651   :  { %v5350_v35 = vsub.f32 1.0, %v5349_v32  ;;  %v16370_v19 = vmul.f32 %v16063_v9, %v5346_v41  ;;  %vm5358_vm13 = vcmp.eq.f32.partialorder %v5357_v38, 8.507059e+37  ;;  %v16381_v32 = vpop.permute.xlu1 %11367 }
 0x652   :  { %6522 = vmatpush.msra.mxu1 %v11319_v28  ;;  %v5360_v28 = vor.u32 1.1754944e-38, %v5359_v44  ;;  %v5374_v44 = vand.u32 2147483648, %v4463_v20  ;;  %vm5373_vm4 = vcmp.eq.f32.partialorder %v5372_v21, 8.507059e+37 }
 0x653   :  { %19279 = vst [vmem:[#allocation35_spill] sm:$0xff] %v16370_v19  ;;  %v5351_v5 = vmul.f32 %v11972_v45, %v5350_v35  ;;  %11372 = vrot.lane.b32.xlu0 %v19281_v10, %s12241_s18  ;;  %6534 = vrot.lane.b32.xlu2 %v16370_v19, %s12239_s5 }
 0x655   :  { %v5352_v11 = vadd.f32 %v11972_v45, %v5351_v5 }
 0x656   :  { %v11974_v2 = vpop.eup %11973 }
 0x657   :  { %v5364_v9 = vmul.f32 %v11974_v2, %v4463_v20  ;;  %10951 = vmatmul.msk.f32.gmra.mxu1 %vm1499_vm1, %v6262_v15  ;;  %v4466_v41 = vpop.f32.mrf.mxu0  ;;  %v5356_v25 = vsel %vm5355_vm12, %v11972_v45, %v5352_v11  ;;  %vm5369_vm14 = vweird.f32 %v11974_v2  ;;  %v19283_v15 = vld [vmem:[#allocation49_spill] sm:$0xff]  ;;  %v11325_v45 = vunpack.i.h.bf16 %v16298_v26 }
 0x658   :  { %11975 = vrcp.f32 %v4466_v41  ;;  %8112 = vrot.lane.b32.xlu1 %v15639_v60, %s12241_s18  ;;  %v5361_v35 = vsel %vm5358_vm13, %v5360_v28, %v5356_v25  ;;  %v16391_v28 = vpop.f32.mrf.mxu1  ;;  %vm5370_vm3 = vmor %vm5368_vm15, %vm5369_vm14  ;;  %v5375_v25 = vor.u32 1.1754944e-38, %v5374_v44  ;;  %v5387_v44 = vand.u32 2147483647, %v4466_v41  ;;  %v6301_v21 = vpop.permute.xlu2 %6300 }
 0x659   :  { %v5365_v53 = vsub.f32 1.0, %v5364_v9  ;;  %v16384_v30 = vmul.f32 %v16094_v23, %v5361_v35  ;;  %19284 = vst [vmem:[#allocation49_spill] sm:$0xff] %v16391_v28  ;;  %v11324_v23 = vunpack.i.l.bf16 %v16298_v26  ;;  %v16400_v60 = vpop.permute.xlu1 %11382  ;;  %v5389_v26 = vand.u32 2147483648, %v4466_v41 }
 0x65a   :  { %vm5383_vm6 = vweird.f32 %v4466_v41  ;;  %vm5388_vm2 = vcmp.eq.f32.partialorder %v5387_v44, 8.507059e+37 }
 0x65b   :  { %19282 = vst [vmem:[#allocation44_spill] sm:$0xff] %v16384_v30  ;;  %v5366_v5 = vmul.f32 %v11974_v2, %v5365_v53  ;;  %11377 = vrot.lane.b32.xlu2 %v19283_v15, %s12241_s18  ;;  %6571 = vrot.lane.b32.xlu0 %v16384_v30, %s12239_s5  ;;  %v19285_v30 = vld [vmem:[#allocation128_spill] sm:$0xff] }
 0x65d   :  { %v5367_v38 = vadd.f32 %v11974_v2, %v5366_v5  ;;  %v6299_v11 = vpop.permute.xlu0 %6298 }
 0x65e   :  { %v11976_v9 = vpop.eup %11975  ;;  %10952 = vmatmul.msk.f32.vlgmr.msrb.gmra.mxu2 %vm1499_vm1, %v6299_v11 }
 0x65f   :  { %v5379_v53 = vmul.f32 %v11976_v9, %v4466_v41  ;;  %6560 = vmatpush.msrb.mxu2 %v11325_v45  ;;  %v4469_v35 = vpop.f32.mrf.mxu0  ;;  %v5371_v19 = vsel %vm5370_vm3, %v11974_v2, %v5367_v38  ;;  %vm5384_vm5 = vweird.f32 %v11976_v9  ;;  %v19287_v45 = vld [vmem:[#allocation54_spill] sm:$0xff] }
 0x660   :  { %11977 = vrcp.f32 %v4469_v35  ;;  %8149 = vrot.lane.b32.xlu1 %v19285_v30, %s12241_s18  ;;  %v5376_v5 = vsel %vm5373_vm4, %v5375_v25, %v5371_v19  ;;  %vm5385_vm7 = vmor %vm5383_vm6, %vm5384_vm5  ;;  %vm5398_vm9 = vweird.f32 %v4469_v35 }
 0x661   :  { %v5380_v20 = vsub.f32 1.0, %v5379_v53  ;;  %6561 = vmatpush.msrb.mxu2 %v11324_v23  ;;  %v16398_v28 = vmul.f32 %v16117_v43, %v5376_v5  ;;  %v5390_v43 = vor.u32 1.1754944e-38, %v5389_v26  ;;  %v16407_v53 = vpop.f32.mrf.mxu1  ;;  %v19290_v26 = vld [vmem:[#allocation61_spill] sm:$0xff]  ;;  %v16419_v44 = vpop.permute.xlu1 %11397 }
 0x662   :  { %19288 = vst [vmem:[#allocation54_spill] sm:$0xff] %v16407_v53 }
 0x663   :  { %19286 = vst [vmem:[#allocation173_spill] sm:$0xff] %v16398_v28  ;;  %v5381_v11 = vmul.f32 %v11976_v9, %v5380_v20  ;;  %11387 = vrot.lane.b32.xlu0 %v19287_v45, %s12241_s18  ;;  %6573 = vrot.lane.b32.xlu2 %v16398_v28, %s12239_s5  ;;  %v5404_v28 = vand.u32 2147483648, %v4469_v35 }
 0x665   :  { %v5382_v2 = vadd.f32 %v11976_v9, %v5381_v11 }
 0x666   :  { %v11978_v38 = vpop.eup %11977  ;;  %10953 = vmatmul.msk.f32.gmra.mxu2 %vm1499_vm1, %v6301_v21  ;;  %v5402_v21 = vand.u32 2147483647, %v4469_v35 }
 0x667   :  { %v5394_v19 = vmul.f32 %v11978_v38, %v4469_v35  ;;  %v4472_v23 = vpop.f32.mrf.mxu0  ;;  %v5386_v25 = vsel %vm5385_vm7, %v11976_v9, %v5382_v2  ;;  %vm5399_vm8 = vweird.f32 %v11978_v38  ;;  %v11330_v9 = vunpack.i.h.bf16 %v16313_v3 }
 0x668   :  { %11979 = vrcp.f32 %v4472_v23  ;;  %8186 = vrot.lane.b32.xlu1 %v15716_v31, %s12241_s18  ;;  %v5391_v5 = vsel %vm5388_vm2, %v5390_v43, %v5386_v25  ;;  %vm5400_vm10 = vmor %vm5398_vm9, %vm5399_vm8  ;;  %v5405_v25 = vor.u32 1.1754944e-38, %v5404_v28  ;;  %vm5403_vm11 = vcmp.eq.f32.partialorder %v5402_v21, 8.507059e+37 }
 0x669   :  { %v5395_v20 = vsub.f32 1.0, %v5394_v19  ;;  %v16412_v11 = vmul.f32 %v16148_v16, %v5391_v5  ;;  %v11329_v16 = vunpack.i.l.bf16 %v16313_v3  ;;  %v5419_v30 = vand.u32 2147483648, %v4472_v23 }
 0x66a   :  { %v5417_v28 = vand.u32 2147483647, %v4472_v23  ;;  %vm5413_vm13 = vweird.f32 %v4472_v23 }
 0x66b   :  { %19289 = vst [vmem:[#allocation174_spill] sm:$0xff] %v16412_v11  ;;  %v5396_v41 = vmul.f32 %v11978_v38, %v5395_v20  ;;  %11392 = vrot.lane.b32.xlu2 %v19290_v26, %s12241_s18  ;;  %6610 = vrot.lane.b32.xlu0 %v16412_v11, %s12239_s5 }
 0x66c   :  { %vm5418_vm15 = vcmp.eq.f32.partialorder %v5417_v28, 8.507059e+37 }
 0x66d   :  { %v5397_v2 = vadd.f32 %v11978_v38, %v5396_v41  ;;  %v6338_v43 = vpop.permute.xlu0 %6337  ;;  %v16425_v41 = vpop.f32.mrf.mxu1 }
 0x66e   :  { %v11980_v19 = vpop.eup %11979  ;;  %10954 = vmatmul.msk.f32.vlgmr.msrb.gmra.mxu3 %vm1499_vm1, %v6338_v43  ;;  %19291 = vst [vmem:[#allocation61_spill] sm:$0xff] %v16425_v41 }
 0x66f   :  { %v5409_v20 = vmul.f32 %v11980_v19, %v4472_v23  ;;  %6599 = vmatpush.msrb.mxu3 %v11330_v9  ;;  %v4475_v5 = vpop.f32.mrf.mxu0  ;;  %v5401_v53 = vsel %vm5400_vm10, %v11978_v38, %v5397_v2  ;;  %vm5414_vm12 = vweird.f32 %v11980_v19  ;;  %v19292_v9 = vld [vmem:[#allocation70_spill] sm:$0xff]  ;;  %v6340_v38 = vpop.permute.xlu2 %6339 }
 0x670   :  { %11981 = vrcp.f32 %v4475_v5  ;;  %8223 = vrot.lane.b32.xlu1 %v15753_v0, %s12241_s18  ;;  %v5406_v35 = vsel %vm5403_vm11, %v5405_v25, %v5401_v53  ;;  %vm5415_vm14 = vmor %vm5413_vm13, %vm5414_vm12  ;;  %v5420_v53 = vor.u32 1.1754944e-38, %v5419_v30  ;;  %v19293_v25 = vld [vmem:[#allocation132_spill] sm:$0xff]  ;;  %v5432_v0 = vand.u32 2147483647, %v4475_v5 }
 0x671   :  { %v5410_v11 = vsub.f32 1.0, %v5409_v20  ;;  %6600 = vmatpush.msrb.mxu3 %v11329_v16  ;;  %v16428_v43 = vmul.f32 %v16171_v50, %v5406_v35  ;;  %v16435_v16 = vpop.permute.xlu1 %11412  ;;  %vm5428_vm4 = vweird.f32 %v4475_v5 }
 0x672   :  { %vm5433_vm6 = vcmp.eq.f32.partialorder %v5432_v0, 8.507059e+37 }
 0x673   :  { %v5411_v3 = vmul.f32 %v11980_v19, %v5410_v11  ;;  %11402 = vrot.lane.b32.xlu0 %v19292_v9, %s12241_s18  ;;  %6612 = vrot.lane.b32.xlu2 %v16428_v43, %s12239_s5 }
 0x675   :  { %v5412_v21 = vadd.f32 %v11980_v19, %v5411_v3  ;;  %v5434_v3 = vand.u32 2147483648, %v4475_v5  ;;  %v16442_v30 = vpop.f32.mrf.mxu1 }
 0x676   :  { %v11982_v2 = vpop.eup %11981  ;;  %10955 = vmatmul.msk.f32.gmra.mxu3 %vm1499_vm1, %v6340_v38  ;;  %19294 = vst [vmem:[#allocation70_spill] sm:$0xff] %v16442_v30  ;;  %v19295_v38 = vld [vmem:[#allocation76_spill] sm:$0xff] }
 0x677   :  { %v5424_v50 = vmul.f32 %v11982_v2, %v4475_v5  ;;  %v5416_v11 = vsel %vm5415_vm14, %v11980_v19, %v5412_v21  ;;  %vm5429_vm3 = vweird.f32 %v11982_v2  ;;  %v11335_v19 = vunpack.i.h.bf16 %v16328_v36  ;;  %v6379_v28 = vpop.permute.xlu2 %6378 }
 0x678   :  { %8260 = vrot.lane.b32.xlu1 %v19293_v25, %s12241_s18  ;;  %v5421_v20 = vsel %vm5418_vm15, %v5420_v53, %v5416_v11  ;;  %vm5430_vm5 = vmor %vm5428_vm4, %vm5429_vm3  ;;  %v19297_v11 = vld [vmem:[#allocation87_spill] sm:$0xff] }
 0x679   :  { %v5425_v35 = vsub.f32 1.0, %v5424_v50  ;;  %v16440_v41 = vmul.f32 %v16197_v61, %v5421_v20  ;;  %v5435_v61 = vor.u32 1.1754944e-38, %v5434_v3  ;;  %v19296_v50 = vld [vmem:[#allocation94_spill] sm:$0xff]  ;;  %v16454_v25 = vpop.permute.xlu1 %11427 }
 0x67a   :  { %v11576_v20 = vpack.i.bf16 %v19297_v11, %v19296_v50  ;;  %v19299_v3 = vld [vmem:[#allocation38_spill] sm:$0xff]  ;;  %v11339_v11 = vunpack.i.l.bf16 %v16348_v29 }
 0x67b   :  { %v5426_v23 = vmul.f32 %v11982_v2, %v5425_v35  ;;  %11407 = vrot.lane.b32.xlu2 %v19295_v38, %s12241_s18  ;;  %6649 = vrot.lane.b32.xlu0 %v16440_v41, %s12239_s5  ;;  %v11334_v35 = vunpack.i.l.bf16 %v16328_v36 }
 0x67d   :  { %v5427_v21 = vadd.f32 %v11982_v2, %v5426_v23  ;;  %v6377_v53 = vpop.permute.xlu0 %6376  ;;  %v16464_v0 = vpop.f32.mrf.mxu1 }
 0x67e   :  { %10956 = vmatmul.msk.f32.vlgmr.msrb.gmra.mxu1 %vm1499_vm1, %v6377_v53  ;;  %19300 = vst [vmem:[#allocation94_spill] sm:$0xff] %v16464_v0 }
 0x67f   :  { %6638 = vmatpush.msrb.mxu1 %v11335_v19  ;;  %v5431_v38 = vsel %vm5430_vm5, %v11982_v2, %v5427_v21  ;;  %v6418_v36 = vpop.permute.xlu2 %6417  ;;  %v19301_v2 = vld [vmem:[#allocation149_spill] sm:$0xff]  ;;  %v19302_v19 = vld [vmem:[#allocation147_spill] sm:$0xff] }
 0x680   :  { %11577 = vrot.lane.b32.xlu1 %v11576_v20, %s12242_s21  ;;  %v5436_v30 = vsel %vm5433_vm6, %v5435_v61, %v5431_v38  ;;  %v19305_v61 = vld [vmem:[#allocation102_spill] sm:$0xff] }
 0x681   :  { %6639 = vmatpush.msrb.mxu1 %v11334_v35  ;;  %v16457_v5 = vmul.f32 %v16219_v46, %v5436_v30  ;;  %v16468_v23 = vpop.permute.xlu1 %11442  ;;  %v19303_v46 = vld [vmem:[#allocation75_spill] sm:$0xff]  ;;  %v11340_v30 = vunpack.i.h.bf16 %v16348_v29  ;;  %v19307_v35 = vld [vmem:[#allocation24_spill] sm:$0xff]  ;;  %v19308_v38 = vld [vmem:[#allocation146_spill] sm:$0xff] }
 0x683   :  { %19298 = vst [vmem:[#allocation76_spill] sm:$0xff] %v16457_v5  ;;  %11417 = vrot.lane.b32.xlu0 %v19299_v3, %s12241_s18  ;;  %6651 = vrot.lane.b32.xlu2 %v16457_v5, %s12239_s5 }
 0x685   :  { %v16480_v20 = vpop.f32.mrf.mxu1 }
 0x686   :  { %10957 = vmatmul.msk.f32.gmra.mxu1 %vm1499_vm1, %v6379_v28  ;;  %v19304_v28 = vld [vmem:[#allocation100_spill] sm:$0xff]  ;;  %19306 = vst [vmem:[#allocation87_spill] sm:$0xff] %v16480_v20 }
 0x687   :  { %v11586_v50 = vpack.i.bf16 %v19305_v61, %v19304_v28 }
 0x688   :  { %8334 = vrot.lane.b32.xlu1 %v19301_v2, %s12241_s18 }
 0x689   :  { %v16486_v3 = vpop.permute.xlu1 %11457 }
 0x68b   :  { %11432 = vrot.lane.b32.xlu0 %v19302_v19, %s12241_s18  ;;  %11422 = vrot.lane.b32.xlu2 %v19303_v46, %s12241_s18  ;;  %v19310_v46 = vld [vmem:[#allocation95_spill] sm:$0xff] }
 0x68d   :  { %v6416_v21 = vpop.permute.xlu0 %6415  ;;  %v6457_v53 = vpop.permute.xlu2 %6456 }
 0x68e   :  { %10958 = vmatmul.msk.f32.vlgmr.msra.gmra.mxu2 %vm1499_vm1, %v6416_v21  ;;  %v16491_v29 = vpop.f32.mrf.mxu1 }
 0x68f   :  { %6677 = vmatpush.msra.mxu2 %v11340_v30  ;;  %19309 = vst [vmem:[#allocation38_spill] sm:$0xff] %v16491_v29  ;;  %v19311_v30 = vld [vmem:[#allocation88_spill] sm:$0xff] }
 0x690   :  { %11587 = vrot.lane.b32.xlu1 %v11586_v50, %s12242_s21 }
 0x691   :  { %6678 = vmatpush.msra.mxu2 %v11339_v11  ;;  %v16498_v61 = vpop.permute.xlu1 %11472 }
 0x693   :  { %11447 = vrot.lane.b32.xlu0 %v19307_v35, %s12241_s18  ;;  %11437 = vrot.lane.b32.xlu2 %v19308_v38, %s12241_s18 }
 0x695   :  { %v11348_v19 = vpop.permute.xlu2 %11347 }
 0x696   :  { %10959 = vmatmul.msk.f32.gmra.mxu2 %vm1499_vm1, %v6418_v36  ;;  %v19312_v36 = vld [vmem:[#allocation130_spill] sm:$0xff]  ;;  %v16506_v50 = vpop.f32.mrf.mxu1 }
 0x697   :  { %19313 = vst [vmem:[#allocation147_spill] sm:$0xff] %v16506_v50 }
 0x698   :  { %8445 = vrot.lane.b32.xlu1 %v16046_v55, %s12241_s18 }
 0x69b   :  { %11462 = vrot.lane.b32.xlu0 %v19310_v46, %s12241_s18  ;;  %11452 = vrot.lane.b32.xlu2 %v19311_v30, %s12241_s18  ;;  %v16513_v30 = vpop.permute.xlu1 %11487 }
 0x69d   :  { %v6455_v21 = vpop.permute.xlu0 %6454  ;;  %v6496_v28 = vpop.permute.xlu2 %6495 }
 0x69e   :  { %10960 = vmatmul.msk.f32.vlgmr.msra.gmra.mxu3 %vm1499_vm1, %v6455_v21  ;;  %v16519_v21 = vpop.f32.mrf.mxu1 }
 0x69f   :  { %19315 = vst [vmem:[#allocation75_spill] sm:$0xff] %v16519_v21 }
 0x6a0   :  { %8410 = vrot.lane.b32.xlu1 %v16017_v59, %s12241_s18 }
 0x6a3   :  { %11477 = vrot.lane.b32.xlu0 %v15880_v1, %s12241_s18  ;;  %11467 = vrot.lane.b32.xlu2 %v19312_v36, %s12241_s18  ;;  %v19314_v1 = vld [vmem:[#allocation55_spill] sm:$0xff]  ;;  %v11350_v36 = vunpack.i.h.bf16 %v11348_v19 }
 0x6a5   :  { %v11343_v11 = vpop.permute.xlu0 %11342  ;;  %v16508_v38 = vpop.permute.xlu2 %11362 }
 0x6a6   :  { %v11345_v35 = vunpack.i.h.bf16 %v11343_v11  ;;  %10961 = vmatmul.msk.f32.gmra.mxu3 %vm1499_vm1, %v6457_v53  ;;  %v11344_v46 = vunpack.i.l.bf16 %v11343_v11  ;;  %v16521_v53 = vpop.f32.mrf.mxu3  ;;  %v11349_v11 = vunpack.i.l.bf16 %v11348_v19  ;;  %v19321_v19 = vld [vmem:[#allocation166_spill] sm:$0xff] }
 0x6a7   :  { %19316 = vst [vmem:[#allocation100_spill] sm:$0xff] %v16521_v53 }
 0x6a8   :  { %8373 = vrot.lane.b32.xlu1 %v15955_v33, %s12241_s18  ;;  %6710 = vmatpush.msra.mxu3 %v11345_v35  ;;  %v16526_v35 = vpop.permute.xlu1 %7742 }
 0x6a9   :  { %19317 = vst [vmem:[#allocation102_spill] sm:$0xff] %v16526_v35 }
 0x6aa   :  { %6711 = vmatpush.msra.mxu3 %v11344_v46  ;;  %v16532_v46 = vpop.f32.mrf.mxu1 }
 0x6ab   :  { %11492 = vrot.lane.b32.xlu0 %v15974_v39, %s12241_s18  ;;  %11482 = vrot.lane.b32.xlu2 %v19314_v1, %s12241_s18  ;;  %v19318_v39 = vld [vmem:[#allocation89_spill] sm:$0xff]  ;;  %19319 = vst [vmem:[#allocation24_spill] sm:$0xff] %v16532_v46 }
 0x6ad   :  { %v6494_v0 = vpop.permute.xlu0 %6493  ;;  %v6535_v20 = vpop.permute.xlu2 %6534 }
 0x6ae   :  { %10962 = vmatmul.msk.f32.vlgmr.msra.gmra.mxu1 %vm1499_vm1, %v6494_v0  ;;  %v16539_v0 = vpop.f32.mrf.mxu3 }
 0x6af   :  { %6743 = vmatpush.msra.mxu1 %v11350_v36  ;;  %19320 = vst [vmem:[#allocation146_spill] sm:$0xff] %v16539_v0  ;;  %v16545_v36 = vpop.f32.mrf.mxu2  ;;  %v11354_v0 = vunpack.i.l.bf16 %v16363_v8 }
 0x6b0   :  { %8556 = vrot.lane.b32.xlu1 %v16200_v52, %s12241_s18  ;;  %19322 = vst [vmem:[#allocation95_spill] sm:$0xff] %v16545_v36 }
 0x6b1   :  { %6744 = vmatpush.msra.mxu1 %v11349_v11  ;;  %v11355_v11 = vunpack.i.h.bf16 %v16363_v8 }
 0x6b3   :  { %7744 = vrot.lane.b32.xlu0 %v19318_v39, %s12241_s18  ;;  %11497 = vrot.lane.b32.xlu2 %v16004_v4, %s12241_s18  ;;  %v16547_v4 = vpop.permute.xlu1 %7779 }
 0x6b5   :  { %v11358_v1 = vpop.permute.xlu0 %11357  ;;  %v16534_v53 = vpop.permute.xlu2 %11377 }
 0x6b6   :  { %10963 = vmatmul.msk.f32.gmra.mxu1 %vm1499_vm1, %v6496_v28  ;;  %v16551_v28 = vpop.f32.mrf.mxu1  ;;  %v16556_v21 = vpop.f32.mrf.mxu3 }
 0x6b7   :  { %19323 = vst [vmem:[#allocation88_spill] sm:$0xff] %v16551_v28 }
 0x6b8   :  { %8521 = vrot.lane.b32.xlu1 %v16179_v37, %s12241_s18  ;;  %19324 = vst [vmem:[#allocation130_spill] sm:$0xff] %v16556_v21 }
 0x6bb   :  { %7781 = vrot.lane.b32.xlu0 %v19321_v19, %s12241_s18  ;;  %11502 = vrot.lane.b32.xlu2 %v19266_v49, %s12242_s21  ;;  %v19325_v49 = vld [vmem:[#allocation33_spill] sm:$0xff]  ;;  %v16566_v28 = vpop.permute.xlu1 %7816 }
 0x6bc   :  { %19327 = vst [vmem:[#allocation89_spill] sm:$0xff] %v16566_v28 }
 0x6bd   :  { %v6533_v29 = vpop.permute.xlu0 %6532  ;;  %v6574_v46 = vpop.permute.xlu2 %6573 }
 0x6be   :  { %10964 = vmatmul.msk.f32.vlgmr.msrb.gmra.mxu2 %vm1499_vm1, %v6533_v29  ;;  %v16564_v29 = vpop.f32.mrf.mxu2  ;;  %v16569_v8 = vpop.f32.mrf.mxu1 }
 0x6bf   :  { %6776 = vmatpush.msrb.mxu2 %v11355_v11  ;;  %19326 = vst [vmem:[#allocation55_spill] sm:$0xff] %v16564_v29  ;;  %v19330_v11 = vld [vmem:[#allocation168_spill] sm:$0xff] }
 0x6c0   :  { %8484 = vrot.lane.b32.xlu1 %v16125_v7, %s12241_s18  ;;  %19328 = vst [vmem:[#allocation166_spill] sm:$0xff] %v16569_v8 }
 0x6c1   :  { %6777 = vmatpush.msrb.mxu2 %v11354_v0  ;;  %v16573_v0 = vpop.f32.mrf.mxu3 }
 0x6c2   :  { %19329 = vst [vmem:[#allocation33_spill] sm:$0xff] %v16573_v0 }
 0x6c3   :  { %7818 = vrot.lane.b32.xlu0 %v19325_v49, %s12241_s18  ;;  %11507 = vrot.lane.b32.xlu2 %v19269_v6, %s12242_s21  ;;  %v11360_v6 = vunpack.i.h.bf16 %v11358_v1  ;;  %v16584_v8 = vpop.permute.xlu1 %7853 }
 0x6c4   :  { %19332 = vst [vmem:[#allocation176_spill] sm:$0xff] %v16584_v8 }
 0x6c5   :  { %v11373_v36 = vpop.permute.xlu0 %11372  ;;  %v16562_v50 = vpop.permute.xlu2 %11392 }
 0x6c6   :  { %10965 = vmatmul.msk.f32.gmra.mxu2 %vm1499_vm1, %v6535_v20  ;;  %v16579_v35 = vpop.f32.mrf.mxu2  ;;  %v11359_v20 = vunpack.i.l.bf16 %v11358_v1  ;;  %v16586_v0 = vpop.f32.mrf.mxu1 }
 0x6c7   :  { %19331 = vst [vmem:[#allocation175_spill] sm:$0xff] %v16579_v35 }
 0x6c8   :  { %8667 = vrot.lane.b32.xlu1 %v16278_v12, %s12241_s18  ;;  %19333 = vst [vmem:[#allocation177_spill] sm:$0xff] %v16586_v0  ;;  %v11365_v0 = vunpack.i.h.bf16 %v16508_v38 }
 0x6c9   :  { %v16588_v28 = vpop.f32.mrf.mxu3 }
 0x6ca   :  { %19334 = vst [vmem:[#allocation178_spill] sm:$0xff] %v16588_v28  ;;  %v19339_v28 = vld [vmem:[#allocation47_spill] sm:$0xff] }
 0x6cb   :  { %7855 = vrot.lane.b32.xlu0 %v19330_v11, %s12241_s18  ;;  %11512 = vrot.lane.b32.xlu2 %v19237_v14, %s12242_s21  ;;  %v19335_v14 = vld [vmem:[#allocation40_spill] sm:$0xff] }
 0x6cd   :  { %v6572_v21 = vpop.permute.xlu0 %6571  ;;  %v6613_v29 = vpop.permute.xlu2 %6612 }
 0x6ce   :  { %10966 = vmatmul.msk.f32.vlgmr.msrb.gmra.mxu3 %vm1499_vm1, %v6572_v21  ;;  %v16599_v1 = vpop.f32.mrf.mxu2 }
 0x6cf   :  { %6809 = vmatpush.msrb.mxu3 %v11360_v6  ;;  %19336 = vst [vmem:[#allocation179_spill] sm:$0xff] %v16599_v1  ;;  %v16601_v6 = vpop.f32.mrf.mxu1  ;;  %v11364_v1 = vunpack.i.l.bf16 %v16508_v38 }
 0x6d0   :  { %8632 = vrot.lane.b32.xlu1 %v16268_v13, %s12241_s18  ;;  %19337 = vst [vmem:[#allocation180_spill] sm:$0xff] %v16601_v6  ;;  %v11374_v6 = vunpack.i.l.bf16 %v11373_v36 }
 0x6d1   :  { %6810 = vmatpush.msrb.mxu3 %v11359_v20  ;;  %v16603_v20 = vpop.permute.xlu1 %7890 }
 0x6d2   :  { %19338 = vst [vmem:[#allocation181_spill] sm:$0xff] %v16603_v20 }
 0x6d3   :  { %7892 = vrot.lane.b32.xlu0 %v19335_v14, %s12241_s18  ;;  %11517 = vrot.lane.b32.xlu2 %v19273_v34, %s12242_s21  ;;  %v16609_v34 = vpop.f32.mrf.mxu3 }
 0x6d4   :  { %19340 = vst [vmem:[#allocation47_spill] sm:$0xff] %v16609_v34  ;;  %v19343_v34 = vld [vmem:[#allocation51_spill] sm:$0xff] }
 0x6d5   :  { %v11388_v35 = vpop.permute.xlu0 %11387  ;;  %v16594_v21 = vpop.permute.xlu2 %11407 }
 0x6d6   :  { %10967 = vmatmul.msk.f32.gmra.mxu3 %vm1499_vm1, %v6574_v46  ;;  %v11375_v46 = vunpack.i.h.bf16 %v11373_v36  ;;  %v16616_v20 = vpop.f32.mrf.mxu2 }
 0x6d7   :  { %19341 = vst [vmem:[#allocation182_spill] sm:$0xff] %v16616_v20 }
 0x6d8   :  { %8595 = vrot.lane.b32.xlu1 %v16248_v27, %s12241_s18 }
 0x6d9   :  { %v16628_v38 = vpop.permute.xlu1 %7927 }
 0x6da   :  { %19345 = vst [vmem:[#allocation184_spill] sm:$0xff] %v16628_v38  ;;  %v11389_v38 = vunpack.i.l.bf16 %v11388_v35 }
 0x6db   :  { %7929 = vrot.lane.b32.xlu0 %v19339_v28, %s12241_s18  ;;  %11522 = vrot.lane.b32.xlu2 %v19277_v51, %s12242_s21  ;;  %v16620_v51 = vpop.f32.mrf.mxu1 }
 0x6dc   :  { %19342 = vst [vmem:[#allocation183_spill] sm:$0xff] %v16620_v51 }
 0x6dd   :  { %v6611_v8 = vpop.permute.xlu0 %6610  ;;  %v6652_v5 = vpop.permute.xlu2 %6651 }
 0x6de   :  { %10968 = vmatmul.msk.f32.vlgmr.msrb.gmra.mxu1 %vm1499_vm1, %v6611_v8  ;;  %10972 = vmatmul.msk.f32.vlgmr.msra.gmra.mxu3 %vm1499_vm1, %v19255_v17  ;;  %v16626_v8 = vpop.f32.mrf.mxu3  ;;  %v11380_v17 = vunpack.i.h.bf16 %v16534_v53 }
 0x6df   :  { %6842 = vmatpush.msrb.mxu1 %v11365_v0  ;;  %6908 = vmatpush.msra.mxu3 %v11375_v46  ;;  %19344 = vst [vmem:[#allocation51_spill] sm:$0xff] %v16626_v8  ;;  %v11370_v46 = vunpack.i.h.bf16 %v16381_v32 }
 0x6e0   :  { %8778 = vrot.lane.b32.xlu1 %v16356_v48, %s12241_s18 }
 0x6e1   :  { %6843 = vmatpush.msrb.mxu1 %v11364_v1  ;;  %6909 = vmatpush.msra.mxu3 %v11374_v6  ;;  %v16639_v1 = vpop.f32.mrf.mxu2  ;;  %v16652_v51 = vpop.permute.xlu1 %7964 }
 0x6e2   :  { %19346 = vst [vmem:[#allocation185_spill] sm:$0xff] %v16639_v1  ;;  %v11390_v1 = vunpack.i.h.bf16 %v11388_v35 }
 0x6e3   :  { %7966 = vrot.lane.b32.xlu0 %v19343_v34, %s12241_s18  ;;  %11527 = vrot.lane.b32.xlu2 %v15156_v40, %s12242_s21  ;;  %v19347_v40 = vld [vmem:[#allocation56_spill] sm:$0xff]  ;;  %v16645_v6 = vpop.f32.mrf.mxu1 }
 0x6e4   :  { %19348 = vst [vmem:[#allocation186_spill] sm:$0xff] %v16645_v6  ;;  %v11379_v6 = vunpack.i.l.bf16 %v16534_v53 }
 0x6e5   :  { %v16630_v36 = vpop.permute.xlu0 %11402  ;;  %v16632_v0 = vpop.permute.xlu2 %11422 }
 0x6e6   :  { %10969 = vmatmul.msk.f32.gmra.mxu1 %vm1499_vm1, %v6613_v29  ;;  %10973 = vmatmul.msk.f32.gmra.mxu3 %vm1499_vm1, %v19318_v39  ;;  %v16650_v20 = vpop.f32.mrf.mxu3 }
 0x6e7   :  { %19349 = vst [vmem:[#allocation187_spill] sm:$0xff] %v16650_v20 }
 0x6e8   :  { %8743 = vrot.lane.b32.xlu1 %v16342_v47, %s12241_s18 }
 0x6e9   :  { %v16664_v20 = vpop.f32.mrf.mxu2 }
 0x6ea   :  { %19350 = vst [vmem:[#allocation188_spill] sm:$0xff] %v16664_v20 }
 0x6eb   :  { %8003 = vrot.lane.b32.xlu0 %v19347_v40, %s12241_s18  ;;  %11532 = vrot.lane.b32.xlu2 %v19281_v10, %s12242_s21  ;;  %v11369_v10 = vunpack.i.l.bf16 %v16381_v32  ;;  %v16681_v35 = vpop.f32.mrf.mxu1 }
 0x6ec   :  { %19353 = vst [vmem:[#allocation190_spill] sm:$0xff] %v16681_v35  ;;  %v11394_v35 = vunpack.i.l.bf16 %v16562_v50 }
 0x6ed   :  { %v6650_v8 = vpop.permute.xlu0 %6649  ;;  %v16648_v29 = vpop.permute.xlu2 %11437 }
 0x6ee   :  { %10970 = vmatmul.msk.f32.vlgmr.msra.gmra.mxu2 %vm1499_vm1, %v6650_v8  ;;  %10974 = vmatmul.msk.f32.vlgmr.msra.gmra.mxu1 %vm1499_vm1, %v15076_v56  ;;  %v19351_v8 = vld [vmem:[#allocation65_spill] sm:$0xff] }
 0x6ef   :  { %10978 = vmatmul.msk.f32.vlgmr.msrb.gmra.mxu3 %vm1499_vm1, %v19259_v18  ;;  %6875 = vmatpush.msra.mxu2 %v11370_v46 }
 0x6f0   :  { %6941 = vmatpush.msra.mxu1 %v11380_v17  ;;  %7007 = vmatpush.msrb.mxu3 %v11390_v1  ;;  %v16674_v17 = vpop.f32.mrf.mxu3  ;;  %v11385_v1 = vunpack.i.h.bf16 %v16400_v60 }
 0x6f1   :  { %8706 = vrot.lane.b32.xlu1 %v16316_v42, %s12241_s18  ;;  %6876 = vmatpush.msra.mxu2 %v11369_v10  ;;  %19352 = vst [vmem:[#allocation189_spill] sm:$0xff] %v16674_v17  ;;  %v11395_v10 = vunpack.i.h.bf16 %v16562_v50  ;;  %v11405_v17 = vunpack.i.h.bf16 %v16630_v36 }
 0x6f2   :  { %6942 = vmatpush.msra.mxu1 %v11379_v6  ;;  %7008 = vmatpush.msrb.mxu3 %v11389_v38  ;;  %v16683_v38 = vpop.permute.xlu1 %8001 }
 0x6f3   :  { %8040 = vrot.lane.b32.xlu0 %v19351_v8, %s12241_s18  ;;  %11537 = vrot.lane.b32.xlu2 %v19283_v15, %s12242_s21  ;;  %v19354_v15 = vld [vmem:[#allocation34_spill] sm:$0xff] }
 0x6f5   :  { %v16670_v32 = vpop.permute.xlu0 %11417  ;;  %v16672_v53 = vpop.permute.xlu2 %11452 }
 0x6f6   :  { %10971 = vmatmul.msk.f32.gmra.mxu2 %vm1499_vm1, %v6652_v5  ;;  %10975 = vmatmul.msk.f32.gmra.mxu1 %vm1499_vm1, %v19321_v19  ;;  %v16691_v5 = vpop.f32.mrf.mxu2 }
 0x6f7   :  { %10979 = vmatmul.msk.f32.gmra.mxu3 %vm1499_vm1, %v19330_v11  ;;  %19355 = vst [vmem:[#allocation191_spill] sm:$0xff] %v16691_v5  ;;  %v16707_v5 = vpop.f32.mrf.mxu1  ;;  %v11404_v11 = vunpack.i.l.bf16 %v16630_v36 }
 0x6f8   :  { %19356 = vst [vmem:[#allocation192_spill] sm:$0xff] %v16707_v5  ;;  %v16709_v20 = vpop.f32.mrf.mxu3 }
 0x6f9   :  { %8889 = vrot.lane.b32.xlu1 %v16440_v41, %s12241_s18  ;;  %19357 = vst [vmem:[#allocation193_spill] sm:$0xff] %v16709_v20 }
 0x6fb   :  { %8077 = vrot.lane.b32.xlu0 %v19354_v15, %s12241_s18  ;;  %11542 = vrot.lane.b32.xlu2 %v15224_v57, %s12242_s21  ;;  %v11384_v57 = vunpack.i.l.bf16 %v16400_v60  ;;  %v19358_v60 = vld [vmem:[#allocation20_spill] sm:$0xff] }
 0x6fd   :  { %v16694_v6 = vpop.permute.xlu0 %11432  ;;  %v16696_v46 = vpop.permute.xlu2 %11467 }
 0x6fe   :  { %10976 = vmatmul.msk.f32.vlgmr.msrb.gmra.mxu2 %vm1499_vm1, %v19257_v63  ;;  %10980 = vmatmul.msk.f32.vlgmr.msrb.gmra.mxu1 %vm1499_vm1, %v19262_v24  ;;  %v16715_v24 = vpop.permute.xlu1 %8038 }
 0x6ff   :  { %10984 = vmatmul.msk.f32.vlgmr.msra.gmra.mxu3 %vm1499_vm1, %v19267_v62  ;;  %6974 = vmatpush.msrb.mxu2 %v11385_v1  ;;  %v16721_v1 = vpop.f32.mrf.mxu2 }
 0x700   :  { %7040 = vmatpush.msrb.mxu1 %v11395_v10  ;;  %7106 = vmatpush.msra.mxu3 %v11405_v17  ;;  %19359 = vst [vmem:[#allocation194_spill] sm:$0xff] %v16721_v1  ;;  %v19362_v17 = vld [vmem:[#allocation46_spill] sm:$0xff]  ;;  %v11400_v10 = vunpack.i.h.bf16 %v16419_v44  ;;  %v11420_v1 = vunpack.i.h.bf16 %v16670_v32 }
 0x701   :  { %8854 = vrot.lane.b32.xlu1 %v16428_v43, %s12241_s18  ;;  %6975 = vmatpush.msrb.mxu2 %v11384_v57 }
 0x702   :  { %7041 = vmatpush.msrb.mxu1 %v11394_v35  ;;  %7107 = vmatpush.msra.mxu3 %v11404_v11  ;;  %v16733_v11 = vpop.f32.mrf.mxu3 }
 0x703   :  { %8114 = vrot.lane.b32.xlu0 %v19358_v60, %s12241_s18  ;;  %11547 = vrot.lane.b32.xlu2 %v19287_v45, %s12242_s21  ;;  %19360 = vst [vmem:[#allocation195_spill] sm:$0xff] %v16733_v11  ;;  %v16737_v45 = vpop.f32.mrf.mxu1 }
 0x704   :  { %19361 = vst [vmem:[#allocation196_spill] sm:$0xff] %v16737_v45  ;;  %v11409_v45 = vunpack.i.l.bf16 %v16594_v21 }
 0x705   :  { %v16723_v50 = vpop.permute.xlu0 %11447  ;;  %v16725_v36 = vpop.permute.xlu2 %11482 }
 0x706   :  { %10977 = vmatmul.msk.f32.gmra.mxu2 %vm1499_vm1, %v19325_v49  ;;  %10981 = vmatmul.msk.f32.gmra.mxu1 %vm1499_vm1, %v19335_v14  ;;  %v16743_v35 = vpop.permute.xlu1 %8075 }
 0x707   :  { %10985 = vmatmul.msk.f32.gmra.mxu3 %vm1499_vm1, %v19343_v34  ;;  %v16750_v11 = vpop.f32.mrf.mxu2 }
 0x708   :  { %19363 = vst [vmem:[#allocation46_spill] sm:$0xff] %v16750_v11  ;;  %v11419_v11 = vunpack.i.l.bf16 %v16670_v32 }
 0x709   :  { %9052 = vrot.lane.b32.xlu1 %v19257_v63, %s12243_s1  ;;  %v11410_v63 = vunpack.i.h.bf16 %v16594_v21 }
 0x70a   :  { %v16765_v5 = vpop.f32.mrf.mxu3 }
 0x70b   :  { %8151 = vrot.lane.b32.xlu0 %v19362_v17, %s12241_s18  ;;  %11552 = vrot.lane.b32.xlu2 %v19290_v26, %s12242_s21  ;;  %v11399_v26 = vunpack.i.l.bf16 %v16419_v44  ;;  %19364 = vst [vmem:[#allocation197_spill] sm:$0xff] %v16765_v5  ;;  %v16767_v14 = vpop.f32.mrf.mxu1  ;;  %v19366_v44 = vld [vmem:[#allocation157_spill] sm:$0xff]  ;;  %v11415_v5 = vunpack.i.h.bf16 %v16435_v16 }
 0x70c   :  { %19365 = vst [vmem:[#allocation198_spill] sm:$0xff] %v16767_v14 }
 0x70d   :  { %v16746_v57 = vpop.permute.xlu0 %11462  ;;  %v16748_v20 = vpop.permute.xlu2 %11497 }
 0x70e   :  { %10982 = vmatmul.msk.f32.vlgmr.msra.gmra.mxu2 %vm1499_vm1, %v19264_v58  ;;  %10986 = vmatmul.msk.f32.vlgmr.msra.gmra.mxu1 %vm1499_vm1, %v19271_v54 }
 0x70f   :  { %10990 = vmatmul.msk.f32.vlgmr.msrb.gmra.mxu3 %vm1499_vm1, %v19278_v22  ;;  %7073 = vmatpush.msra.mxu2 %v11400_v10  ;;  %v19367_v10 = vld [vmem:[#allocation63_spill] sm:$0xff]  ;;  %v11434_v22 = vunpack.i.l.bf16 %v16694_v6 }
 0x710   :  { %7139 = vmatpush.msra.mxu1 %v11410_v63  ;;  %7205 = vmatpush.msrb.mxu3 %v11420_v1  ;;  %v16777_v1 = vpop.f32.mrf.mxu2 }
 0x711   :  { %9021 = vrot.lane.b32.xlu1 %v15076_v56, %s12243_s1  ;;  %7074 = vmatpush.msra.mxu2 %v11399_v26  ;;  %19368 = vst [vmem:[#allocation157_spill] sm:$0xff] %v16777_v1  ;;  %v16779_v56 = vpop.permute.xlu1 %8112 }
 0x712   :  { %7140 = vmatpush.msra.mxu1 %v11409_v45  ;;  %7206 = vmatpush.msrb.mxu3 %v11419_v11  ;;  %v19369_v11 = vld [vmem:[#allocation80_spill] sm:$0xff]  ;;  %v19370_v45 = vld [vmem:[#allocation78_spill] sm:$0xff]  ;;  %v16791_v26 = vpop.f32.mrf.mxu3 }
 0x713   :  { %8188 = vrot.lane.b32.xlu0 %v19366_v44, %s12241_s18  ;;  %11557 = vrot.lane.b32.xlu2 %v19367_v10, %s12242_s21  ;;  %v11566_v63 = vpack.i.bf16 %v19370_v45, %v19369_v11  ;;  %19371 = vst [vmem:[#allocation63_spill] sm:$0xff] %v16791_v26  ;;  %v16796_v10 = vpop.f32.mrf.mxu1  ;;  %v19373_v11 = vld [vmem:[#allocation152_spill] sm:$0xff]  ;;  %v19374_v45 = vld [vmem:[#allocation43_spill] sm:$0xff]  ;;  %v11424_v26 = vunpack.i.l.bf16 %v16632_v0 }
 0x714   :  { %19372 = vst [vmem:[#allocation80_spill] sm:$0xff] %v16796_v10 }
 0x715   :  { %v16773_v21 = vpop.permute.xlu0 %11477  ;;  %v16775_v32 = vpop.permute.xlu2 %11502 }
 0x716   :  { %10983 = vmatmul.msk.f32.gmra.mxu2 %vm1499_vm1, %v19339_v28  ;;  %10987 = vmatmul.msk.f32.gmra.mxu1 %vm1499_vm1, %v19347_v40 }
 0x717   :  { %10991 = vmatmul.msk.f32.gmra.mxu3 %vm1499_vm1, %v19354_v15  ;;  %v11435_v15 = vunpack.i.h.bf16 %v16694_v6 }
 0x719   :  { %8992 = vrot.lane.b32.xlu1 %v19318_v39, %s12243_s1  ;;  %v11425_v39 = vunpack.i.h.bf16 %v16632_v0  ;;  %v16814_v10 = vpop.permute.xlu1 %8149 }
 0x71a   :  { %19376 = vst [vmem:[#allocation152_spill] sm:$0xff] %v16814_v10 }
 0x71b   :  { %11567 = vrot.lane.b32.xlu0 %v11566_v63, %s12242_s21  ;;  %11562 = vrot.lane.b32.xlu2 %v19292_v9, %s12242_s21  ;;  %v11414_v9 = vunpack.i.l.bf16 %v16435_v16  ;;  %v16812_v63 = vpop.f32.mrf.mxu2  ;;  %v19377_v16 = vld [vmem:[#allocation164_spill] sm:$0xff] }
 0x71c   :  { %19375 = vst [vmem:[#allocation78_spill] sm:$0xff] %v16812_v63  ;;  %v16824_v63 = vpop.f32.mrf.mxu3 }
 0x71d   :  { %v16799_v1 = vpop.permute.xlu0 %11492  ;;  %v16801_v14 = vpop.permute.xlu2 %11507  ;;  %19379 = vst [vmem:[#allocation199_spill] sm:$0xff] %v16824_v63 }
 0x71e   :  { %10988 = vmatmul.msk.f32.vlgmr.msrb.gmra.mxu2 %vm1499_vm1, %v19373_v11  ;;  %10992 = vmatmul.msk.f32.vlgmr.msrb.gmra.mxu1 %vm1499_vm1, %v19374_v45 }
 0x71f   :  { %10996 = vmatmul.msk.f32.vlgmr.msra.gmra.mxu3 %vm1499_vm1, %v15716_v31  ;;  %7172 = vmatpush.msrb.mxu2 %v11415_v5  ;;  %v19378_v5 = vld [vmem:[#allocation48_spill] sm:$0xff]  ;;  %v16826_v31 = vpop.f32.mrf.mxu1 }
 0x720   :  { %7238 = vmatpush.msrb.mxu1 %v11425_v39  ;;  %7304 = vmatpush.msra.mxu3 %v11435_v15  ;;  %19380 = vst [vmem:[#allocation200_spill] sm:$0xff] %v16826_v31  ;;  %v19383_v15 = vld [vmem:[#allocation85_spill] sm:$0xff]  ;;  %v19384_v39 = vld [vmem:[#allocation83_spill] sm:$0xff] }
 0x721   :  { %9207 = vrot.lane.b32.xlu1 %v19271_v54, %s12243_s1  ;;  %7173 = vmatpush.msrb.mxu2 %v11414_v9  ;;  %v19385_v9 = vld [vmem:[#allocation90_spill] sm:$0xff]  ;;  %v16846_v63 = vpop.permute.xlu1 %8186 }
 0x722   :  { %7239 = vmatpush.msrb.mxu1 %v11424_v26  ;;  %7305 = vmatpush.msra.mxu3 %v11434_v22  ;;  %v19382_v22 = vld [vmem:[#allocation92_spill] sm:$0xff]  ;;  %v11571_v31 = vpack.i.bf16 %v19385_v9, %v19384_v39  ;;  %v19389_v39 = vld [vmem:[#allocation91_spill] sm:$0xff]  ;;  %v19391_v9 = vld [vmem:[#allocation161_spill] sm:$0xff] }
 0x723   :  { %8262 = vrot.lane.b32.xlu0 %v19377_v16, %s12241_s18  ;;  %8225 = vrot.lane.b32.xlu2 %v19378_v5, %s12241_s18  ;;  %v16838_v54 = vpop.f32.mrf.mxu2  ;;  %v11581_v26 = vpack.i.bf16 %v19383_v15, %v19382_v22  ;;  %19386 = vst [vmem:[#allocation92_spill] sm:$0xff] %v16846_v63  ;;  %v11450_v22 = vunpack.i.h.bf16 %v16723_v50  ;;  %v19388_v15 = vld [vmem:[#allocation128_spill] sm:$0xff]  ;;  %v11449_v63 = vunpack.i.l.bf16 %v16723_v50 }
 0x724   :  { %19381 = vst [vmem:[#allocation201_spill] sm:$0xff] %v16838_v54 }
 0x725   :  { %v16828_v0 = vpop.permute.xlu0 %7744  ;;  %v16830_v6 = vpop.permute.xlu2 %11512 }
 0x726   :  { %10989 = vmatmul.msk.f32.gmra.mxu2 %vm1499_vm1, %v19351_v8  ;;  %10993 = vmatmul.msk.f32.gmra.mxu1 %vm1499_vm1, %v19358_v60  ;;  %v16850_v60 = vpop.f32.mrf.mxu3  ;;  %v11430_v8 = vunpack.i.h.bf16 %v16454_v25 }
 0x727   :  { %10997 = vmatmul.msk.f32.gmra.mxu3 %vm1499_vm1, %v19366_v44  ;;  %19387 = vst [vmem:[#allocation85_spill] sm:$0xff] %v16850_v60  ;;  %v11439_v60 = vunpack.i.l.bf16 %v16648_v29 }
 0x729   :  { %9178 = vrot.lane.b32.xlu1 %v19343_v34, %s12243_s1  ;;  %v11440_v34 = vunpack.i.h.bf16 %v16648_v29 }
 0x72b   :  { %11582 = vrot.lane.b32.xlu0 %v11581_v26, %s12242_s21  ;;  %11572 = vrot.lane.b32.xlu2 %v11571_v31, %s12242_s21  ;;  %v11429_v31 = vunpack.i.l.bf16 %v16454_v25  ;;  %v16864_v26 = vpop.f32.mrf.mxu1  ;;  %v19393_v25 = vld [vmem:[#allocation162_spill] sm:$0xff] }
 0x72c   :  { %19390 = vst [vmem:[#allocation83_spill] sm:$0xff] %v16864_v26  ;;  %v11445_v26 = vunpack.i.h.bf16 %v16468_v23 }
 0x72d   :  { %v16853_v54 = vpop.permute.xlu0 %7781  ;;  %v16855_v45 = vpop.permute.xlu2 %11517 }
 0x72e   :  { %10994 = vmatmul.msk.f32.vlgmr.msra.gmra.mxu2 %vm1499_vm1, %v19388_v15  ;;  %10998 = vmatmul.msk.f32.vlgmr.msra.gmra.mxu1 %vm1499_vm1, %v19389_v39  ;;  %v16872_v15 = vpop.f32.mrf.mxu2 }
 0x72f   :  { %11002 = vmatmul.msk.f32.vlgmr.msrb.gmra.mxu3 %vm1499_vm1, %v19391_v9  ;;  %7271 = vmatpush.msra.mxu2 %v11430_v8  ;;  %19392 = vst [vmem:[#allocation90_spill] sm:$0xff] %v16872_v15  ;;  %v16878_v8 = vpop.permute.xlu1 %8223  ;;  %v19400_v15 = vld [vmem:[#allocation165_spill] sm:$0xff] }
 0x730   :  { %7337 = vmatpush.msra.mxu1 %v11440_v34  ;;  %7403 = vmatpush.msrb.mxu3 %v11450_v22  ;;  %19394 = vst [vmem:[#allocation91_spill] sm:$0xff] %v16878_v8  ;;  %v19398_v34 = vld [vmem:[#allocation101_spill] sm:$0xff] }
 0x731   :  { %9147 = vrot.lane.b32.xlu1 %v19339_v28, %s12243_s1  ;;  %7272 = vmatpush.msra.mxu2 %v11429_v31  ;;  %v16888_v28 = vpop.f32.mrf.mxu3 }
 0x732   :  { %7338 = vmatpush.msra.mxu1 %v11439_v60  ;;  %7404 = vmatpush.msrb.mxu3 %v11449_v63  ;;  %19395 = vst [vmem:[#allocation202_spill] sm:$0xff] %v16888_v28  ;;  %v19397_v63 = vld [vmem:[#allocation99_spill] sm:$0xff] }
 0x733   :  { %8299 = vrot.lane.b32.xlu0 %v19393_v25, %s12241_s18  ;;  %8297 = vrot.lane.b32.xlu2 %v19391_v9, %s12241_s18  ;;  %v16890_v60 = vpop.f32.mrf.mxu1  ;;  %v11591_v22 = vpack.i.bf16 %v19398_v34, %v19397_v63  ;;  %v19402_v63 = vld [vmem:[#allocation132_spill] sm:$0xff]  ;;  %v11444_v34 = vunpack.i.l.bf16 %v16468_v23  ;;  %v11454_v9 = vunpack.i.l.bf16 %v16672_v53  ;;  %v19407_v23 = vld [vmem:[#allocation97_spill] sm:$0xff] }
 0x734   :  { %19396 = vst [vmem:[#allocation203_spill] sm:$0xff] %v16890_v60 }
 0x735   :  { %v16880_v29 = vpop.permute.xlu0 %7818  ;;  %v16882_v50 = vpop.permute.xlu2 %11522 }
 0x736   :  { %10995 = vmatmul.msk.f32.gmra.mxu2 %vm1499_vm1, %v19362_v17  ;;  %10999 = vmatmul.msk.f32.gmra.mxu1 %vm1499_vm1, %v19378_v5  ;;  %v16898_v31 = vpop.f32.mrf.mxu2  ;;  %v11465_v5 = vunpack.i.h.bf16 %v16746_v57 }
 0x737   :  { %11003 = vmatmul.msk.f32.gmra.mxu3 %vm1499_vm1, %v19393_v25  ;;  %19399 = vst [vmem:[#allocation99_spill] sm:$0xff] %v16898_v31  ;;  %v16908_v25 = vpop.permute.xlu1 %8260  ;;  %v19404_v31 = vld [vmem:[#allocation136_spill] sm:$0xff] }
 0x738   :  { %19401 = vst [vmem:[#allocation101_spill] sm:$0xff] %v16908_v25  ;;  %v11464_v25 = vunpack.i.l.bf16 %v16746_v57 }
 0x739   :  { %9238 = vrot.lane.b32.xlu1 %v19373_v11, %s12243_s1  ;;  %v11455_v11 = vunpack.i.h.bf16 %v16672_v53 }
 0x73b   :  { %11592 = vrot.lane.b32.xlu0 %v11591_v22, %s12242_s21  ;;  %8336 = vrot.lane.b32.xlu2 %v19400_v15, %s12241_s18  ;;  %v16917_v22 = vpop.f32.mrf.mxu3  ;;  %v16923_v58 = vpop.f32.mrf.mxu1 }
 0x73c   :  { %19403 = vst [vmem:[#allocation132_spill] sm:$0xff] %v16917_v22 }
 0x73d   :  { %v16904_v28 = vpop.permute.xlu0 %7855  ;;  %v16906_v60 = vpop.permute.xlu2 %11527  ;;  %19405 = vst [vmem:[#allocation204_spill] sm:$0xff] %v16923_v58  ;;  %v19414_v58 = vld [vmem:[#allocation156_spill] sm:$0xff] }
 0x73e   :  { %11000 = vmatmul.msk.f32.vlgmr.msrb.gmra.mxu2 %vm1499_vm1, %v19402_v63  ;;  %11004 = vmatmul.msk.f32.vlgmr.msrb.gmra.mxu1 %vm1499_vm1, %v19301_v2  ;;  %v19406_v2 = vld [vmem:[#allocation98_spill] sm:$0xff]  ;;  %v16932_v53 = vpop.f32.mrf.mxu2 }
 0x73f   :  { %11008 = vmatmul.msk.f32.vlgmr.msra.gmra.mxu3 %vm1499_vm1, %v19404_v31  ;;  %7370 = vmatpush.msrb.mxu2 %v11445_v26  ;;  %v11596_v40 = vpack.i.bf16 %v19407_v23, %v19406_v2  ;;  %19408 = vst [vmem:[#allocation98_spill] sm:$0xff] %v16932_v53  ;;  %v16944_v2 = vpop.permute.xlu1 %11577  ;;  %v19411_v26 = vld [vmem:[#allocation59_spill] sm:$0xff]  ;;  %v11470_v53 = vunpack.i.h.bf16 %v16696_v46 }
 0x740   :  { %7436 = vmatpush.msrb.mxu1 %v11455_v11  ;;  %7502 = vmatpush.msra.mxu3 %v11465_v5  ;;  %v11460_v11 = vunpack.i.h.bf16 %v16486_v3 }
 0x741   :  { %9333 = vrot.lane.b32.xlu1 %v19362_v17, %s12243_s1  ;;  %7371 = vmatpush.msrb.mxu2 %v11444_v34 }
 0x742   :  { %7437 = vmatpush.msrb.mxu1 %v11454_v9  ;;  %7503 = vmatpush.msra.mxu3 %v11464_v25  ;;  %v19412_v9 = vld [vmem:[#allocation135_spill] sm:$0xff] }
 0x743   :  { %11597 = vrot.lane.b32.xlu0 %v11596_v40, %s12242_s21  ;;  %8408 = vrot.lane.b32.xlu2 %v19404_v31, %s12241_s18  ;;  %v16946_v40 = vpop.f32.mrf.mxu3  ;;  %v16948_v17 = vpop.f32.mrf.mxu1 }
 0x744   :  { %19409 = vst [vmem:[#allocation97_spill] sm:$0xff] %v16946_v40  ;;  %v11479_v40 = vunpack.i.l.bf16 %v16773_v21 }
 0x745   :  { %v16934_v57 = vpop.permute.xlu0 %7892  ;;  %v16936_v5 = vpop.permute.xlu2 %11532  ;;  %19410 = vst [vmem:[#allocation205_spill] sm:$0xff] %v16948_v17  ;;  %v11480_v17 = vunpack.i.h.bf16 %v16773_v21 }
 0x746   :  { %11001 = vmatmul.msk.f32.gmra.mxu2 %vm1499_vm1, %v19377_v16  ;;  %11005 = vmatmul.msk.f32.gmra.mxu1 %vm1499_vm1, %v19400_v15  ;;  %v16956_v25 = vpop.f32.mrf.mxu2  ;;  %v19416_v15 = vld [vmem:[#allocation105_spill] sm:$0xff]  ;;  %v19419_v16 = vld [vmem:[#allocation108_spill] sm:$0xff] }
 0x747   :  { %11009 = vmatmul.msk.f32.gmra.mxu3 %vm1499_vm1, %v16017_v59  ;;  %19413 = vst [vmem:[#allocation59_spill] sm:$0xff] %v16956_v25  ;;  %v11469_v25 = vunpack.i.l.bf16 %v16696_v46  ;;  %v16982_v10 = vpop.permute.xlu1 %8334 }
 0x749   :  { %9424 = vrot.lane.b32.xlu1 %v19402_v63, %s12243_s1  ;;  %v11459_v63 = vunpack.i.l.bf16 %v16486_v3  ;;  %v19418_v3 = vld [vmem:[#allocation106_spill] sm:$0xff] }
 0x74a   :  { %v11601_v8 = vpack.i.bf16 %v19419_v16, %v19418_v3  ;;  %v19426_v3 = vld [vmem:[#allocation139_spill] sm:$0xff] }
 0x74b   :  { %8447 = vrot.lane.b32.xlu0 %v19411_v26, %s12241_s18  ;;  %8371 = vrot.lane.b32.xlu2 %v19412_v9, %s12241_s18  ;;  %v16984_v46 = vpop.f32.mrf.mxu1 }
 0x74c   :  { %19420 = vst [vmem:[#allocation105_spill] sm:$0xff] %v16984_v46 }
 0x74d   :  { %v16959_v34 = vpop.permute.xlu0 %7929  ;;  %v16961_v23 = vpop.permute.xlu2 %11537 }
 0x74e   :  { %11006 = vmatmul.msk.f32.vlgmr.msra.gmra.mxu2 %vm1499_vm1, %v19412_v9  ;;  %11010 = vmatmul.msk.f32.vlgmr.msra.gmra.mxu1 %vm1499_vm1, %v16046_v55  ;;  %v19417_v9 = vld [vmem:[#allocation107_spill] sm:$0xff]  ;;  %v16996_v16 = vpop.f32.mrf.mxu2 }
 0x74f   :  { %11014 = vmatmul.msk.f32.vlgmr.msrb.gmra.mxu3 %vm1499_vm1, %v19414_v58  ;;  %7469 = vmatpush.msra.mxu2 %v11460_v11  ;;  %v11606_v31 = vpack.i.bf16 %v19417_v9, %v19416_v15  ;;  %19421 = vst [vmem:[#allocation107_spill] sm:$0xff] %v16996_v16  ;;  %v11475_v9 = vunpack.i.h.bf16 %v16498_v61  ;;  %v11484_v16 = vunpack.i.l.bf16 %v16725_v36 }
 0x750   :  { %7535 = vmatpush.msra.mxu1 %v11470_v53  ;;  %7601 = vmatpush.msrb.mxu3 %v11480_v17  ;;  %v17011_v17 = vpop.permute.xlu1 %11587 }
 0x751   :  { %9393 = vrot.lane.b32.xlu1 %v19389_v39, %s12243_s1  ;;  %7470 = vmatpush.msra.mxu2 %v11459_v63  ;;  %v16976_v22 = vpop.f32.mrf.mxu3  ;;  %v11495_v63 = vunpack.i.h.bf16 %v16799_v1 }
 0x752   :  { %19415 = vst [vmem:[#allocation206_spill] sm:$0xff] %v16976_v22  ;;  %7536 = vmatpush.msra.mxu1 %v11469_v25  ;;  %7602 = vmatpush.msrb.mxu3 %v11479_v40 }
 0x753   :  { %11607 = vrot.lane.b32.xlu0 %v11606_v31, %s12242_s21  ;;  %11602 = vrot.lane.b32.xlu2 %v11601_v8, %s12242_s21  ;;  %v19423_v8 = vld [vmem:[#allocation104_spill] sm:$0xff]  ;;  %v19424_v31 = vld [vmem:[#allocation103_spill] sm:$0xff] }
 0x754   :  { %v11611_v53 = vpack.i.bf16 %v19424_v31, %v19423_v8  ;;  %v11474_v8 = vunpack.i.l.bf16 %v16498_v61  ;;  %v19430_v61 = vld [vmem:[#allocation153_spill] sm:$0xff] }
 0x755   :  { %v16988_v21 = vpop.permute.xlu0 %7966  ;;  %v16990_v39 = vpop.permute.xlu2 %11542 }
 0x756   :  { %11007 = vmatmul.msk.f32.gmra.mxu2 %vm1499_vm1, %v15955_v33  ;;  %11011 = vmatmul.msk.f32.gmra.mxu1 %vm1499_vm1, %v19411_v26  ;;  %v17025_v31 = vpop.f32.mrf.mxu2 }
 0x757   :  { %11015 = vmatmul.msk.f32.gmra.mxu3 %vm1499_vm1, %v16179_v37  ;;  %19427 = vst [vmem:[#allocation104_spill] sm:$0xff] %v17025_v31  ;;  %v19436_v31 = vld [vmem:[#allocation112_spill] sm:$0xff]  ;;  %v11490_v37 = vunpack.i.h.bf16 %v16513_v30 }
 0x759   :  { %9364 = vrot.lane.b32.xlu1 %v19366_v44, %s12243_s1  ;;  %v17002_v15 = vpop.f32.mrf.mxu3  ;;  %v11485_v44 = vunpack.i.h.bf16 %v16725_v36 }
 0x75a   :  { %19422 = vst [vmem:[#allocation106_spill] sm:$0xff] %v17002_v15 }
 0x75b   :  { %11612 = vrot.lane.b32.xlu0 %v11611_v53, %s12242_s21  ;;  %8519 = vrot.lane.b32.xlu2 %v19414_v58, %s12241_s18  ;;  %v17009_v40 = vpop.f32.mrf.mxu1  ;;  %v19428_v53 = vld [vmem:[#allocation159_spill] sm:$0xff] }
 0x75c   :  { %19425 = vst [vmem:[#allocation108_spill] sm:$0xff] %v17009_v40  ;;  %v11494_v40 = vunpack.i.l.bf16 %v16799_v1 }
 0x75d   :  { %v17014_v25 = vpop.permute.xlu0 %8003  ;;  %v17016_v11 = vpop.permute.xlu2 %11547 }
 0x75e   :  { %11012 = vmatmul.msk.f32.vlgmr.msrb.gmra.mxu2 %vm1499_vm1, %v19426_v3  ;;  %11016 = vmatmul.msk.f32.vlgmr.msrb.gmra.mxu1 %vm1499_vm1, %v16200_v52 }
 0x75f   :  { %11020 = vmatmul.msk.f32.vlgmr.msra.gmra.mxu3 %vm1499_vm1, %v19428_v53  ;;  %7568 = vmatpush.msrb.mxu2 %v11475_v9 }
 0x760   :  { %7634 = vmatpush.msrb.mxu1 %v11485_v44  ;;  %7700 = vmatpush.msra.mxu3 %v11495_v63  ;;  %v17045_v44 = vpop.permute.xlu1 %8445  ;;  %v19435_v63 = vld [vmem:[#allocation113_spill] sm:$0xff] }
 0x761   :  { %9579 = vrot.lane.b32.xlu1 %v16046_v55, %s12243_s1  ;;  %7569 = vmatpush.msrb.mxu2 %v11474_v8  ;;  %v17033_v46 = vpop.f32.mrf.mxu3  ;;  %v17053_v55 = vpop.f32.mrf.mxu2 }
 0x762   :  { %19429 = vst [vmem:[#allocation103_spill] sm:$0xff] %v17033_v46  ;;  %7635 = vmatpush.msrb.mxu1 %v11484_v16  ;;  %7701 = vmatpush.msra.mxu3 %v11494_v40  ;;  %v19434_v40 = vld [vmem:[#allocation111_spill] sm:$0xff] }
 0x763   :  { %8558 = vrot.lane.b32.xlu0 %v19430_v61, %s12241_s18  ;;  %8482 = vrot.lane.b32.xlu2 %v19426_v3, %s12241_s18  ;;  %v17039_v9 = vpop.f32.mrf.mxu1  ;;  %19432 = vst [vmem:[#allocation207_spill] sm:$0xff] %v17053_v55  ;;  %v11621_v8 = vpack.i.bf16 %v19435_v63, %v19434_v40  ;;  %v19439_v40 = vld [vmem:[#allocation158_spill] sm:$0xff] }
 0x764   :  { %19431 = vst [vmem:[#allocation139_spill] sm:$0xff] %v17039_v9  ;;  %v19437_v9 = vld [vmem:[#allocation114_spill] sm:$0xff] }
 0x765   :  { %v17041_v36 = vpop.permute.xlu0 %8040  ;;  %v17043_v1 = vpop.permute.xlu2 %11552  ;;  %v11616_v15 = vpack.i.bf16 %v19437_v9, %v19436_v31  ;;  %v19440_v31 = vld [vmem:[#allocation72_spill] sm:$0xff]  ;;  %v11499_v9 = vunpack.i.l.bf16 %v16748_v20 }
 0x766   :  { %11013 = vmatmul.msk.f32.gmra.mxu2 %vm1499_vm1, %v16125_v7  ;;  %11017 = vmatmul.msk.f32.gmra.mxu1 %vm1499_vm1, %v19430_v61  ;;  %v11510_v7 = vunpack.i.h.bf16 %v16801_v14 }
 0x767   :  { %11021 = vmatmul.msk.f32.gmra.mxu3 %vm1499_vm1, %v16268_v13 }
 0x768   :  { %v17082_v63 = vpop.permute.xlu1 %8410 }
 0x769   :  { %9550 = vrot.lane.b32.xlu1 %v16017_v59, %s12243_s1  ;;  %v17057_v16 = vpop.f32.mrf.mxu3  ;;  %v11500_v59 = vunpack.i.h.bf16 %v16748_v20  ;;  %v19446_v20 = vld [vmem:[#allocation68_spill] sm:$0xff] }
 0x76a   :  { %19433 = vst [vmem:[#allocation208_spill] sm:$0xff] %v17057_v16  ;;  %v19442_v16 = vld [vmem:[#allocation110_spill] sm:$0xff] }
 0x76b   :  { %11622 = vrot.lane.b32.xlu0 %v11621_v8, %s12242_s21  ;;  %11617 = vrot.lane.b32.xlu2 %v11616_v15, %s12242_s21  ;;  %v17065_v22 = vpop.f32.mrf.mxu1  ;;  %v11489_v15 = vunpack.i.l.bf16 %v16513_v30  ;;  %v11509_v8 = vunpack.i.l.bf16 %v16801_v14  ;;  %v19443_v30 = vld [vmem:[#allocation109_spill] sm:$0xff] }
 0x76c   :  { %19438 = vst [vmem:[#allocation111_spill] sm:$0xff] %v17065_v22  ;;  %v11626_v58 = vpack.i.bf16 %v19443_v30, %v19442_v16 }
 0x76d   :  { %v17068_v55 = vpop.permute.xlu0 %8077  ;;  %v17070_v61 = vpop.permute.xlu2 %11557 }
 0x76e   :  { %11018 = vmatmul.msk.f32.vlgmr.msra.gmra.mxu2 %vm1499_vm1, %v19439_v40  ;;  %11022 = vmatmul.msk.f32.vlgmr.msra.gmra.mxu1 %vm1499_vm1, %v16278_v12 }
 0x76f   :  { %11026 = vmatmul.msk.f32.vlgmr.msrb.gmra.mxu3 %vm1499_vm1, %v19440_v31  ;;  %7667 = vmatpush.msra.mxu2 %v11490_v37 }
 0x770   :  { %7733 = vmatpush.msra.mxu1 %v11500_v59  ;;  %7807 = vmatpush.msrb.mxu3 %v11510_v7  ;;  %v17112_v16 = vpop.permute.xlu1 %8373 }
 0x771   :  { %9519 = vrot.lane.b32.xlu1 %v15955_v33, %s12243_s1  ;;  %7668 = vmatpush.msra.mxu2 %v11489_v15  ;;  %v17087_v22 = vpop.f32.mrf.mxu2 }
 0x772   :  { %19441 = vst [vmem:[#allocation113_spill] sm:$0xff] %v17087_v22  ;;  %7734 = vmatpush.msra.mxu1 %v11499_v9  ;;  %7808 = vmatpush.msrb.mxu3 %v11509_v8  ;;  %v17091_v37 = vpop.f32.mrf.mxu3  ;;  %v11505_v9 = vunpack.i.h.bf16 %v16775_v32  ;;  %v19450_v22 = vld [vmem:[#allocation170_spill] sm:$0xff] }
 0x773   :  { %19444 = vst [vmem:[#allocation112_spill] sm:$0xff] %v17091_v37  ;;  %11627 = vrot.lane.b32.xlu0 %v11626_v58, %s12242_s21  ;;  %8630 = vrot.lane.b32.xlu2 %v19428_v53, %s12241_s18  ;;  %v17096_v14 = vpop.f32.mrf.mxu1 }
 0x774   :  { %19445 = vst [vmem:[#allocation114_spill] sm:$0xff] %v17096_v14  ;;  %v11504_v14 = vunpack.i.l.bf16 %v16775_v32  ;;  %v19455_v32 = vld [vmem:[#allocation118_spill] sm:$0xff] }
 0x775   :  { %v17098_v7 = vpop.permute.xlu0 %8114  ;;  %v17100_v33 = vpop.permute.xlu2 %11562 }
 0x776   :  { %11019 = vmatmul.msk.f32.gmra.mxu2 %vm1499_vm1, %v16248_v27  ;;  %11023 = vmatmul.msk.f32.gmra.mxu1 %vm1499_vm1, %v19446_v20 }
 0x777   :  { %11027 = vmatmul.msk.f32.gmra.mxu3 %vm1499_vm1, %v16342_v47  ;;  %v19451_v47 = vld [vmem:[#allocation174_spill] sm:$0xff] }
 0x779   :  { %9610 = vrot.lane.b32.xlu1 %v19426_v3, %s12243_s1  ;;  %v17110_v58 = vpop.f32.mrf.mxu2  ;;  %v11515_v3 = vunpack.i.h.bf16 %v16830_v6 }
 0x77a   :  { %19447 = vst [vmem:[#allocation72_spill] sm:$0xff] %v17110_v58  ;;  %v17114_v59 = vpop.f32.mrf.mxu3  ;;  %v11525_v58 = vunpack.i.h.bf16 %v16882_v50 }
 0x77b   :  { %19448 = vst [vmem:[#allocation110_spill] sm:$0xff] %v17114_v59  ;;  %8669 = vrot.lane.b32.xlu0 %v19446_v20, %s12241_s18  ;;  %8593 = vrot.lane.b32.xlu2 %v19439_v40, %s12241_s18  ;;  %v17120_v15 = vpop.f32.mrf.mxu1  ;;  %v11524_v20 = vunpack.i.l.bf16 %v16882_v50  ;;  %v19453_v59 = vld [vmem:[#allocation117_spill] sm:$0xff]  ;;  %v19456_v40 = vld [vmem:[#allocation120_spill] sm:$0xff] }
 0x77c   :  { %19449 = vst [vmem:[#allocation109_spill] sm:$0xff] %v17120_v15  ;;  %v11514_v15 = vunpack.i.l.bf16 %v16830_v6  ;;  %v11631_v46 = vpack.i.bf16 %v19456_v40, %v19455_v32  ;;  %v19461_v40 = vld [vmem:[#allocation116_spill] sm:$0xff] }
 0x77d   :  { %v17123_v8 = vpop.permute.xlu0 %8151  ;;  %v17125_v30 = vpop.permute.xlu2 %8225 }
 0x77e   :  { %11024 = vmatmul.msk.f32.vlgmr.msrb.gmra.mxu2 %vm1499_vm1, %v19450_v22  ;;  %11028 = vmatmul.msk.f32.vlgmr.msrb.gmra.mxu1 %vm1499_vm1, %v16356_v48  ;;  %v19454_v48 = vld [vmem:[#allocation119_spill] sm:$0xff] }
 0x77f   :  { %11032 = vmatmul.msk.f32.vlgmr.msra.gmra.mxu3 %vm1499_vm1, %v19451_v47  ;;  %7770 = vmatpush.msrb.mxu2 %v11505_v9  ;;  %v11636_v37 = vpack.i.bf16 %v19454_v48, %v19453_v59  ;;  %v19459_v48 = vld [vmem:[#allocation35_spill] sm:$0xff] }
 0x780   :  { %7844 = vmatpush.msrb.mxu1 %v11515_v3  ;;  %7918 = vmatpush.msra.mxu3 %v11525_v58 }
 0x781   :  { %9705 = vrot.lane.b32.xlu1 %v16248_v27, %s12243_s1  ;;  %7771 = vmatpush.msrb.mxu2 %v11504_v14  ;;  %v17140_v53 = vpop.f32.mrf.mxu2  ;;  %v17152_v27 = vpop.permute.xlu1 %8556 }
 0x782   :  { %19452 = vst [vmem:[#allocation170_spill] sm:$0xff] %v17140_v53  ;;  %7845 = vmatpush.msrb.mxu1 %v11514_v15  ;;  %7919 = vmatpush.msra.mxu3 %v11524_v20  ;;  %v17146_v9 = vpop.f32.mrf.mxu3  ;;  %v11520_v15 = vunpack.i.h.bf16 %v16855_v45 }
 0x783   :  { %19457 = vst [vmem:[#allocation174_spill] sm:$0xff] %v17146_v9  ;;  %11637 = vrot.lane.b32.xlu0 %v11636_v37, %s12242_s21  ;;  %11632 = vrot.lane.b32.xlu2 %v11631_v46, %s12242_s21  ;;  %v17150_v6 = vpop.f32.mrf.mxu1  ;;  %v19462_v37 = vld [vmem:[#allocation115_spill] sm:$0xff] }
 0x784   :  { %19458 = vst [vmem:[#allocation117_spill] sm:$0xff] %v17150_v6  ;;  %v11641_v20 = vpack.i.bf16 %v19462_v37, %v19461_v40  ;;  %v11540_v40 = vunpack.i.h.bf16 %v16961_v23  ;;  %v19465_v37 = vld [vmem:[#allocation44_spill] sm:$0xff]  ;;  %v11539_v6 = vunpack.i.l.bf16 %v16961_v23 }
 0x785   :  { %v17154_v50 = vpop.permute.xlu0 %8188  ;;  %v17156_v14 = vpop.permute.xlu2 %11572  ;;  %v19470_v23 = vld [vmem:[#allocation76_spill] sm:$0xff] }
 0x786   :  { %11025 = vmatmul.msk.f32.gmra.mxu2 %vm1499_vm1, %v16316_v42  ;;  %11029 = vmatmul.msk.f32.gmra.mxu1 %vm1499_vm1, %v19459_v48 }
 0x787   :  { %11033 = vmatmul.msk.f32.gmra.mxu3 %vm1499_vm1, %v16428_v43 }
 0x789   :  { %9796 = vrot.lane.b32.xlu1 %v19450_v22, %s12243_s1  ;;  %v17166_v46 = vpop.f32.mrf.mxu2  ;;  %v17182_v53 = vpop.permute.xlu1 %8521 }
 0x78a   :  { %19460 = vst [vmem:[#allocation119_spill] sm:$0xff] %v17166_v46  ;;  %v17170_v58 = vpop.f32.mrf.mxu3  ;;  %v11530_v46 = vunpack.i.h.bf16 %v16906_v60 }
 0x78b   :  { %19463 = vst [vmem:[#allocation118_spill] sm:$0xff] %v17170_v58  ;;  %11642 = vrot.lane.b32.xlu0 %v11641_v20, %s12242_s21  ;;  %8741 = vrot.lane.b32.xlu2 %v19440_v31, %s12241_s18  ;;  %v17175_v59 = vpop.f32.mrf.mxu1  ;;  %v11519_v20 = vunpack.i.l.bf16 %v16855_v45 }
 0x78c   :  { %19464 = vst [vmem:[#allocation120_spill] sm:$0xff] %v17175_v59  ;;  %v11529_v59 = vunpack.i.l.bf16 %v16906_v60 }
 0x78d   :  { %v17178_v3 = vpop.permute.xlu0 %11567  ;;  %v17180_v32 = vpop.permute.xlu2 %8297 }
 0x78e   :  { %11030 = vmatmul.msk.f32.vlgmr.msra.gmra.mxu2 %vm1499_vm1, %v19465_v37  ;;  %11034 = vmatmul.msk.f32.vlgmr.msra.gmra.mxu1 %vm1499_vm1, %v16440_v41 }
 0x78f   :  { %11038 = vmatmul.msk.f32.vlgmr.msrb.gmra.mxu3 %vm1499_vm1, %v16547_v4  ;;  %7881 = vmatpush.msra.mxu2 %v11520_v15 }
 0x790   :  { %7955 = vmatpush.msra.mxu1 %v11530_v46  ;;  %8029 = vmatpush.msrb.mxu3 %v11540_v40  ;;  %v19472_v46 = vld [vmem:[#allocation123_spill] sm:$0xff]  ;;  %v19474_v40 = vld [vmem:[#allocation124_spill] sm:$0xff] }
 0x791   :  { %9765 = vrot.lane.b32.xlu1 %v16278_v12, %s12243_s1  ;;  %7882 = vmatpush.msra.mxu2 %v11519_v20  ;;  %v17197_v58 = vpop.f32.mrf.mxu2  ;;  %v19469_v12 = vld [vmem:[#allocation173_spill] sm:$0xff] }
 0x792   :  { %19466 = vst [vmem:[#allocation116_spill] sm:$0xff] %v17197_v58  ;;  %7956 = vmatpush.msra.mxu1 %v11529_v59  ;;  %8030 = vmatpush.msrb.mxu3 %v11539_v6  ;;  %v17199_v9 = vpop.f32.mrf.mxu3  ;;  %v17217_v6 = vpop.permute.xlu1 %8484  ;;  %v19473_v59 = vld [vmem:[#allocation126_spill] sm:$0xff]  ;;  %v19475_v20 = vld [vmem:[#allocation125_spill] sm:$0xff] }
 0x793   :  { %19467 = vst [vmem:[#allocation115_spill] sm:$0xff] %v17199_v9  ;;  %8780 = vrot.lane.b32.xlu0 %v19459_v48, %s12241_s18  ;;  %8704 = vrot.lane.b32.xlu2 %v19450_v22, %s12241_s18  ;;  %v17205_v4 = vpop.f32.mrf.mxu1  ;;  %v11651_v15 = vpack.i.bf16 %v19473_v59, %v19472_v46  ;;  %v11535_v48 = vunpack.i.h.bf16 %v16936_v5  ;;  %v11555_v46 = vunpack.i.h.bf16 %v17043_v1  ;;  %v19478_v59 = vld [vmem:[#allocation102_spill] sm:$0xff] }
 0x794   :  { %19468 = vst [vmem:[#allocation44_spill] sm:$0xff] %v17205_v4  ;;  %v11646_v4 = vpack.i.bf16 %v19475_v20, %v19474_v40  ;;  %v19479_v40 = vld [vmem:[#allocation89_spill] sm:$0xff]  ;;  %v11544_v20 = vunpack.i.l.bf16 %v16990_v39 }
 0x795   :  { %v17207_v45 = vpop.permute.xlu0 %8262  ;;  %v17209_v60 = vpop.permute.xlu2 %8336 }
 0x796   :  { %11031 = vmatmul.msk.f32.gmra.mxu2 %vm1499_vm1, %v19469_v12  ;;  %11035 = vmatmul.msk.f32.gmra.mxu1 %vm1499_vm1, %v19470_v23 }
 0x797   :  { %11039 = vmatmul.msk.f32.gmra.mxu3 %vm1499_vm1, %v16853_v54 }
 0x799   :  { %9736 = vrot.lane.b32.xlu1 %v16268_v13, %s12243_s1  ;;  %v17221_v22 = vpop.f32.mrf.mxu2 }
 0x79a   :  { %19471 = vst [vmem:[#allocation173_spill] sm:$0xff] %v17221_v22  ;;  %v17227_v58 = vpop.f32.mrf.mxu3  ;;  %v11545_v22 = vunpack.i.h.bf16 %v16990_v39 }
 0x79b   :  { %19476 = vst [vmem:[#allocation76_spill] sm:$0xff] %v17227_v58  ;;  %11652 = vrot.lane.b32.xlu0 %v11651_v15, %s12242_s21  ;;  %11647 = vrot.lane.b32.xlu2 %v11646_v4, %s12242_s21  ;;  %v17231_v54 = vpop.f32.mrf.mxu1  ;;  %v11534_v4 = vunpack.i.l.bf16 %v16936_v5  ;;  %v19480_v15 = vld [vmem:[#allocation181_spill] sm:$0xff]  ;;  %v19482_v58 = vld [vmem:[#allocation122_spill] sm:$0xff]  ;;  %v17255_v5 = vpop.permute.xlu1 %8667 }
 0x79c   :  { %19477 = vst [vmem:[#allocation123_spill] sm:$0xff] %v17231_v54  ;;  %v11554_v54 = vunpack.i.l.bf16 %v17043_v1 }
 0x79d   :  { %v17234_v9 = vpop.permute.xlu0 %11582  ;;  %v17236_v13 = vpop.permute.xlu2 %8408 }
 0x79e   :  { %11036 = vmatmul.msk.f32.vlgmr.msrb.gmra.mxu2 %vm1499_vm1, %v19478_v59  ;;  %11040 = vmatmul.msk.f32.vlgmr.msrb.gmra.mxu1 %vm1499_vm1, %v19479_v40  ;;  %v19483_v40 = vld [vmem:[#allocation121_spill] sm:$0xff] }
 0x79f   :  { %11044 = vmatmul.msk.f32.vlgmr.msra.gmra.mxu3 %vm1499_vm1, %v19480_v15  ;;  %7992 = vmatpush.msrb.mxu2 %v11535_v48  ;;  %v11656_v42 = vpack.i.bf16 %v19483_v40, %v19482_v58  ;;  %v19488_v15 = vld [vmem:[#allocation184_spill] sm:$0xff]  ;;  %v11559_v40 = vunpack.i.l.bf16 %v17070_v61 }
 0x7a0   :  { %8066 = vmatpush.msrb.mxu1 %v11545_v22  ;;  %8140 = vmatpush.msra.mxu3 %v11555_v46  ;;  %v11569_v46 = vunpack.i.l.bf16 %v17178_v3 }
 0x7a1   :  { %9951 = vrot.lane.b32.xlu1 %v16440_v41, %s12243_s1  ;;  %7993 = vmatpush.msrb.mxu2 %v11534_v4  ;;  %v17251_v59 = vpop.f32.mrf.mxu2  ;;  %v19487_v4 = vld [vmem:[#allocation176_spill] sm:$0xff] }
 0x7a2   :  { %19481 = vst [vmem:[#allocation126_spill] sm:$0xff] %v17251_v59  ;;  %8067 = vmatpush.msrb.mxu1 %v11544_v20  ;;  %8141 = vmatpush.msra.mxu3 %v11554_v54  ;;  %v17257_v48 = vpop.f32.mrf.mxu3  ;;  %v11549_v20 = vunpack.i.l.bf16 %v17016_v11 }
 0x7a3   :  { %11657 = vrot.lane.b32.xlu0 %v11656_v42, %s12242_s21  ;;  %8852 = vrot.lane.b32.xlu2 %v19451_v47, %s12241_s18  ;;  %v17262_v39 = vpop.f32.mrf.mxu1  ;;  %v17286_v22 = vpop.permute.xlu1 %8632 }
 0x7a4   :  { %19484 = vst [vmem:[#allocation124_spill] sm:$0xff] %v17262_v39  ;;  %v11570_v39 = vunpack.i.h.bf16 %v17178_v3 }
 0x7a5   :  { %v17264_v41 = vpop.permute.xlu0 %8299  ;;  %v17266_v1 = vpop.permute.xlu2 %8371 }
 0x7a6   :  { %11037 = vmatmul.msk.f32.gmra.mxu2 %vm1499_vm1, %v16828_v0  ;;  %11041 = vmatmul.msk.f32.gmra.mxu1 %vm1499_vm1, %v16880_v29  ;;  %v11550_v29 = vunpack.i.h.bf16 %v17016_v11 }
 0x7a7   :  { %11045 = vmatmul.msk.f32.gmra.mxu3 %vm1499_vm1, %v16934_v57 }
 0x7a9   :  { %9922 = vrot.lane.b32.xlu1 %v16428_v43, %s12243_s1  ;;  %v17276_v42 = vpop.f32.mrf.mxu2  ;;  %v11560_v43 = vunpack.i.h.bf16 %v17070_v61 }
 0x7aa   :  { %19485 = vst [vmem:[#allocation125_spill] sm:$0xff] %v17276_v42  ;;  %v17278_v58 = vpop.f32.mrf.mxu3 }
 0x7ab   :  { %8891 = vrot.lane.b32.xlu0 %v19470_v23, %s12241_s18  ;;  %8815 = vrot.lane.b32.xlu2 %v19465_v37, %s12241_s18  ;;  %v17284_v0 = vpop.f32.mrf.mxu1  ;;  %v17318_v3 = vpop.permute.xlu1 %8595 }
 0x7ac   :  { %19486 = vst [vmem:[#allocation102_spill] sm:$0xff] %v17284_v0 }
 0x7ad   :  { %v17289_v57 = vpop.permute.xlu0 %11592  ;;  %v17291_v54 = vpop.permute.xlu2 %11602 }
 0x7ae   :  { %11042 = vmatmul.msk.f32.vlgmr.msra.gmra.mxu2 %vm1499_vm1, %v19487_v4  ;;  %11046 = vmatmul.msk.f32.vlgmr.msra.gmra.mxu1 %vm1499_vm1, %v19488_v15 }
 0x7af   :  { %11050 = vmatmul.msk.f32.vlgmr.msrb.gmra.mxu3 %vm1499_vm1, %v16683_v38  ;;  %8103 = vmatpush.msra.mxu2 %v11550_v29 }
 0x7b0   :  { %8177 = vmatpush.msra.mxu1 %v11560_v43  ;;  %8251 = vmatpush.msrb.mxu3 %v11569_v46  ;;  %v11585_v46 = vunpack.i.h.bf16 %v17234_v9 }
 0x7b1   :  { %9891 = vrot.lane.b32.xlu1 %v19469_v12, %s12243_s1  ;;  %8104 = vmatpush.msra.mxu2 %v11549_v20  ;;  %v17306_v4 = vpop.f32.mrf.mxu2 }
 0x7b2   :  { %19489 = vst [vmem:[#allocation89_spill] sm:$0xff] %v17306_v4  ;;  %8178 = vmatpush.msra.mxu1 %v11559_v40  ;;  %8252 = vmatpush.msrb.mxu3 %v11570_v39  ;;  %v17308_v15 = vpop.f32.mrf.mxu3  ;;  %v11574_v40 = vunpack.i.l.bf16 %v17156_v14 }
 0x7b3   :  { %9083 = vrot.lane.b32.xlu0 %v19259_v18, %s12243_s1  ;;  %8817 = vrot.lane.b32.xlu2 %v19469_v12, %s12241_s18  ;;  %v17314_v38 = vpop.f32.mrf.mxu1  ;;  %v19492_v12 = vld [vmem:[#allocation148_spill] sm:$0xff]  ;;  %v17350_v20 = vpop.permute.xlu1 %8778 }
 0x7b4   :  { %19490 = vst [vmem:[#allocation181_spill] sm:$0xff] %v17314_v38 }
 0x7b5   :  { %v11598_v11 = vpop.permute.xlu0 %11597  ;;  %v17316_v61 = vpop.permute.xlu2 %8519 }
 0x7b6   :  { %11043 = vmatmul.msk.f32.gmra.mxu2 %vm1499_vm1, %v16904_v28  ;;  %11047 = vmatmul.msk.f32.gmra.mxu1 %vm1499_vm1, %v16959_v34  ;;  %v11565_v28 = vunpack.i.h.bf16 %v17100_v33 }
 0x7b7   :  { %11051 = vmatmul.msk.f32.gmra.mxu3 %vm1499_vm1, %v17014_v25  ;;  %v11579_v25 = vunpack.i.l.bf16 %v16944_v2 }
 0x7b9   :  { %v17326_v18 = vpop.f32.mrf.mxu2 }
 0x7ba   :  { %19491 = vst [vmem:[#allocation122_spill] sm:$0xff] %v17326_v18  ;;  %v17328_v39 = vpop.f32.mrf.mxu3  ;;  %v19541_v18 = vld [vmem:[#allocation103_spill] sm:$0xff] }
 0x7bb   :  { %9054 = vrot.lane.b32.xlu0 %v19325_v49, %s12243_s1  ;;  %8990 = vrot.lane.b32.xlu2 %v19492_v12, %s12243_s1  ;;  %v17334_v29 = vpop.f32.mrf.mxu1  ;;  %v11564_v49 = vunpack.i.l.bf16 %v17100_v33  ;;  %v11584_v12 = vunpack.i.l.bf16 %v17234_v9 }
 0x7bc   :  { %19493 = vst [vmem:[#allocation121_spill] sm:$0xff] %v17334_v29 }
 0x7bd   :  { %v17337_v43 = vpop.permute.xlu0 %8447  ;;  %v17339_v34 = vpop.permute.xlu2 %8482 }
 0x7be   :  { %11048 = vmatmul.msk.f32.vlgmr.msrb.gmra.mxu2 %vm1499_vm1, %v16652_v51  ;;  %11052 = vmatmul.msk.f32.vlgmr.msrb.gmra.mxu1 %vm1499_vm1, %v16715_v24  ;;  %v19495_v51 = vld [vmem:[#allocation168_spill] sm:$0xff] }
 0x7bf   :  { %11056 = vmatmul.msk.f32.vlgmr.msra.gmra.mxu3 %vm1499_vm1, %v16779_v56  ;;  %8214 = vmatpush.msrb.mxu2 %v11565_v28 }
 0x7c0   :  { %8288 = vmatpush.msrb.mxu1 %v11585_v46  ;;  %8362 = vmatpush.msra.mxu3 %v11579_v25  ;;  %v19498_v46 = vld [vmem:[#allocation73_spill] sm:$0xff] }
 0x7c1   :  { %8215 = vmatpush.msrb.mxu2 %v11564_v49  ;;  %v17354_v29 = vpop.f32.mrf.mxu2 }
 0x7c2   :  { %19494 = vst [vmem:[#allocation176_spill] sm:$0xff] %v17354_v29  ;;  %8289 = vmatpush.msrb.mxu1 %v11574_v40  ;;  %8363 = vmatpush.msra.mxu3 %v11584_v12  ;;  %v17356_v24 = vpop.f32.mrf.mxu3  ;;  %v11599_v12 = vunpack.i.l.bf16 %v11598_v11 }
 0x7c3   :  { %9023 = vrot.lane.b32.xlu0 %v19321_v19, %s12243_s1  ;;  %9085 = vrot.lane.b32.xlu2 %v19495_v51, %s12243_s1  ;;  %v17362_v56 = vpop.f32.mrf.mxu1  ;;  %v17376_v19 = vpop.permute.xlu1 %8743  ;;  %v19500_v51 = vld [vmem:[#allocation152_spill] sm:$0xff] }
 0x7c4   :  { %19496 = vst [vmem:[#allocation184_spill] sm:$0xff] %v17362_v56 }
 0x7c5   :  { %v17364_v33 = vpop.permute.xlu0 %11607  ;;  %v17366_v9 = vpop.permute.xlu2 %11617 }
 0x7c6   :  { %11049 = vmatmul.msk.f32.gmra.mxu2 %vm1499_vm1, %v16988_v21  ;;  %11053 = vmatmul.msk.f32.gmra.mxu1 %vm1499_vm1, %v17041_v36  ;;  %v11575_v21 = vunpack.i.h.bf16 %v17156_v14  ;;  %v11600_v14 = vunpack.i.h.bf16 %v11598_v11 }
 0x7c7   :  { %11057 = vmatmul.msk.f32.gmra.mxu3 %vm1499_vm1, %v17098_v7  ;;  %v11590_v7 = vunpack.i.h.bf16 %v17011_v17 }
 0x7c9   :  { %v17374_v28 = vpop.f32.mrf.mxu2 }
 0x7ca   :  { %19497 = vst [vmem:[#allocation148_spill] sm:$0xff] %v17374_v28  ;;  %v17378_v25 = vpop.f32.mrf.mxu3  ;;  %v19501_v28 = vld [vmem:[#allocation91_spill] sm:$0xff] }
 0x7cb   :  { %9114 = vrot.lane.b32.xlu0 %v19498_v46, %s12243_s1  ;;  %9176 = vrot.lane.b32.xlu2 %v19267_v62, %s12243_s1  ;;  %v17384_v49 = vpop.f32.mrf.mxu1  ;;  %v11580_v46 = vunpack.i.h.bf16 %v16944_v2  ;;  %v11595_v62 = vunpack.i.h.bf16 %v17289_v57  ;;  %v19504_v2 = vld [vmem:[#allocation142_spill] sm:$0xff] }
 0x7cc   :  { %19499 = vst [vmem:[#allocation168_spill] sm:$0xff] %v17384_v49  ;;  %v19510_v49 = vld [vmem:[#allocation92_spill] sm:$0xff] }
 0x7cd   :  { %v11613_v36 = vpop.permute.xlu0 %11612  ;;  %v17387_v40 = vpop.permute.xlu2 %8630 }
 0x7ce   :  { %11054 = vmatmul.msk.f32.vlgmr.msra.gmra.mxu2 %vm1499_vm1, %v16743_v35  ;;  %11058 = vmatmul.msk.f32.vlgmr.msra.gmra.mxu1 %vm1499_vm1, %v19500_v51  ;;  %v19503_v51 = vld [vmem:[#allocation56_spill] sm:$0xff] }
 0x7cf   :  { %11062 = vmatmul.msk.f32.vlgmr.msrb.gmra.mxu3 %vm1499_vm1, %v19501_v28  ;;  %8325 = vmatpush.msra.mxu2 %v11575_v21  ;;  %v17408_v21 = vpop.permute.xlu1 %8706 }
 0x7d0   :  { %8399 = vmatpush.msra.mxu1 %v11599_v12  ;;  %8473 = vmatpush.msrb.mxu3 %v11590_v7 }
 0x7d1   :  { %8326 = vmatpush.msra.mxu2 %v11580_v46  ;;  %v17398_v56 = vpop.f32.mrf.mxu2 }
 0x7d2   :  { %19502 = vst [vmem:[#allocation73_spill] sm:$0xff] %v17398_v56  ;;  %8400 = vmatpush.msra.mxu1 %v11600_v14  ;;  %8474 = vmatpush.msrb.mxu3 %v11595_v62  ;;  %v17400_v35 = vpop.f32.mrf.mxu3  ;;  %v19507_v62 = vld [vmem:[#allocation43_spill] sm:$0xff]  ;;  %v19508_v14 = vld [vmem:[#allocation40_spill] sm:$0xff] }
 0x7d3   :  { %9209 = vrot.lane.b32.xlu0 %v19503_v51, %s12243_s1  ;;  %9145 = vrot.lane.b32.xlu2 %v19504_v2, %s12243_s1  ;;  %v17406_v28 = vpop.f32.mrf.mxu1 }
 0x7d4   :  { %19505 = vst [vmem:[#allocation152_spill] sm:$0xff] %v17406_v28 }
 0x7d5   :  { %v17410_v11 = vpop.permute.xlu0 %8558  ;;  %v17412_v7 = vpop.permute.xlu2 %8593 }
 0x7d6   :  { %11055 = vmatmul.msk.f32.gmra.mxu2 %vm1499_vm1, %v17068_v55  ;;  %11059 = vmatmul.msk.f32.gmra.mxu1 %vm1499_vm1, %v17123_v8  ;;  %v11589_v55 = vunpack.i.l.bf16 %v17011_v17  ;;  %v11610_v17 = vunpack.i.h.bf16 %v17364_v33 }
 0x7d7   :  { %11063 = vmatmul.msk.f32.gmra.mxu3 %vm1499_vm1, %v17125_v30  ;;  %v17435_v28 = vpop.permute.xlu1 %8889  ;;  %v11605_v30 = vunpack.i.h.bf16 %v17291_v54 }
 0x7d9   :  { %v17420_v12 = vpop.f32.mrf.mxu2 }
 0x7da   :  { %19506 = vst [vmem:[#allocation91_spill] sm:$0xff] %v17420_v12  ;;  %v17422_v46 = vpop.f32.mrf.mxu3  ;;  %v11614_v12 = vunpack.i.l.bf16 %v11613_v36 }
 0x7db   :  { %9300 = vrot.lane.b32.xlu0 %v19507_v62, %s12243_s1  ;;  %9116 = vrot.lane.b32.xlu2 %v19508_v14, %s12243_s1  ;;  %v17428_v51 = vpop.f32.mrf.mxu1  ;;  %v19511_v62 = vld [vmem:[#allocation101_spill] sm:$0xff]  ;;  %v11594_v14 = vunpack.i.l.bf16 %v17289_v57  ;;  %v19513_v57 = vld [vmem:[#allocation128_spill] sm:$0xff] }
 0x7dc   :  { %19509 = vst [vmem:[#allocation56_spill] sm:$0xff] %v17428_v51  ;;  %v11615_v51 = vunpack.i.h.bf16 %v11613_v36 }
 0x7dd   :  { %v17431_v2 = vpop.permute.xlu0 %11622  ;;  %v17433_v8 = vpop.permute.xlu2 %11632 }
 0x7de   :  { %11060 = vmatmul.msk.f32.vlgmr.msrb.gmra.mxu2 %vm1499_vm1, %v19510_v49  ;;  %11064 = vmatmul.msk.f32.vlgmr.msrb.gmra.mxu1 %vm1499_vm1, %v19511_v62  ;;  %v19512_v62 = vld [vmem:[#allocation144_spill] sm:$0xff] }
 0x7df   :  { %11068 = vmatmul.msk.f32.vlgmr.msra.gmra.mxu3 %vm1499_vm1, %v16982_v10  ;;  %8436 = vmatpush.msrb.mxu2 %v11589_v55  ;;  %v17464_v36 = vpop.permute.xlu1 %8854 }
 0x7e0   :  { %8510 = vmatpush.msrb.mxu1 %v11614_v12  ;;  %8584 = vmatpush.msra.mxu3 %v11605_v30  ;;  %v19515_v30 = vld [vmem:[#allocation65_spill] sm:$0xff] }
 0x7e1   :  { %8437 = vmatpush.msrb.mxu2 %v11594_v14  ;;  %v17446_v29 = vpop.f32.mrf.mxu2  ;;  %v19516_v14 = vld [vmem:[#allocation20_spill] sm:$0xff] }
 0x7e2   :  { %8511 = vmatpush.msrb.mxu1 %v11615_v51  ;;  %8585 = vmatpush.msra.mxu3 %v11610_v17  ;;  %v17448_v49 = vpop.f32.mrf.mxu3 }
 0x7e3   :  { %9269 = vrot.lane.b32.xlu0 %v19512_v62, %s12243_s1  ;;  %9331 = vrot.lane.b32.xlu2 %v19513_v57, %s12243_s1  ;;  %v17454_v10 = vpop.f32.mrf.mxu1 }
 0x7e4   :  { %19514 = vst [vmem:[#allocation142_spill] sm:$0xff] %v17454_v10 }
 0x7e5   :  { %v11628_v55 = vpop.permute.xlu0 %11627  ;;  %v17456_v56 = vpop.permute.xlu2 %8741 }
 0x7e6   :  { %11061 = vmatmul.msk.f32.gmra.mxu2 %vm1499_vm1, %v17154_v50  ;;  %11065 = vmatmul.msk.f32.gmra.mxu1 %vm1499_vm1, %v17207_v45  ;;  %v11604_v50 = vunpack.i.l.bf16 %v17291_v54  ;;  %v11629_v57 = vunpack.i.l.bf16 %v11628_v55  ;;  %v11625_v54 = vunpack.i.h.bf16 %v17431_v2 }
 0x7e7   :  { %11069 = vmatmul.msk.f32.gmra.mxu3 %vm1499_vm1, %v17209_v60  ;;  %v11620_v60 = vunpack.i.h.bf16 %v17366_v9 }
 0x7e9   :  { %v17466_v12 = vpop.f32.mrf.mxu2 }
 0x7ea   :  { %v17468_v51 = vpop.f32.mrf.mxu3 }
 0x7eb   :  { %9240 = vrot.lane.b32.xlu0 %v19515_v30, %s12243_s1  ;;  %9302 = vrot.lane.b32.xlu2 %v19516_v14, %s12243_s1  ;;  %v17474_v17 = vpop.f32.mrf.mxu1  ;;  %v11609_v30 = vunpack.i.l.bf16 %v17364_v33  ;;  %v11630_v14 = vunpack.i.h.bf16 %v11628_v55 }
 0x7ec   :  { %19517 = vst [vmem:[#allocation43_spill] sm:$0xff] %v17474_v17  ;;  %v17492_v17 = vpop.permute.xlu1 %9052 }
 0x7ed   :  { %v17477_v45 = vpop.permute.xlu0 %8669  ;;  %v17479_v62 = vpop.permute.xlu2 %8704 }
 0x7ee   :  { %11066 = vmatmul.msk.f32.vlgmr.msra.gmra.mxu2 %vm1499_vm1, %v17180_v32  ;;  %11070 = vmatmul.msk.f32.vlgmr.msra.gmra.mxu1 %vm1499_vm1, %v17266_v1  ;;  %v19518_v1 = vld [vmem:[#allocation161_spill] sm:$0xff] }
 0x7ef   :  { %11074 = vmatmul.msk.f32.vlgmr.msrb.gmra.mxu3 %vm1499_vm1, %v17045_v44  ;;  %8547 = vmatpush.msra.mxu2 %v11604_v50  ;;  %v19519_v44 = vld [vmem:[#allocation34_spill] sm:$0xff] }
 0x7f0   :  { %8621 = vmatpush.msra.mxu1 %v11629_v57  ;;  %8695 = vmatpush.msrb.mxu3 %v11620_v60 }
 0x7f1   :  { %8548 = vmatpush.msra.mxu2 %v11609_v30  ;;  %v17490_v10 = vpop.f32.mrf.mxu2  ;;  %v19521_v30 = vld [vmem:[#allocation164_spill] sm:$0xff] }
 0x7f2   :  { %8622 = vmatpush.msra.mxu1 %v11630_v14  ;;  %8696 = vmatpush.msrb.mxu3 %v11625_v54  ;;  %v17494_v32 = vpop.f32.mrf.mxu3  ;;  %v19522_v54 = vld [vmem:[#allocation96_spill] sm:$0xff] }
 0x7f3   :  { %9455 = vrot.lane.b32.xlu0 %v19518_v1, %s12243_s1  ;;  %9271 = vrot.lane.b32.xlu2 %v19519_v44, %s12243_s1  ;;  %v17500_v33 = vpop.f32.mrf.mxu1 }
 0x7f4   :  { %19520 = vst [vmem:[#allocation40_spill] sm:$0xff] %v17500_v33  ;;  %v17520_v1 = vpop.permute.xlu1 %9021 }
 0x7f5   :  { %v11638_v55 = vpop.permute.xlu0 %11637  ;;  %v17502_v50 = vpop.permute.xlu2 %11647 }
 0x7f6   :  { %11067 = vmatmul.msk.f32.gmra.mxu2 %vm1499_vm1, %v17264_v41  ;;  %11071 = vmatmul.msk.f32.gmra.mxu1 %vm1499_vm1, %v17112_v16  ;;  %v11619_v41 = vunpack.i.l.bf16 %v17366_v9 }
 0x7f7   :  { %11075 = vmatmul.msk.f32.gmra.mxu3 %vm1499_vm1, %v17337_v43  ;;  %v11635_v43 = vunpack.i.h.bf16 %v17433_v8 }
 0x7f9   :  { %v17510_v60 = vpop.f32.mrf.mxu2 }
 0x7fa   :  { %v17512_v57 = vpop.f32.mrf.mxu3 }
 0x7fb   :  { %9426 = vrot.lane.b32.xlu0 %v19521_v30, %s12243_s1  ;;  %9362 = vrot.lane.b32.xlu2 %v19522_v54, %s12243_s1  ;;  %v17518_v14 = vpop.f32.mrf.mxu1  ;;  %v11624_v30 = vunpack.i.l.bf16 %v17431_v2  ;;  %v11640_v54 = vunpack.i.h.bf16 %v11638_v55 }
 0x7fc   :  { %19523 = vst [vmem:[#allocation92_spill] sm:$0xff] %v17518_v14 }
 0x7fd   :  { %v11643_v16 = vpop.permute.xlu0 %11642  ;;  %v17523_v44 = vpop.permute.xlu2 %8852 }
 0x7fe   :  { %v11644_v33 = vunpack.i.l.bf16 %v11643_v16  ;;  %11072 = vmatmul.msk.f32.vlgmr.msrb.gmra.mxu2 %vm1499_vm1, %v17236_v13  ;;  %11076 = vmatmul.msk.f32.vlgmr.msrb.gmra.mxu1 %vm1499_vm1, %v17339_v34  ;;  %v11645_v9 = vunpack.i.h.bf16 %v11643_v16  ;;  %v19524_v13 = vld [vmem:[#allocation48_spill] sm:$0xff]  ;;  %v19525_v34 = vld [vmem:[#allocation162_spill] sm:$0xff] }
 0x7ff   :  { %11080 = vmatmul.msk.f32.vlgmr.msra.gmra.mxu3 %vm1499_vm1, %v17152_v27  ;;  %8658 = vmatpush.msrb.mxu2 %v11619_v41 }
 0x800   :  { %8806 = vmatpush.msra.mxu3 %v11635_v43  ;;  %8732 = vmatpush.msrb.mxu1 %v11644_v33  ;;  %v8993_v33 = vpop.permute.xlu1 %8992 }
 0x801   :  { %8659 = vmatpush.msrb.mxu2 %v11624_v30  ;;  %v17533_v14 = vpop.f32.mrf.mxu2  ;;  %v19527_v30 = vld [vmem:[#allocation149_spill] sm:$0xff] }
 0x802   :  { %8807 = vmatpush.msra.mxu3 %v11640_v54  ;;  %v17535_v38 = vpop.f32.mrf.mxu3  ;;  %8733 = vmatpush.msrb.mxu1 %v11645_v9  ;;  %v19528_v54 = vld [vmem:[#allocation136_spill] sm:$0xff] }
 0x803   :  { %9395 = vrot.lane.b32.xlu0 %v19524_v13, %s12243_s1  ;;  %9457 = vrot.lane.b32.xlu2 %v19525_v34, %s12243_s1  ;;  %v17541_v2 = vpop.f32.mrf.mxu1 }
 0x804   :  { %19526 = vst [vmem:[#allocation101_spill] sm:$0xff] %v17541_v2 }
 0x805   :  { %v17543_v27 = vpop.permute.xlu0 %8780  ;;  %v17545_v41 = vpop.permute.xlu2 %8815 }
 0x806   :  { %11073 = vmatmul.msk.f32.gmra.mxu2 %vm1499_vm1, %v17082_v63  ;;  %11077 = vmatmul.msk.f32.gmra.mxu1 %vm1499_vm1, %v17217_v6  ;;  %v11634_v63 = vunpack.i.l.bf16 %v17433_v8  ;;  %v11650_v6 = vunpack.i.h.bf16 %v17502_v50 }
 0x807   :  { %11081 = vmatmul.msk.f32.gmra.mxu3 %vm1499_vm1, %v17410_v11 }
 0x809   :  { %v17553_v16 = vpop.f32.mrf.mxu2 }
 0x80a   :  { %v17555_v43 = vpop.f32.mrf.mxu3 }
 0x80b   :  { %9486 = vrot.lane.b32.xlu0 %v19527_v30, %s12243_s1  ;;  %9548 = vrot.lane.b32.xlu2 %v19528_v54, %s12243_s1  ;;  %v17561_v9 = vpop.f32.mrf.mxu1  ;;  %v11639_v30 = vunpack.i.l.bf16 %v11638_v55  ;;  %v17573_v54 = vpop.permute.xlu1 %9207 }
 0x80c   :  { %19529 = vst [vmem:[#allocation144_spill] sm:$0xff] %v17561_v9  ;;  %v19533_v9 = vld [vmem:[#allocation52_spill] sm:$0xff] }
 0x80d   :  { %v11653_v13 = vpop.permute.xlu0 %11652  ;;  %v17564_v34 = vpop.permute.xlu2 %8817 }
 0x80e   :  { %v11655_v11 = vunpack.i.h.bf16 %v11653_v13  ;;  %11078 = vmatmul.msk.f32.vlgmr.msra.gmra.mxu2 %vm1499_vm1, %v17316_v61  ;;  %11082 = vmatmul.msk.f32.vlgmr.msra.gmra.mxu1 %vm1499_vm1, %v17412_v7  ;;  %v19530_v61 = vld [vmem:[#allocation135_spill] sm:$0xff] }
 0x80f   :  { %11086 = vmatmul.msk.f32.vlgmr.msrb.gmra.mxu3 %vm1499_vm1, %v17255_v5  ;;  %8769 = vmatpush.msra.mxu2 %v11634_v63  ;;  %v19532_v63 = vld [vmem:[#allocation131_spill] sm:$0xff] }
 0x810   :  { %8917 = vmatpush.msrb.mxu3 %v11650_v6  ;;  %v1058_v0 = vadd.f32 %v19533_v9, %v19532_v63 }
 0x811   :  { %8770 = vmatpush.msra.mxu2 %v11639_v30  ;;  %v17575_v8 = vpop.f32.mrf.mxu2 }
 0x812   :  { %8918 = vmatpush.msrb.mxu3 %v11655_v11  ;;  %v17577_v2 = vpop.f32.mrf.mxu3 }
 0x813   :  { %9581 = vrot.lane.b32.xlu0 %v19411_v26, %s12243_s1  ;;  %9517 = vrot.lane.b32.xlu2 %v19530_v61, %s12243_s1  ;;  %v17583_v7 = vpop.f32.mrf.mxu1  ;;  %v19534_v26 = vld [vmem:[#allocation50_spill] sm:$0xff]  ;;  %v17598_v9 = vpop.permute.xlu1 %9178 }
 0x814   :  { %19531 = vst [vmem:[#allocation128_spill] sm:$0xff] %v17583_v7  ;;  %v1055_v11 = vadd.f32 %v19534_v26, %v19532_v63  ;;  %v19540_v7 = vld [vmem:[#allocation147_spill] sm:$0xff] }
 0x815   :  { %v11658_v55 = vpop.permute.xlu0 %11657  ;;  %v8991_v5 = vpop.permute.xlu2 %8990 }
 0x816   :  { %v11659_v6 = vunpack.i.l.bf16 %v11658_v55  ;;  %11079 = vmatmul.msk.f32.gmra.mxu2 %vm1499_vm1, %v17182_v53  ;;  %11083 = vmatmul.msk.f32.gmra.mxu1 %vm1499_vm1, %v17318_v3  ;;  %v11660_v30 = vunpack.i.h.bf16 %v11658_v55  ;;  %v19535_v3 = vld [vmem:[#allocation165_spill] sm:$0xff]  ;;  %v11649_v55 = vunpack.i.l.bf16 %v17502_v50  ;;  %v19539_v50 = vld [vmem:[#allocation127_spill] sm:$0xff] }
 0x817   :  { %11087 = vmatmul.msk.f32.gmra.mxu3 %vm1499_vm1, %v17477_v45  ;;  %11100 = vmatmul.msk.f32.vlgmr.msra.gmra.mxu0 %vm1499_vm1, %v8991_v5 }
 0x818   :  { %9260 = vmatpush.msra.mxu0 %v1058_v0  ;;  %8843 = vmatpush.msra.mxu1 %v11659_v6  ;;  %v19537_v6 = vld [vmem:[#allocation21_spill] sm:$0xff] }
 0x819   :  { %v17596_v61 = vpop.f32.mrf.mxu2  ;;  %v1016_v26 = vadd.f32 %v19537_v6, %v19532_v63  ;;  %v6714_v6 = vadd.f32 %v19541_v18, %v19540_v7 }
 0x81a   :  { %9261 = vmatpush.msra.mxu0 %v1055_v11  ;;  %v17600_v53 = vpop.f32.mrf.mxu3  ;;  %8844 = vmatpush.msra.mxu1 %v11660_v30  ;;  %v11654_v30 = vunpack.i.l.bf16 %v11653_v13 }
 0x81b   :  { %9672 = vrot.lane.b32.xlu0 %v16200_v52, %s12243_s1  ;;  %9488 = vrot.lane.b32.xlu2 %v19535_v3, %s12243_s1  ;;  %v17606_v45 = vpop.f32.mrf.mxu1  ;;  %v19538_v52 = vld [vmem:[#allocation29_spill] sm:$0xff]  ;;  %v1013_v3 = vadd.f32 %v19539_v50, %v19532_v63  ;;  %v17638_v18 = vpop.permute.xlu1 %9147 }
 0x81c   :  { %19536 = vst [vmem:[#allocation65_spill] sm:$0xff] %v17606_v45  ;;  %v1028_v11 = vadd.f32 %v19538_v52, %v19532_v63  ;;  %v19557_v45 = vld [vmem:[#allocation24_spill] sm:$0xff] }
 0x81d   :  { %v17609_v0 = vpop.permute.xlu0 %8891  ;;  %v17611_v5 = vpop.permute.xlu2 %9085 }
 0x81e   :  { %11084 = vmatmul.msk.f32.vlgmr.msrb.gmra.mxu2 %vm1499_vm1, %v17387_v40  ;;  %11088 = vmatmul.msk.f32.vlgmr.msrb.gmra.mxu1 %vm1499_vm1, %v17479_v62  ;;  %v19542_v40 = vld [vmem:[#allocation27_spill] sm:$0xff] }
 0x81f   :  { %11092 = vmatmul.msk.f32.vlgmr.msra.gmra.mxu3 %vm1499_vm1, %v17350_v20  ;;  %8880 = vmatpush.msrb.mxu2 %v11649_v55  ;;  %v1025_v62 = vadd.f32 %v19542_v40, %v19532_v63  ;;  %v19543_v55 = vld [vmem:[#allocation156_spill] sm:$0xff] }
 0x820   :  { %11101 = vmatmul.msk.f32.gmra.mxu0 %vm1499_vm1, %v8993_v33  ;;  %9043 = vmatpush.msrb.mxu1 %v1016_v26  ;;  %v19545_v33 = vld [vmem:[#allocation158_spill] sm:$0xff] }
 0x821   :  { %9105 = vmatpush.msra.mxu3 %v1028_v11  ;;  %8881 = vmatpush.msrb.mxu2 %v11654_v30  ;;  %v7773_v52 = vpop.f32.mrf.mxu2  ;;  %v19546_v11 = vld [vmem:[#allocation75_spill] sm:$0xff]  ;;  %v19547_v30 = vld [vmem:[#allocation208_spill] sm:$0xff] }
 0x822   :  { %9044 = vmatpush.msrb.mxu1 %v1013_v3  ;;  %v17630_v13 = vadd.f32 %v7773_v52, %v6714_v6  ;;  %v17632_v20 = vpop.f32.mrf.mxu3  ;;  %v6717_v3 = vadd.f32 %v19547_v30, %v19546_v11  ;;  %v19548_v52 = vld [vmem:[#allocation66_spill] sm:$0xff]  ;;  %v19552_v11 = vld [vmem:[#allocation32_spill] sm:$0xff] }
 0x823   :  { %9106 = vmatpush.msra.mxu3 %v1025_v62  ;;  %9641 = vrot.lane.b32.xlu0 %v19543_v55, %s12243_s1  ;;  %v17636_v50 = vpop.f32.mrf.mxu1  ;;  %v1040_v30 = vadd.f32 %v19552_v11, %v19532_v63 }
 0x824   :  { %19544 = vst [vmem:[#allocation20_spill] sm:$0xff] %v17636_v50  ;;  %9703 = vrot.lane.b32.xlu2 %v19545_v33, %s12243_s1  ;;  %v17672_v50 = vpop.permute.xlu1 %9238 }
 0x825   :  { %v9084_v7 = vpop.permute.xlu0 %9083  ;;  %v17642_v26 = vpop.permute.xlu2 %9176 }
 0x826   :  { %11085 = vmatmul.msk.f32.gmra.mxu2 %vm1499_vm1, %v17286_v22  ;;  %11089 = vmatmul.msk.f32.gmra.mxu1 %vm1499_vm1, %v17408_v21  ;;  %v19550_v22 = vld [vmem:[#allocation153_spill] sm:$0xff] }
 0x827   :  { %11093 = vmatmul.msk.f32.gmra.mxu3 %vm1499_vm1, %v17543_v27  ;;  %v19551_v21 = vld [vmem:[#allocation25_spill] sm:$0xff] }
 0x828   :  { %v1022_v33 = vadd.f32 %v19551_v21, %v19532_v63  ;;  %v19555_v21 = vld [vmem:[#allocation31_spill] sm:$0xff] }
 0x829   :  { %v7776_v6 = vpop.f32.mrf.mxu2  ;;  %v1037_v11 = vadd.f32 %v19555_v21, %v19532_v63 }
 0x82a   :  { %v17652_v40 = vadd.f32 %v7776_v6, %v6717_v3  ;;  %v17654_v62 = vpop.f32.mrf.mxu3  ;;  %v19553_v3 = vld [vmem:[#allocation129_spill] sm:$0xff] }
 0x82b   :  { %9612 = vrot.lane.b32.xlu0 %v19548_v52, %s12243_s1  ;;  %v17658_v55 = vpop.f32.mrf.mxu1  ;;  %v1052_v6 = vadd.f32 %v19553_v3, %v19532_v63  ;;  %v19554_v52 = vld [vmem:[#allocation23_spill] sm:$0xff]  ;;  %v19556_v3 = vld [vmem:[#allocation45_spill] sm:$0xff] }
 0x82c   :  { %19549 = vst [vmem:[#allocation161_spill] sm:$0xff] %v17658_v55  ;;  %9674 = vrot.lane.b32.xlu2 %v19550_v22, %s12243_s1  ;;  %v1019_v22 = vadd.f32 %v19554_v52, %v19532_v63  ;;  %v1049_v42 = vadd.f32 %v19556_v3, %v19532_v63  ;;  %v19558_v55 = vld [vmem:[#allocation112_spill] sm:$0xff] }
 0x82d   :  { %v17664_v27 = vpop.permute.xlu0 %9054  ;;  %v17666_v4 = vpop.permute.xlu2 %9145  ;;  %v6813_v59 = vadd.f32 %v19558_v55, %v19557_v45 }
 0x82e   :  { %11090 = vmatmul.msk.f32.vlgmr.msra.gmra.mxu2 %vm1499_vm1, %v17456_v56  ;;  %11094 = vmatmul.msk.f32.vlgmr.msra.gmra.mxu1 %vm1499_vm1, %v17545_v41 }
 0x82f   :  { %11098 = vmatmul.msk.f32.vlgmr.msrb.gmra.mxu3 %vm1499_vm1, %v17435_v28  ;;  %9074 = vmatpush.msra.mxu2 %v1022_v33  ;;  %v19561_v33 = vld [vmem:[#allocation26_spill] sm:$0xff] }
 0x830   :  { %9167 = vmatpush.msra.mxu1 %v1040_v30  ;;  %9229 = vmatpush.msrb.mxu3 %v1052_v6 }
 0x831   :  { %9075 = vmatpush.msra.mxu2 %v1019_v22  ;;  %v7884_v56 = vpop.f32.mrf.mxu2 }
 0x832   :  { %9168 = vmatpush.msra.mxu1 %v1037_v11  ;;  %9230 = vmatpush.msrb.mxu3 %v1049_v42  ;;  %v17688_v41 = vadd.f32 %v7884_v56, %v6813_v59  ;;  %v17690_v52 = vpop.f32.mrf.mxu3  ;;  %v19562_v59 = vld [vmem:[#allocation88_spill] sm:$0xff]  ;;  %v19563_v42 = vld [vmem:[#allocation110_spill] sm:$0xff]  ;;  %v19566_v11 = vld [vmem:[#allocation171_spill] sm:$0xff] }
 0x833   :  { %19559 = vst [vmem:[#allocation34_spill] sm:$0xff] %v17690_v52  ;;  %9827 = vrot.lane.b32.xlu0 %v19440_v31, %s12243_s1  ;;  %v17694_v28 = vpop.f32.mrf.mxu1  ;;  %v6816_v55 = vadd.f32 %v19563_v42, %v19562_v59  ;;  %v17706_v31 = vpop.permute.xlu1 %9333  ;;  %v19569_v56 = vld [vmem:[#allocation39_spill] sm:$0xff]  ;;  %v19570_v59 = vld [vmem:[#allocation137_spill] sm:$0xff]  ;;  %v19576_v52 = vld [vmem:[#allocation174_spill] sm:$0xff] }
 0x834   :  { %19560 = vst [vmem:[#allocation164_spill] sm:$0xff] %v17694_v28  ;;  %9643 = vrot.lane.b32.xlu2 %v19561_v33, %s12243_s1  ;;  %v1046_v33 = vadd.f32 %v19569_v56, %v19532_v63  ;;  %v1064_v42 = vadd.f32 %v19570_v59, %v19532_v63  ;;  %v19573_v56 = vld [vmem:[#allocation36_spill] sm:$0xff]  ;;  %v19574_v59 = vld [vmem:[#allocation53_spill] sm:$0xff] }
 0x835   :  { %v9024_v21 = vpop.permute.xlu0 %9023  ;;  %v9117_v45 = vpop.permute.xlu2 %9116  ;;  %v1061_v28 = vadd.f32 %v19574_v59, %v19532_v63 }
 0x836   :  { %11091 = vmatmul.msk.f32.gmra.mxu2 %vm1499_vm1, %v17376_v19  ;;  %11095 = vmatmul.msk.f32.gmra.mxu1 %vm1499_vm1, %v17564_v34  ;;  %v19568_v34 = vld [vmem:[#allocation159_spill] sm:$0xff] }
 0x837   :  { %11099 = vmatmul.msk.f32.gmra.mxu3 %vm1499_vm1, %v17609_v0 }
 0x839   :  { %v7887_v30 = vpop.f32.mrf.mxu2 }
 0x83a   :  { %v17708_v6 = vadd.f32 %v7887_v30, %v6816_v55  ;;  %v17710_v22 = vpop.f32.mrf.mxu3  ;;  %v19571_v55 = vld [vmem:[#allocation64_spill] sm:$0xff] }
 0x83b   :  { %19565 = vst [vmem:[#allocation48_spill] sm:$0xff] %v17710_v22  ;;  %9798 = vrot.lane.b32.xlu0 %v19566_v11, %s12243_s1  ;;  %v17714_v19 = vpop.f32.mrf.mxu1  ;;  %v1076_v30 = vadd.f32 %v19571_v55, %v19532_v63  ;;  %v19572_v11 = vld [vmem:[#allocation69_spill] sm:$0xff]  ;;  %v1043_v22 = vadd.f32 %v19573_v56, %v19532_v63 }
 0x83c   :  { %19564 = vst [vmem:[#allocation96_spill] sm:$0xff] %v17708_v6  ;;  %9734 = vrot.lane.b32.xlu2 %v19568_v34, %s12243_s1  ;;  %v1082_v34 = vadd.f32 %v19572_v11, %v19532_v63  ;;  %v19578_v11 = vld [vmem:[#allocation141_spill] sm:$0xff] }
 0x83d   :  { %19567 = vst [vmem:[#allocation162_spill] sm:$0xff] %v17714_v19  ;;  %v9115_v3 = vpop.permute.xlu0 %9114  ;;  %v17718_v0 = vpop.permute.xlu2 %9331  ;;  %v1079_v19 = vadd.f32 %v19578_v11, %v19532_v63 }
 0x83e   :  { %11096 = vmatmul.msk.f32.vlgmr.msrb.gmra.mxu2 %vm1499_vm1, %v17523_v44  ;;  %11102 = vmatmul.msk.f32.vlgmr.msrb.gmra.mxu1 %vm1499_vm1, %v17520_v1  ;;  %v19575_v44 = vld [vmem:[#allocation166_spill] sm:$0xff]  ;;  %v19577_v1 = vld [vmem:[#allocation140_spill] sm:$0xff] }
 0x83f   :  { %11106 = vmatmul.msk.f32.vlgmr.msra.gmra.mxu3 %vm1499_vm1, %v9084_v7  ;;  %11108 = vmatmul.msk.f32.vlgmr.msrb.gmra.mxu0 %vm1499_vm1, %v9115_v3  ;;  %v6912_v6 = vadd.f32 %v19576_v52, %v19575_v44  ;;  %v1073_v55 = vadd.f32 %v19577_v1, %v19532_v63  ;;  %v17744_v3 = vpop.permute.xlu1 %9424 }
 0x840   :  { %9198 = vmatpush.msrb.mxu2 %v1046_v33  ;;  %9291 = vmatpush.msrb.mxu1 %v1064_v42  ;;  %v19580_v33 = vld [vmem:[#allocation68_spill] sm:$0xff]  ;;  %v19581_v42 = vld [vmem:[#allocation22_spill] sm:$0xff] }
 0x841   :  { %9353 = vmatpush.msra.mxu3 %v1076_v30  ;;  %9384 = vmatpush.msrb.mxu0 %v1082_v34  ;;  %v7995_v7 = vpop.f32.mrf.mxu2 }
 0x842   :  { %9199 = vmatpush.msrb.mxu2 %v1043_v22  ;;  %9292 = vmatpush.msrb.mxu1 %v1061_v28  ;;  %v17746_v56 = vadd.f32 %v7995_v7, %v6912_v6  ;;  %v17748_v59 = vpop.f32.mrf.mxu3  ;;  %v19582_v28 = vld [vmem:[#allocation177_spill] sm:$0xff]  ;;  %v19583_v6 = vld [vmem:[#allocation118_spill] sm:$0xff] }
 0x843   :  { %19579 = vst [vmem:[#allocation149_spill] sm:$0xff] %v17748_v59  ;;  %9354 = vmatpush.msra.mxu3 %v1073_v55  ;;  %9385 = vmatpush.msrb.mxu0 %v1079_v19  ;;  %v17750_v52 = vpop.f32.mrf.mxu1  ;;  %v6915_v22 = vadd.f32 %v19583_v6, %v19582_v28  ;;  %v19589_v28 = vld [vmem:[#allocation145_spill] sm:$0xff]  ;;  %v19596_v59 = vld [vmem:[#allocation84_spill] sm:$0xff] }
 0x844   :  { %9767 = vrot.lane.b32.xlu0 %v19580_v33, %s12243_s1  ;;  %9829 = vrot.lane.b32.xlu2 %v19581_v42, %s12243_s1  ;;  %v19588_v33 = vld [vmem:[#allocation19_spill] sm:$0xff]  ;;  %v1100_v6 = vadd.f32 %v19589_v28, %v19532_v63 }
 0x845   :  { %v9210_v30 = vpop.permute.xlu0 %9209  ;;  %v17756_v34 = vpop.permute.xlu2 %9302  ;;  %v1088_v42 = vadd.f32 %v19588_v33, %v19532_v63  ;;  %v19593_v33 = vld [vmem:[#allocation180_spill] sm:$0xff]  ;;  %v19595_v28 = vld [vmem:[#allocation79_spill] sm:$0xff] }
 0x846   :  { %11097 = vmatmul.msk.f32.gmra.mxu2 %vm1499_vm1, %v17464_v36  ;;  %11103 = vmatmul.msk.f32.gmra.mxu1 %vm1499_vm1, %v9024_v21  ;;  %v19586_v36 = vld [vmem:[#allocation30_spill] sm:$0xff] }
 0x847   :  { %11107 = vmatmul.msk.f32.gmra.mxu3 %vm1499_vm1, %v17611_v5  ;;  %11109 = vmatmul.msk.f32.gmra.mxu0 %vm1499_vm1, %v9117_v45  ;;  %v17772_v11 = vpop.permute.xlu1 %9393  ;;  %v19587_v45 = vld [vmem:[#allocation60_spill] sm:$0xff] }
 0x848   :  { %v1070_v7 = vadd.f32 %v19587_v45, %v19532_v63 }
 0x849   :  { %v7998_v19 = vpop.f32.mrf.mxu2 }
 0x84a   :  { %v17766_v44 = vadd.f32 %v7998_v19, %v6915_v22  ;;  %v17768_v1 = vpop.f32.mrf.mxu3  ;;  %v19591_v19 = vld [vmem:[#allocation138_spill] sm:$0xff] }
 0x84b   :  { %19585 = vst [vmem:[#allocation135_spill] sm:$0xff] %v17768_v1  ;;  %v17770_v55 = vpop.f32.mrf.mxu1 }
 0x84c   :  { %19584 = vst [vmem:[#allocation136_spill] sm:$0xff] %v17766_v44  ;;  %9858 = vrot.lane.b32.xlu0 %v19586_v36, %s12243_s1  ;;  %9920 = vrot.lane.b32.xlu2 %v19451_v47, %s12243_s1  ;;  %v19590_v47 = vld [vmem:[#allocation86_spill] sm:$0xff]  ;;  %v1067_v36 = vadd.f32 %v19591_v19, %v19532_v63 }
 0x84d   :  { %v17778_v5 = vpop.permute.xlu0 %9300  ;;  %v17780_v21 = vpop.permute.xlu2 %9271  ;;  %v1106_v22 = vadd.f32 %v19590_v47, %v19532_v63  ;;  %v1097_v47 = vadd.f32 %v19595_v28, %v19532_v63 }
 0x84e   :  { %11104 = vmatmul.msk.f32.vlgmr.msra.gmra.mxu2 %vm1499_vm1, %v17492_v17  ;;  %11110 = vmatmul.msk.f32.vlgmr.msra.gmra.mxu1 %vm1499_vm1, %v17666_v4  ;;  %v19592_v17 = vld [vmem:[#allocation143_spill] sm:$0xff] }
 0x84f   :  { %11114 = vmatmul.msk.f32.vlgmr.msrb.gmra.mxu3 %vm1499_vm1, %v17573_v54  ;;  %11116 = vmatmul.msk.f32.vlgmr.msra.gmra.mxu0 %vm1499_vm1, %v17672_v50  ;;  %v1085_v45 = vadd.f32 %v19592_v17, %v19532_v63  ;;  %v19594_v4 = vld [vmem:[#allocation115_spill] sm:$0xff]  ;;  %v1103_v54 = vadd.f32 %v19596_v59, %v19532_v63 }
 0x850   :  { %v7011_v1 = vadd.f32 %v19594_v4, %v19593_v33  ;;  %9322 = vmatpush.msra.mxu2 %v1070_v7  ;;  %9415 = vmatpush.msra.mxu1 %v1088_v42  ;;  %v9365_v42 = vpop.permute.xlu1 %9364  ;;  %v19600_v33 = vld [vmem:[#allocation35_spill] sm:$0xff] }
 0x851   :  { %9477 = vmatpush.msrb.mxu3 %v1100_v6  ;;  %9508 = vmatpush.msra.mxu0 %v1106_v22  ;;  %v8106_v50 = vpop.f32.mrf.mxu2  ;;  %v19598_v6 = vld [vmem:[#allocation76_spill] sm:$0xff] }
 0x852   :  { %9323 = vmatpush.msra.mxu2 %v1067_v36  ;;  %9416 = vmatpush.msra.mxu1 %v1085_v45  ;;  %v17808_v19 = vadd.f32 %v8106_v50, %v7011_v1  ;;  %v17810_v44 = vpop.f32.mrf.mxu3  ;;  %v19597_v1 = vld [vmem:[#allocation183_spill] sm:$0xff] }
 0x853   :  { %9478 = vmatpush.msrb.mxu3 %v1097_v47  ;;  %9509 = vmatpush.msra.mxu0 %v1103_v54  ;;  %v17812_v17 = vpop.f32.mrf.mxu1  ;;  %v7014_v22 = vadd.f32 %v19598_v6, %v19597_v1  ;;  %v19603_v54 = vld [vmem:[#allocation163_spill] sm:$0xff]  ;;  %v19604_v1 = vld [vmem:[#allocation74_spill] sm:$0xff] }
 0x854   :  { %9953 = vrot.lane.b32.xlu0 %v19470_v23, %s12243_s1  ;;  %9889 = vrot.lane.b32.xlu2 %v19465_v37, %s12243_s1  ;;  %v1124_v50 = vadd.f32 %v19603_v54, %v19532_v63  ;;  %v1091_v6 = vadd.f32 %v19604_v1, %v19532_v63 }
 0x855   :  { %v9270_v59 = vpop.permute.xlu0 %9269  ;;  %v9363_v7 = vpop.permute.xlu2 %9362 }
 0x856   :  { %11105 = vmatmul.msk.f32.gmra.mxu2 %vm1499_vm1, %v17664_v27  ;;  %11111 = vmatmul.msk.f32.gmra.mxu1 %vm1499_vm1, %v17638_v18  ;;  %v19601_v18 = vld [vmem:[#allocation77_spill] sm:$0xff] }
 0x857   :  { %11115 = vmatmul.msk.f32.gmra.mxu3 %vm1499_vm1, %v9210_v30  ;;  %v1094_v28 = vadd.f32 %v19601_v18, %v19532_v63  ;;  %v19602_v30 = vld [vmem:[#allocation150_spill] sm:$0xff] }
 0x858   :  { %v1112_v47 = vadd.f32 %v19602_v30, %v19532_v63 }
 0x859   :  { %v8109_v36 = vpop.f32.mrf.mxu2 }
 0x85a   :  { %v17825_v45 = vadd.f32 %v8109_v36, %v7014_v22  ;;  %v17827_v23 = vpop.f32.mrf.mxu3  ;;  %v19605_v22 = vld [vmem:[#allocation28_spill] sm:$0xff] }
 0x85b   :  { %v17829_v37 = vpop.f32.mrf.mxu1  ;;  %v1109_v36 = vadd.f32 %v19605_v22, %v19532_v63 }
 0x85c   :  { %19599 = vst [vmem:[#allocation131_spill] sm:$0xff] %v17829_v37  ;;  %9860 = vrot.lane.b32.xlu2 %v19600_v33, %s12243_s1  ;;  %v19606_v33 = vld [vmem:[#allocation186_spill] sm:$0xff] }
 0x85d   :  { %v9241_v4 = vpop.permute.xlu0 %9240  ;;  %v17833_v27 = vpop.permute.xlu2 %9457  ;;  %v7110_v18 = vadd.f32 %v17257_v48, %v19606_v33 }
 0x85e   :  { %11112 = vmatmul.msk.f32.vlgmr.msrb.gmra.mxu2 %vm1499_vm1, %v17642_v26  ;;  %11117 = vmatmul.msk.f32.gmra.mxu0 %vm1499_vm1, %v9241_v4  ;;  %v17853_v26 = vpop.permute.xlu1 %9579  ;;  %v19607_v4 = vld [vmem:[#allocation160_spill] sm:$0xff] }
 0x85f   :  { %11118 = vmatmul.msk.f32.vlgmr.msrb.gmra.mxu1 %vm1499_vm1, %v9270_v59  ;;  %11122 = vmatmul.msk.f32.vlgmr.msra.gmra.mxu3 %vm1499_vm1, %v17718_v0  ;;  %v1121_v30 = vadd.f32 %v19607_v4, %v19532_v63 }
 0x860   :  { %9446 = vmatpush.msrb.mxu2 %v1094_v28  ;;  %9539 = vmatpush.msrb.mxu1 %v1112_v47  ;;  %v19609_v28 = vld [vmem:[#allocation58_spill] sm:$0xff] }
 0x861   :  { %9601 = vmatpush.msra.mxu3 %v1124_v50  ;;  %v8217_v59 = vpop.f32.mrf.mxu2  ;;  %v1130_v47 = vadd.f32 %v19609_v28, %v19532_v63  ;;  %v19610_v50 = vld [vmem:[#allocation42_spill] sm:$0xff] }
 0x862   :  { %9447 = vmatpush.msrb.mxu2 %v1091_v6  ;;  %9540 = vmatpush.msrb.mxu1 %v1109_v36  ;;  %v17857_v0 = vadd.f32 %v8217_v59, %v7110_v18  ;;  %v17859_v54 = vpop.f32.mrf.mxu3  ;;  %v1127_v6 = vadd.f32 %v19610_v50, %v19532_v63  ;;  %v19611_v36 = vld [vmem:[#allocation190_spill] sm:$0xff]  ;;  %v19613_v59 = vld [vmem:[#allocation155_spill] sm:$0xff] }
 0x863   :  { %9602 = vmatpush.msra.mxu3 %v1121_v30  ;;  %v17861_v1 = vpop.f32.mrf.mxu1  ;;  %v7113_v33 = vadd.f32 %v17278_v58, %v19611_v36  ;;  %v1118_v28 = vadd.f32 %v19613_v59, %v19532_v63  ;;  %v19614_v50 = vld [vmem:[#allocation134_spill] sm:$0xff]  ;;  %v19616_v36 = vld [vmem:[#allocation93_spill] sm:$0xff] }
 0x864   :  { %19608 = vst [vmem:[#allocation52_spill] sm:$0xff] %v17861_v1  ;;  %v1136_v58 = vadd.f32 %v19614_v50, %v19532_v63  ;;  %v19618_v50 = vld [vmem:[#allocation192_spill] sm:$0xff] }
 0x865   :  { %v9456_v22 = vpop.permute.xlu0 %9455  ;;  %v17863_v48 = vpop.permute.xlu2 %9548  ;;  %v7209_v1 = vadd.f32 %v17308_v15, %v19618_v50  ;;  %v19621_v15 = vld [vmem:[#allocation196_spill] sm:$0xff] }
 0x866   :  { %11113 = vmatmul.msk.f32.gmra.mxu2 %vm1499_vm1, %v17598_v9  ;;  %11124 = vmatmul.msk.f32.vlgmr.msrb.gmra.mxu0 %vm1499_vm1, %v9363_v7  ;;  %v17878_v4 = vpop.permute.xlu1 %9550 }
 0x867   :  { %11119 = vmatmul.msk.f32.gmra.mxu1 %vm1499_vm1, %v17780_v21  ;;  %11123 = vmatmul.msk.f32.gmra.mxu3 %vm1499_vm1, %v17706_v31 }
 0x868   :  { %9632 = vmatpush.msrb.mxu0 %v1130_v47  ;;  %v19615_v47 = vld [vmem:[#allocation154_spill] sm:$0xff] }
 0x869   :  { %v8220_v18 = vpop.f32.mrf.mxu2 }
 0x86a   :  { %9633 = vmatpush.msrb.mxu0 %v1127_v6  ;;  %v17880_v9 = vadd.f32 %v8220_v18, %v7113_v33  ;;  %v17882_v7 = vpop.f32.mrf.mxu3  ;;  %v1148_v6 = vadd.f32 %v19615_v47, %v19532_v63  ;;  %v1115_v33 = vadd.f32 %v19616_v36, %v19532_v63  ;;  %v19617_v18 = vld [vmem:[#allocation133_spill] sm:$0xff] }
 0x86b   :  { %19612 = vst [vmem:[#allocation50_spill] sm:$0xff] %v17882_v7  ;;  %v17884_v30 = vpop.f32.mrf.mxu1  ;;  %v1133_v59 = vadd.f32 %v19617_v18, %v19532_v63 }
 0x86d   :  { %v17886_v21 = vpop.permute.xlu0 %9426  ;;  %v9518_v31 = vpop.permute.xlu2 %9517 }
 0x86e   :  { %11120 = vmatmul.msk.f32.vlgmr.msra.gmra.mxu2 %vm1499_vm1, %v17778_v5  ;;  %11125 = vmatmul.msk.f32.gmra.mxu0 %vm1499_vm1, %v9365_v42  ;;  %v19619_v5 = vld [vmem:[#allocation57_spill] sm:$0xff]  ;;  %v9520_v18 = vpop.permute.xlu1 %9519 }
 0x86f   :  { %11126 = vmatmul.msk.f32.vlgmr.msra.gmra.mxu1 %vm1499_vm1, %v17772_v11  ;;  %11130 = vmatmul.msk.f32.vlgmr.msrb.gmra.mxu3 %vm1499_vm1, %v9456_v22  ;;  %v1145_v42 = vadd.f32 %v19619_v5, %v19532_v63 }
 0x870   :  { %9570 = vmatpush.msra.mxu2 %v1118_v28  ;;  %9663 = vmatpush.msra.mxu1 %v1136_v58  ;;  %v19622_v58 = vld [vmem:[#allocation63_spill] sm:$0xff] }
 0x871   :  { %9725 = vmatpush.msrb.mxu3 %v1148_v6  ;;  %v8328_v47 = vpop.f32.mrf.mxu2  ;;  %v7374_v6 = vadd.f32 %v17446_v29, %v19622_v58 }
 0x872   :  { %9571 = vmatpush.msra.mxu2 %v1115_v33  ;;  %9664 = vmatpush.msra.mxu1 %v1133_v59  ;;  %v17908_v11 = vadd.f32 %v8328_v47, %v7209_v1  ;;  %v17910_v22 = vpop.f32.mrf.mxu3  ;;  %v7212_v1 = vadd.f32 %v17328_v39, %v19621_v15  ;;  %v19626_v39 = vld [vmem:[#allocation81_spill] sm:$0xff] }
 0x873   :  { %9726 = vmatpush.msrb.mxu3 %v1145_v42  ;;  %v17912_v36 = vpop.f32.mrf.mxu1  ;;  %v1160_v29 = vadd.f32 %v19626_v39, %v19532_v63  ;;  %v19627_v15 = vld [vmem:[#allocation41_spill] sm:$0xff] }
 0x874   :  { %19620 = vst [vmem:[#allocation165_spill] sm:$0xff] %v17912_v36 }
 0x875   :  { %v9396_v7 = vpop.permute.xlu0 %9395  ;;  %v9489_v37 = vpop.permute.xlu2 %9488 }
 0x876   :  { %11121 = vmatmul.msk.f32.gmra.mxu2 %vm1499_vm1, %v17756_v34  ;;  %v9611_v36 = vpop.permute.xlu1 %9610 }
 0x877   :  { %11127 = vmatmul.msk.f32.gmra.mxu1 %vm1499_vm1, %v9396_v7  ;;  %11131 = vmatmul.msk.f32.gmra.mxu3 %vm1499_vm1, %v17833_v27  ;;  %v19624_v7 = vld [vmem:[#allocation167_spill] sm:$0xff] }
 0x878   :  { %v1142_v42 = vadd.f32 %v19624_v7, %v19532_v63  ;;  %v19625_v27 = vld [vmem:[#allocation67_spill] sm:$0xff] }
 0x879   :  { %v8331_v28 = vpop.f32.mrf.mxu2  ;;  %v1154_v47 = vadd.f32 %v19625_v27, %v19532_v63  ;;  %v19631_v27 = vld [vmem:[#allocation71_spill] sm:$0xff] }
 0x87a   :  { %v17923_v33 = vadd.f32 %v8331_v28, %v7212_v1  ;;  %v17925_v59 = vpop.f32.mrf.mxu3  ;;  %v1172_v1 = vadd.f32 %v19627_v15, %v19532_v63  ;;  %v19628_v28 = vld [vmem:[#allocation151_spill] sm:$0xff]  ;;  %v1157_v39 = vadd.f32 %v19631_v27, %v19532_v63 }
 0x87b   :  { %v8513_v50 = vpop.f32.mrf.mxu1  ;;  %v1139_v58 = vadd.f32 %v19628_v28, %v19532_v63 }
 0x87c   :  { %v17927_v5 = vadd.f32 %v8513_v50, %v7374_v6  ;;  %v19629_v6 = vld [vmem:[#allocation62_spill] sm:$0xff] }
 0x87d   :  { %v9487_v34 = vpop.permute.xlu0 %9486  ;;  %v1151_v50 = vadd.f32 %v19629_v6, %v19532_v63 }
 0x87e   :  { %19623 = vst [vmem:[#allocation21_spill] sm:$0xff] %v17927_v5  ;;  %11128 = vmatmul.msk.f32.vlgmr.msrb.gmra.mxu2 %vm1499_vm1, %v17744_v3  ;;  %11132 = vmatmul.msk.f32.vlgmr.msra.gmra.mxu0 %vm1499_vm1, %v9487_v34  ;;  %v19630_v3 = vld [vmem:[#allocation198_spill] sm:$0xff]  ;;  %v9704_v7 = vpop.permute.xlu2 %9703  ;;  %v19633_v5 = vld [vmem:[#allocation199_spill] sm:$0xff] }
 0x87f   :  { %11134 = vmatmul.msk.f32.vlgmr.msrb.gmra.mxu1 %vm1499_vm1, %v9518_v31  ;;  %11138 = vmatmul.msk.f32.vlgmr.msra.gmra.mxu3 %vm1499_vm1, %v17853_v26  ;;  %v7308_v34 = vadd.f32 %v17356_v24, %v19630_v3  ;;  %v19632_v31 = vld [vmem:[#allocation82_spill] sm:$0xff]  ;;  %v7377_v28 = vadd.f32 %v17466_v12, %v19633_v5  ;;  %v19634_v12 = vld [vmem:[#allocation80_spill] sm:$0xff] }
 0x880   :  { %9694 = vmatpush.msrb.mxu2 %v1142_v42  ;;  %9756 = vmatpush.msra.mxu0 %v1154_v47  ;;  %v1169_v15 = vadd.f32 %v19632_v31, %v19532_v63  ;;  %v7311_v5 = vadd.f32 %v17378_v25, %v19634_v12  ;;  %v19638_v25 = vld [vmem:[#allocation49_spill] sm:$0xff]  ;;  %v19641_v12 = vld [vmem:[#allocation172_spill] sm:$0xff] }
 0x881   :  { %9787 = vmatpush.msrb.mxu1 %v1160_v29  ;;  %9849 = vmatpush.msra.mxu3 %v1172_v1  ;;  %v8439_v26 = vpop.f32.mrf.mxu2  ;;  %v9706_v29 = vpop.permute.xlu1 %9705 }
 0x882   :  { %9695 = vmatpush.msrb.mxu2 %v1139_v58  ;;  %9757 = vmatpush.msra.mxu0 %v1151_v50  ;;  %v17955_v6 = vadd.f32 %v8439_v26, %v7308_v34  ;;  %v17957_v24 = vpop.f32.mrf.mxu3  ;;  %v19635_v58 = vld [vmem:[#allocation85_spill] sm:$0xff]  ;;  %v1178_v26 = vadd.f32 %v19638_v25, %v19532_v63 }
 0x883   :  { %9788 = vmatpush.msrb.mxu1 %v1157_v39  ;;  %9850 = vmatpush.msra.mxu3 %v1169_v15  ;;  %v8516_v42 = vpop.f32.mrf.mxu1  ;;  %v7473_v50 = vadd.f32 %v17490_v10, %v19635_v58  ;;  %v19640_v10 = vld [vmem:[#allocation37_spill] sm:$0xff] }
 0x884   :  { %v17959_v47 = vadd.f32 %v8516_v42, %v7377_v28  ;;  %v19639_v28 = vld [vmem:[#allocation38_spill] sm:$0xff] }
 0x885   :  { %v9582_v3 = vpop.permute.xlu0 %9581  ;;  %v1196_v42 = vadd.f32 %v19639_v28, %v19532_v63 }
 0x886   :  { %11129 = vmatmul.msk.f32.gmra.mxu2 %vm1499_vm1, %v17886_v21  ;;  %11133 = vmatmul.msk.f32.gmra.mxu0 %vm1499_vm1, %v9489_v37  ;;  %v17970_v34 = vpop.permute.xlu2 %9674 }
 0x887   :  { %11135 = vmatmul.msk.f32.gmra.mxu1 %vm1499_vm1, %v9520_v18  ;;  %11139 = vmatmul.msk.f32.gmra.mxu3 %vm1499_vm1, %v9582_v3  ;;  %v19637_v18 = vld [vmem:[#allocation169_spill] sm:$0xff]  ;;  %v1163_v3 = vadd.f32 %v19640_v10, %v19532_v63 }
 0x888   :  { %v1166_v31 = vadd.f32 %v19637_v18, %v19532_v63 }
 0x889   :  { %v8442_v1 = vpop.f32.mrf.mxu2  ;;  %v17998_v25 = vpop.permute.xlu1 %9796 }
 0x88a   :  { %v17972_v27 = vadd.f32 %v8442_v1, %v7311_v5  ;;  %v17974_v39 = vpop.f32.mrf.mxu3  ;;  %v1175_v5 = vadd.f32 %v19641_v12, %v19532_v63  ;;  %v19642_v1 = vld [vmem:[#allocation87_spill] sm:$0xff] }
 0x88b   :  { %19636 = vst [vmem:[#allocation29_spill] sm:$0xff] %v17974_v39  ;;  %v8624_v21 = vpop.f32.mrf.mxu1  ;;  %v1193_v58 = vadd.f32 %v19642_v1, %v19532_v63  ;;  %v19647_v1 = vld [vmem:[#allocation54_spill] sm:$0xff] }
 0x88c   :  { %v17976_v37 = vadd.f32 %v8624_v21, %v7473_v50  ;;  %v19643_v50 = vld [vmem:[#allocation200_spill] sm:$0xff] }
 0x88d   :  { %v9673_v15 = vpop.permute.xlu0 %9672  ;;  %v7407_v21 = vadd.f32 %v17400_v35, %v19643_v50  ;;  %v11984_v50 = vld [vmem:[#allocation2] sm:$0xff] }
 0x88e   :  { %11136 = vmatmul.msk.f32.vlgmr.msra.gmra.mxu2 %vm1499_vm1, %v17863_v48  ;;  %11140 = vmatmul.msk.f32.vlgmr.msrb.gmra.mxu0 %vm1499_vm1, %v9611_v36  ;;  %v19644_v36 = vld [vmem:[#allocation202_spill] sm:$0xff]  ;;  %v9644_v10 = vpop.permute.xlu2 %9643 }
 0x88f   :  { %11146 = vmatmul.msk.f32.vlgmr.msrb.gmra.mxu3 %vm1499_vm1, %v9704_v7  ;;  %9818 = vmatpush.msra.mxu2 %v1166_v31  ;;  %v7476_v18 = vadd.f32 %v17510_v60, %v19644_v36  ;;  %v18012_v60 = vld [vmem:[%s18451_s7] ss:$0 sm:$0xff] }
 0x890   :  { %9880 = vmatpush.msrb.mxu0 %v1178_v26  ;;  %9973 = vmatpush.msrb.mxu3 %v1196_v42  ;;  %v19646_v26 = vld [vmem:[#allocation61_spill] sm:$0xff] }
 0x891   :  { %9819 = vmatpush.msra.mxu2 %v1163_v3  ;;  %v8550_v48 = vpop.f32.mrf.mxu2  ;;  %v1184_v42 = vadd.f32 %v19646_v26, %v19532_v63 }
 0x892   :  { %9881 = vmatpush.msrb.mxu0 %v1175_v5  ;;  %9974 = vmatpush.msrb.mxu3 %v1193_v58  ;;  %v18000_v7 = vadd.f32 %v8550_v48, %v7407_v21  ;;  %v18002_v31 = vpop.f32.mrf.mxu3  ;;  %v1181_v58 = vadd.f32 %v19647_v1, %v19532_v63  ;;  %v19648_v48 = vld [vmem:[#allocation83_spill] sm:$0xff] }
 0x893   :  { %19645 = vst [vmem:[#allocation127_spill] sm:$0xff] %v18002_v31  ;;  %v8627_v28 = vpop.f32.mrf.mxu1  ;;  %v7410_v36 = vadd.f32 %v17422_v46, %v19648_v48 }
 0x894   :  { %v18004_v12 = vadd.f32 %v8627_v28, %v7476_v18  ;;  %v9015_v35 = vpop.f32.mrf.mxu0  ;;  %v19649_v28 = vld [vmem:[#allocation132_spill] sm:$0xff] }
 0x895   :  { %v9982_v3 = vadd.f32 %v9015_v35, %v17630_v13  ;;  %v9642_v5 = vpop.permute.xlu0 %9641  ;;  %v18022_v13 = vld [vmem:[%s18452_s8] ss:$0 sm:$0xff]  ;;  %v7572_v35 = vadd.f32 %v17533_v14, %v19649_v28  ;;  %v11985_v28 = vld [vmem:[#allocation2 + $0x8] sm:$0xff] }
 0x896   :  { %11137 = vmatmul.msk.f32.gmra.mxu2 %vm1499_vm1, %v17878_v4  ;;  %11142 = vmatmul.msk.f32.vlgmr.msra.gmra.mxu1 %vm1499_vm1, %v9642_v5  ;;  %v9735_v48 = vpop.permute.xlu2 %9734  ;;  %v19651_v14 = vld [vmem:[#allocation70_spill] sm:$0xff] }
 0x897   :  { %v10046_v21 = vadd.f32 %v11984_v50, %v9982_v3  ;;  %11147 = vmatmul.msk.f32.gmra.mxu3 %vm1499_vm1, %v9706_v29  ;;  %9911 = vmatpush.msra.mxu1 %v1184_v42  ;;  %v9766_v50 = vpop.permute.xlu1 %9765 }
 0x899   :  { %v10114_v4 = vmul.f32 %v18012_v60, %v10046_v21  ;;  %9912 = vmatpush.msra.mxu1 %v1181_v58  ;;  %v8553_v18 = vpop.f32.mrf.mxu2  ;;  %v19650_v21 = vld [vmem:[#allocation94_spill] sm:$0xff] }
 0x89a   :  { %v18030_v26 = vadd.f32 %v8553_v18, %v7410_v36  ;;  %v18032_v3 = vpop.f32.mrf.mxu3  ;;  %v1190_v58 = vadd.f32 %v19650_v21, %v19532_v63  ;;  %v1187_v36 = vadd.f32 %v19651_v14, %v19532_v63 }
 0x89b   :  { %v10182_v5 = vadd.f32 %v18022_v13, %v10114_v4  ;;  %v8735_v1 = vpop.f32.mrf.mxu1  ;;  %v19652_v4 = vld [vmem:[#allocation203_spill] sm:$0xff] }
 0x89c   :  { %v18035_v29 = vadd.f32 %v8735_v1, %v7572_v35  ;;  %v7506_v18 = vadd.f32 %v17448_v49, %v19652_v4  ;;  %v19653_v1 = vld [vmem:[#allocation97_spill] sm:$0xff]  ;;  %v19655_v4 = vld [vmem:[#allocation206_spill] sm:$0xff] }
 0x89d   :  { %v10246_v42 = vmax.f32 %v10182_v5, 0.0  ;;  %v9018_v39 = vpop.f32.mrf.mxu0  ;;  %v9613_v46 = vpop.permute.xlu0 %9612 }
 0x89e   :  { %v9983_v31 = vadd.f32 %v9018_v39, %v17652_v40  ;;  %11141 = vmatmul.msk.f32.gmra.mxu0 %vm1499_vm1, %v9613_v46  ;;  %11143 = vmatmul.msk.f32.gmra.mxu1 %vm1499_vm1, %v9644_v10  ;;  %v7575_v40 = vadd.f32 %v17553_v16, %v19653_v1  ;;  %v19654_v16 = vld [vmem:[#allocation204_spill] sm:$0xff]  ;;  %v9830_v14 = vpop.permute.xlu2 %9829 }
 0x89f   :  { %10310 = vst.msk [vmem:[#allocation13] sm:$0xff] %vm587_vm0, %v10246_v42  ;;  %11144 = vmatmul.msk.f32.vlgmr.msrb.gmra.mxu2 %vm1499_vm1, %v9673_v15 }
 0x8a0   :  { %v10047_v35 = vadd.f32 %v11985_v28, %v9983_v31  ;;  %9942 = vmatpush.msrb.mxu2 %v1190_v58  ;;  %v9737_v31 = vpop.permute.xlu1 %9736  ;;  %v7509_v58 = vadd.f32 %v17468_v51, %v19654_v16  ;;  %v19656_v51 = vld [vmem:[#allocation205_spill] sm:$0xff] }
 0x8a1   :  { %v8661_v5 = vpop.f32.mrf.mxu2 }
 0x8a2   :  { %v10115_v39 = vmul.f32 %v18012_v60, %v10047_v35  ;;  %9943 = vmatpush.msrb.mxu2 %v1187_v36  ;;  %v18051_v10 = vadd.f32 %v8661_v5, %v7506_v18  ;;  %v18053_v42 = vpop.f32.mrf.mxu3  ;;  %v7671_v18 = vadd.f32 %v17575_v8, %v19655_v4  ;;  %v7605_v5 = vadd.f32 %v17494_v32, %v19656_v51  ;;  %v19660_v32 = vld [vmem:[#allocation111_spill] sm:$0xff]  ;;  %v19663_v4 = vld [vmem:[#allocation109_spill] sm:$0xff] }
 0x8a3   :  { %v8738_v15 = vpop.f32.mrf.mxu1 }
 0x8a4   :  { %v10183_v63 = vadd.f32 %v18022_v13, %v10115_v39  ;;  %v18056_v46 = vadd.f32 %v8738_v15, %v7575_v40  ;;  %v19657_v40 = vld [vmem:[#allocation106_spill] sm:$0xff] }
 0x8a5   :  { %v9828_v49 = vpop.permute.xlu0 %9827  ;;  %v7674_v39 = vadd.f32 %v17596_v61, %v19657_v40  ;;  %v19662_v61 = vld [vmem:[#allocation175_spill] sm:$0xff] }
 0x8a6   :  { %v10247_v21 = vmax.f32 %v10183_v63, 0.0  ;;  %11148 = vmatmul.msk.f32.vlgmr.msra.gmra.mxu0 %vm1499_vm1, %v9735_v48  ;;  %11150 = vmatmul.msk.f32.vlgmr.msrb.gmra.mxu1 %vm1499_vm1, %v9766_v50  ;;  %v9921_v15 = vpop.permute.xlu2 %9920 }
 0x8a7   :  { %11145 = vmatmul.msk.f32.gmra.mxu2 %vm1499_vm1, %v17970_v34  ;;  %11154 = vmatmul.msk.f32.vlgmr.msra.gmra.mxu3 %vm1499_vm1, %v9828_v49 }
 0x8a8   :  { %10311 = vst.msk [vmem:[#allocation13 + $0x8] sm:$0xff] %vm587_vm0, %v10247_v21  ;;  %v9952_v1 = vpop.permute.xlu1 %9951 }
 0x8a9   :  { %v8664_v36 = vpop.f32.mrf.mxu2 }
 0x8aa   :  { %v18068_v28 = vadd.f32 %v8664_v36, %v7509_v58  ;;  %v18070_v48 = vpop.f32.mrf.mxu3 }
 0x8ab   :  { %v8846_v50 = vpop.f32.mrf.mxu1 }
 0x8ac   :  { %v18072_v35 = vadd.f32 %v8846_v50, %v7671_v18  ;;  %v6846_v18 = vadd.f32 %v19663_v4, %v19662_v61  ;;  %v19666_v4 = vld [vmem:[#allocation108_spill] sm:$0xff] }
 0x8ad   :  { %v9799_v34 = vpop.permute.xlu0 %9798 }
 0x8ae   :  { %11149 = vmatmul.msk.f32.gmra.mxu0 %vm1499_vm1, %v9737_v31 }
 0x8af   :  { %11152 = vmatmul.msk.f32.vlgmr.msra.gmra.mxu2 %vm1499_vm1, %v17998_v25  ;;  %11155 = vmatmul.msk.f32.gmra.mxu3 %vm1499_vm1, %v9830_v14  ;;  %v19659_v25 = vld [vmem:[#allocation95_spill] sm:$0xff]  ;;  %v19661_v14 = vld [vmem:[#allocation105_spill] sm:$0xff] }
 0x8b0   :  { %v6747_v58 = vadd.f32 %v19660_v32, %v19659_v25  ;;  %v7608_v36 = vadd.f32 %v17512_v57, %v19661_v14  ;;  %v9923_v40 = vpop.permute.xlu1 %9922  ;;  %v11986_v32 = vld [vmem:[#allocation2 + $0x10] sm:$0xff] }
 0x8b1   :  { %v8772_v8 = vpop.f32.mrf.mxu2 }
 0x8b2   :  { %v18082_v63 = vadd.f32 %v8772_v8, %v7605_v5  ;;  %v18084_v49 = vpop.f32.mrf.mxu3  ;;  %v8928_v51 = vadd.f32 %v17577_v2, %v6747_v58  ;;  %v19664_v2 = vld [vmem:[#allocation55_spill] sm:$0xff]  ;;  %v19665_v58 = vld [vmem:[#allocation114_spill] sm:$0xff] }
 0x8b3   :  { %v8849_v21 = vpop.f32.mrf.mxu1 }
 0x8b4   :  { %v18086_v31 = vadd.f32 %v8849_v21, %v7674_v39  ;;  %v9890_v21 = vpop.permute.xlu2 %9889 }
 0x8b6   :  { %19658 = vst [vmem:[#allocation147_spill] sm:$0xff] %v18086_v31  ;;  %v9768_v16 = vpop.permute.xlu0 %9767  ;;  %v11987_v31 = vld [vmem:[#allocation2 + $0x40] sm:$0xff] }
 0x8b7   :  { %11151 = vmatmul.msk.f32.gmra.mxu1 %vm1499_vm1, %v9768_v16  ;;  %11153 = vmatmul.msk.f32.gmra.mxu2 %vm1499_vm1, %v9799_v34  ;;  %v8934_v34 = vadd.f32 %v17632_v20, %v6846_v18  ;;  %v7704_v20 = vadd.f32 %v17535_v38, %v19666_v4 }
 0x8b8   :  { %11162 = vmatmul.msk.f32.vlgmr.msrb.gmra.mxu3 %vm1499_vm1, %v9952_v1  ;;  %v9892_v4 = vpop.permute.xlu1 %9891 }
 0x8b9   :  { %v8775_v50 = vpop.f32.mrf.mxu2 }
 0x8ba   :  { %v18098_v5 = vadd.f32 %v8775_v50, %v7608_v36  ;;  %v18100_v8 = vpop.f32.mrf.mxu3  ;;  %v6750_v36 = vadd.f32 %v19665_v58, %v19664_v2  ;;  %v19667_v50 = vld [vmem:[#allocation179_spill] sm:$0xff] }
 0x8bb   :  { %v9046_v39 = vpop.f32.mrf.mxu1 }
 0x8bc   :  { %v9984_v16 = vadd.f32 %v9046_v39, %v8928_v51  ;;  %v9139_v25 = vpop.f32.mrf.mxu0  ;;  %v19668_v51 = vld [vmem:[#allocation117_spill] sm:$0xff] }
 0x8bd   :  { %v9990_v57 = vadd.f32 %v9139_v25, %v8934_v34  ;;  %v6849_v34 = vadd.f32 %v19668_v51, %v19667_v50  ;;  %v11988_v50 = vld [vmem:[#allocation2 + $0x30] sm:$0xff] }
 0x8be   :  { %v10048_v1 = vadd.f32 %v11986_v32, %v9984_v16  ;;  %v9859_v14 = vpop.permute.xlu0 %9858  ;;  %v8929_v16 = vadd.f32 %v17600_v53, %v6750_v36  ;;  %v9861_v36 = vpop.permute.xlu2 %9860 }
 0x8bf   :  { %v10054_v61 = vadd.f32 %v11987_v31, %v9990_v57  ;;  %11156 = vmatmul.msk.f32.vlgmr.msrb.gmra.mxu0 %vm1499_vm1, %v9859_v14  ;;  %11158 = vmatmul.msk.f32.vlgmr.msra.gmra.mxu1 %vm1499_vm1, %v9890_v21  ;;  %v8935_v32 = vadd.f32 %v17654_v62, %v6849_v34 }
 0x8c0   :  { %v10116_v18 = vmul.f32 %v18012_v60, %v10048_v1  ;;  %11160 = vmatmul.msk.f32.vlgmr.msrb.gmra.mxu2 %vm1499_vm1, %v9921_v15 }
 0x8c1   :  { %v10122_v39 = vmul.f32 %v18012_v60, %v10054_v61  ;;  %v8883_v31 = vpop.f32.mrf.mxu2 }
 0x8c2   :  { %v10184_v21 = vadd.f32 %v18022_v13, %v10116_v18  ;;  %v18116_v25 = vadd.f32 %v8883_v31, %v7704_v20  ;;  %v9108_v57 = vpop.f32.mrf.mxu3  ;;  %v11989_v20 = vld [vmem:[#allocation2 + $0x18] sm:$0xff] }
 0x8c3   :  { %v10190_v38 = vadd.f32 %v18022_v13, %v10122_v39  ;;  %v9988_v1 = vadd.f32 %v9108_v57, %v17688_v41  ;;  %v9049_v15 = vpop.f32.mrf.mxu1  ;;  %v11990_v41 = vld [vmem:[#allocation2 + $0x48] sm:$0xff]  ;;  %v19669_v39 = vld [vmem:[#allocation130_spill] sm:$0xff] }
 0x8c4   :  { %v10248_v14 = vmax.f32 %v10184_v21, 0.0  ;;  %v9985_v2 = vadd.f32 %v9049_v15, %v8929_v16  ;;  %v9142_v58 = vpop.f32.mrf.mxu0  ;;  %v19670_v16 = vld [vmem:[#allocation116_spill] sm:$0xff]  ;;  %v19671_v57 = vld [vmem:[#allocation139_spill] sm:$0xff]  ;;  %v19673_v15 = vld [vmem:[#allocation126_spill] sm:$0xff] }
 0x8c5   :  { %v10254_v61 = vmax.f32 %v10190_v38, 0.0  ;;  %v10052_v51 = vadd.f32 %v11988_v50, %v9988_v1  ;;  %v9991_v53 = vadd.f32 %v9142_v58, %v8935_v32  ;;  %v6879_v21 = vadd.f32 %v19670_v16, %v19669_v39  ;;  %v19672_v1 = vld [vmem:[#allocation178_spill] sm:$0xff] }
 0x8c6   :  { %10312 = vst.msk [vmem:[#allocation13 + $0x10] sm:$0xff] %vm587_vm0, %v10248_v14  ;;  %v10049_v18 = vadd.f32 %v11989_v20, %v9985_v2  ;;  %v9954_v31 = vpop.permute.xlu0 %9953  ;;  %v7707_v32 = vadd.f32 %v17555_v43, %v19671_v57  ;;  %v6978_v14 = vadd.f32 %v19673_v15, %v19672_v1  ;;  %v19678_v15 = vld [vmem:[#allocation170_spill] sm:$0xff] }
 0x8c7   :  { %10318 = vst.msk [vmem:[#allocation13 + $0x40] sm:$0xff] %vm587_vm0, %v10254_v61  ;;  %v10120_v62 = vmul.f32 %v18012_v60, %v10052_v51  ;;  %v10055_v34 = vadd.f32 %v11990_v41, %v9991_v53  ;;  %11157 = vmatmul.msk.f32.gmra.mxu0 %vm1499_vm1, %v9861_v36  ;;  %11159 = vmatmul.msk.f32.gmra.mxu1 %vm1499_vm1, %v9892_v4  ;;  %v19674_v61 = vld [vmem:[#allocation161_spill] sm:$0xff]  ;;  %v19675_v36 = vld [vmem:[#allocation162_spill] sm:$0xff] }
 0x8c8   :  { %v10117_v38 = vmul.f32 %v18012_v60, %v10049_v18  ;;  %11161 = vmatmul.msk.f32.gmra.mxu2 %vm1499_vm1, %v9923_v40  ;;  %11163 = vmatmul.msk.f32.gmra.mxu3 %vm1499_vm1, %v9954_v31  ;;  %v8936_v50 = vadd.f32 %v19674_v61, %v6879_v21  ;;  %v8942_v20 = vadd.f32 %v19675_v36, %v6978_v14  ;;  %v19676_v31 = vld [vmem:[#allocation96_spill] sm:$0xff]  ;;  %v11991_v21 = vld [vmem:[#allocation2 + $0x38] sm:$0xff] }
 0x8c9   :  { %v10188_v2 = vadd.f32 %v18022_v13, %v10120_v62  ;;  %v10123_v58 = vmul.f32 %v18012_v60, %v10055_v34  ;;  %v8886_v4 = vpop.f32.mrf.mxu2  ;;  %v11992_v14 = vld [vmem:[#allocation2 + $0x50] sm:$0xff] }
 0x8ca   :  { %v10185_v51 = vadd.f32 %v18022_v13, %v10117_v38  ;;  %v18139_v53 = vadd.f32 %v8886_v4, %v7707_v32  ;;  %v9111_v43 = vpop.f32.mrf.mxu3  ;;  %v19677_v32 = vld [vmem:[#allocation100_spill] sm:$0xff] }
 0x8cb   :  { %v10252_v40 = vmax.f32 %v10188_v2, 0.0  ;;  %v10191_v18 = vadd.f32 %v18022_v13, %v10123_v58  ;;  %v9989_v41 = vadd.f32 %v9111_v43, %v19676_v31  ;;  %v9170_v39 = vpop.f32.mrf.mxu1  ;;  %v6780_v4 = vadd.f32 %v19678_v15, %v19677_v32  ;;  %v19679_v58 = vld [vmem:[#allocation182_spill] sm:$0xff]  ;;  %v19680_v61 = vld [vmem:[#allocation120_spill] sm:$0xff] }
 0x8cc   :  { %v10249_v16 = vmax.f32 %v10185_v51, 0.0  ;;  %v9992_v62 = vadd.f32 %v9170_v39, %v8936_v50  ;;  %v9263_v57 = vpop.f32.mrf.mxu0  ;;  %v6945_v43 = vadd.f32 %v19680_v61, %v19679_v58  ;;  %v11993_v51 = vld [vmem:[#allocation2 + $0x80] sm:$0xff]  ;;  %v19685_v15 = vld [vmem:[#allocation164_spill] sm:$0xff] }
 0x8cd   :  { %10316 = vst.msk [vmem:[#allocation13 + $0x30] sm:$0xff] %vm587_vm0, %v10252_v40  ;;  %v10255_v34 = vmax.f32 %v10191_v18, 0.0  ;;  %v10053_v1 = vadd.f32 %v11991_v21, %v9989_v41  ;;  %v9998_v38 = vadd.f32 %v9263_v57, %v8942_v20  ;;  %v19681_v40 = vld [vmem:[#allocation33_spill] sm:$0xff]  ;;  %v19684_v57 = vld [vmem:[#allocation34_spill] sm:$0xff] }
 0x8ce   :  { %10313 = vst.msk [vmem:[#allocation13 + $0x18] sm:$0xff] %vm587_vm0, %v10249_v16  ;;  %v10056_v2 = vadd.f32 %v11992_v14, %v9992_v62  ;;  %v19682_v18 = vld [vmem:[#allocation173_spill] sm:$0xff]  ;;  %v8940_v16 = vadd.f32 %v19684_v57, %v6945_v43  ;;  %v19686_v57 = vld [vmem:[#allocation146_spill] sm:$0xff] }
 0x8cf   :  { %10319 = vst.msk [vmem:[#allocation13 + $0x48] sm:$0xff] %vm587_vm0, %v10255_v34  ;;  %v10121_v50 = vmul.f32 %v18012_v60, %v10053_v1  ;;  %v10062_v36 = vadd.f32 %v11993_v51, %v9998_v38  ;;  %v6882_v31 = vadd.f32 %v19682_v18, %v19681_v40  ;;  %v19683_v20 = vld [vmem:[#allocation65_spill] sm:$0xff] }
 0x8d0   :  { %v8930_v41 = vadd.f32 %v19683_v20, %v6780_v4  ;;  %v10124_v39 = vmul.f32 %v18012_v60, %v10056_v2  ;;  %v11994_v2 = vld [vmem:[#allocation2 + $0x20] sm:$0xff] }
 0x8d1   :  { %v10189_v62 = vadd.f32 %v18022_v13, %v10121_v50  ;;  %v10130_v21 = vmul.f32 %v18012_v60, %v10062_v36  ;;  %v9077_v32 = vpop.f32.mrf.mxu2  ;;  %v8937_v34 = vadd.f32 %v19685_v15, %v6882_v31  ;;  %v11995_v36 = vld [vmem:[#allocation2 + $0x70] sm:$0xff]  ;;  %v19687_v31 = vld [vmem:[#allocation119_spill] sm:$0xff] }
 0x8d2   :  { %v10192_v1 = vadd.f32 %v18022_v13, %v10124_v39  ;;  %v9986_v14 = vadd.f32 %v9077_v32, %v8930_v41  ;;  %v9232_v38 = vpop.f32.mrf.mxu3  ;;  %v6783_v15 = vadd.f32 %v19687_v31, %v19686_v57  ;;  %v11996_v39 = vld [vmem:[#allocation2 + $0x58] sm:$0xff] }
 0x8d3   :  { %v10253_v58 = vmax.f32 %v10189_v62, 0.0  ;;  %v10198_v61 = vadd.f32 %v18022_v13, %v10130_v21  ;;  %v9996_v51 = vadd.f32 %v9232_v38, %v8940_v16  ;;  %v9173_v4 = vpop.f32.mrf.mxu1  ;;  %v19688_v16 = vld [vmem:[#allocation185_spill] sm:$0xff]  ;;  %v19689_v21 = vld [vmem:[#allocation44_spill] sm:$0xff] }
 0x8d4   :  { %v10256_v40 = vmax.f32 %v10192_v1, 0.0  ;;  %v10050_v18 = vadd.f32 %v11994_v2, %v9986_v14  ;;  %v9993_v43 = vadd.f32 %v9173_v4, %v8937_v34  ;;  %v6948_v32 = vadd.f32 %v19689_v21, %v19688_v16  ;;  %v19690_v1 = vld [vmem:[#allocation47_spill] sm:$0xff]  ;;  %v19691_v14 = vld [vmem:[#allocation125_spill] sm:$0xff] }
 0x8d5   :  { %10317 = vst.msk [vmem:[#allocation13 + $0x38] sm:$0xff] %vm587_vm0, %v10253_v58  ;;  %v10262_v50 = vmax.f32 %v10198_v61, 0.0  ;;  %v10060_v20 = vadd.f32 %v11995_v36, %v9996_v51  ;;  %v6981_v38 = vadd.f32 %v19691_v14, %v19690_v1  ;;  %v19692_v58 = vld [vmem:[#allocation20_spill] sm:$0xff] }
 0x8d6   :  { %10320 = vst.msk [vmem:[#allocation13 + $0x50] sm:$0xff] %vm587_vm0, %v10256_v40  ;;  %v10118_v41 = vmul.f32 %v18012_v60, %v10050_v18  ;;  %v10057_v62 = vadd.f32 %v11996_v39, %v9993_v43  ;;  %v8931_v61 = vadd.f32 %v19692_v58, %v6783_v15  ;;  %v19693_v40 = vld [vmem:[#allocation48_spill] sm:$0xff] }
 0x8d7   :  { %10326 = vst.msk [vmem:[#allocation13 + $0x80] sm:$0xff] %vm587_vm0, %v10262_v50  ;;  %v10128_v34 = vmul.f32 %v18012_v60, %v10060_v20  ;;  %v8941_v2 = vadd.f32 %v19693_v40, %v6948_v32  ;;  %v8943_v36 = vadd.f32 %v17750_v52, %v6981_v38  ;;  %v11999_v58 = vld [vmem:[#allocation2 + $0x88] sm:$0xff] }
 0x8d8   :  { %v10186_v51 = vadd.f32 %v18022_v13, %v10118_v41  ;;  %v10125_v4 = vmul.f32 %v18012_v60, %v10057_v62  ;;  %v11997_v41 = vld [vmem:[#allocation2 + $0x28] sm:$0xff] }
 0x8d9   :  { %v10196_v18 = vadd.f32 %v18022_v13, %v10128_v34  ;;  %v9080_v43 = vpop.f32.mrf.mxu2  ;;  %v11998_v34 = vld [vmem:[#allocation2 + $0x78] sm:$0xff] }
 0x8da   :  { %v10250_v57 = vmax.f32 %v10186_v51, 0.0  ;;  %v10193_v50 = vadd.f32 %v18022_v13, %v10125_v4  ;;  %v9987_v20 = vadd.f32 %v9080_v43, %v8931_v61  ;;  %v9235_v31 = vpop.f32.mrf.mxu3  ;;  %v19694_v51 = vld [vmem:[#allocation51_spill] sm:$0xff]  ;;  %v19695_v4 = vld [vmem:[#allocation89_spill] sm:$0xff] }
 0x8db   :  { %v10260_v39 = vmax.f32 %v10196_v18, 0.0  ;;  %v9997_v16 = vadd.f32 %v9235_v31, %v8941_v2  ;;  %v9266_v21 = vpop.f32.mrf.mxu0  ;;  %v7077_v40 = vadd.f32 %v19695_v4, %v19694_v51  ;;  %v12000_v18 = vld [vmem:[#allocation2 + $0x90] sm:$0xff] }
 0x8dc   :  { %10314 = vst.msk [vmem:[#allocation13 + $0x20] sm:$0xff] %vm587_vm0, %v10250_v57  ;;  %v10257_v15 = vmax.f32 %v10193_v50, 0.0  ;;  %v10051_v62 = vadd.f32 %v11997_v41, %v9987_v20  ;;  %v9999_v1 = vadd.f32 %v9266_v21, %v8943_v36  ;;  %v9294_v32 = vpop.f32.mrf.mxu1 }
 0x8dd   :  { %10324 = vst.msk [vmem:[#allocation13 + $0x70] sm:$0xff] %vm587_vm0, %v10260_v39  ;;  %v10061_v14 = vadd.f32 %v11998_v34, %v9997_v16  ;;  %v10000_v52 = vadd.f32 %v9294_v32, %v17808_v19  ;;  %v8948_v50 = vadd.f32 %v17770_v55, %v7077_v40  ;;  %v12001_v55 = vld [vmem:[#allocation2 + $0x60] sm:$0xff] }
 0x8de   :  { %10321 = vst.msk [vmem:[#allocation13 + $0x58] sm:$0xff] %vm587_vm0, %v10257_v15  ;;  %v10119_v38 = vmul.f32 %v18012_v60, %v10051_v62  ;;  %v10063_v61 = vadd.f32 %v11999_v58, %v9999_v1  ;;  %v12003_v40 = vld [vmem:[#allocation2 + $0xc0] sm:$0xff] }
 0x8df   :  { %v10129_v2 = vmul.f32 %v18012_v60, %v10061_v14  ;;  %v10064_v43 = vadd.f32 %v12000_v18, %v10000_v52  ;;  %v19696_v18 = vld [vmem:[#allocation187_spill] sm:$0xff] }
 0x8e0   :  { %v10187_v36 = vadd.f32 %v18022_v13, %v10119_v38  ;;  %v10131_v57 = vmul.f32 %v18012_v60, %v10063_v61  ;;  %v12002_v61 = vld [vmem:[#allocation2 + $0xb0] sm:$0xff] }
 0x8e1   :  { %v10197_v19 = vadd.f32 %v18022_v13, %v10129_v2  ;;  %v10132_v20 = vmul.f32 %v18012_v60, %v10064_v43  ;;  %v9201_v31 = vpop.f32.mrf.mxu2  ;;  %v19697_v43 = vld [vmem:[#allocation122_spill] sm:$0xff] }
 0x8e2   :  { %v10251_v39 = vmax.f32 %v10187_v36, 0.0  ;;  %v10199_v16 = vadd.f32 %v18022_v13, %v10131_v57  ;;  %v9994_v21 = vadd.f32 %v9201_v31, %v17746_v56  ;;  %v9356_v15 = vpop.f32.mrf.mxu3  ;;  %v7080_v36 = vadd.f32 %v19697_v43, %v19696_v18  ;;  %v12004_v57 = vld [vmem:[#allocation2 + $0x98] sm:$0xff] }
 0x8e3   :  { %v10261_v41 = vmax.f32 %v10197_v19, 0.0  ;;  %v10200_v62 = vadd.f32 %v18022_v13, %v10132_v20  ;;  %v10004_v1 = vadd.f32 %v9356_v15, %v8948_v50  ;;  %v9387_v32 = vpop.f32.mrf.mxu0  ;;  %v19699_v31 = vld [vmem:[#allocation102_spill] sm:$0xff] }
 0x8e4   :  { %10315 = vst.msk [vmem:[#allocation13 + $0x28] sm:$0xff] %vm587_vm0, %v10251_v39  ;;  %v10263_v34 = vmax.f32 %v10199_v16, 0.0  ;;  %v10058_v14 = vadd.f32 %v12001_v55, %v9994_v21  ;;  %v9297_v52 = vpop.f32.mrf.mxu1  ;;  %v10006_v38 = vadd.f32 %v9387_v32, %v17857_v0  ;;  %v8949_v16 = vadd.f32 %v17812_v17, %v7080_v36  ;;  %v19700_v32 = vld [vmem:[#allocation136_spill] sm:$0xff]  ;;  %v12006_v18 = vld [vmem:[#allocation2 + $0xb8] sm:$0xff] }
 0x8e5   :  { %10325 = vst.msk [vmem:[#allocation13 + $0x78] sm:$0xff] %vm587_vm0, %v10261_v41  ;;  %v10264_v58 = vmax.f32 %v10200_v62, 0.0  ;;  %v10068_v51 = vadd.f32 %v12002_v61, %v10004_v1  ;;  %v10001_v56 = vadd.f32 %v9297_v52, %v17825_v45  ;;  %v19698_v45 = vld [vmem:[#allocation194_spill] sm:$0xff] }
 0x8e6   :  { %10327 = vst.msk [vmem:[#allocation13 + $0x88] sm:$0xff] %vm587_vm0, %v10263_v34  ;;  %v10126_v4 = vmul.f32 %v18012_v60, %v10058_v14  ;;  %v10070_v2 = vadd.f32 %v12003_v40, %v10006_v38  ;;  %v7143_v39 = vadd.f32 %v19699_v31, %v19698_v45  ;;  %v12008_v45 = vld [vmem:[#allocation2 + $0xd0] sm:$0xff] }
 0x8e7   :  { %10328 = vst.msk [vmem:[#allocation13 + $0x90] sm:$0xff] %vm587_vm0, %v10264_v58  ;;  %v10136_v0 = vmul.f32 %v18012_v60, %v10068_v51  ;;  %v10065_v50 = vadd.f32 %v12004_v57, %v10001_v56  ;;  %v12005_v51 = vld [vmem:[#allocation2 + $0x68] sm:$0xff] }
 0x8e8   :  { %v10194_v19 = vadd.f32 %v18022_v13, %v10126_v4  ;;  %v10138_v20 = vmul.f32 %v18012_v60, %v10070_v2  ;;  %v8952_v14 = vadd.f32 %v17810_v44, %v7143_v39  ;;  %v19701_v44 = vld [vmem:[#allocation188_spill] sm:$0xff]  ;;  %v19703_v39 = vld [vmem:[#allocation149_spill] sm:$0xff] }
 0x8e9   :  { %v10204_v21 = vadd.f32 %v18022_v13, %v10136_v0  ;;  %v10133_v15 = vmul.f32 %v18012_v60, %v10065_v50  ;;  %v9204_v41 = vpop.f32.mrf.mxu2  ;;  %v19702_v0 = vld [vmem:[#allocation123_spill] sm:$0xff] }
 0x8ea   :  { %v10258_v62 = vmax.f32 %v10194_v19, 0.0  ;;  %v10206_v1 = vadd.f32 %v18022_v13, %v10138_v20  ;;  %v9995_v34 = vadd.f32 %v9204_v41, %v19700_v32  ;;  %v9359_v55 = vpop.f32.mrf.mxu3  ;;  %v7044_v57 = vadd.f32 %v19702_v0, %v19701_v44  ;;  %v12007_v19 = vld [vmem:[#allocation2 + $0xc8] sm:$0xff]  ;;  %v19704_v41 = vld [vmem:[#allocation46_spill] sm:$0xff] }
 0x8eb   :  { %v10268_v52 = vmax.f32 %v10204_v21, 0.0  ;;  %v10201_v38 = vadd.f32 %v18022_v13, %v10133_v15  ;;  %v10005_v58 = vadd.f32 %v9359_v55, %v8949_v16  ;;  %v9390_v61 = vpop.f32.mrf.mxu0 }
 0x8ec   :  { %10322 = vst.msk [vmem:[#allocation13 + $0x60] sm:$0xff] %vm587_vm0, %v10258_v62  ;;  %v10270_v17 = vmax.f32 %v10206_v1, 0.0  ;;  %v10059_v56 = vadd.f32 %v12005_v51, %v9995_v34  ;;  %v10007_v4 = vadd.f32 %v9390_v61, %v17880_v9  ;;  %v9418_v40 = vpop.f32.mrf.mxu1  ;;  %v8946_v16 = vadd.f32 %v19703_v39, %v7044_v57  ;;  %v19705_v62 = vld [vmem:[#allocation181_spill] sm:$0xff]  ;;  %v19706_v57 = vld [vmem:[#allocation191_spill] sm:$0xff] }
 0x8ed   :  { %10332 = vst.msk [vmem:[#allocation13 + $0xb0] sm:$0xff] %vm587_vm0, %v10268_v52  ;;  %v10265_v2 = vmax.f32 %v10201_v38, 0.0  ;;  %v10069_v43 = vadd.f32 %v12006_v18, %v10005_v58  ;;  %v10008_v36 = vadd.f32 %v9418_v40, %v8952_v14  ;;  %v7146_v1 = vadd.f32 %v19705_v62, %v19704_v41  ;;  %v12009_v40 = vld [vmem:[#allocation2 + $0xa0] sm:$0xff]  ;;  %v19712_v62 = vld [vmem:[#allocation73_spill] sm:$0xff] }
 0x8ee   :  { %10334 = vst.msk [vmem:[#allocation13 + $0xc0] sm:$0xff] %vm587_vm0, %v10270_v17  ;;  %v10127_v50 = vmul.f32 %v18012_v60, %v10059_v56  ;;  %v10071_v20 = vadd.f32 %v12007_v19, %v10007_v4  ;;  %v19711_v41 = vld [vmem:[#allocation195_spill] sm:$0xff] }
 0x8ef   :  { %10329 = vst.msk [vmem:[#allocation13 + $0x98] sm:$0xff] %vm587_vm0, %v10265_v2  ;;  %v10137_v9 = vmul.f32 %v18012_v60, %v10069_v43  ;;  %v10072_v31 = vadd.f32 %v12008_v45, %v10008_v36  ;;  %v8953_v61 = vadd.f32 %v17827_v23, %v7146_v1  ;;  %v12010_v36 = vld [vmem:[#allocation2 + $0xf0] sm:$0xff]  ;;  %v7275_v1 = vadd.f32 %v19712_v62, %v19711_v41  ;;  %v19719_v41 = vld [vmem:[#allocation131_spill] sm:$0xff] }
 0x8f0   :  { %v10195_v21 = vadd.f32 %v18022_v13, %v10127_v50  ;;  %v10139_v15 = vmul.f32 %v18012_v60, %v10071_v20  ;;  %v19707_v50 = vld [vmem:[#allocation124_spill] sm:$0xff]  ;;  %v12011_v20 = vld [vmem:[#allocation2 + $0xd8] sm:$0xff] }
 0x8f1   :  { %v10205_v32 = vadd.f32 %v18022_v13, %v10137_v9  ;;  %v10140_v34 = vmul.f32 %v18012_v60, %v10072_v31  ;;  %v9325_v55 = vpop.f32.mrf.mxu2  ;;  %v7047_v23 = vadd.f32 %v19707_v50, %v19706_v57  ;;  %v19708_v45 = vld [vmem:[#allocation157_spill] sm:$0xff] }
 0x8f2   :  { %v10259_v14 = vmax.f32 %v10195_v21, 0.0  ;;  %v10207_v52 = vadd.f32 %v18022_v13, %v10139_v15  ;;  %v10002_v38 = vadd.f32 %v9325_v55, %v8946_v16  ;;  %v9480_v58 = vpop.f32.mrf.mxu3  ;;  %v19709_v31 = vld [vmem:[#allocation121_spill] sm:$0xff]  ;;  %v19710_v16 = vld [vmem:[#allocation135_spill] sm:$0xff] }
 0x8f3   :  { %v10269_v17 = vmax.f32 %v10205_v32, 0.0  ;;  %v10208_v51 = vadd.f32 %v18022_v13, %v10140_v34  ;;  %v10012_v56 = vadd.f32 %v9480_v58, %v17908_v11  ;;  %v7242_v39 = vadd.f32 %v19709_v31, %v19708_v45  ;;  %v19713_v57 = vld [vmem:[#allocation189_spill] sm:$0xff] }
 0x8f4   :  { %10323 = vst.msk [vmem:[#allocation13 + $0x68] sm:$0xff] %vm587_vm0, %v10259_v14  ;;  %v10271_v4 = vmax.f32 %v10207_v52, 0.0  ;;  %v10066_v2 = vadd.f32 %v12009_v40, %v10002_v38  ;;  %v9421_v18 = vpop.f32.mrf.mxu1  ;;  %v8947_v21 = vadd.f32 %v19710_v16, %v7047_v23  ;;  %v12012_v40 = vld [vmem:[#allocation2 + $0xa8] sm:$0xff]  ;;  %v12015_v31 = vld [vmem:[#allocation2 + $0x110] sm:$0xff]  ;;  %v19717_v16 = vld [vmem:[#allocation78_spill] sm:$0xff] }
 0x8f5   :  { %10333 = vst.msk [vmem:[#allocation13 + $0xb8] sm:$0xff] %vm587_vm0, %v10269_v17  ;;  %v10272_v43 = vmax.f32 %v10208_v51, 0.0  ;;  %v10076_v44 = vadd.f32 %v12010_v36, %v10012_v56  ;;  %v10009_v0 = vadd.f32 %v9421_v18, %v8953_v61  ;;  %v8958_v14 = vadd.f32 %v17859_v54, %v7242_v39  ;;  %v12013_v36 = vld [vmem:[#allocation2 + $0xf8] sm:$0xff] }
 0x8f6   :  { %10335 = vst.msk [vmem:[#allocation13 + $0xc8] sm:$0xff] %vm587_vm0, %v10271_v4  ;;  %v10134_v19 = vmul.f32 %v18012_v60, %v10066_v2  ;;  %v8960_v61 = vadd.f32 %v17884_v30, %v7275_v1  ;;  %v19714_v30 = vld [vmem:[#allocation176_spill] sm:$0xff] }
 0x8f7   :  { %10336 = vst.msk [vmem:[#allocation13 + $0xd0] sm:$0xff] %vm587_vm0, %v10272_v43  ;;  %v10144_v11 = vmul.f32 %v18012_v60, %v10076_v44  ;;  %v10073_v9 = vadd.f32 %v12011_v20, %v10009_v0  ;;  %v7176_v50 = vadd.f32 %v19714_v30, %v19713_v57  ;;  %v19716_v20 = vld [vmem:[#allocation168_spill] sm:$0xff]  ;;  %v12016_v57 = vld [vmem:[#allocation2 + $0xe0] sm:$0xff] }
 0x8f8   :  { %v10202_v15 = vadd.f32 %v18022_v13, %v10134_v19  ;;  %v12014_v19 = vld [vmem:[#allocation2 + $0x100] sm:$0xff] }
 0x8f9   :  { %v10212_v32 = vadd.f32 %v18022_v13, %v10144_v11  ;;  %v10141_v34 = vmul.f32 %v18012_v60, %v10073_v9  ;;  %v9328_v55 = vpop.f32.mrf.mxu2  ;;  %v19715_v11 = vld [vmem:[#allocation201_spill] sm:$0xff]  ;;  %v8954_v62 = vadd.f32 %v19719_v41, %v7176_v50  ;;  %v19727_v41 = vld [vmem:[#allocation152_spill] sm:$0xff] }
 0x8fa   :  { %v10266_v52 = vmax.f32 %v10202_v15, 0.0  ;;  %v10003_v38 = vadd.f32 %v9328_v55, %v8947_v21  ;;  %v9483_v58 = vpop.f32.mrf.mxu3  ;;  %v7341_v9 = vadd.f32 %v19716_v20, %v19715_v11  ;;  %v19718_v21 = vld [vmem:[#allocation184_spill] sm:$0xff]  ;;  %v19721_v55 = vld [vmem:[#allocation91_spill] sm:$0xff] }
 0x8fb   :  { %v10276_v17 = vmax.f32 %v10212_v32, 0.0  ;;  %v10209_v51 = vadd.f32 %v18022_v13, %v10141_v34  ;;  %v10013_v56 = vadd.f32 %v9483_v58, %v17923_v33  ;;  %v9511_v4 = vpop.f32.mrf.mxu0  ;;  %v7245_v15 = vadd.f32 %v19718_v21, %v19717_v16  ;;  %v19720_v34 = vld [vmem:[#allocation197_spill] sm:$0xff]  ;;  %v12018_v16 = vld [vmem:[#allocation2 + $0x108] sm:$0xff] }
 0x8fc   :  { %10330 = vst.msk [vmem:[#allocation13 + $0xa0] sm:$0xff] %vm587_vm0, %v10266_v52  ;;  %v10067_v2 = vadd.f32 %v12012_v40, %v10003_v38  ;;  %v10014_v18 = vadd.f32 %v9511_v4, %v8958_v14  ;;  %v9542_v43 = vpop.f32.mrf.mxu1  ;;  %v7278_v14 = vadd.f32 %v19721_v55, %v19720_v34  ;;  %v8964_v52 = vadd.f32 %v17910_v22, %v7341_v9  ;;  %v19724_v9 = vld [vmem:[#allocation193_spill] sm:$0xff]  ;;  %v19728_v55 = vld [vmem:[#allocation52_spill] sm:$0xff] }
 0x8fd   :  { %10340 = vst.msk [vmem:[#allocation13 + $0xf0] sm:$0xff] %vm587_vm0, %v10276_v17  ;;  %v10273_v54 = vmax.f32 %v10209_v51, 0.0  ;;  %v10077_v44 = vadd.f32 %v12013_v36, %v10013_v56  ;;  %v10016_v0 = vadd.f32 %v9542_v43, %v8960_v61  ;;  %v19722_v17 = vld [vmem:[#allocation50_spill] sm:$0xff] }
 0x8fe   :  { %v10135_v23 = vmul.f32 %v18012_v60, %v10067_v2  ;;  %v10078_v33 = vadd.f32 %v12014_v19, %v10014_v18  ;;  %v8959_v51 = vadd.f32 %v19722_v17, %v7245_v15  ;;  %v19723_v18 = vld [vmem:[#allocation165_spill] sm:$0xff]  ;;  %v19726_v15 = vld [vmem:[#allocation90_spill] sm:$0xff] }
 0x8ff   :  { %10337 = vst.msk [vmem:[#allocation13 + $0xd8] sm:$0xff] %vm587_vm0, %v10273_v54  ;;  %v10145_v45 = vmul.f32 %v18012_v60, %v10077_v44  ;;  %v10080_v39 = vadd.f32 %v12015_v31, %v10016_v0  ;;  %v8961_v43 = vadd.f32 %v19723_v18, %v7278_v14 }
 0x900   :  { %v10203_v1 = vadd.f32 %v18022_v13, %v10135_v23  ;;  %v10146_v32 = vmul.f32 %v18012_v60, %v10078_v33  ;;  %v12017_v33 = vld [vmem:[#allocation2 + $0x130] sm:$0xff] }
 0x901   :  { %v10213_v38 = vadd.f32 %v18022_v13, %v10145_v45  ;;  %v10148_v58 = vmul.f32 %v18012_v60, %v10080_v39  ;;  %v9449_v61 = vpop.f32.mrf.mxu2  ;;  %v19725_v45 = vld [vmem:[#allocation148_spill] sm:$0xff] }
 0x902   :  { %v10267_v56 = vmax.f32 %v10203_v1, 0.0  ;;  %v10214_v4 = vadd.f32 %v18022_v13, %v10146_v32  ;;  %v10010_v40 = vadd.f32 %v9449_v61, %v8954_v62  ;;  %v9604_v2 = vpop.f32.mrf.mxu3  ;;  %v7179_v31 = vadd.f32 %v19725_v45, %v19724_v9  ;;  %v12019_v32 = vld [vmem:[#allocation2 + $0x118] sm:$0xff] }
 0x903   :  { %v10277_v54 = vmax.f32 %v10213_v38, 0.0  ;;  %v10216_v36 = vadd.f32 %v18022_v13, %v10148_v58  ;;  %v10020_v44 = vadd.f32 %v9604_v2, %v8964_v52  ;;  %v9514_v0 = vpop.f32.mrf.mxu0  ;;  %v7344_v62 = vadd.f32 %v19727_v41, %v19726_v15 }
 0x904   :  { %10331 = vst.msk [vmem:[#allocation13 + $0xa8] sm:$0xff] %vm587_vm0, %v10267_v56  ;;  %v10278_v22 = vmax.f32 %v10214_v4, 0.0  ;;  %v10074_v30 = vadd.f32 %v12016_v57, %v10010_v40  ;;  %v10015_v50 = vadd.f32 %v9514_v0, %v8959_v51  ;;  %v9545_v23 = vpop.f32.mrf.mxu1  ;;  %v8955_v14 = vadd.f32 %v19728_v55, %v7179_v31  ;;  %v12020_v0 = vld [vmem:[#allocation2 + $0xe8] sm:$0xff]  ;;  %v12023_v55 = vld [vmem:[#allocation2 + $0x120] sm:$0xff] }
 0x905   :  { %10341 = vst.msk [vmem:[#allocation13 + $0xf8] sm:$0xff] %vm587_vm0, %v10277_v54  ;;  %v10280_v19 = vmax.f32 %v10216_v36, 0.0  ;;  %v10084_v11 = vadd.f32 %v12017_v33, %v10020_v44  ;;  %v10017_v20 = vadd.f32 %v9545_v23, %v8961_v43  ;;  %v8965_v58 = vadd.f32 %v17925_v59, %v7344_v62  ;;  %v12022_v33 = vld [vmem:[#allocation2 + $0x140] sm:$0xff] }
 0x906   :  { %10342 = vst.msk [vmem:[#allocation13 + $0x100] sm:$0xff] %vm587_vm0, %v10278_v22  ;;  %v10142_v39 = vmul.f32 %v18012_v60, %v10074_v30  ;;  %v10079_v21 = vadd.f32 %v12018_v16, %v10015_v50  ;;  %v19729_v22 = vld [vmem:[#allocation21_spill] sm:$0xff] }
 0x907   :  { %10344 = vst.msk [vmem:[#allocation13 + $0x110] sm:$0xff] %vm587_vm0, %v10280_v19  ;;  %v10152_v1 = vmul.f32 %v18012_v60, %v10084_v11  ;;  %v10081_v34 = vadd.f32 %v12019_v32, %v10017_v20  ;;  %v12021_v50 = vld [vmem:[#allocation2 + $0x138] sm:$0xff] }
 0x908   :  { %v10210_v52 = vadd.f32 %v18022_v13, %v10142_v39  ;;  %v10147_v38 = vmul.f32 %v18012_v60, %v10079_v21 }
 0x909   :  { %v10220_v61 = vadd.f32 %v18022_v13, %v10152_v1  ;;  %v10149_v17 = vmul.f32 %v18012_v60, %v10081_v34  ;;  %v9452_v51 = vpop.f32.mrf.mxu2 }
 0x90a   :  { %v10274_v56 = vmax.f32 %v10210_v52, 0.0  ;;  %v10215_v4 = vadd.f32 %v18022_v13, %v10147_v38  ;;  %v10011_v40 = vadd.f32 %v9452_v51, %v8955_v14  ;;  %v9607_v2 = vpop.f32.mrf.mxu3  ;;  %v12024_v38 = vld [vmem:[#allocation2 + $0x170] sm:$0xff] }
 0x90b   :  { %v10284_v18 = vmax.f32 %v10220_v61, 0.0  ;;  %v10217_v43 = vadd.f32 %v18022_v13, %v10149_v17  ;;  %v10021_v54 = vadd.f32 %v9607_v2, %v8965_v58  ;;  %v9635_v36 = vpop.f32.mrf.mxu0  ;;  %v12025_v61 = vld [vmem:[#allocation2 + $0x150] sm:$0xff] }
 0x90c   :  { %10338 = vst.msk [vmem:[#allocation13 + $0xe0] sm:$0xff] %vm587_vm0, %v10274_v56  ;;  %v10279_v44 = vmax.f32 %v10215_v4, 0.0  ;;  %v10075_v59 = vadd.f32 %v12020_v0, %v10011_v40  ;;  %v10022_v57 = vadd.f32 %v9635_v36, %v19729_v22  ;;  %v12026_v22 = vld [vmem:[#allocation2 + $0x128] sm:$0xff] }
 0x90d   :  { %10348 = vst.msk [vmem:[#allocation13 + $0x130] sm:$0xff] %vm587_vm0, %v10284_v18  ;;  %v10281_v30 = vmax.f32 %v10217_v43, 0.0  ;;  %v10085_v23 = vadd.f32 %v12021_v50, %v10021_v54 }
 0x90e   :  { %10343 = vst.msk [vmem:[#allocation13 + $0x108] sm:$0xff] %vm587_vm0, %v10279_v44  ;;  %v10143_v19 = vmul.f32 %v18012_v60, %v10075_v59  ;;  %v10086_v11 = vadd.f32 %v12022_v33, %v10022_v57 }
 0x90f   :  { %10345 = vst.msk [vmem:[#allocation13 + $0x118] sm:$0xff] %vm587_vm0, %v10281_v30  ;;  %v10153_v20 = vmul.f32 %v18012_v60, %v10085_v23  ;;  %v12027_v23 = vld [vmem:[#allocation2 + $0x178] sm:$0xff] }
 0x910   :  { %v10211_v9 = vadd.f32 %v18022_v13, %v10143_v19  ;;  %v10154_v45 = vmul.f32 %v18012_v60, %v10086_v11  ;;  %v12029_v11 = vld [vmem:[#allocation2 + $0x158] sm:$0xff] }
 0x911   :  { %v10221_v31 = vadd.f32 %v18022_v13, %v10153_v20  ;;  %v9573_v39 = vpop.f32.mrf.mxu2 }
 0x912   :  { %v10275_v16 = vmax.f32 %v10211_v9, 0.0  ;;  %v10222_v21 = vadd.f32 %v18022_v13, %v10154_v45  ;;  %v10018_v15 = vadd.f32 %v9573_v39, %v17955_v6  ;;  %v9728_v41 = vpop.f32.mrf.mxu3  ;;  %v19730_v9 = vld [vmem:[#allocation99_spill] sm:$0xff]  ;;  %v19731_v45 = vld [vmem:[#allocation56_spill] sm:$0xff] }
 0x913   :  { %v10285_v62 = vmax.f32 %v10221_v31, 0.0  ;;  %v10028_v1 = vadd.f32 %v9728_v41, %v17976_v37  ;;  %v9666_v32 = vpop.f32.mrf.mxu1  ;;  %v7440_v31 = vadd.f32 %v19731_v45, %v19730_v9 }
 0x914   :  { %10339 = vst.msk [vmem:[#allocation13 + $0xe8] sm:$0xff] %vm587_vm0, %v10275_v16  ;;  %v10286_v34 = vmax.f32 %v10222_v21, 0.0  ;;  %v10082_v14 = vadd.f32 %v12023_v55, %v10018_v15  ;;  %v10024_v52 = vadd.f32 %v9666_v32, %v18000_v7  ;;  %v19733_v16 = vld [vmem:[#allocation43_spill] sm:$0xff] }
 0x915   :  { %10349 = vst.msk [vmem:[#allocation13 + $0x138] sm:$0xff] %vm587_vm0, %v10285_v62  ;;  %v10092_v58 = vadd.f32 %v12024_v38, %v10028_v1  ;;  %v8970_v62 = vadd.f32 %v17957_v24, %v7440_v31  ;;  %v19734_v32 = vld [vmem:[#allocation127_spill] sm:$0xff] }
 0x916   :  { %10350 = vst.msk [vmem:[#allocation13 + $0x140] sm:$0xff] %vm587_vm0, %v10286_v34  ;;  %v10150_v6 = vmul.f32 %v18012_v60, %v10082_v14  ;;  %v10088_v17 = vadd.f32 %v12025_v61, %v10024_v52 }
 0x917   :  { %v10160_v37 = vmul.f32 %v18012_v60, %v10092_v58 }
 0x918   :  { %v10218_v51 = vadd.f32 %v18022_v13, %v10150_v6  ;;  %v10156_v56 = vmul.f32 %v18012_v60, %v10088_v17 }
 0x919   :  { %v10228_v4 = vadd.f32 %v18022_v13, %v10160_v37  ;;  %v9576_v40 = vpop.f32.mrf.mxu2 }
 0x91a   :  { %v10282_v7 = vmax.f32 %v10218_v51, 0.0  ;;  %v10224_v2 = vadd.f32 %v18022_v13, %v10156_v56  ;;  %v10019_v18 = vadd.f32 %v9576_v40, %v17972_v27  ;;  %v9731_v43 = vpop.f32.mrf.mxu3 }
 0x91b   :  { %v10292_v54 = vmax.f32 %v10228_v4, 0.0  ;;  %v10029_v36 = vadd.f32 %v9731_v43, %v18004_v12  ;;  %v9638_v44 = vpop.f32.mrf.mxu0  ;;  %v9669_v0 = vpop.f32.mrf.mxu1  ;;  %v12028_v12 = vld [vmem:[#allocation2 + $0x148] sm:$0xff]  ;;  %v12030_v4 = vld [vmem:[#allocation2 + $0x160] sm:$0xff] }
 0x91c   :  { %10346 = vst.msk [vmem:[#allocation13 + $0x120] sm:$0xff] %vm587_vm0, %v10282_v7  ;;  %v10288_v59 = vmax.f32 %v10224_v2, 0.0  ;;  %v10083_v57 = vadd.f32 %v12026_v22, %v10019_v18  ;;  %v10023_v30 = vadd.f32 %v9638_v44, %v17959_v47  ;;  %v10025_v50 = vadd.f32 %v9669_v0, %v18030_v26  ;;  %v19732_v47 = vld [vmem:[#allocation59_spill] sm:$0xff]  ;;  %v12032_v18 = vld [vmem:[#allocation2 + $0x190] sm:$0xff] }
 0x91d   :  { %10356 = vst.msk [vmem:[#allocation13 + $0x170] sm:$0xff] %vm587_vm0, %v10292_v54  ;;  %v10093_v19 = vadd.f32 %v12027_v23, %v10029_v36  ;;  %v7539_v26 = vadd.f32 %v19733_v16, %v19732_v47  ;;  %v12031_v7 = vld [vmem:[#allocation2 + $0x180] sm:$0xff]  ;;  %v19737_v22 = vld [vmem:[#allocation29_spill] sm:$0xff] }
 0x91e   :  { %10352 = vst.msk [vmem:[#allocation13 + $0x150] sm:$0xff] %vm587_vm0, %v10288_v59  ;;  %v10151_v27 = vmul.f32 %v18012_v60, %v10083_v57  ;;  %v10087_v33 = vadd.f32 %v12028_v12, %v10023_v30  ;;  %v10089_v20 = vadd.f32 %v12029_v11, %v10025_v50  ;;  %v19735_v54 = vld [vmem:[#allocation98_spill] sm:$0xff]  ;;  %v12034_v16 = vld [vmem:[#allocation2 + $0x1b0] sm:$0xff] }
 0x91f   :  { %v10161_v39 = vmul.f32 %v18012_v60, %v10093_v19  ;;  %v8976_v34 = vadd.f32 %v19734_v32, %v7539_v26  ;;  %v19736_v36 = vld [vmem:[#allocation142_spill] sm:$0xff] }
 0x920   :  { %v10219_v21 = vadd.f32 %v18022_v13, %v10151_v27  ;;  %v10155_v15 = vmul.f32 %v18012_v60, %v10087_v33  ;;  %v10157_v41 = vmul.f32 %v18012_v60, %v10089_v20  ;;  %v7443_v44 = vadd.f32 %v19736_v36, %v19735_v54  ;;  %v19742_v36 = vld [vmem:[#allocation113_spill] sm:$0xff] }
 0x921   :  { %v10229_v1 = vadd.f32 %v18022_v13, %v10161_v39  ;;  %v12033_v39 = vld [vmem:[#allocation2 + $0x168] sm:$0xff] }
 0x922   :  { %v10283_v55 = vmax.f32 %v10219_v21, 0.0  ;;  %v10223_v14 = vadd.f32 %v18022_v13, %v10155_v15  ;;  %v10225_v52 = vadd.f32 %v18022_v13, %v10157_v41  ;;  %v9697_v38 = vpop.f32.mrf.mxu2  ;;  %v8971_v57 = vadd.f32 %v19737_v22, %v7443_v44  ;;  %v12035_v21 = vld [vmem:[#allocation2 + $0x188] sm:$0xff] }
 0x923   :  { %v10293_v58 = vmax.f32 %v10229_v1, 0.0  ;;  %v10026_v6 = vadd.f32 %v9697_v38, %v8970_v62  ;;  %v9759_v61 = vpop.f32.mrf.mxu0  ;;  %v9790_v17 = vpop.f32.mrf.mxu1  ;;  %v19738_v62 = vld [vmem:[#allocation107_spill] sm:$0xff]  ;;  %v19739_v1 = vld [vmem:[#allocation40_spill] sm:$0xff] }
 0x924   :  { %10347 = vst.msk [vmem:[#allocation13 + $0x128] sm:$0xff] %vm587_vm0, %v10283_v55  ;;  %v10287_v37 = vmax.f32 %v10223_v14, 0.0  ;;  %v10289_v51 = vmax.f32 %v10225_v52, 0.0  ;;  %v10030_v24 = vadd.f32 %v9759_v61, %v18051_v10  ;;  %v10032_v56 = vadd.f32 %v9790_v17, %v8976_v34  ;;  %v19743_v44 = vld [vmem:[#allocation144_spill] sm:$0xff] }
 0x925   :  { %10357 = vst.msk [vmem:[#allocation13 + $0x178] sm:$0xff] %vm587_vm0, %v10293_v58  ;;  %v10090_v40 = vadd.f32 %v12030_v4, %v10026_v6  ;;  %v7542_v32 = vadd.f32 %v19739_v1, %v19738_v62  ;;  %v12037_v4 = vld [vmem:[#allocation2 + $0x1b8] sm:$0xff]  ;;  %v19744_v1 = vld [vmem:[#allocation207_spill] sm:$0xff] }
 0x926   :  { %10351 = vst.msk [vmem:[#allocation13 + $0x148] sm:$0xff] %vm587_vm0, %v10287_v37  ;;  %v10094_v2 = vadd.f32 %v12031_v7, %v10030_v24  ;;  %v10096_v43 = vadd.f32 %v12032_v18, %v10032_v56  ;;  %v19740_v18 = vld [vmem:[#allocation104_spill] sm:$0xff] }
 0x927   :  { %10353 = vst.msk [vmem:[#allocation13 + $0x158] sm:$0xff] %vm587_vm0, %v10289_v51  ;;  %v10158_v0 = vmul.f32 %v18012_v60, %v10090_v40  ;;  %v8977_v14 = vadd.f32 %v18032_v3, %v7542_v32  ;;  %v19745_v32 = vld [vmem:[#allocation101_spill] sm:$0xff] }
 0x928   :  { %v10162_v10 = vmul.f32 %v18012_v60, %v10094_v2  ;;  %v10164_v59 = vmul.f32 %v18012_v60, %v10096_v43  ;;  %v19741_v43 = vld [vmem:[#allocation92_spill] sm:$0xff] }
 0x929   :  { %v10226_v30 = vadd.f32 %v18022_v13, %v10158_v0  ;;  %v7638_v54 = vadd.f32 %v19741_v43, %v19740_v18  ;;  %v7737_v0 = vadd.f32 %v19743_v44, %v19742_v36  ;;  %v19748_v43 = vld [vmem:[#allocation128_spill] sm:$0xff] }
 0x92a   :  { %v10230_v50 = vadd.f32 %v18022_v13, %v10162_v10  ;;  %v10232_v23 = vadd.f32 %v18022_v13, %v10164_v59  ;;  %v9700_v19 = vpop.f32.mrf.mxu2  ;;  %v9852_v27 = vpop.f32.mrf.mxu3  ;;  %v18389_v10 = vld [vmem:[%s18452_s8] ss:$0 sm:$0xff] }
 0x92b   :  { %v10290_v12 = vmax.f32 %v10226_v30, 0.0  ;;  %v10027_v33 = vadd.f32 %v9700_v19, %v8971_v57  ;;  %v10036_v11 = vadd.f32 %v9852_v27, %v18082_v63  ;;  %v9762_v20 = vpop.f32.mrf.mxu0  ;;  %v8982_v30 = vadd.f32 %v18053_v42, %v7638_v54 }
 0x92c   :  { %v10294_v9 = vmax.f32 %v10230_v50, 0.0  ;;  %v10296_v45 = vmax.f32 %v10232_v23, 0.0  ;;  %v10031_v31 = vadd.f32 %v9762_v20, %v18068_v28  ;;  %v8988_v50 = vadd.f32 %v18084_v49, %v7737_v0  ;;  %v12042_v49 = vld [vmem:[#allocation2 + $0x1f0] sm:$0xff] }
 0x92d   :  { %10354 = vst.msk [vmem:[#allocation13 + $0x160] sm:$0xff] %vm587_vm0, %v10290_v12  ;;  %v10091_v47 = vadd.f32 %v12033_v39, %v10027_v33  ;;  %v10100_v26 = vadd.f32 %v12034_v16, %v10036_v11  ;;  %v12041_v39 = vld [vmem:[#allocation2 + $0x1a8] sm:$0xff] }
 0x92e   :  { %10358 = vst.msk [vmem:[#allocation13 + $0x180] sm:$0xff] %vm587_vm0, %v10294_v9  ;;  %v10095_v15 = vadd.f32 %v12035_v21, %v10031_v31  ;;  %v12043_v21 = vld [vmem:[#allocation2 + $0x1c0] sm:$0xff] }
 0x92f   :  { %10360 = vst.msk [vmem:[#allocation13 + $0x190] sm:$0xff] %vm587_vm0, %v10296_v45  ;;  %v10159_v41 = vmul.f32 %v18012_v60, %v10091_v47  ;;  %v10168_v63 = vmul.f32 %v18012_v60, %v10100_v26 }
 0x930   :  { %v10163_v28 = vmul.f32 %v18012_v60, %v10095_v15  ;;  %v12036_v60 = vld [vmem:[#allocation2 + $0x1a0] sm:$0xff] }
 0x931   :  { %v10227_v34 = vadd.f32 %v18022_v13, %v10159_v41  ;;  %v10236_v55 = vadd.f32 %v18022_v13, %v10168_v63  ;;  %v12044_v41 = vld [vmem:[#allocation2 + $0x1d0] sm:$0xff] }
 0x932   :  { %v10231_v52 = vadd.f32 %v18022_v13, %v10163_v28  ;;  %v9821_v38 = vpop.f32.mrf.mxu2  ;;  %v9855_v58 = vpop.f32.mrf.mxu3  ;;  %v18378_v13 = vld [vmem:[%s18451_s7] ss:$0 sm:$0xff]  ;;  %v7641_v28 = vadd.f32 %v19745_v32, %v19744_v1  ;;  %s12244_s7 = smov [#allocation13]  }
 0x933   :  { %v10291_v6 = vmax.f32 %v10227_v34, 0.0  ;;  %v10300_v61 = vmax.f32 %v10236_v55, 0.0  ;;  %v10034_v17 = vadd.f32 %v9821_v38, %v18035_v29  ;;  %v10037_v37 = vadd.f32 %v9855_v58, %v18098_v5  ;;  %v12039_v5 = vld [vmem:[#allocation2 + $0x198] sm:$0xff]  ;;  %s10378_s8 = sshll.u32 %s12244_s7, 4  ;;  %s10379_s8 = int_to_ptr.vmem [resolvable:$true] %s10378_s8 }
 0x934   :  { %v10295_v51 = vmax.f32 %v10231_v52, 0.0  ;;  %v9793_v24 = vpop.f32.mrf.mxu1  ;;  %v8983_v52 = vadd.f32 %v18070_v48, %v7641_v28  ;;  %v12045_v48 = vld [vmem:[#allocation2 + $0x1e0] sm:$0xff] }
 0x935   :  { %10355 = vst.msk [vmem:[#allocation13 + $0x168] sm:$0xff] %vm587_vm0, %v10291_v6  ;;  %v10098_v56 = vadd.f32 %v12036_v60, %v10034_v17  ;;  %v10101_v40 = vadd.f32 %v12037_v4, %v10037_v37  ;;  %v10033_v7 = vadd.f32 %v9793_v24, %v8977_v14 }
 0x936   :  { %10364 = vst.msk [vmem:[#allocation13 + $0x1b0] sm:$0xff] %vm587_vm0, %v10300_v61 }
 0x937   :  { %10359 = vst.msk [vmem:[#allocation13 + $0x188] sm:$0xff] %vm587_vm0, %v10295_v51  ;;  %v10166_v3 = vmul.f32 %v18378_v13, %v10098_v56  ;;  %v10169_v29 = vmul.f32 %v18378_v13, %v10101_v40  ;;  %v10097_v2 = vadd.f32 %v12039_v5, %v10033_v7  ;;  %v19746_v40 = vld [vmem:[#allocation147_spill] sm:$0xff] }
 0x939   :  { %v10234_v59 = vadd.f32 %v18389_v10, %v10166_v3  ;;  %v10237_v22 = vadd.f32 %v18389_v10, %v10169_v29  ;;  %v10165_v57 = vmul.f32 %v18378_v13, %v10097_v2  ;;  %v12046_v29 = vld [vmem:[#allocation2 + $0x1c8] sm:$0xff]  ;;  %v12047_v2 = vld [vmem:[#allocation2 + $0x1d8] sm:$0xff] }
 0x93a   :  { %v9824_v23 = vpop.f32.mrf.mxu2 }
 0x93b   :  { %v10298_v19 = vmax.f32 %v10234_v59, 0.0  ;;  %v10301_v27 = vmax.f32 %v10237_v22, 0.0  ;;  %v10233_v12 = vadd.f32 %v18389_v10, %v10165_v57  ;;  %v10035_v33 = vadd.f32 %v9824_v23, %v18056_v46  ;;  %v9976_v11 = vpop.f32.mrf.mxu3 }
 0x93c   :  { %v10044_v20 = vadd.f32 %v9976_v11, %v8988_v50  ;;  %v9883_v9 = vpop.f32.mrf.mxu0  ;;  %v9914_v45 = vpop.f32.mrf.mxu1 }
 0x93d   :  { %10362 = vst.msk [vmem:[#allocation13 + $0x1a0] sm:$0xff] %vm587_vm0, %v10298_v19  ;;  %v10297_v31 = vmax.f32 %v10233_v12, 0.0  ;;  %v10099_v47 = vadd.f32 %v12041_v39, %v10035_v33  ;;  %v10038_v16 = vadd.f32 %v9883_v9, %v8982_v30  ;;  %v10040_v42 = vadd.f32 %v9914_v45, %v18072_v35  ;;  %v12049_v45 = vld [vmem:[#allocation2 + $0x1f8] sm:$0xff] }
 0x93e   :  { %10365 = vst.msk [vmem:[#allocation13 + $0x1b8] sm:$0xff] %vm587_vm0, %v10301_v27  ;;  %v10108_v26 = vadd.f32 %v12042_v49, %v10044_v20  ;;  %v12048_v20 = vld [vmem:[#allocation2 + $0x1e8] sm:$0xff] }
 0x93f   :  { %10361 = vst.msk [vmem:[#allocation13 + $0x198] sm:$0xff] %vm587_vm0, %v10297_v31  ;;  %v10167_v46 = vmul.f32 %v18378_v13, %v10099_v47  ;;  %v10102_v15 = vadd.f32 %v12043_v21, %v10038_v16  ;;  %v10104_v63 = vadd.f32 %v12044_v41, %v10040_v42 }
 0x940   :  { %v10176_v62 = vmul.f32 %v18378_v13, %v10108_v26 }
 0x941   :  { %v10235_v34 = vadd.f32 %v18389_v10, %v10167_v46  ;;  %v10170_v35 = vmul.f32 %v18378_v13, %v10102_v15  ;;  %v10172_v55 = vmul.f32 %v18378_v13, %v10104_v63 }
 0x942   :  { %v10244_v14 = vadd.f32 %v18389_v10, %v10176_v62 }
 0x943   :  { %v10299_v38 = vmax.f32 %v10235_v34, 0.0  ;;  %v10238_v58 = vadd.f32 %v18389_v10, %v10170_v35  ;;  %v10240_v6 = vadd.f32 %v18389_v10, %v10172_v55  ;;  %v9945_v61 = vpop.f32.mrf.mxu2 }
 0x944   :  { %v10308_v17 = vmax.f32 %v10244_v14, 0.0  ;;  %v10042_v37 = vadd.f32 %v9945_v61, %v18116_v25  ;;  %v9886_v51 = vpop.f32.mrf.mxu0  ;;  %v9917_v24 = vpop.f32.mrf.mxu1  ;;  %v19747_v25 = vld [vmem:[#allocation72_spill] sm:$0xff] }
 0x945   :  { %10363 = vst.msk [vmem:[#allocation13 + $0x1a8] sm:$0xff] %vm587_vm0, %v10299_v38  ;;  %v10302_v60 = vmax.f32 %v10238_v58, 0.0  ;;  %v10304_v56 = vmax.f32 %v10240_v6, 0.0  ;;  %v10039_v4 = vadd.f32 %v9886_v51, %v8983_v52  ;;  %v10041_v7 = vadd.f32 %v9917_v24, %v19746_v40 }
 0x946   :  { %10372 = vst.msk [vmem:[#allocation13 + $0x1f0] sm:$0xff] %vm587_vm0, %v10308_v17  ;;  %v10106_v3 = vadd.f32 %v12045_v48, %v10042_v37  ;;  %v7740_v54 = vadd.f32 %v19748_v43, %v19747_v25 }
 0x947   :  { %10366 = vst.msk [vmem:[#allocation13 + $0x1c0] sm:$0xff] %vm587_vm0, %v10302_v60  ;;  %v10103_v5 = vadd.f32 %v12046_v29, %v10039_v4  ;;  %v10105_v18 = vadd.f32 %v12047_v2, %v10041_v7 }
 0x948   :  { %10368 = vst.msk [vmem:[#allocation13 + $0x1d0] sm:$0xff] %vm587_vm0, %v10304_v56  ;;  %v10174_v36 = vmul.f32 %v18378_v13, %v10106_v3  ;;  %v8989_v59 = vadd.f32 %v18100_v8, %v7740_v54 }
 0x949   :  { %v10171_v44 = vmul.f32 %v18378_v13, %v10103_v5  ;;  %v10173_v0 = vmul.f32 %v18378_v13, %v10105_v18 }
 0x94a   :  { %v10242_v22 = vadd.f32 %v18389_v10, %v10174_v36 }
 0x94b   :  { %v10239_v57 = vadd.f32 %v18389_v10, %v10171_v44  ;;  %v10241_v30 = vadd.f32 %v18389_v10, %v10173_v0  ;;  %v9948_v50 = vpop.f32.mrf.mxu2  ;;  %v9979_v23 = vpop.f32.mrf.mxu3 }
 0x94c   :  { %v10306_v19 = vmax.f32 %v10242_v22, 0.0  ;;  %v10043_v27 = vadd.f32 %v9948_v50, %v18139_v53  ;;  %v10045_v12 = vadd.f32 %v9979_v23, %v8989_v59 }
 0x94d   :  { %v10303_v33 = vmax.f32 %v10239_v57, 0.0  ;;  %v10305_v11 = vmax.f32 %v10241_v30, 0.0 }
 0x94e   :  { %10370 = vst.msk [vmem:[#allocation13 + $0x1e0] sm:$0xff] %vm587_vm0, %v10306_v19  ;;  %v10107_v9 = vadd.f32 %v12048_v20, %v10043_v27  ;;  %v10109_v8 = vadd.f32 %v12049_v45, %v10045_v12 }
 0x94f   :  { %10367 = vst.msk [vmem:[#allocation13 + $0x1c8] sm:$0xff] %vm587_vm0, %v10303_v33 }
 0x950   :  { %10369 = vst.msk [vmem:[#allocation13 + $0x1d8] sm:$0xff] %vm587_vm0, %v10305_v11  ;;  %v10175_v31 = vmul.f32 %v18378_v13, %v10107_v9  ;;  %v10177_v39 = vmul.f32 %v18378_v13, %v10109_v8 }
 0x952   :  { %v10243_v47 = vadd.f32 %v18389_v10, %v10175_v31  ;;  %v10245_v53 = vadd.f32 %v18389_v10, %v10177_v39 }
 0x954   :  { %v10307_v16 = vmax.f32 %v10243_v47, 0.0  ;;  %v10309_v42 = vmax.f32 %v10245_v53, 0.0 }
 0x956   :  { %10371 = vst.msk [vmem:[#allocation13 + $0x1e8] sm:$0xff] %vm587_vm0, %v10307_v16 }
 0x957   :  { %10373 = vst.msk [vmem:[#allocation13 + $0x1f8] sm:$0xff] %vm587_vm0, %v10309_v42 }
 0x958   :  { %10386 = dma.vmem_to_hbm [thread:$0]  %s10379_s8, 8192, %s10381_s11, [#allocation4], %s12234_s3, %s12234_s3, %s12235_s26  }
 0x959   :  { %12226 = dma.done.wait [#allocation4], 8192  }
 0x95a   :  { %12227 = vsyncadd [#allocation4], 4294959104 }
 0x95b   :  { %10391 = vsyncpa [#allocation3], 1 }
 0x95c   :  { %10392 = vsyncpa [#allocation6], 1 }
 0x95d   :  { %10393 = vsyncpa [#allocation9], 1 }
 0x95e   :  { %10394 = vsyncpa [#allocation12], 1 }
 0x95f   :  { %10395 = vsyncpa [#allocation4], 1 }

</bundles_post_ra>
